<compile_context>
chip_gen: v6e
topology: v6e:2x2x1
jax: 0.10.0
libtpu: 0.0.40
codegen_flags: <defaults>
</compile_context>

<pallas_src>
import functools

import jax
import jax.numpy as jnp
from jax.experimental import pallas as pl
from jax.experimental.pallas import tpu as pltpu

_LANE = 128
_TM_MAX = 256                      # fits v7x's 64 MiB VMEM comfortably; sweep higher on v6e
_VMEM_LIMIT = 48 * 1024 * 1024     # < v7x 64 MiB physical, > 32 MiB default scoped limit


def _round_up(x, m):
    return (x + m - 1) // m * m


def _pick_kp(k):
    # Small K: single K block padded to a sublane multiple (block == full dim,
    # so no 128-alignment requirement).  Large K (the 8x8 conv, K=2048): 512-wide
    # K tiles so the reduction runs on the K grid axis with the accumulator.
    return _round_up(k, 512) if k > 1024 else _round_up(k, 8)


# ---------------------------------------------------------------------------
# Pallas kernels
# ---------------------------------------------------------------------------
def _mm_bias_prelu_kernel(a_ref, w_ref, b_ref, alpha_ref, o_ref, acc_ref):
    """Tiled GEMM with fp32 accumulation; bias + PReLU epilogue on the last K step."""
    k = pl.program_id(1)

    @pl.when(k == 0)
    def _():
        acc_ref[...] = jnp.zeros_like(acc_ref)

    acc_ref[...] += jnp.dot(a_ref[...], w_ref[...],
                            preferred_element_type=jnp.float32)

    @pl.when(k == pl.num_programs(1) - 1)
    def _():
        acc = acc_ref[...] + b_ref[...]
        o_ref[...] = jnp.where(acc >= 0.0, acc,
                               alpha_ref[...] * acc).astype(o_ref.dtype)


def _mm2_bias_prelu_kernel(a1_ref, w1_ref, a2_ref, w2_ref, b_ref, alpha_ref, o_ref):
    """Split-K GEMM for concat-fed convs: a1@w1 + a2@w2 + bias, then PReLU."""
    acc = jnp.dot(a1_ref[...], w1_ref[...], preferred_element_type=jnp.float32)
    acc += jnp.dot(a2_ref[...], w2_ref[...], preferred_element_type=jnp.float32)
    acc += b_ref[...]
    o_ref[...] = jnp.where(acc >= 0.0, acc,
                           alpha_ref[...] * acc).astype(o_ref.dtype)


# ---------------------------------------------------------------------------
# GEMM dispatcher (handles M/K padding, tiling, 1- or 2-segment inputs)
# ---------------------------------------------------------------------------
def _fused_matmul(patch_list, wms, bias, alpha_row):
    M = patch_list[0].shape[0]
    Np = wms[0].shape[1]
    TM = min(_TM_MAX, _round_up(M, 8))
    Mp = _round_up(M, TM)

    padded = []
    for patches, wm in zip(patch_list, wms):
        Kp = wm.shape[0]
        K = patches.shape[1]
        padded.append(jnp.pad(patches, ((0, Mp - M), (0, Kp - K))))

    if len(padded) == 1:
        a, wm = padded[0], wms[0]
        Kp = wm.shape[0]
        TK = 512 if Kp > 1024 else Kp
        grid = (Mp // TM, Kp // TK)
        out = pl.pallas_call(
            _mm_bias_prelu_kernel,
            out_shape=jax.ShapeDtypeStruct((Mp, Np), jnp.bfloat16),
            grid=grid,
            in_specs=[
                pl.BlockSpec((TM, TK), lambda i, k: (i, k)),
                pl.BlockSpec((TK, Np), lambda i, k: (k, 0)),
                pl.BlockSpec((1, Np), lambda i, k: (0, 0)),
                pl.BlockSpec((1, Np), lambda i, k: (0, 0)),
            ],
            out_specs=pl.BlockSpec((TM, Np), lambda i, k: (i, 0)),
            scratch_shapes=[pltpu.VMEM((TM, Np), jnp.float32)],
            compiler_params=pltpu.CompilerParams(
                dimension_semantics=("parallel", "arbitrary"),
                vmem_limit_bytes=_VMEM_LIMIT),
        )(a, wm, bias, alpha_row)
    else:
        a1, a2 = padded
        w1, w2 = wms
        K1p, K2p = w1.shape[0], w2.shape[0]
        grid = (Mp // TM,)
        out = pl.pallas_call(
            _mm2_bias_prelu_kernel,
            out_shape=jax.ShapeDtypeStruct((Mp, Np), jnp.bfloat16),
            grid=grid,
            in_specs=[
                pl.BlockSpec((TM, K1p), lambda i: (i, 0)),
                pl.BlockSpec((K1p, Np), lambda i: (0, 0)),
                pl.BlockSpec((TM, K2p), lambda i: (i, 0)),
                pl.BlockSpec((K2p, Np), lambda i: (0, 0)),
                pl.BlockSpec((1, Np), lambda i: (0, 0)),
                pl.BlockSpec((1, Np), lambda i: (0, 0)),
            ],
            out_specs=pl.BlockSpec((TM, Np), lambda i: (i, 0)),
            compiler_params=pltpu.CompilerParams(
                dimension_semantics=("parallel",),
                vmem_limit_bytes=_VMEM_LIMIT),
        )(a1, w1, a2, w2, bias, alpha_row)
    return out, M


# ---------------------------------------------------------------------------
# JAX glue: patch extraction (bf16), conv / sub-pixel conv-transpose wrappers
# ---------------------------------------------------------------------------
def _im2col(x, kh, kw, stride, pad):
    # x: (B, H, W, C) bf16; pad = ((top, bottom), (left, right))
    B, H, W, C = x.shape
    xp = jnp.pad(x, ((0, 0), pad[0], pad[1], (0, 0)))
    Hp = H + pad[0][0] + pad[0][1]
    Wp = W + pad[1][0] + pad[1][1]
    Ho = (Hp - kh) // stride + 1
    Wo = (Wp - kw) // stride + 1
    slices = []
    for i in range(kh):
        for j in range(kw):
            slices.append(xp[:, i:i + stride * Ho:stride, j:j + stride * Wo:stride, :])
    patches = jnp.concatenate(slices, axis=-1)            # (B, Ho, Wo, kh*kw*C)
    return patches.reshape(B * Ho * Wo, kh * kw * C), Ho, Wo


def _conv_fused(xs, layer_p, spec):
    # xs: list of NHWC bf16 tensors whose channel-concat feeds this conv.
    k, s, p = spec["k"], spec["s"], spec["p"]
    B = xs[0].shape[0]
    patch_list, Ho, Wo = [], None, None
    for x_seg in xs:
        patches, Ho, Wo = _im2col(x_seg, k, k, s, ((p, p), (p, p)))
        patch_list.append(patches)
    out2d, M = _fused_matmul(patch_list, layer_p["wms"], layer_p["b"], layer_p["alpha"])
    co = spec["cout"]
    return out2d[:M, :co].reshape(B, Ho, Wo, co)


def _convT_fused(x, layer_p, spec):
    # ConvTranspose2d(k=3, stride=2, pad=1, out_pad=1) via phase split + pixel shuffle.
    B, H, W, C = x.shape
    patches, _, _ = _im2col(x, 2, 2, 1, ((0, 1), (0, 1)))  # taps (di,dj) in {0,1}^2
    out2d, M = _fused_matmul([patches], layer_p["wms"], layer_p["b"], layer_p["alpha"])
    co = spec["cout"]
    out = out2d[:M, :4 * co].reshape(B, H, W, 2, 2, co)    # (..., dy, dx, c)
    out = jnp.transpose(out, (0, 1, 3, 2, 4, 5)).reshape(B, 2 * H, 2 * W, co)
    return out


# ---------------------------------------------------------------------------
# Model definition (mirrors Gen.__init__); concat inputs are kept split.
# ---------------------------------------------------------------------------
def _gen_block_specs(ch):
    def conv(splits, co, k, s, p, act):
        return {"kind": "conv", "splits": tuple(splits), "cout": co,
                "k": k, "s": s, "p": p, "act": act}

    def convt(ci, co):
        return {"kind": "convT", "splits": (ci,), "cout": co, "act": False}

    return {
        "block1_1": [conv([ch], 32, 3, 1, 1, True), conv([32], 32, 3, 1, 1, True),
                     conv([32], 32, 4, 2, 1, True)],
        "block1_2": [conv([ch], 32, 3, 1, 1, True), conv([32], 32, 3, 1, 1, True),
                     conv([32], 32, 4, 4, 0, True)],
        "block1_3": [conv([ch], 32, 3, 1, 1, True), conv([32], 32, 3, 1, 1, True),
                     conv([32], 32, 8, 8, 0, True)],
        "block2_1": [conv([32], 32, 3, 1, 1, True), conv([32], 32, 4, 2, 1, True)],
        "block2_2": [conv([32, 32], 32, 3, 1, 1, True), conv([32], 32, 4, 2, 1, True)],
        "block3":   [conv([32, 32], 32, 3, 1, 1, True), convt(32, 32)],
        "block4":   [conv([32, 32], 64, 3, 1, 1, True), conv([64], 64, 3, 1, 1, True),
                     convt(64, 64)],
        "block5":   [conv([64, 32], 64, 3, 1, 1, True), conv([64], 64, 3, 1, 1, True),
                     convt(64, 64)],
        "block6":   [conv([64, ch], 64, 3, 1, 1, True), conv([64], 32, 3, 1, 1, True),
                     conv([32], ch, 3, 1, 1, False)],
    }


def _prep_conv_layer(w, b, spec):
    # w: (Cout, Cin_total, k, k) fp32 -> per-segment (Kp, Np) bf16 matrices.
    co, k = spec["cout"], spec["k"]
    Np = _round_up(co, _LANE)
    wms, c0 = [], 0
    for cs in spec["splits"]:
        w_seg = w[:, c0:c0 + cs]
        c0 += cs
        K = k * k * cs
        wm = jnp.transpose(w_seg, (2, 3, 1, 0)).reshape(K, co)   # rows: (i, j, cin)
        Kp = _pick_kp(K)
        wms.append(jnp.pad(wm, ((0, Kp - K), (0, Np - co))).astype(jnp.bfloat16))
    bias = jnp.pad(b, (0, Np - co)).reshape(1, Np).astype(jnp.float32)
    alpha = jnp.full((1, Np), 0.25 if spec["act"] else 1.0, jnp.float32)
    return {"wms": wms, "b": bias, "alpha": alpha}


def _prep_convT_layer(w, b, spec):
    # w: (Cin, Cout, 3, 3) -> combined phase matrix (4*Cin, 4*Cout):
    #   out[2p+dy, 2q+dx, co] = sum_{di,dj,ci} in[p+di, q+dj, ci] * W[ci, co, ky, kx]
    #   with ky = dy - 2*di + 1, kx = dx - 2*dj + 1 (taps outside [0,3) contribute 0).
    cin, co = spec["splits"][0], spec["cout"]
    wc = jnp.zeros((4 * cin, 4 * co), jnp.float32)
    for di in range(2):
        for dj in range(2):
            for dy in range(2):
                for dx in range(2):
                    ky = dy - 2 * di + 1
                    kx = dx - 2 * dj + 1
                    if 0 <= ky < 3 and 0 <= kx < 3:
                        t = di * 2 + dj
                        ph = dy * 2 + dx
                        wc = wc.at[t * cin:(t + 1) * cin,
                                   ph * co:(ph + 1) * co].set(w[:, :, ky, kx])
    bias = jnp.tile(b, 4).reshape(1, 4 * co).astype(jnp.float32)
    alpha = jnp.ones((1, 4 * co), jnp.float32)               # no PReLU after convT
    return {"wms": [wc.astype(jnp.bfloat16)], "b": bias, "alpha": alpha}


def init_params(key, ch):
    specs = _gen_block_specs(ch)
    params = {}
    for bname, layers in specs.items():
        blk = []
        for spec in layers:
            key, kw_, kb_ = jax.random.split(key, 3)
            co, cin = spec["cout"], sum(spec["splits"])
            if spec["kind"] == "conv":
                k = spec["k"]
                scale = 1.0 / (cin * k * k) ** 0.5
                w = jax.random.normal(kw_, (co, cin, k, k), jnp.float32) * scale
                b = jax.random.normal(kb_, (co,), jnp.float32) * 0.01
                blk.append(_prep_conv_layer(w, b, spec))
            else:
                scale = 1.0 / (cin * 9) ** 0.5
                w = jax.random.normal(kw_, (cin, co, 3, 3), jnp.float32) * scale
                b = jax.random.normal(kb_, (co,), jnp.float32) * 0.01
                blk.append(_prep_convT_layer(w, b, spec))
        params[bname] = blk
    return params


def _run_block(block_params, block_specs, inputs):
    xs = inputs
    for spec, p in zip(block_specs, block_params):
        if spec["kind"] == "conv":
            x = _conv_fused(xs, p, spec)
        else:
            x = _convT_fused(xs[0], p, spec)
        xs = [x]
    return xs[0]


@functools.partial(jax.jit, static_argnames=("ch",))
def gen_forward(params, x_nchw, ch):
    specs = _gen_block_specs(ch)
    x = jnp.transpose(x_nchw, (0, 2, 3, 1)).astype(jnp.bfloat16)    # NCHW -> NHWC bf16

    d1_1 = _run_block(params["block1_1"], specs["block1_1"], [x])   # (B, H/2, W/2, 32)
    d1_2 = _run_block(params["block1_2"], specs["block1_2"], [x])   # (B, H/4, W/4, 32)
    d1_3 = _run_block(params["block1_3"], specs["block1_3"], [x])   # (B, H/8, W/8, 32)

    d2 = _run_block(params["block2_1"], specs["block2_1"], [d1_1])  # (B, H/4, W/4, 32)
    d3 = _run_block(params["block2_2"], specs["block2_2"], [d2, d1_2])     # concat fused
    up1 = _run_block(params["block3"], specs["block3"], [d3, d1_3])        # concat fused
    up2 = _run_block(params["block4"], specs["block4"], [up1, d2])         # concat fused
    up3 = _run_block(params["block5"], specs["block5"], [up2, d1_1])       # concat fused
    out = _run_block(params["block6"], specs["block6"], [up3, x])          # concat fused

    return jnp.transpose(out, (0, 3, 1, 2)).astype(jnp.float32)     # NHWC -> NCHW


if __name__ == "__main__":
    B, CH, H, W = 2, 4, 16, 16                               # H, W divisible by 8
    key = jax.random.PRNGKey(0)
    pkey, xkey = jax.random.split(key)
    params = init_params(pkey, CH)
    x = jax.random.normal(xkey, (B, CH, H, W), jnp.float32)  # NCHW like PyTorch

    out = gen_forward(params, x, CH)
    out = jax.block_until_ready(out)
    assert out.shape == (B, CH, H, W), out.shape
    assert bool(jnp.all(jnp.isfinite(out)))
    print("KERNEL_OK")
</pallas_src>

<mosaic_0001>
module attributes {stable_mosaic.version = 11 : i64} {
  func.func @_mm_bias_prelu_kernel(%arg0: i32, %arg1: i32, %arg2: memref<256x40xbf16, #tpu.memory_space<vmem>>, %arg3: memref<40x128xbf16, #tpu.memory_space<vmem>>, %arg4: memref<1x128xf32, #tpu.memory_space<vmem>>, %arg5: memref<1x128xf32, #tpu.memory_space<vmem>>, %arg6: memref<256x128xbf16, #tpu.memory_space<vmem>>, %arg7: memref<256x128xf32, #tpu.memory_space<vmem>>) attributes {dimension_semantics = [#tpu.dimension_semantics<parallel>, #tpu.dimension_semantics<arbitrary>], iteration_bounds = array<i64: 2, 1>, scalar_prefetch = 0 : i64, scratch_operands = 1 : i64, tpu.core_type = #tpu.core_type<tc>, window_params = [{transform_indices = @transform_0, window_bounds = array<i64: 256, 40>}, {transform_indices = @transform_1, window_bounds = array<i64: 40, 128>}, {pipeline_mode = #tpu.pipeline_mode<synchronous>, transform_indices = @transform_2, window_bounds = array<i64: 1, 128>}, {pipeline_mode = #tpu.pipeline_mode<synchronous>, transform_indices = @transform_3, window_bounds = array<i64: 1, 128>}, {transform_indices = @transform_4, window_bounds = array<i64: 256, 128>}]} {
    %c0_i32 = arith.constant 0 : i32
    %0 = arith.cmpi eq, %arg1, %c0_i32 : i32
    %1 = arith.extui %0 : i1 to i32
    %c0_i32_0 = arith.constant 0 : i32
    %2 = arith.cmpi ne, %1, %c0_i32_0 : i32
    scf.if %2 {
      %cst_10 = arith.constant 0.000000e+00 : f32
      %12 = vector.broadcast %cst_10 : f32 to vector<256x128xf32>
      %c0_11 = arith.constant 0 : index
      %c0_12 = arith.constant 0 : index
      %13 = vector.load %arg7[%c0_11, %c0_12] : memref<256x128xf32, #tpu.memory_space<vmem>>, vector<256x128xf32>
      tpu.vector_store %arg7[%c0_11, %c0_12], %12 {strides = array<i32>} : memref<256x128xf32, #tpu.memory_space<vmem>>, vector<256x128xf32>,
    } else {
    }
    %c0 = arith.constant 0 : index
    %c0_1 = arith.constant 0 : index
    %3 = vector.load %arg7[%c0, %c0_1] : memref<256x128xf32, #tpu.memory_space<vmem>>, vector<256x128xf32>
    %c0_2 = arith.constant 0 : index
    %c0_3 = arith.constant 0 : index
    %4 = vector.load %arg2[%c0_2, %c0_3] : memref<256x40xbf16, #tpu.memory_space<vmem>>, vector<256x40xbf16>
    %c0_4 = arith.constant 0 : index
    %c0_5 = arith.constant 0 : index
    %5 = vector.load %arg3[%c0_4, %c0_5] : memref<40x128xbf16, #tpu.memory_space<vmem>>, vector<40x128xbf16>
    %cst = arith.constant dense<0.000000e+00> : vector<256x128xf32>
    %6 = tpu.matmul %4, %5, %cst {dimension_numbers = #tpu.dot_dimension_numbers<[1], [0], [0], [1], [0, 0, 1, 1], [], []>} : vector<256x40xbf16>, vector<40x128xbf16>, vector<256x128xf32> -> vector<256x128xf32>
    %7 = arith.addf %3, %6 : vector<256x128xf32>
    %c0_6 = arith.constant 0 : index
    %c0_7 = arith.constant 0 : index
    %8 = vector.load %arg7[%c0_6, %c0_7] : memref<256x128xf32, #tpu.memory_space<vmem>>, vector<256x128xf32>
    tpu.vector_store %arg7[%c0_6, %c0_7], %7 {strides = array<i32>} : memref<256x128xf32, #tpu.memory_space<vmem>>, vector<256x128xf32>,
    %c0_i32_8 = arith.constant 0 : i32
    %9 = arith.cmpi eq, %arg1, %c0_i32_8 : i32
    %10 = arith.extui %9 : i1 to i32
    %c0_i32_9 = arith.constant 0 : i32
    %11 = arith.cmpi ne, %10, %c0_i32_9 : i32
    scf.if %11 {
      %c0_10 = arith.constant 0 : index
      %c0_11 = arith.constant 0 : index
      %12 = vector.load %arg7[%c0_10, %c0_11] : memref<256x128xf32, #tpu.memory_space<vmem>>, vector<256x128xf32>
      %c0_12 = arith.constant 0 : index
      %c0_13 = arith.constant 0 : index
      %13 = vector.load %arg4[%c0_12, %c0_13] : memref<1x128xf32, #tpu.memory_space<vmem>>, vector<1x128xf32>
      %14 = vector.broadcast %13 : vector<1x128xf32> to vector<256x128xf32>
      %15 = arith.addf %12, %14 : vector<256x128xf32>
      %cst_14 = arith.constant 0.000000e+00 : f32
      %16 = vector.broadcast %cst_14 : f32 to vector<256x128xf32>
      %17 = arith.cmpf oge, %15, %16 : vector<256x128xf32>
      %c0_15 = arith.constant 0 : index
      %c0_16 = arith.constant 0 : index
      %18 = vector.load %arg5[%c0_15, %c0_16] : memref<1x128xf32, #tpu.memory_space<vmem>>, vector<1x128xf32>
      %19 = vector.broadcast %18 : vector<1x128xf32> to vector<256x128xf32>
      %20 = arith.mulf %19, %15 : vector<256x128xf32>
      %21 = arith.select %17, %15, %20 : vector<256x128xi1>, vector<256x128xf32>
      %22 = arith.truncf %21 : vector<256x128xf32> to vector<256x128xbf16>
      %c0_17 = arith.constant 0 : index
      %c0_18 = arith.constant 0 : index
      %23 = vector.load %arg6[%c0_17, %c0_18] : memref<256x128xbf16, #tpu.memory_space<vmem>>, vector<256x128xbf16>
      tpu.vector_store %arg6[%c0_17, %c0_18], %22 {strides = array<i32>} : memref<256x128xbf16, #tpu.memory_space<vmem>>, vector<256x128xbf16>,
    } else {
    }
    return
  }
  func.func @transform_0(%arg0: i32, %arg1: i32) -> (i32, i32) {
    %c0_i32 = arith.constant 0 : i32
    return %arg0, %arg1 : i32, i32
  }
  func.func @transform_1(%arg0: i32, %arg1: i32) -> (i32, i32) {
    %c0_i32 = arith.constant 0 : i32
    %c0_i32_0 = arith.constant 0 : i32
    return %arg1, %c0_i32 : i32, i32
  }
  func.func @transform_2(%arg0: i32, %arg1: i32) -> (i32, i32) {
    %c0_i32 = arith.constant 0 : i32
    %c0_i32_0 = arith.constant 0 : i32
    %c0_i32_1 = arith.constant 0 : i32
    return %c0_i32, %c0_i32_0 : i32, i32
  }
  func.func @transform_3(%arg0: i32, %arg1: i32) -> (i32, i32) {
    %c0_i32 = arith.constant 0 : i32
    %c0_i32_0 = arith.constant 0 : i32
    %c0_i32_1 = arith.constant 0 : i32
    return %c0_i32, %c0_i32_0 : i32, i32
  }
  func.func @transform_4(%arg0: i32, %arg1: i32) -> (i32, i32) {
    %c0_i32 = arith.constant 0 : i32
    %c0_i32_0 = arith.constant 0 : i32
    return %arg0, %c0_i32 : i32, i32
  }
}

module attributes {stable_mosaic.version = 11 : i64} {
  func.func @_mm_bias_prelu_kernel(%arg0: i32, %arg1: i32, %arg2: memref<256x288xbf16, #tpu.memory_space<vmem>>, %arg3: memref<288x128xbf16, #tpu.memory_space<vmem>>, %arg4: memref<1x128xf32, #tpu.memory_space<vmem>>, %arg5: memref<1x128xf32, #tpu.memory_space<vmem>>, %arg6: memref<256x128xbf16, #tpu.memory_space<vmem>>, %arg7: memref<256x128xf32, #tpu.memory_space<vmem>>) attributes {dimension_semantics = [#tpu.dimension_semantics<parallel>, #tpu.dimension_semantics<arbitrary>], iteration_bounds = array<i64: 2, 1>, scalar_prefetch = 0 : i64, scratch_operands = 1 : i64, tpu.core_type = #tpu.core_type<tc>, window_params = [{transform_indices = @transform_0, window_bounds = array<i64: 256, 288>}, {transform_indices = @transform_1, window_bounds = array<i64: 288, 128>}, {pipeline_mode = #tpu.pipeline_mode<synchronous>, transform_indices = @transform_2, window_bounds = array<i64: 1, 128>}, {pipeline_mode = #tpu.pipeline_mode<synchronous>, transform_indices = @transform_3, window_bounds = array<i64: 1, 128>}, {transform_indices = @transform_4, window_bounds = array<i64: 256, 128>}]} {
    %c0_i32 = arith.constant 0 : i32
    %0 = arith.cmpi eq, %arg1, %c0_i32 : i32
    %1 = arith.extui %0 : i1 to i32
    %c0_i32_0 = arith.constant 0 : i32
    %2 = arith.cmpi ne, %1, %c0_i32_0 : i32
    scf.if %2 {
      %cst_10 = arith.constant 0.000000e+00 : f32
      %12 = vector.broadcast %cst_10 : f32 to vector<256x128xf32>
      %c0_11 = arith.constant 0 : index
      %c0_12 = arith.constant 0 : index
      %13 = vector.load %arg7[%c0_11, %c0_12] : memref<256x128xf32, #tpu.memory_space<vmem>>, vector<256x128xf32>
      tpu.vector_store %arg7[%c0_11, %c0_12], %12 {strides = array<i32>} : memref<256x128xf32, #tpu.memory_space<vmem>>, vector<256x128xf32>,
    } else {
    }
    %c0 = arith.constant 0 : index
    %c0_1 = arith.constant 0 : index
    %3 = vector.load %arg7[%c0, %c0_1] : memref<256x128xf32, #tpu.memory_space<vmem>>, vector<256x128xf32>
    %c0_2 = arith.constant 0 : index
    %c0_3 = arith.constant 0 : index
    %4 = vector.load %arg2[%c0_2, %c0_3] : memref<256x288xbf16, #tpu.memory_space<vmem>>, vector<256x288xbf16>
    %c0_4 = arith.constant 0 : index
    %c0_5 = arith.constant 0 : index
    %5 = vector.load %arg3[%c0_4, %c0_5] : memref<288x128xbf16, #tpu.memory_space<vmem>>, vector<288x128xbf16>
    %cst = arith.constant dense<0.000000e+00> : vector<256x128xf32>
    %6 = tpu.matmul %4, %5, %cst {dimension_numbers = #tpu.dot_dimension_numbers<[1], [0], [0], [1], [0, 0, 1, 1], [], []>} : vector<256x288xbf16>, vector<288x128xbf16>, vector<256x128xf32> -> vector<256x128xf32>
    %7 = arith.addf %3, %6 : vector<256x128xf32>
    %c0_6 = arith.constant 0 : index
    %c0_7 = arith.constant 0 : index
    %8 = vector.load %arg7[%c0_6, %c0_7] : memref<256x128xf32, #tpu.memory_space<vmem>>, vector<256x128xf32>
    tpu.vector_store %arg7[%c0_6, %c0_7], %7 {strides = array<i32>} : memref<256x128xf32, #tpu.memory_space<vmem>>, vector<256x128xf32>,
    %c0_i32_8 = arith.constant 0 : i32
    %9 = arith.cmpi eq, %arg1, %c0_i32_8 : i32
    %10 = arith.extui %9 : i1 to i32
    %c0_i32_9 = arith.constant 0 : i32
    %11 = arith.cmpi ne, %10, %c0_i32_9 : i32
    scf.if %11 {
      %c0_10 = arith.constant 0 : index
      %c0_11 = arith.constant 0 : index
      %12 = vector.load %arg7[%c0_10, %c0_11] : memref<256x128xf32, #tpu.memory_space<vmem>>, vector<256x128xf32>
      %c0_12 = arith.constant 0 : index
      %c0_13 = arith.constant 0 : index
      %13 = vector.load %arg4[%c0_12, %c0_13] : memref<1x128xf32, #tpu.memory_space<vmem>>, vector<1x128xf32>
      %14 = vector.broadcast %13 : vector<1x128xf32> to vector<256x128xf32>
      %15 = arith.addf %12, %14 : vector<256x128xf32>
      %cst_14 = arith.constant 0.000000e+00 : f32
      %16 = vector.broadcast %cst_14 : f32 to vector<256x128xf32>
      %17 = arith.cmpf oge, %15, %16 : vector<256x128xf32>
      %c0_15 = arith.constant 0 : index
      %c0_16 = arith.constant 0 : index
      %18 = vector.load %arg5[%c0_15, %c0_16] : memref<1x128xf32, #tpu.memory_space<vmem>>, vector<1x128xf32>
      %19 = vector.broadcast %18 : vector<1x128xf32> to vector<256x128xf32>
      %20 = arith.mulf %19, %15 : vector<256x128xf32>
      %21 = arith.select %17, %15, %20 : vector<256x128xi1>, vector<256x128xf32>
      %22 = arith.truncf %21 : vector<256x128xf32> to vector<256x128xbf16>
      %c0_17 = arith.constant 0 : index
      %c0_18 = arith.constant 0 : index
      %23 = vector.load %arg6[%c0_17, %c0_18] : memref<256x128xbf16, #tpu.memory_space<vmem>>, vector<256x128xbf16>
      tpu.vector_store %arg6[%c0_17, %c0_18], %22 {strides = array<i32>} : memref<256x128xbf16, #tpu.memory_space<vmem>>, vector<256x128xbf16>,
    } else {
    }
    return
  }
  func.func @transform_0(%arg0: i32, %arg1: i32) -> (i32, i32) {
    %c0_i32 = arith.constant 0 : i32
    return %arg0, %arg1 : i32, i32
  }
  func.func @transform_1(%arg0: i32, %arg1: i32) -> (i32, i32) {
    %c0_i32 = arith.constant 0 : i32
    %c0_i32_0 = arith.constant 0 : i32
    return %arg1, %c0_i32 : i32, i32
  }
  func.func @transform_2(%arg0: i32, %arg1: i32) -> (i32, i32) {
    %c0_i32 = arith.constant 0 : i32
    %c0_i32_0 = arith.constant 0 : i32
    %c0_i32_1 = arith.constant 0 : i32
    return %c0_i32, %c0_i32_0 : i32, i32
  }
  func.func @transform_3(%arg0: i32, %arg1: i32) -> (i32, i32) {
    %c0_i32 = arith.constant 0 : i32
    %c0_i32_0 = arith.constant 0 : i32
    %c0_i32_1 = arith.constant 0 : i32
    return %c0_i32, %c0_i32_0 : i32, i32
  }
  func.func @transform_4(%arg0: i32, %arg1: i32) -> (i32, i32) {
    %c0_i32 = arith.constant 0 : i32
    %c0_i32_0 = arith.constant 0 : i32
    return %arg0, %c0_i32 : i32, i32
  }
}

module attributes {stable_mosaic.version = 11 : i64} {
  func.func @_mm_bias_prelu_kernel(%arg0: i32, %arg1: i32, %arg2: memref<128x512xbf16, #tpu.memory_space<vmem>>, %arg3: memref<512x128xbf16, #tpu.memory_space<vmem>>, %arg4: memref<1x128xf32, #tpu.memory_space<vmem>>, %arg5: memref<1x128xf32, #tpu.memory_space<vmem>>, %arg6: memref<128x128xbf16, #tpu.memory_space<vmem>>, %arg7: memref<128x128xf32, #tpu.memory_space<vmem>>) attributes {dimension_semantics = [#tpu.dimension_semantics<parallel>, #tpu.dimension_semantics<arbitrary>], iteration_bounds = array<i64: 1, 1>, scalar_prefetch = 0 : i64, scratch_operands = 1 : i64, tpu.core_type = #tpu.core_type<tc>, window_params = [{transform_indices = @transform_0, window_bounds = array<i64: 128, 512>}, {transform_indices = @transform_1, window_bounds = array<i64: 512, 128>}, {pipeline_mode = #tpu.pipeline_mode<synchronous>, transform_indices = @transform_2, window_bounds = array<i64: 1, 128>}, {pipeline_mode = #tpu.pipeline_mode<synchronous>, transform_indices = @transform_3, window_bounds = array<i64: 1, 128>}, {transform_indices = @transform_4, window_bounds = array<i64: 128, 128>}]} {
    %c0_i32 = arith.constant 0 : i32
    %0 = arith.cmpi eq, %arg1, %c0_i32 : i32
    %1 = arith.extui %0 : i1 to i32
    %c0_i32_0 = arith.constant 0 : i32
    %2 = arith.cmpi ne, %1, %c0_i32_0 : i32
    scf.if %2 {
      %cst_10 = arith.constant 0.000000e+00 : f32
      %12 = vector.broadcast %cst_10 : f32 to vector<128x128xf32>
      %c0_11 = arith.constant 0 : index
      %c0_12 = arith.constant 0 : index
      %13 = vector.load %arg7[%c0_11, %c0_12] : memref<128x128xf32, #tpu.memory_space<vmem>>, vector<128x128xf32>
      tpu.vector_store %arg7[%c0_11, %c0_12], %12 {strides = array<i32>} : memref<128x128xf32, #tpu.memory_space<vmem>>, vector<128x128xf32>,
    } else {
    }
    %c0 = arith.constant 0 : index
    %c0_1 = arith.constant 0 : index
    %3 = vector.load %arg7[%c0, %c0_1] : memref<128x128xf32, #tpu.memory_space<vmem>>, vector<128x128xf32>
    %c0_2 = arith.constant 0 : index
    %c0_3 = arith.constant 0 : index
    %4 = vector.load %arg2[%c0_2, %c0_3] : memref<128x512xbf16, #tpu.memory_space<vmem>>, vector<128x512xbf16>
    %c0_4 = arith.constant 0 : index
    %c0_5 = arith.constant 0 : index
    %5 = vector.load %arg3[%c0_4, %c0_5] : memref<512x128xbf16, #tpu.memory_space<vmem>>, vector<512x128xbf16>
    %cst = arith.constant dense<0.000000e+00> : vector<128x128xf32>
    %6 = tpu.matmul %4, %5, %cst {dimension_numbers = #tpu.dot_dimension_numbers<[1], [0], [0], [1], [0, 0, 1, 1], [], []>} : vector<128x512xbf16>, vector<512x128xbf16>, vector<128x128xf32> -> vector<128x128xf32>
    %7 = arith.addf %3, %6 : vector<128x128xf32>
    %c0_6 = arith.constant 0 : index
    %c0_7 = arith.constant 0 : index
    %8 = vector.load %arg7[%c0_6, %c0_7] : memref<128x128xf32, #tpu.memory_space<vmem>>, vector<128x128xf32>
    tpu.vector_store %arg7[%c0_6, %c0_7], %7 {strides = array<i32>} : memref<128x128xf32, #tpu.memory_space<vmem>>, vector<128x128xf32>,
    %c0_i32_8 = arith.constant 0 : i32
    %9 = arith.cmpi eq, %arg1, %c0_i32_8 : i32
    %10 = arith.extui %9 : i1 to i32
    %c0_i32_9 = arith.constant 0 : i32
    %11 = arith.cmpi ne, %10, %c0_i32_9 : i32
    scf.if %11 {
      %c0_10 = arith.constant 0 : index
      %c0_11 = arith.constant 0 : index
      %12 = vector.load %arg7[%c0_10, %c0_11] : memref<128x128xf32, #tpu.memory_space<vmem>>, vector<128x128xf32>
      %c0_12 = arith.constant 0 : index
      %c0_13 = arith.constant 0 : index
      %13 = vector.load %arg4[%c0_12, %c0_13] : memref<1x128xf32, #tpu.memory_space<vmem>>, vector<1x128xf32>
      %14 = vector.broadcast %13 : vector<1x128xf32> to vector<128x128xf32>
      %15 = arith.addf %12, %14 : vector<128x128xf32>
      %cst_14 = arith.constant 0.000000e+00 : f32
      %16 = vector.broadcast %cst_14 : f32 to vector<128x128xf32>
      %17 = arith.cmpf oge, %15, %16 : vector<128x128xf32>
      %c0_15 = arith.constant 0 : index
      %c0_16 = arith.constant 0 : index
      %18 = vector.load %arg5[%c0_15, %c0_16] : memref<1x128xf32, #tpu.memory_space<vmem>>, vector<1x128xf32>
      %19 = vector.broadcast %18 : vector<1x128xf32> to vector<128x128xf32>
      %20 = arith.mulf %19, %15 : vector<128x128xf32>
      %21 = arith.select %17, %15, %20 : vector<128x128xi1>, vector<128x128xf32>
      %22 = arith.truncf %21 : vector<128x128xf32> to vector<128x128xbf16>
      %c0_17 = arith.constant 0 : index
      %c0_18 = arith.constant 0 : index
      %23 = vector.load %arg6[%c0_17, %c0_18] : memref<128x128xbf16, #tpu.memory_space<vmem>>, vector<128x128xbf16>
      tpu.vector_store %arg6[%c0_17, %c0_18], %22 {strides = array<i32>} : memref<128x128xbf16, #tpu.memory_space<vmem>>, vector<128x128xbf16>,
    } else {
    }
    return
  }
  func.func @transform_0(%arg0: i32, %arg1: i32) -> (i32, i32) {
    %c0_i32 = arith.constant 0 : i32
    return %arg0, %arg1 : i32, i32
  }
  func.func @transform_1(%arg0: i32, %arg1: i32) -> (i32, i32) {
    %c0_i32 = arith.constant 0 : i32
    %c0_i32_0 = arith.constant 0 : i32
    return %arg1, %c0_i32 : i32, i32
  }
  func.func @transform_2(%arg0: i32, %arg1: i32) -> (i32, i32) {
    %c0_i32 = arith.constant 0 : i32
    %c0_i32_0 = arith.constant 0 : i32
    %c0_i32_1 = arith.constant 0 : i32
    return %c0_i32, %c0_i32_0 : i32, i32
  }
  func.func @transform_3(%arg0: i32, %arg1: i32) -> (i32, i32) {
    %c0_i32 = arith.constant 0 : i32
    %c0_i32_0 = arith.constant 0 : i32
    %c0_i32_1 = arith.constant 0 : i32
    return %c0_i32, %c0_i32_0 : i32, i32
  }
  func.func @transform_4(%arg0: i32, %arg1: i32) -> (i32, i32) {
    %c0_i32 = arith.constant 0 : i32
    %c0_i32_0 = arith.constant 0 : i32
    return %arg0, %c0_i32 : i32, i32
  }
}

module attributes {stable_mosaic.version = 11 : i64} {
  func.func @_mm_bias_prelu_kernel(%arg0: i32, %arg1: i32, %arg2: memref<128x288xbf16, #tpu.memory_space<vmem>>, %arg3: memref<288x128xbf16, #tpu.memory_space<vmem>>, %arg4: memref<1x128xf32, #tpu.memory_space<vmem>>, %arg5: memref<1x128xf32, #tpu.memory_space<vmem>>, %arg6: memref<128x128xbf16, #tpu.memory_space<vmem>>, %arg7: memref<128x128xf32, #tpu.memory_space<vmem>>) attributes {dimension_semantics = [#tpu.dimension_semantics<parallel>, #tpu.dimension_semantics<arbitrary>], iteration_bounds = array<i64: 1, 1>, scalar_prefetch = 0 : i64, scratch_operands = 1 : i64, tpu.core_type = #tpu.core_type<tc>, window_params = [{transform_indices = @transform_0, window_bounds = array<i64: 128, 288>}, {transform_indices = @transform_1, window_bounds = array<i64: 288, 128>}, {pipeline_mode = #tpu.pipeline_mode<synchronous>, transform_indices = @transform_2, window_bounds = array<i64: 1, 128>}, {pipeline_mode = #tpu.pipeline_mode<synchronous>, transform_indices = @transform_3, window_bounds = array<i64: 1, 128>}, {transform_indices = @transform_4, window_bounds = array<i64: 128, 128>}]} {
    %c0_i32 = arith.constant 0 : i32
    %0 = arith.cmpi eq, %arg1, %c0_i32 : i32
    %1 = arith.extui %0 : i1 to i32
    %c0_i32_0 = arith.constant 0 : i32
    %2 = arith.cmpi ne, %1, %c0_i32_0 : i32
    scf.if %2 {
      %cst_10 = arith.constant 0.000000e+00 : f32
      %12 = vector.broadcast %cst_10 : f32 to vector<128x128xf32>
      %c0_11 = arith.constant 0 : index
      %c0_12 = arith.constant 0 : index
      %13 = vector.load %arg7[%c0_11, %c0_12] : memref<128x128xf32, #tpu.memory_space<vmem>>, vector<128x128xf32>
      tpu.vector_store %arg7[%c0_11, %c0_12], %12 {strides = array<i32>} : memref<128x128xf32, #tpu.memory_space<vmem>>, vector<128x128xf32>,
    } else {
    }
    %c0 = arith.constant 0 : index
    %c0_1 = arith.constant 0 : index
    %3 = vector.load %arg7[%c0, %c0_1] : memref<128x128xf32, #tpu.memory_space<vmem>>, vector<128x128xf32>
    %c0_2 = arith.constant 0 : index
    %c0_3 = arith.constant 0 : index
    %4 = vector.load %arg2[%c0_2, %c0_3] : memref<128x288xbf16, #tpu.memory_space<vmem>>, vector<128x288xbf16>
    %c0_4 = arith.constant 0 : index
    %c0_5 = arith.constant 0 : index
    %5 = vector.load %arg3[%c0_4, %c0_5] : memref<288x128xbf16, #tpu.memory_space<vmem>>, vector<288x128xbf16>
    %cst = arith.constant dense<0.000000e+00> : vector<128x128xf32>
    %6 = tpu.matmul %4, %5, %cst {dimension_numbers = #tpu.dot_dimension_numbers<[1], [0], [0], [1], [0, 0, 1, 1], [], []>} : vector<128x288xbf16>, vector<288x128xbf16>, vector<128x128xf32> -> vector<128x128xf32>
    %7 = arith.addf %3, %6 : vector<128x128xf32>
    %c0_6 = arith.constant 0 : index
    %c0_7 = arith.constant 0 : index
    %8 = vector.load %arg7[%c0_6, %c0_7] : memref<128x128xf32, #tpu.memory_space<vmem>>, vector<128x128xf32>
    tpu.vector_store %arg7[%c0_6, %c0_7], %7 {strides = array<i32>} : memref<128x128xf32, #tpu.memory_space<vmem>>, vector<128x128xf32>,
    %c0_i32_8 = arith.constant 0 : i32
    %9 = arith.cmpi eq, %arg1, %c0_i32_8 : i32
    %10 = arith.extui %9 : i1 to i32
    %c0_i32_9 = arith.constant 0 : i32
    %11 = arith.cmpi ne, %10, %c0_i32_9 : i32
    scf.if %11 {
      %c0_10 = arith.constant 0 : index
      %c0_11 = arith.constant 0 : index
      %12 = vector.load %arg7[%c0_10, %c0_11] : memref<128x128xf32, #tpu.memory_space<vmem>>, vector<128x128xf32>
      %c0_12 = arith.constant 0 : index
      %c0_13 = arith.constant 0 : index
      %13 = vector.load %arg4[%c0_12, %c0_13] : memref<1x128xf32, #tpu.memory_space<vmem>>, vector<1x128xf32>
      %14 = vector.broadcast %13 : vector<1x128xf32> to vector<128x128xf32>
      %15 = arith.addf %12, %14 : vector<128x128xf32>
      %cst_14 = arith.constant 0.000000e+00 : f32
      %16 = vector.broadcast %cst_14 : f32 to vector<128x128xf32>
      %17 = arith.cmpf oge, %15, %16 : vector<128x128xf32>
      %c0_15 = arith.constant 0 : index
      %c0_16 = arith.constant 0 : index
      %18 = vector.load %arg5[%c0_15, %c0_16] : memref<1x128xf32, #tpu.memory_space<vmem>>, vector<1x128xf32>
      %19 = vector.broadcast %18 : vector<1x128xf32> to vector<128x128xf32>
      %20 = arith.mulf %19, %15 : vector<128x128xf32>
      %21 = arith.select %17, %15, %20 : vector<128x128xi1>, vector<128x128xf32>
      %22 = arith.truncf %21 : vector<128x128xf32> to vector<128x128xbf16>
      %c0_17 = arith.constant 0 : index
      %c0_18 = arith.constant 0 : index
      %23 = vector.load %arg6[%c0_17, %c0_18] : memref<128x128xbf16, #tpu.memory_space<vmem>>, vector<128x128xbf16>
      tpu.vector_store %arg6[%c0_17, %c0_18], %22 {strides = array<i32>} : memref<128x128xbf16, #tpu.memory_space<vmem>>, vector<128x128xbf16>,
    } else {
    }
    return
  }
  func.func @transform_0(%arg0: i32, %arg1: i32) -> (i32, i32) {
    %c0_i32 = arith.constant 0 : i32
    return %arg0, %arg1 : i32, i32
  }
  func.func @transform_1(%arg0: i32, %arg1: i32) -> (i32, i32) {
    %c0_i32 = arith.constant 0 : i32
    %c0_i32_0 = arith.constant 0 : i32
    return %arg1, %c0_i32 : i32, i32
  }
  func.func @transform_2(%arg0: i32, %arg1: i32) -> (i32, i32) {
    %c0_i32 = arith.constant 0 : i32
    %c0_i32_0 = arith.constant 0 : i32
    %c0_i32_1 = arith.constant 0 : i32
    return %c0_i32, %c0_i32_0 : i32, i32
  }
  func.func @transform_3(%arg0: i32, %arg1: i32) -> (i32, i32) {
    %c0_i32 = arith.constant 0 : i32
    %c0_i32_0 = arith.constant 0 : i32
    %c0_i32_1 = arith.constant 0 : i32
    return %c0_i32, %c0_i32_0 : i32, i32
  }
  func.func @transform_4(%arg0: i32, %arg1: i32) -> (i32, i32) {
    %c0_i32 = arith.constant 0 : i32
    %c0_i32_0 = arith.constant 0 : i32
    return %arg0, %c0_i32 : i32, i32
  }
}

module attributes {stable_mosaic.version = 11 : i64} {
  func.func @_mm_bias_prelu_kernel(%arg0: i32, %arg1: i32, %arg2: memref<32x512xbf16, #tpu.memory_space<vmem>>, %arg3: memref<512x128xbf16, #tpu.memory_space<vmem>>, %arg4: memref<1x128xf32, #tpu.memory_space<vmem>>, %arg5: memref<1x128xf32, #tpu.memory_space<vmem>>, %arg6: memref<32x128xbf16, #tpu.memory_space<vmem>>, %arg7: memref<32x128xf32, #tpu.memory_space<vmem>>) attributes {dimension_semantics = [#tpu.dimension_semantics<parallel>, #tpu.dimension_semantics<arbitrary>], iteration_bounds = array<i64: 1, 1>, scalar_prefetch = 0 : i64, scratch_operands = 1 : i64, tpu.core_type = #tpu.core_type<tc>, window_params = [{transform_indices = @transform_0, window_bounds = array<i64: 32, 512>}, {transform_indices = @transform_1, window_bounds = array<i64: 512, 128>}, {pipeline_mode = #tpu.pipeline_mode<synchronous>, transform_indices = @transform_2, window_bounds = array<i64: 1, 128>}, {pipeline_mode = #tpu.pipeline_mode<synchronous>, transform_indices = @transform_3, window_bounds = array<i64: 1, 128>}, {transform_indices = @transform_4, window_bounds = array<i64: 32, 128>}]} {
    %c0_i32 = arith.constant 0 : i32
    %0 = arith.cmpi eq, %arg1, %c0_i32 : i32
    %1 = arith.extui %0 : i1 to i32
    %c0_i32_0 = arith.constant 0 : i32
    %2 = arith.cmpi ne, %1, %c0_i32_0 : i32
    scf.if %2 {
      %cst_10 = arith.constant 0.000000e+00 : f32
      %12 = vector.broadcast %cst_10 : f32 to vector<32x128xf32>
      %c0_11 = arith.constant 0 : index
      %c0_12 = arith.constant 0 : index
      %13 = vector.load %arg7[%c0_11, %c0_12] : memref<32x128xf32, #tpu.memory_space<vmem>>, vector<32x128xf32>
      tpu.vector_store %arg7[%c0_11, %c0_12], %12 {strides = array<i32>} : memref<32x128xf32, #tpu.memory_space<vmem>>, vector<32x128xf32>,
    } else {
    }
    %c0 = arith.constant 0 : index
    %c0_1 = arith.constant 0 : index
    %3 = vector.load %arg7[%c0, %c0_1] : memref<32x128xf32, #tpu.memory_space<vmem>>, vector<32x128xf32>
    %c0_2 = arith.constant 0 : index
    %c0_3 = arith.constant 0 : index
    %4 = vector.load %arg2[%c0_2, %c0_3] : memref<32x512xbf16, #tpu.memory_space<vmem>>, vector<32x512xbf16>
    %c0_4 = arith.constant 0 : index
    %c0_5 = arith.constant 0 : index
    %5 = vector.load %arg3[%c0_4, %c0_5] : memref<512x128xbf16, #tpu.memory_space<vmem>>, vector<512x128xbf16>
    %cst = arith.constant dense<0.000000e+00> : vector<32x128xf32>
    %6 = tpu.matmul %4, %5, %cst {dimension_numbers = #tpu.dot_dimension_numbers<[1], [0], [0], [1], [0, 0, 1, 1], [], []>} : vector<32x512xbf16>, vector<512x128xbf16>, vector<32x128xf32> -> vector<32x128xf32>
    %7 = arith.addf %3, %6 : vector<32x128xf32>
    %c0_6 = arith.constant 0 : index
    %c0_7 = arith.constant 0 : index
    %8 = vector.load %arg7[%c0_6, %c0_7] : memref<32x128xf32, #tpu.memory_space<vmem>>, vector<32x128xf32>
    tpu.vector_store %arg7[%c0_6, %c0_7], %7 {strides = array<i32>} : memref<32x128xf32, #tpu.memory_space<vmem>>, vector<32x128xf32>,
    %c0_i32_8 = arith.constant 0 : i32
    %9 = arith.cmpi eq, %arg1, %c0_i32_8 : i32
    %10 = arith.extui %9 : i1 to i32
    %c0_i32_9 = arith.constant 0 : i32
    %11 = arith.cmpi ne, %10, %c0_i32_9 : i32
    scf.if %11 {
      %c0_10 = arith.constant 0 : index
      %c0_11 = arith.constant 0 : index
      %12 = vector.load %arg7[%c0_10, %c0_11] : memref<32x128xf32, #tpu.memory_space<vmem>>, vector<32x128xf32>
      %c0_12 = arith.constant 0 : index
      %c0_13 = arith.constant 0 : index
      %13 = vector.load %arg4[%c0_12, %c0_13] : memref<1x128xf32, #tpu.memory_space<vmem>>, vector<1x128xf32>
      %14 = vector.broadcast %13 : vector<1x128xf32> to vector<32x128xf32>
      %15 = arith.addf %12, %14 : vector<32x128xf32>
      %cst_14 = arith.constant 0.000000e+00 : f32
      %16 = vector.broadcast %cst_14 : f32 to vector<32x128xf32>
      %17 = arith.cmpf oge, %15, %16 : vector<32x128xf32>
      %c0_15 = arith.constant 0 : index
      %c0_16 = arith.constant 0 : index
      %18 = vector.load %arg5[%c0_15, %c0_16] : memref<1x128xf32, #tpu.memory_space<vmem>>, vector<1x128xf32>
      %19 = vector.broadcast %18 : vector<1x128xf32> to vector<32x128xf32>
      %20 = arith.mulf %19, %15 : vector<32x128xf32>
      %21 = arith.select %17, %15, %20 : vector<32x128xi1>, vector<32x128xf32>
      %22 = arith.truncf %21 : vector<32x128xf32> to vector<32x128xbf16>
      %c0_17 = arith.constant 0 : index
      %c0_18 = arith.constant 0 : index
      %23 = vector.load %arg6[%c0_17, %c0_18] : memref<32x128xbf16, #tpu.memory_space<vmem>>, vector<32x128xbf16>
      tpu.vector_store %arg6[%c0_17, %c0_18], %22 {strides = array<i32>} : memref<32x128xbf16, #tpu.memory_space<vmem>>, vector<32x128xbf16>,
    } else {
    }
    return
  }
  func.func @transform_0(%arg0: i32, %arg1: i32) -> (i32, i32) {
    %c0_i32 = arith.constant 0 : i32
    return %arg0, %arg1 : i32, i32
  }
  func.func @transform_1(%arg0: i32, %arg1: i32) -> (i32, i32) {
    %c0_i32 = arith.constant 0 : i32
    %c0_i32_0 = arith.constant 0 : i32
    return %arg1, %c0_i32 : i32, i32
  }
  func.func @transform_2(%arg0: i32, %arg1: i32) -> (i32, i32) {
    %c0_i32 = arith.constant 0 : i32
    %c0_i32_0 = arith.constant 0 : i32
    %c0_i32_1 = arith.constant 0 : i32
    return %c0_i32, %c0_i32_0 : i32, i32
  }
  func.func @transform_3(%arg0: i32, %arg1: i32) -> (i32, i32) {
    %c0_i32 = arith.constant 0 : i32
    %c0_i32_0 = arith.constant 0 : i32
    %c0_i32_1 = arith.constant 0 : i32
    return %c0_i32, %c0_i32_0 : i32, i32
  }
  func.func @transform_4(%arg0: i32, %arg1: i32) -> (i32, i32) {
    %c0_i32 = arith.constant 0 : i32
    %c0_i32_0 = arith.constant 0 : i32
    return %arg0, %c0_i32 : i32, i32
  }
}

module attributes {stable_mosaic.version = 11 : i64} {
  func.func @_mm2_bias_prelu_kernel(%arg0: i32, %arg1: memref<32x288xbf16, #tpu.memory_space<vmem>>, %arg2: memref<288x128xbf16, #tpu.memory_space<vmem>>, %arg3: memref<32x288xbf16, #tpu.memory_space<vmem>>, %arg4: memref<288x128xbf16, #tpu.memory_space<vmem>>, %arg5: memref<1x128xf32, #tpu.memory_space<vmem>>, %arg6: memref<1x128xf32, #tpu.memory_space<vmem>>, %arg7: memref<32x128xbf16, #tpu.memory_space<vmem>>) attributes {dimension_semantics = [#tpu.dimension_semantics<parallel>], iteration_bounds = array<i64: 1>, scalar_prefetch = 0 : i64, scratch_operands = 0 : i64, tpu.core_type = #tpu.core_type<tc>, window_params = [{transform_indices = @transform_0, window_bounds = array<i64: 32, 288>}, {pipeline_mode = #tpu.pipeline_mode<synchronous>, transform_indices = @transform_1, window_bounds = array<i64: 288, 128>}, {transform_indices = @transform_2, window_bounds = array<i64: 32, 288>}, {pipeline_mode = #tpu.pipeline_mode<synchronous>, transform_indices = @transform_3, window_bounds = array<i64: 288, 128>}, {pipeline_mode = #tpu.pipeline_mode<synchronous>, transform_indices = @transform_4, window_bounds = array<i64: 1, 128>}, {pipeline_mode = #tpu.pipeline_mode<synchronous>, transform_indices = @transform_5, window_bounds = array<i64: 1, 128>}, {transform_indices = @transform_6, window_bounds = array<i64: 32, 128>}]} {
    %c0 = arith.constant 0 : index
    %c0_0 = arith.constant 0 : index
    %0 = vector.load %arg1[%c0, %c0_0] : memref<32x288xbf16, #tpu.memory_space<vmem>>, vector<32x288xbf16>
    %c0_1 = arith.constant 0 : index
    %c0_2 = arith.constant 0 : index
    %1 = vector.load %arg2[%c0_1, %c0_2] : memref<288x128xbf16, #tpu.memory_space<vmem>>, vector<288x128xbf16>
    %cst = arith.constant dense<0.000000e+00> : vector<32x128xf32>
    %2 = tpu.matmul %0, %1, %cst {dimension_numbers = #tpu.dot_dimension_numbers<[1], [0], [0], [1], [0, 0, 1, 1], [], []>} : vector<32x288xbf16>, vector<288x128xbf16>, vector<32x128xf32> -> vector<32x128xf32>
    %c0_3 = arith.constant 0 : index
    %c0_4 = arith.constant 0 : index
    %3 = vector.load %arg3[%c0_3, %c0_4] : memref<32x288xbf16, #tpu.memory_space<vmem>>, vector<32x288xbf16>
    %c0_5 = arith.constant 0 : index
    %c0_6 = arith.constant 0 : index
    %4 = vector.load %arg4[%c0_5, %c0_6] : memref<288x128xbf16, #tpu.memory_space<vmem>>, vector<288x128xbf16>
    %cst_7 = arith.constant dense<0.000000e+00> : vector<32x128xf32>
    %5 = tpu.matmul %3, %4, %cst_7 {dimension_numbers = #tpu.dot_dimension_numbers<[1], [0], [0], [1], [0, 0, 1, 1], [], []>} : vector<32x288xbf16>, vector<288x128xbf16>, vector<32x128xf32> -> vector<32x128xf32>
    %6 = arith.addf %2, %5 : vector<32x128xf32>
    %c0_8 = arith.constant 0 : index
    %c0_9 = arith.constant 0 : index
    %7 = vector.load %arg5[%c0_8, %c0_9] : memref<1x128xf32, #tpu.memory_space<vmem>>, vector<1x128xf32>
    %8 = vector.broadcast %7 : vector<1x128xf32> to vector<32x128xf32>
    %9 = arith.addf %6, %8 : vector<32x128xf32>
    %cst_10 = arith.constant 0.000000e+00 : f32
    %10 = vector.broadcast %cst_10 : f32 to vector<32x128xf32>
    %11 = arith.cmpf oge, %9, %10 : vector<32x128xf32>
    %c0_11 = arith.constant 0 : index
    %c0_12 = arith.constant 0 : index
    %12 = vector.load %arg6[%c0_11, %c0_12] : memref<1x128xf32, #tpu.memory_space<vmem>>, vector<1x128xf32>
    %13 = vector.broadcast %12 : vector<1x128xf32> to vector<32x128xf32>
    %14 = arith.mulf %13, %9 : vector<32x128xf32>
    %15 = arith.select %11, %9, %14 : vector<32x128xi1>, vector<32x128xf32>
    %16 = arith.truncf %15 : vector<32x128xf32> to vector<32x128xbf16>
    %c0_13 = arith.constant 0 : index
    %c0_14 = arith.constant 0 : index
    %17 = vector.load %arg7[%c0_13, %c0_14] : memref<32x128xbf16, #tpu.memory_space<vmem>>, vector<32x128xbf16>
    tpu.vector_store %arg7[%c0_13, %c0_14], %16 {strides = array<i32>} : memref<32x128xbf16, #tpu.memory_space<vmem>>, vector<32x128xbf16>,
    return
  }
  func.func @transform_0(%arg0: i32) -> (i32, i32) {
    %c0_i32 = arith.constant 0 : i32
    %c0_i32_0 = arith.constant 0 : i32
    return %arg0, %c0_i32 : i32, i32
  }
  func.func @transform_1(%arg0: i32) -> (i32, i32) {
    %c0_i32 = arith.constant 0 : i32
    %c0_i32_0 = arith.constant 0 : i32
    %c0_i32_1 = arith.constant 0 : i32
    return %c0_i32, %c0_i32_0 : i32, i32
  }
  func.func @transform_2(%arg0: i32) -> (i32, i32) {
    %c0_i32 = arith.constant 0 : i32
    %c0_i32_0 = arith.constant 0 : i32
    return %arg0, %c0_i32 : i32, i32
  }
  func.func @transform_3(%arg0: i32) -> (i32, i32) {
    %c0_i32 = arith.constant 0 : i32
    %c0_i32_0 = arith.constant 0 : i32
    %c0_i32_1 = arith.constant 0 : i32
    return %c0_i32, %c0_i32_0 : i32, i32
  }
  func.func @transform_4(%arg0: i32) -> (i32, i32) {
    %c0_i32 = arith.constant 0 : i32
    %c0_i32_0 = arith.constant 0 : i32
    %c0_i32_1 = arith.constant 0 : i32
    return %c0_i32, %c0_i32_0 : i32, i32
  }
  func.func @transform_5(%arg0: i32) -> (i32, i32) {
    %c0_i32 = arith.constant 0 : i32
    %c0_i32_0 = arith.constant 0 : i32
    %c0_i32_1 = arith.constant 0 : i32
    return %c0_i32, %c0_i32_0 : i32, i32
  }
  func.func @transform_6(%arg0: i32) -> (i32, i32) {
    %c0_i32 = arith.constant 0 : i32
    %c0_i32_0 = arith.constant 0 : i32
    return %arg0, %c0_i32 : i32, i32
  }
}

module attributes {stable_mosaic.version = 11 : i64} {
  func.func @_mm_bias_prelu_kernel(%arg0: i32, %arg1: i32, %arg2: memref<8x512xbf16, #tpu.memory_space<vmem>>, %arg3: memref<512x128xbf16, #tpu.memory_space<vmem>>, %arg4: memref<1x128xf32, #tpu.memory_space<vmem>>, %arg5: memref<1x128xf32, #tpu.memory_space<vmem>>, %arg6: memref<8x128xbf16, #tpu.memory_space<vmem>>, %arg7: memref<8x128xf32, #tpu.memory_space<vmem>>) attributes {dimension_semantics = [#tpu.dimension_semantics<parallel>, #tpu.dimension_semantics<arbitrary>], iteration_bounds = array<i64: 1, 1>, scalar_prefetch = 0 : i64, scratch_operands = 1 : i64, tpu.core_type = #tpu.core_type<tc>, window_params = [{transform_indices = @transform_0, window_bounds = array<i64: 8, 512>}, {transform_indices = @transform_1, window_bounds = array<i64: 512, 128>}, {pipeline_mode = #tpu.pipeline_mode<synchronous>, transform_indices = @transform_2, window_bounds = array<i64: 1, 128>}, {pipeline_mode = #tpu.pipeline_mode<synchronous>, transform_indices = @transform_3, window_bounds = array<i64: 1, 128>}, {transform_indices = @transform_4, window_bounds = array<i64: 8, 128>}]} {
    %c0_i32 = arith.constant 0 : i32
    %0 = arith.cmpi eq, %arg1, %c0_i32 : i32
    %1 = arith.extui %0 : i1 to i32
    %c0_i32_0 = arith.constant 0 : i32
    %2 = arith.cmpi ne, %1, %c0_i32_0 : i32
    scf.if %2 {
      %cst_10 = arith.constant 0.000000e+00 : f32
      %12 = vector.broadcast %cst_10 : f32 to vector<8x128xf32>
      %c0_11 = arith.constant 0 : index
      %c0_12 = arith.constant 0 : index
      %13 = vector.load %arg7[%c0_11, %c0_12] : memref<8x128xf32, #tpu.memory_space<vmem>>, vector<8x128xf32>
      tpu.vector_store %arg7[%c0_11, %c0_12], %12 {strides = array<i32>} : memref<8x128xf32, #tpu.memory_space<vmem>>, vector<8x128xf32>,
    } else {
    }
    %c0 = arith.constant 0 : index
    %c0_1 = arith.constant 0 : index
    %3 = vector.load %arg7[%c0, %c0_1] : memref<8x128xf32, #tpu.memory_space<vmem>>, vector<8x128xf32>
    %c0_2 = arith.constant 0 : index
    %c0_3 = arith.constant 0 : index
    %4 = vector.load %arg2[%c0_2, %c0_3] : memref<8x512xbf16, #tpu.memory_space<vmem>>, vector<8x512xbf16>
    %c0_4 = arith.constant 0 : index
    %c0_5 = arith.constant 0 : index
    %5 = vector.load %arg3[%c0_4, %c0_5] : memref<512x128xbf16, #tpu.memory_space<vmem>>, vector<512x128xbf16>
    %cst = arith.constant dense<0.000000e+00> : vector<8x128xf32>
    %6 = tpu.matmul %4, %5, %cst {dimension_numbers = #tpu.dot_dimension_numbers<[1], [0], [0], [1], [0, 0, 1, 1], [], []>} : vector<8x512xbf16>, vector<512x128xbf16>, vector<8x128xf32> -> vector<8x128xf32>
    %7 = arith.addf %3, %6 : vector<8x128xf32>
    %c0_6 = arith.constant 0 : index
    %c0_7 = arith.constant 0 : index
    %8 = vector.load %arg7[%c0_6, %c0_7] : memref<8x128xf32, #tpu.memory_space<vmem>>, vector<8x128xf32>
    tpu.vector_store %arg7[%c0_6, %c0_7], %7 {strides = array<i32>} : memref<8x128xf32, #tpu.memory_space<vmem>>, vector<8x128xf32>,
    %c0_i32_8 = arith.constant 0 : i32
    %9 = arith.cmpi eq, %arg1, %c0_i32_8 : i32
    %10 = arith.extui %9 : i1 to i32
    %c0_i32_9 = arith.constant 0 : i32
    %11 = arith.cmpi ne, %10, %c0_i32_9 : i32
    scf.if %11 {
      %c0_10 = arith.constant 0 : index
      %c0_11 = arith.constant 0 : index
      %12 = vector.load %arg7[%c0_10, %c0_11] : memref<8x128xf32, #tpu.memory_space<vmem>>, vector<8x128xf32>
      %c0_12 = arith.constant 0 : index
      %c0_13 = arith.constant 0 : index
      %13 = vector.load %arg4[%c0_12, %c0_13] : memref<1x128xf32, #tpu.memory_space<vmem>>, vector<1x128xf32>
      %14 = vector.broadcast %13 : vector<1x128xf32> to vector<8x128xf32>
      %15 = arith.addf %12, %14 : vector<8x128xf32>
      %cst_14 = arith.constant 0.000000e+00 : f32
      %16 = vector.broadcast %cst_14 : f32 to vector<8x128xf32>
      %17 = arith.cmpf oge, %15, %16 : vector<8x128xf32>
      %c0_15 = arith.constant 0 : index
      %c0_16 = arith.constant 0 : index
      %18 = vector.load %arg5[%c0_15, %c0_16] : memref<1x128xf32, #tpu.memory_space<vmem>>, vector<1x128xf32>
      %19 = vector.broadcast %18 : vector<1x128xf32> to vector<8x128xf32>
      %20 = arith.mulf %19, %15 : vector<8x128xf32>
      %21 = arith.select %17, %15, %20 : vector<8x128xi1>, vector<8x128xf32>
      %22 = arith.truncf %21 : vector<8x128xf32> to vector<8x128xbf16>
      %c0_17 = arith.constant 0 : index
      %c0_18 = arith.constant 0 : index
      %23 = vector.load %arg6[%c0_17, %c0_18] : memref<8x128xbf16, #tpu.memory_space<vmem>>, vector<8x128xbf16>
      tpu.vector_store %arg6[%c0_17, %c0_18], %22 {strides = array<i32>} : memref<8x128xbf16, #tpu.memory_space<vmem>>, vector<8x128xbf16>,
    } else {
    }
    return
  }
  func.func @transform_0(%arg0: i32, %arg1: i32) -> (i32, i32) {
    %c0_i32 = arith.constant 0 : i32
    return %arg0, %arg1 : i32, i32
  }
  func.func @transform_1(%arg0: i32, %arg1: i32) -> (i32, i32) {
    %c0_i32 = arith.constant 0 : i32
    %c0_i32_0 = arith.constant 0 : i32
    return %arg1, %c0_i32 : i32, i32
  }
  func.func @transform_2(%arg0: i32, %arg1: i32) -> (i32, i32) {
    %c0_i32 = arith.constant 0 : i32
    %c0_i32_0 = arith.constant 0 : i32
    %c0_i32_1 = arith.constant 0 : i32
    return %c0_i32, %c0_i32_0 : i32, i32
  }
  func.func @transform_3(%arg0: i32, %arg1: i32) -> (i32, i32) {
    %c0_i32 = arith.constant 0 : i32
    %c0_i32_0 = arith.constant 0 : i32
    %c0_i32_1 = arith.constant 0 : i32
    return %c0_i32, %c0_i32_0 : i32, i32
  }
  func.func @transform_4(%arg0: i32, %arg1: i32) -> (i32, i32) {
    %c0_i32 = arith.constant 0 : i32
    %c0_i32_0 = arith.constant 0 : i32
    return %arg0, %c0_i32 : i32, i32
  }
}

module attributes {stable_mosaic.version = 11 : i64} {
  func.func @_mm_bias_prelu_kernel(%arg0: i32, %arg1: i32, %arg2: memref<8x512xbf16, #tpu.memory_space<vmem>>, %arg3: memref<512x128xbf16, #tpu.memory_space<vmem>>, %arg4: memref<1x128xf32, #tpu.memory_space<vmem>>, %arg5: memref<1x128xf32, #tpu.memory_space<vmem>>, %arg6: memref<8x128xbf16, #tpu.memory_space<vmem>>, %arg7: memref<8x128xf32, #tpu.memory_space<vmem>>) attributes {dimension_semantics = [#tpu.dimension_semantics<parallel>, #tpu.dimension_semantics<arbitrary>], iteration_bounds = array<i64: 1, 4>, scalar_prefetch = 0 : i64, scratch_operands = 1 : i64, tpu.core_type = #tpu.core_type<tc>, window_params = [{transform_indices = @transform_0, window_bounds = array<i64: 8, 512>}, {transform_indices = @transform_1, window_bounds = array<i64: 512, 128>}, {pipeline_mode = #tpu.pipeline_mode<synchronous>, transform_indices = @transform_2, window_bounds = array<i64: 1, 128>}, {pipeline_mode = #tpu.pipeline_mode<synchronous>, transform_indices = @transform_3, window_bounds = array<i64: 1, 128>}, {transform_indices = @transform_4, window_bounds = array<i64: 8, 128>}]} {
    %c0_i32 = arith.constant 0 : i32
    %0 = arith.cmpi eq, %arg1, %c0_i32 : i32
    %1 = arith.extui %0 : i1 to i32
    %c0_i32_0 = arith.constant 0 : i32
    %2 = arith.cmpi ne, %1, %c0_i32_0 : i32
    scf.if %2 {
      %cst_9 = arith.constant 0.000000e+00 : f32
      %12 = vector.broadcast %cst_9 : f32 to vector<8x128xf32>
      %c0_10 = arith.constant 0 : index
      %c0_11 = arith.constant 0 : index
      %13 = vector.load %arg7[%c0_10, %c0_11] : memref<8x128xf32, #tpu.memory_space<vmem>>, vector<8x128xf32>
      tpu.vector_store %arg7[%c0_10, %c0_11], %12 {strides = array<i32>} : memref<8x128xf32, #tpu.memory_space<vmem>>, vector<8x128xf32>,
    } else {
    }
    %c0 = arith.constant 0 : index
    %c0_1 = arith.constant 0 : index
    %3 = vector.load %arg7[%c0, %c0_1] : memref<8x128xf32, #tpu.memory_space<vmem>>, vector<8x128xf32>
    %c0_2 = arith.constant 0 : index
    %c0_3 = arith.constant 0 : index
    %4 = vector.load %arg2[%c0_2, %c0_3] : memref<8x512xbf16, #tpu.memory_space<vmem>>, vector<8x512xbf16>
    %c0_4 = arith.constant 0 : index
    %c0_5 = arith.constant 0 : index
    %5 = vector.load %arg3[%c0_4, %c0_5] : memref<512x128xbf16, #tpu.memory_space<vmem>>, vector<512x128xbf16>
    %cst = arith.constant dense<0.000000e+00> : vector<8x128xf32>
    %6 = tpu.matmul %4, %5, %cst {dimension_numbers = #tpu.dot_dimension_numbers<[1], [0], [0], [1], [0, 0, 1, 1], [], []>} : vector<8x512xbf16>, vector<512x128xbf16>, vector<8x128xf32> -> vector<8x128xf32>
    %7 = arith.addf %3, %6 : vector<8x128xf32>
    %c0_6 = arith.constant 0 : index
    %c0_7 = arith.constant 0 : index
    %8 = vector.load %arg7[%c0_6, %c0_7] : memref<8x128xf32, #tpu.memory_space<vmem>>, vector<8x128xf32>
    tpu.vector_store %arg7[%c0_6, %c0_7], %7 {strides = array<i32>} : memref<8x128xf32, #tpu.memory_space<vmem>>, vector<8x128xf32>,
    %c3_i32 = arith.constant 3 : i32
    %9 = arith.cmpi eq, %arg1, %c3_i32 : i32
    %10 = arith.extui %9 : i1 to i32
    %c0_i32_8 = arith.constant 0 : i32
    %11 = arith.cmpi ne, %10, %c0_i32_8 : i32
    scf.if %11 {
      %c0_9 = arith.constant 0 : index
      %c0_10 = arith.constant 0 : index
      %12 = vector.load %arg7[%c0_9, %c0_10] : memref<8x128xf32, #tpu.memory_space<vmem>>, vector<8x128xf32>
      %c0_11 = arith.constant 0 : index
      %c0_12 = arith.constant 0 : index
      %13 = vector.load %arg4[%c0_11, %c0_12] : memref<1x128xf32, #tpu.memory_space<vmem>>, vector<1x128xf32>
      %14 = vector.broadcast %13 : vector<1x128xf32> to vector<8x128xf32>
      %15 = arith.addf %12, %14 : vector<8x128xf32>
      %cst_13 = arith.constant 0.000000e+00 : f32
      %16 = vector.broadcast %cst_13 : f32 to vector<8x128xf32>
      %17 = arith.cmpf oge, %15, %16 : vector<8x128xf32>
      %c0_14 = arith.constant 0 : index
      %c0_15 = arith.constant 0 : index
      %18 = vector.load %arg5[%c0_14, %c0_15] : memref<1x128xf32, #tpu.memory_space<vmem>>, vector<1x128xf32>
      %19 = vector.broadcast %18 : vector<1x128xf32> to vector<8x128xf32>
      %20 = arith.mulf %19, %15 : vector<8x128xf32>
      %21 = arith.select %17, %15, %20 : vector<8x128xi1>, vector<8x128xf32>
      %22 = arith.truncf %21 : vector<8x128xf32> to vector<8x128xbf16>
      %c0_16 = arith.constant 0 : index
      %c0_17 = arith.constant 0 : index
      %23 = vector.load %arg6[%c0_16, %c0_17] : memref<8x128xbf16, #tpu.memory_space<vmem>>, vector<8x128xbf16>
      tpu.vector_store %arg6[%c0_16, %c0_17], %22 {strides = array<i32>} : memref<8x128xbf16, #tpu.memory_space<vmem>>, vector<8x128xbf16>,
    } else {
    }
    return
  }
  func.func @transform_0(%arg0: i32, %arg1: i32) -> (i32, i32) {
    %c0_i32 = arith.constant 0 : i32
    return %arg0, %arg1 : i32, i32
  }
  func.func @transform_1(%arg0: i32, %arg1: i32) -> (i32, i32) {
    %c0_i32 = arith.constant 0 : i32
    %c0_i32_0 = arith.constant 0 : i32
    return %arg1, %c0_i32 : i32, i32
  }
  func.func @transform_2(%arg0: i32, %arg1: i32) -> (i32, i32) {
    %c0_i32 = arith.constant 0 : i32
    %c0_i32_0 = arith.constant 0 : i32
    %c0_i32_1 = arith.constant 0 : i32
    return %c0_i32, %c0_i32_0 : i32, i32
  }
  func.func @transform_3(%arg0: i32, %arg1: i32) -> (i32, i32) {
    %c0_i32 = arith.constant 0 : i32
    %c0_i32_0 = arith.constant 0 : i32
    %c0_i32_1 = arith.constant 0 : i32
    return %c0_i32, %c0_i32_0 : i32, i32
  }
  func.func @transform_4(%arg0: i32, %arg1: i32) -> (i32, i32) {
    %c0_i32 = arith.constant 0 : i32
    %c0_i32_0 = arith.constant 0 : i32
    return %arg0, %c0_i32 : i32, i32
  }
}

module attributes {stable_mosaic.version = 11 : i64} {
  func.func @_mm2_bias_prelu_kernel(%arg0: i32, %arg1: memref<8x288xbf16, #tpu.memory_space<vmem>>, %arg2: memref<288x128xbf16, #tpu.memory_space<vmem>>, %arg3: memref<8x288xbf16, #tpu.memory_space<vmem>>, %arg4: memref<288x128xbf16, #tpu.memory_space<vmem>>, %arg5: memref<1x128xf32, #tpu.memory_space<vmem>>, %arg6: memref<1x128xf32, #tpu.memory_space<vmem>>, %arg7: memref<8x128xbf16, #tpu.memory_space<vmem>>) attributes {dimension_semantics = [#tpu.dimension_semantics<parallel>], iteration_bounds = array<i64: 1>, scalar_prefetch = 0 : i64, scratch_operands = 0 : i64, tpu.core_type = #tpu.core_type<tc>, window_params = [{transform_indices = @transform_0, window_bounds = array<i64: 8, 288>}, {pipeline_mode = #tpu.pipeline_mode<synchronous>, transform_indices = @transform_1, window_bounds = array<i64: 288, 128>}, {transform_indices = @transform_2, window_bounds = array<i64: 8, 288>}, {pipeline_mode = #tpu.pipeline_mode<synchronous>, transform_indices = @transform_3, window_bounds = array<i64: 288, 128>}, {pipeline_mode = #tpu.pipeline_mode<synchronous>, transform_indices = @transform_4, window_bounds = array<i64: 1, 128>}, {pipeline_mode = #tpu.pipeline_mode<synchronous>, transform_indices = @transform_5, window_bounds = array<i64: 1, 128>}, {transform_indices = @transform_6, window_bounds = array<i64: 8, 128>}]} {
    %c0 = arith.constant 0 : index
    %c0_0 = arith.constant 0 : index
    %0 = vector.load %arg1[%c0, %c0_0] : memref<8x288xbf16, #tpu.memory_space<vmem>>, vector<8x288xbf16>
    %c0_1 = arith.constant 0 : index
    %c0_2 = arith.constant 0 : index
    %1 = vector.load %arg2[%c0_1, %c0_2] : memref<288x128xbf16, #tpu.memory_space<vmem>>, vector<288x128xbf16>
    %cst = arith.constant dense<0.000000e+00> : vector<8x128xf32>
    %2 = tpu.matmul %0, %1, %cst {dimension_numbers = #tpu.dot_dimension_numbers<[1], [0], [0], [1], [0, 0, 1, 1], [], []>} : vector<8x288xbf16>, vector<288x128xbf16>, vector<8x128xf32> -> vector<8x128xf32>
    %c0_3 = arith.constant 0 : index
    %c0_4 = arith.constant 0 : index
    %3 = vector.load %arg3[%c0_3, %c0_4] : memref<8x288xbf16, #tpu.memory_space<vmem>>, vector<8x288xbf16>
    %c0_5 = arith.constant 0 : index
    %c0_6 = arith.constant 0 : index
    %4 = vector.load %arg4[%c0_5, %c0_6] : memref<288x128xbf16, #tpu.memory_space<vmem>>, vector<288x128xbf16>
    %cst_7 = arith.constant dense<0.000000e+00> : vector<8x128xf32>
    %5 = tpu.matmul %3, %4, %cst_7 {dimension_numbers = #tpu.dot_dimension_numbers<[1], [0], [0], [1], [0, 0, 1, 1], [], []>} : vector<8x288xbf16>, vector<288x128xbf16>, vector<8x128xf32> -> vector<8x128xf32>
    %6 = arith.addf %2, %5 : vector<8x128xf32>
    %c0_8 = arith.constant 0 : index
    %c0_9 = arith.constant 0 : index
    %7 = vector.load %arg5[%c0_8, %c0_9] : memref<1x128xf32, #tpu.memory_space<vmem>>, vector<1x128xf32>
    %8 = vector.broadcast %7 : vector<1x128xf32> to vector<8x128xf32>
    %9 = arith.addf %6, %8 : vector<8x128xf32>
    %cst_10 = arith.constant 0.000000e+00 : f32
    %10 = vector.broadcast %cst_10 : f32 to vector<8x128xf32>
    %11 = arith.cmpf oge, %9, %10 : vector<8x128xf32>
    %c0_11 = arith.constant 0 : index
    %c0_12 = arith.constant 0 : index
    %12 = vector.load %arg6[%c0_11, %c0_12] : memref<1x128xf32, #tpu.memory_space<vmem>>, vector<1x128xf32>
    %13 = vector.broadcast %12 : vector<1x128xf32> to vector<8x128xf32>
    %14 = arith.mulf %13, %9 : vector<8x128xf32>
    %15 = arith.select %11, %9, %14 : vector<8x128xi1>, vector<8x128xf32>
    %16 = arith.truncf %15 : vector<8x128xf32> to vector<8x128xbf16>
    %c0_13 = arith.constant 0 : index
    %c0_14 = arith.constant 0 : index
    %17 = vector.load %arg7[%c0_13, %c0_14] : memref<8x128xbf16, #tpu.memory_space<vmem>>, vector<8x128xbf16>
    tpu.vector_store %arg7[%c0_13, %c0_14], %16 {strides = array<i32>} : memref<8x128xbf16, #tpu.memory_space<vmem>>, vector<8x128xbf16>,
    return
  }
  func.func @transform_0(%arg0: i32) -> (i32, i32) {
    %c0_i32 = arith.constant 0 : i32
    %c0_i32_0 = arith.constant 0 : i32
    return %arg0, %c0_i32 : i32, i32
  }
  func.func @transform_1(%arg0: i32) -> (i32, i32) {
    %c0_i32 = arith.constant 0 : i32
    %c0_i32_0 = arith.constant 0 : i32
    %c0_i32_1 = arith.constant 0 : i32
    return %c0_i32, %c0_i32_0 : i32, i32
  }
  func.func @transform_2(%arg0: i32) -> (i32, i32) {
    %c0_i32 = arith.constant 0 : i32
    %c0_i32_0 = arith.constant 0 : i32
    return %arg0, %c0_i32 : i32, i32
  }
  func.func @transform_3(%arg0: i32) -> (i32, i32) {
    %c0_i32 = arith.constant 0 : i32
    %c0_i32_0 = arith.constant 0 : i32
    %c0_i32_1 = arith.constant 0 : i32
    return %c0_i32, %c0_i32_0 : i32, i32
  }
  func.func @transform_4(%arg0: i32) -> (i32, i32) {
    %c0_i32 = arith.constant 0 : i32
    %c0_i32_0 = arith.constant 0 : i32
    %c0_i32_1 = arith.constant 0 : i32
    return %c0_i32, %c0_i32_0 : i32, i32
  }
  func.func @transform_5(%arg0: i32) -> (i32, i32) {
    %c0_i32 = arith.constant 0 : i32
    %c0_i32_0 = arith.constant 0 : i32
    %c0_i32_1 = arith.constant 0 : i32
    return %c0_i32, %c0_i32_0 : i32, i32
  }
  func.func @transform_6(%arg0: i32) -> (i32, i32) {
    %c0_i32 = arith.constant 0 : i32
    %c0_i32_0 = arith.constant 0 : i32
    return %arg0, %c0_i32 : i32, i32
  }
}

module attributes {stable_mosaic.version = 11 : i64} {
  func.func @_mm_bias_prelu_kernel(%arg0: i32, %arg1: i32, %arg2: memref<8x128xbf16, #tpu.memory_space<vmem>>, %arg3: memref<128x128xbf16, #tpu.memory_space<vmem>>, %arg4: memref<1x128xf32, #tpu.memory_space<vmem>>, %arg5: memref<1x128xf32, #tpu.memory_space<vmem>>, %arg6: memref<8x128xbf16, #tpu.memory_space<vmem>>, %arg7: memref<8x128xf32, #tpu.memory_space<vmem>>) attributes {dimension_semantics = [#tpu.dimension_semantics<parallel>, #tpu.dimension_semantics<arbitrary>], iteration_bounds = array<i64: 1, 1>, scalar_prefetch = 0 : i64, scratch_operands = 1 : i64, tpu.core_type = #tpu.core_type<tc>, window_params = [{transform_indices = @transform_0, window_bounds = array<i64: 8, 128>}, {transform_indices = @transform_1, window_bounds = array<i64: 128, 128>}, {pipeline_mode = #tpu.pipeline_mode<synchronous>, transform_indices = @transform_2, window_bounds = array<i64: 1, 128>}, {pipeline_mode = #tpu.pipeline_mode<synchronous>, transform_indices = @transform_3, window_bounds = array<i64: 1, 128>}, {transform_indices = @transform_4, window_bounds = array<i64: 8, 128>}]} {
    %c0_i32 = arith.constant 0 : i32
    %0 = arith.cmpi eq, %arg1, %c0_i32 : i32
    %1 = arith.extui %0 : i1 to i32
    %c0_i32_0 = arith.constant 0 : i32
    %2 = arith.cmpi ne, %1, %c0_i32_0 : i32
    scf.if %2 {
      %cst_10 = arith.constant 0.000000e+00 : f32
      %12 = vector.broadcast %cst_10 : f32 to vector<8x128xf32>
      %c0_11 = arith.constant 0 : index
      %c0_12 = arith.constant 0 : index
      %13 = vector.load %arg7[%c0_11, %c0_12] : memref<8x128xf32, #tpu.memory_space<vmem>>, vector<8x128xf32>
      tpu.vector_store %arg7[%c0_11, %c0_12], %12 {strides = array<i32>} : memref<8x128xf32, #tpu.memory_space<vmem>>, vector<8x128xf32>,
    } else {
    }
    %c0 = arith.constant 0 : index
    %c0_1 = arith.constant 0 : index
    %3 = vector.load %arg7[%c0, %c0_1] : memref<8x128xf32, #tpu.memory_space<vmem>>, vector<8x128xf32>
    %c0_2 = arith.constant 0 : index
    %c0_3 = arith.constant 0 : index
    %4 = vector.load %arg2[%c0_2, %c0_3] : memref<8x128xbf16, #tpu.memory_space<vmem>>, vector<8x128xbf16>
    %c0_4 = arith.constant 0 : index
    %c0_5 = arith.constant 0 : index
    %5 = vector.load %arg3[%c0_4, %c0_5] : memref<128x128xbf16, #tpu.memory_space<vmem>>, vector<128x128xbf16>
    %cst = arith.constant dense<0.000000e+00> : vector<8x128xf32>
    %6 = tpu.matmul %4, %5, %cst {dimension_numbers = #tpu.dot_dimension_numbers<[1], [0], [0], [1], [0, 0, 1, 1], [], []>} : vector<8x128xbf16>, vector<128x128xbf16>, vector<8x128xf32> -> vector<8x128xf32>
    %7 = arith.addf %3, %6 : vector<8x128xf32>
    %c0_6 = arith.constant 0 : index
    %c0_7 = arith.constant 0 : index
    %8 = vector.load %arg7[%c0_6, %c0_7] : memref<8x128xf32, #tpu.memory_space<vmem>>, vector<8x128xf32>
    tpu.vector_store %arg7[%c0_6, %c0_7], %7 {strides = array<i32>} : memref<8x128xf32, #tpu.memory_space<vmem>>, vector<8x128xf32>,
    %c0_i32_8 = arith.constant 0 : i32
    %9 = arith.cmpi eq, %arg1, %c0_i32_8 : i32
    %10 = arith.extui %9 : i1 to i32
    %c0_i32_9 = arith.constant 0 : i32
    %11 = arith.cmpi ne, %10, %c0_i32_9 : i32
    scf.if %11 {
      %c0_10 = arith.constant 0 : index
      %c0_11 = arith.constant 0 : index
      %12 = vector.load %arg7[%c0_10, %c0_11] : memref<8x128xf32, #tpu.memory_space<vmem>>, vector<8x128xf32>
      %c0_12 = arith.constant 0 : index
      %c0_13 = arith.constant 0 : index
      %13 = vector.load %arg4[%c0_12, %c0_13] : memref<1x128xf32, #tpu.memory_space<vmem>>, vector<1x128xf32>
      %14 = vector.broadcast %13 : vector<1x128xf32> to vector<8x128xf32>
      %15 = arith.addf %12, %14 : vector<8x128xf32>
      %cst_14 = arith.constant 0.000000e+00 : f32
      %16 = vector.broadcast %cst_14 : f32 to vector<8x128xf32>
      %17 = arith.cmpf oge, %15, %16 : vector<8x128xf32>
      %c0_15 = arith.constant 0 : index
      %c0_16 = arith.constant 0 : index
      %18 = vector.load %arg5[%c0_15, %c0_16] : memref<1x128xf32, #tpu.memory_space<vmem>>, vector<1x128xf32>
      %19 = vector.broadcast %18 : vector<1x128xf32> to vector<8x128xf32>
      %20 = arith.mulf %19, %15 : vector<8x128xf32>
      %21 = arith.select %17, %15, %20 : vector<8x128xi1>, vector<8x128xf32>
      %22 = arith.truncf %21 : vector<8x128xf32> to vector<8x128xbf16>
      %c0_17 = arith.constant 0 : index
      %c0_18 = arith.constant 0 : index
      %23 = vector.load %arg6[%c0_17, %c0_18] : memref<8x128xbf16, #tpu.memory_space<vmem>>, vector<8x128xbf16>
      tpu.vector_store %arg6[%c0_17, %c0_18], %22 {strides = array<i32>} : memref<8x128xbf16, #tpu.memory_space<vmem>>, vector<8x128xbf16>,
    } else {
    }
    return
  }
  func.func @transform_0(%arg0: i32, %arg1: i32) -> (i32, i32) {
    %c0_i32 = arith.constant 0 : i32
    return %arg0, %arg1 : i32, i32
  }
  func.func @transform_1(%arg0: i32, %arg1: i32) -> (i32, i32) {
    %c0_i32 = arith.constant 0 : i32
    %c0_i32_0 = arith.constant 0 : i32
    return %arg1, %c0_i32 : i32, i32
  }
  func.func @transform_2(%arg0: i32, %arg1: i32) -> (i32, i32) {
    %c0_i32 = arith.constant 0 : i32
    %c0_i32_0 = arith.constant 0 : i32
    %c0_i32_1 = arith.constant 0 : i32
    return %c0_i32, %c0_i32_0 : i32, i32
  }
  func.func @transform_3(%arg0: i32, %arg1: i32) -> (i32, i32) {
    %c0_i32 = arith.constant 0 : i32
    %c0_i32_0 = arith.constant 0 : i32
    %c0_i32_1 = arith.constant 0 : i32
    return %c0_i32, %c0_i32_0 : i32, i32
  }
  func.func @transform_4(%arg0: i32, %arg1: i32) -> (i32, i32) {
    %c0_i32 = arith.constant 0 : i32
    %c0_i32_0 = arith.constant 0 : i32
    return %arg0, %c0_i32 : i32, i32
  }
}

module attributes {stable_mosaic.version = 11 : i64} {
  func.func @_mm_bias_prelu_kernel(%arg0: i32, %arg1: i32, %arg2: memref<32x576xbf16, #tpu.memory_space<vmem>>, %arg3: memref<576x128xbf16, #tpu.memory_space<vmem>>, %arg4: memref<1x128xf32, #tpu.memory_space<vmem>>, %arg5: memref<1x128xf32, #tpu.memory_space<vmem>>, %arg6: memref<32x128xbf16, #tpu.memory_space<vmem>>, %arg7: memref<32x128xf32, #tpu.memory_space<vmem>>) attributes {dimension_semantics = [#tpu.dimension_semantics<parallel>, #tpu.dimension_semantics<arbitrary>], iteration_bounds = array<i64: 1, 1>, scalar_prefetch = 0 : i64, scratch_operands = 1 : i64, tpu.core_type = #tpu.core_type<tc>, window_params = [{transform_indices = @transform_0, window_bounds = array<i64: 32, 576>}, {transform_indices = @transform_1, window_bounds = array<i64: 576, 128>}, {pipeline_mode = #tpu.pipeline_mode<synchronous>, transform_indices = @transform_2, window_bounds = array<i64: 1, 128>}, {pipeline_mode = #tpu.pipeline_mode<synchronous>, transform_indices = @transform_3, window_bounds = array<i64: 1, 128>}, {transform_indices = @transform_4, window_bounds = array<i64: 32, 128>}]} {
    %c0_i32 = arith.constant 0 : i32
    %0 = arith.cmpi eq, %arg1, %c0_i32 : i32
    %1 = arith.extui %0 : i1 to i32
    %c0_i32_0 = arith.constant 0 : i32
    %2 = arith.cmpi ne, %1, %c0_i32_0 : i32
    scf.if %2 {
      %cst_10 = arith.constant 0.000000e+00 : f32
      %12 = vector.broadcast %cst_10 : f32 to vector<32x128xf32>
      %c0_11 = arith.constant 0 : index
      %c0_12 = arith.constant 0 : index
      %13 = vector.load %arg7[%c0_11, %c0_12] : memref<32x128xf32, #tpu.memory_space<vmem>>, vector<32x128xf32>
      tpu.vector_store %arg7[%c0_11, %c0_12], %12 {strides = array<i32>} : memref<32x128xf32, #tpu.memory_space<vmem>>, vector<32x128xf32>,
    } else {
    }
    %c0 = arith.constant 0 : index
    %c0_1 = arith.constant 0 : index
    %3 = vector.load %arg7[%c0, %c0_1] : memref<32x128xf32, #tpu.memory_space<vmem>>, vector<32x128xf32>
    %c0_2 = arith.constant 0 : index
    %c0_3 = arith.constant 0 : index
    %4 = vector.load %arg2[%c0_2, %c0_3] : memref<32x576xbf16, #tpu.memory_space<vmem>>, vector<32x576xbf16>
    %c0_4 = arith.constant 0 : index
    %c0_5 = arith.constant 0 : index
    %5 = vector.load %arg3[%c0_4, %c0_5] : memref<576x128xbf16, #tpu.memory_space<vmem>>, vector<576x128xbf16>
    %cst = arith.constant dense<0.000000e+00> : vector<32x128xf32>
    %6 = tpu.matmul %4, %5, %cst {dimension_numbers = #tpu.dot_dimension_numbers<[1], [0], [0], [1], [0, 0, 1, 1], [], []>} : vector<32x576xbf16>, vector<576x128xbf16>, vector<32x128xf32> -> vector<32x128xf32>
    %7 = arith.addf %3, %6 : vector<32x128xf32>
    %c0_6 = arith.constant 0 : index
    %c0_7 = arith.constant 0 : index
    %8 = vector.load %arg7[%c0_6, %c0_7] : memref<32x128xf32, #tpu.memory_space<vmem>>, vector<32x128xf32>
    tpu.vector_store %arg7[%c0_6, %c0_7], %7 {strides = array<i32>} : memref<32x128xf32, #tpu.memory_space<vmem>>, vector<32x128xf32>,
    %c0_i32_8 = arith.constant 0 : i32
    %9 = arith.cmpi eq, %arg1, %c0_i32_8 : i32
    %10 = arith.extui %9 : i1 to i32
    %c0_i32_9 = arith.constant 0 : i32
    %11 = arith.cmpi ne, %10, %c0_i32_9 : i32
    scf.if %11 {
      %c0_10 = arith.constant 0 : index
      %c0_11 = arith.constant 0 : index
      %12 = vector.load %arg7[%c0_10, %c0_11] : memref<32x128xf32, #tpu.memory_space<vmem>>, vector<32x128xf32>
      %c0_12 = arith.constant 0 : index
      %c0_13 = arith.constant 0 : index
      %13 = vector.load %arg4[%c0_12, %c0_13] : memref<1x128xf32, #tpu.memory_space<vmem>>, vector<1x128xf32>
      %14 = vector.broadcast %13 : vector<1x128xf32> to vector<32x128xf32>
      %15 = arith.addf %12, %14 : vector<32x128xf32>
      %cst_14 = arith.constant 0.000000e+00 : f32
      %16 = vector.broadcast %cst_14 : f32 to vector<32x128xf32>
      %17 = arith.cmpf oge, %15, %16 : vector<32x128xf32>
      %c0_15 = arith.constant 0 : index
      %c0_16 = arith.constant 0 : index
      %18 = vector.load %arg5[%c0_15, %c0_16] : memref<1x128xf32, #tpu.memory_space<vmem>>, vector<1x128xf32>
      %19 = vector.broadcast %18 : vector<1x128xf32> to vector<32x128xf32>
      %20 = arith.mulf %19, %15 : vector<32x128xf32>
      %21 = arith.select %17, %15, %20 : vector<32x128xi1>, vector<32x128xf32>
      %22 = arith.truncf %21 : vector<32x128xf32> to vector<32x128xbf16>
      %c0_17 = arith.constant 0 : index
      %c0_18 = arith.constant 0 : index
      %23 = vector.load %arg6[%c0_17, %c0_18] : memref<32x128xbf16, #tpu.memory_space<vmem>>, vector<32x128xbf16>
      tpu.vector_store %arg6[%c0_17, %c0_18], %22 {strides = array<i32>} : memref<32x128xbf16, #tpu.memory_space<vmem>>, vector<32x128xbf16>,
    } else {
    }
    return
  }
  func.func @transform_0(%arg0: i32, %arg1: i32) -> (i32, i32) {
    %c0_i32 = arith.constant 0 : i32
    return %arg0, %arg1 : i32, i32
  }
  func.func @transform_1(%arg0: i32, %arg1: i32) -> (i32, i32) {
    %c0_i32 = arith.constant 0 : i32
    %c0_i32_0 = arith.constant 0 : i32
    return %arg1, %c0_i32 : i32, i32
  }
  func.func @transform_2(%arg0: i32, %arg1: i32) -> (i32, i32) {
    %c0_i32 = arith.constant 0 : i32
    %c0_i32_0 = arith.constant 0 : i32
    %c0_i32_1 = arith.constant 0 : i32
    return %c0_i32, %c0_i32_0 : i32, i32
  }
  func.func @transform_3(%arg0: i32, %arg1: i32) -> (i32, i32) {
    %c0_i32 = arith.constant 0 : i32
    %c0_i32_0 = arith.constant 0 : i32
    %c0_i32_1 = arith.constant 0 : i32
    return %c0_i32, %c0_i32_0 : i32, i32
  }
  func.func @transform_4(%arg0: i32, %arg1: i32) -> (i32, i32) {
    %c0_i32 = arith.constant 0 : i32
    %c0_i32_0 = arith.constant 0 : i32
    return %arg0, %c0_i32 : i32, i32
  }
}

module attributes {stable_mosaic.version = 11 : i64} {
  func.func @_mm_bias_prelu_kernel(%arg0: i32, %arg1: i32, %arg2: memref<32x256xbf16, #tpu.memory_space<vmem>>, %arg3: memref<256x256xbf16, #tpu.memory_space<vmem>>, %arg4: memref<1x256xf32, #tpu.memory_space<vmem>>, %arg5: memref<1x256xf32, #tpu.memory_space<vmem>>, %arg6: memref<32x256xbf16, #tpu.memory_space<vmem>>, %arg7: memref<32x256xf32, #tpu.memory_space<vmem>>) attributes {dimension_semantics = [#tpu.dimension_semantics<parallel>, #tpu.dimension_semantics<arbitrary>], iteration_bounds = array<i64: 1, 1>, scalar_prefetch = 0 : i64, scratch_operands = 1 : i64, tpu.core_type = #tpu.core_type<tc>, window_params = [{transform_indices = @transform_0, window_bounds = array<i64: 32, 256>}, {transform_indices = @transform_1, window_bounds = array<i64: 256, 256>}, {pipeline_mode = #tpu.pipeline_mode<synchronous>, transform_indices = @transform_2, window_bounds = array<i64: 1, 256>}, {pipeline_mode = #tpu.pipeline_mode<synchronous>, transform_indices = @transform_3, window_bounds = array<i64: 1, 256>}, {transform_indices = @transform_4, window_bounds = array<i64: 32, 256>}]} {
    %c0_i32 = arith.constant 0 : i32
    %0 = arith.cmpi eq, %arg1, %c0_i32 : i32
    %1 = arith.extui %0 : i1 to i32
    %c0_i32_0 = arith.constant 0 : i32
    %2 = arith.cmpi ne, %1, %c0_i32_0 : i32
    scf.if %2 {
      %cst_10 = arith.constant 0.000000e+00 : f32
      %12 = vector.broadcast %cst_10 : f32 to vector<32x256xf32>
      %c0_11 = arith.constant 0 : index
      %c0_12 = arith.constant 0 : index
      %13 = vector.load %arg7[%c0_11, %c0_12] : memref<32x256xf32, #tpu.memory_space<vmem>>, vector<32x256xf32>
      tpu.vector_store %arg7[%c0_11, %c0_12], %12 {strides = array<i32>} : memref<32x256xf32, #tpu.memory_space<vmem>>, vector<32x256xf32>,
    } else {
    }
    %c0 = arith.constant 0 : index
    %c0_1 = arith.constant 0 : index
    %3 = vector.load %arg7[%c0, %c0_1] : memref<32x256xf32, #tpu.memory_space<vmem>>, vector<32x256xf32>
    %c0_2 = arith.constant 0 : index
    %c0_3 = arith.constant 0 : index
    %4 = vector.load %arg2[%c0_2, %c0_3] : memref<32x256xbf16, #tpu.memory_space<vmem>>, vector<32x256xbf16>
    %c0_4 = arith.constant 0 : index
    %c0_5 = arith.constant 0 : index
    %5 = vector.load %arg3[%c0_4, %c0_5] : memref<256x256xbf16, #tpu.memory_space<vmem>>, vector<256x256xbf16>
    %cst = arith.constant dense<0.000000e+00> : vector<32x256xf32>
    %6 = tpu.matmul %4, %5, %cst {dimension_numbers = #tpu.dot_dimension_numbers<[1], [0], [0], [1], [0, 0, 1, 1], [], []>} : vector<32x256xbf16>, vector<256x256xbf16>, vector<32x256xf32> -> vector<32x256xf32>
    %7 = arith.addf %3, %6 : vector<32x256xf32>
    %c0_6 = arith.constant 0 : index
    %c0_7 = arith.constant 0 : index
    %8 = vector.load %arg7[%c0_6, %c0_7] : memref<32x256xf32, #tpu.memory_space<vmem>>, vector<32x256xf32>
    tpu.vector_store %arg7[%c0_6, %c0_7], %7 {strides = array<i32>} : memref<32x256xf32, #tpu.memory_space<vmem>>, vector<32x256xf32>,
    %c0_i32_8 = arith.constant 0 : i32
    %9 = arith.cmpi eq, %arg1, %c0_i32_8 : i32
    %10 = arith.extui %9 : i1 to i32
    %c0_i32_9 = arith.constant 0 : i32
    %11 = arith.cmpi ne, %10, %c0_i32_9 : i32
    scf.if %11 {
      %c0_10 = arith.constant 0 : index
      %c0_11 = arith.constant 0 : index
      %12 = vector.load %arg7[%c0_10, %c0_11] : memref<32x256xf32, #tpu.memory_space<vmem>>, vector<32x256xf32>
      %c0_12 = arith.constant 0 : index
      %c0_13 = arith.constant 0 : index
      %13 = vector.load %arg4[%c0_12, %c0_13] : memref<1x256xf32, #tpu.memory_space<vmem>>, vector<1x256xf32>
      %14 = vector.broadcast %13 : vector<1x256xf32> to vector<32x256xf32>
      %15 = arith.addf %12, %14 : vector<32x256xf32>
      %cst_14 = arith.constant 0.000000e+00 : f32
      %16 = vector.broadcast %cst_14 : f32 to vector<32x256xf32>
      %17 = arith.cmpf oge, %15, %16 : vector<32x256xf32>
      %c0_15 = arith.constant 0 : index
      %c0_16 = arith.constant 0 : index
      %18 = vector.load %arg5[%c0_15, %c0_16] : memref<1x256xf32, #tpu.memory_space<vmem>>, vector<1x256xf32>
      %19 = vector.broadcast %18 : vector<1x256xf32> to vector<32x256xf32>
      %20 = arith.mulf %19, %15 : vector<32x256xf32>
      %21 = arith.select %17, %15, %20 : vector<32x256xi1>, vector<32x256xf32>
      %22 = arith.truncf %21 : vector<32x256xf32> to vector<32x256xbf16>
      %c0_17 = arith.constant 0 : index
      %c0_18 = arith.constant 0 : index
      %23 = vector.load %arg6[%c0_17, %c0_18] : memref<32x256xbf16, #tpu.memory_space<vmem>>, vector<32x256xbf16>
      tpu.vector_store %arg6[%c0_17, %c0_18], %22 {strides = array<i32>} : memref<32x256xbf16, #tpu.memory_space<vmem>>, vector<32x256xbf16>,
    } else {
    }
    return
  }
  func.func @transform_0(%arg0: i32, %arg1: i32) -> (i32, i32) {
    %c0_i32 = arith.constant 0 : i32
    return %arg0, %arg1 : i32, i32
  }
  func.func @transform_1(%arg0: i32, %arg1: i32) -> (i32, i32) {
    %c0_i32 = arith.constant 0 : i32
    %c0_i32_0 = arith.constant 0 : i32
    return %arg1, %c0_i32 : i32, i32
  }
  func.func @transform_2(%arg0: i32, %arg1: i32) -> (i32, i32) {
    %c0_i32 = arith.constant 0 : i32
    %c0_i32_0 = arith.constant 0 : i32
    %c0_i32_1 = arith.constant 0 : i32
    return %c0_i32, %c0_i32_0 : i32, i32
  }
  func.func @transform_3(%arg0: i32, %arg1: i32) -> (i32, i32) {
    %c0_i32 = arith.constant 0 : i32
    %c0_i32_0 = arith.constant 0 : i32
    %c0_i32_1 = arith.constant 0 : i32
    return %c0_i32, %c0_i32_0 : i32, i32
  }
  func.func @transform_4(%arg0: i32, %arg1: i32) -> (i32, i32) {
    %c0_i32 = arith.constant 0 : i32
    %c0_i32_0 = arith.constant 0 : i32
    return %arg0, %c0_i32 : i32, i32
  }
}

module attributes {stable_mosaic.version = 11 : i64} {
  func.func @_mm2_bias_prelu_kernel(%arg0: i32, %arg1: memref<128x576xbf16, #tpu.memory_space<vmem>>, %arg2: memref<576x128xbf16, #tpu.memory_space<vmem>>, %arg3: memref<128x288xbf16, #tpu.memory_space<vmem>>, %arg4: memref<288x128xbf16, #tpu.memory_space<vmem>>, %arg5: memref<1x128xf32, #tpu.memory_space<vmem>>, %arg6: memref<1x128xf32, #tpu.memory_space<vmem>>, %arg7: memref<128x128xbf16, #tpu.memory_space<vmem>>) attributes {dimension_semantics = [#tpu.dimension_semantics<parallel>], iteration_bounds = array<i64: 1>, scalar_prefetch = 0 : i64, scratch_operands = 0 : i64, tpu.core_type = #tpu.core_type<tc>, window_params = [{transform_indices = @transform_0, window_bounds = array<i64: 128, 576>}, {pipeline_mode = #tpu.pipeline_mode<synchronous>, transform_indices = @transform_1, window_bounds = array<i64: 576, 128>}, {transform_indices = @transform_2, window_bounds = array<i64: 128, 288>}, {pipeline_mode = #tpu.pipeline_mode<synchronous>, transform_indices = @transform_3, window_bounds = array<i64: 288, 128>}, {pipeline_mode = #tpu.pipeline_mode<synchronous>, transform_indices = @transform_4, window_bounds = array<i64: 1, 128>}, {pipeline_mode = #tpu.pipeline_mode<synchronous>, transform_indices = @transform_5, window_bounds = array<i64: 1, 128>}, {transform_indices = @transform_6, window_bounds = array<i64: 128, 128>}]} {
    %c0 = arith.constant 0 : index
    %c0_0 = arith.constant 0 : index
    %0 = vector.load %arg1[%c0, %c0_0] : memref<128x576xbf16, #tpu.memory_space<vmem>>, vector<128x576xbf16>
    %c0_1 = arith.constant 0 : index
    %c0_2 = arith.constant 0 : index
    %1 = vector.load %arg2[%c0_1, %c0_2] : memref<576x128xbf16, #tpu.memory_space<vmem>>, vector<576x128xbf16>
    %cst = arith.constant dense<0.000000e+00> : vector<128x128xf32>
    %2 = tpu.matmul %0, %1, %cst {dimension_numbers = #tpu.dot_dimension_numbers<[1], [0], [0], [1], [0, 0, 1, 1], [], []>} : vector<128x576xbf16>, vector<576x128xbf16>, vector<128x128xf32> -> vector<128x128xf32>
    %c0_3 = arith.constant 0 : index
    %c0_4 = arith.constant 0 : index
    %3 = vector.load %arg3[%c0_3, %c0_4] : memref<128x288xbf16, #tpu.memory_space<vmem>>, vector<128x288xbf16>
    %c0_5 = arith.constant 0 : index
    %c0_6 = arith.constant 0 : index
    %4 = vector.load %arg4[%c0_5, %c0_6] : memref<288x128xbf16, #tpu.memory_space<vmem>>, vector<288x128xbf16>
    %cst_7 = arith.constant dense<0.000000e+00> : vector<128x128xf32>
    %5 = tpu.matmul %3, %4, %cst_7 {dimension_numbers = #tpu.dot_dimension_numbers<[1], [0], [0], [1], [0, 0, 1, 1], [], []>} : vector<128x288xbf16>, vector<288x128xbf16>, vector<128x128xf32> -> vector<128x128xf32>
    %6 = arith.addf %2, %5 : vector<128x128xf32>
    %c0_8 = arith.constant 0 : index
    %c0_9 = arith.constant 0 : index
    %7 = vector.load %arg5[%c0_8, %c0_9] : memref<1x128xf32, #tpu.memory_space<vmem>>, vector<1x128xf32>
    %8 = vector.broadcast %7 : vector<1x128xf32> to vector<128x128xf32>
    %9 = arith.addf %6, %8 : vector<128x128xf32>
    %cst_10 = arith.constant 0.000000e+00 : f32
    %10 = vector.broadcast %cst_10 : f32 to vector<128x128xf32>
    %11 = arith.cmpf oge, %9, %10 : vector<128x128xf32>
    %c0_11 = arith.constant 0 : index
    %c0_12 = arith.constant 0 : index
    %12 = vector.load %arg6[%c0_11, %c0_12] : memref<1x128xf32, #tpu.memory_space<vmem>>, vector<1x128xf32>
    %13 = vector.broadcast %12 : vector<1x128xf32> to vector<128x128xf32>
    %14 = arith.mulf %13, %9 : vector<128x128xf32>
    %15 = arith.select %11, %9, %14 : vector<128x128xi1>, vector<128x128xf32>
    %16 = arith.truncf %15 : vector<128x128xf32> to vector<128x128xbf16>
    %c0_13 = arith.constant 0 : index
    %c0_14 = arith.constant 0 : index
    %17 = vector.load %arg7[%c0_13, %c0_14] : memref<128x128xbf16, #tpu.memory_space<vmem>>, vector<128x128xbf16>
    tpu.vector_store %arg7[%c0_13, %c0_14], %16 {strides = array<i32>} : memref<128x128xbf16, #tpu.memory_space<vmem>>, vector<128x128xbf16>,
    return
  }
  func.func @transform_0(%arg0: i32) -> (i32, i32) {
    %c0_i32 = arith.constant 0 : i32
    %c0_i32_0 = arith.constant 0 : i32
    return %arg0, %c0_i32 : i32, i32
  }
  func.func @transform_1(%arg0: i32) -> (i32, i32) {
    %c0_i32 = arith.constant 0 : i32
    %c0_i32_0 = arith.constant 0 : i32
    %c0_i32_1 = arith.constant 0 : i32
    return %c0_i32, %c0_i32_0 : i32, i32
  }
  func.func @transform_2(%arg0: i32) -> (i32, i32) {
    %c0_i32 = arith.constant 0 : i32
    %c0_i32_0 = arith.constant 0 : i32
    return %arg0, %c0_i32 : i32, i32
  }
  func.func @transform_3(%arg0: i32) -> (i32, i32) {
    %c0_i32 = arith.constant 0 : i32
    %c0_i32_0 = arith.constant 0 : i32
    %c0_i32_1 = arith.constant 0 : i32
    return %c0_i32, %c0_i32_0 : i32, i32
  }
  func.func @transform_4(%arg0: i32) -> (i32, i32) {
    %c0_i32 = arith.constant 0 : i32
    %c0_i32_0 = arith.constant 0 : i32
    %c0_i32_1 = arith.constant 0 : i32
    return %c0_i32, %c0_i32_0 : i32, i32
  }
  func.func @transform_5(%arg0: i32) -> (i32, i32) {
    %c0_i32 = arith.constant 0 : i32
    %c0_i32_0 = arith.constant 0 : i32
    %c0_i32_1 = arith.constant 0 : i32
    return %c0_i32, %c0_i32_0 : i32, i32
  }
  func.func @transform_6(%arg0: i32) -> (i32, i32) {
    %c0_i32 = arith.constant 0 : i32
    %c0_i32_0 = arith.constant 0 : i32
    return %arg0, %c0_i32 : i32, i32
  }
}

module attributes {stable_mosaic.version = 11 : i64} {
  func.func @_mm_bias_prelu_kernel(%arg0: i32, %arg1: i32, %arg2: memref<128x576xbf16, #tpu.memory_space<vmem>>, %arg3: memref<576x128xbf16, #tpu.memory_space<vmem>>, %arg4: memref<1x128xf32, #tpu.memory_space<vmem>>, %arg5: memref<1x128xf32, #tpu.memory_space<vmem>>, %arg6: memref<128x128xbf16, #tpu.memory_space<vmem>>, %arg7: memref<128x128xf32, #tpu.memory_space<vmem>>) attributes {dimension_semantics = [#tpu.dimension_semantics<parallel>, #tpu.dimension_semantics<arbitrary>], iteration_bounds = array<i64: 1, 1>, scalar_prefetch = 0 : i64, scratch_operands = 1 : i64, tpu.core_type = #tpu.core_type<tc>, window_params = [{transform_indices = @transform_0, window_bounds = array<i64: 128, 576>}, {transform_indices = @transform_1, window_bounds = array<i64: 576, 128>}, {pipeline_mode = #tpu.pipeline_mode<synchronous>, transform_indices = @transform_2, window_bounds = array<i64: 1, 128>}, {pipeline_mode = #tpu.pipeline_mode<synchronous>, transform_indices = @transform_3, window_bounds = array<i64: 1, 128>}, {transform_indices = @transform_4, window_bounds = array<i64: 128, 128>}]} {
    %c0_i32 = arith.constant 0 : i32
    %0 = arith.cmpi eq, %arg1, %c0_i32 : i32
    %1 = arith.extui %0 : i1 to i32
    %c0_i32_0 = arith.constant 0 : i32
    %2 = arith.cmpi ne, %1, %c0_i32_0 : i32
    scf.if %2 {
      %cst_10 = arith.constant 0.000000e+00 : f32
      %12 = vector.broadcast %cst_10 : f32 to vector<128x128xf32>
      %c0_11 = arith.constant 0 : index
      %c0_12 = arith.constant 0 : index
      %13 = vector.load %arg7[%c0_11, %c0_12] : memref<128x128xf32, #tpu.memory_space<vmem>>, vector<128x128xf32>
      tpu.vector_store %arg7[%c0_11, %c0_12], %12 {strides = array<i32>} : memref<128x128xf32, #tpu.memory_space<vmem>>, vector<128x128xf32>,
    } else {
    }
    %c0 = arith.constant 0 : index
    %c0_1 = arith.constant 0 : index
    %3 = vector.load %arg7[%c0, %c0_1] : memref<128x128xf32, #tpu.memory_space<vmem>>, vector<128x128xf32>
    %c0_2 = arith.constant 0 : index
    %c0_3 = arith.constant 0 : index
    %4 = vector.load %arg2[%c0_2, %c0_3] : memref<128x576xbf16, #tpu.memory_space<vmem>>, vector<128x576xbf16>
    %c0_4 = arith.constant 0 : index
    %c0_5 = arith.constant 0 : index
    %5 = vector.load %arg3[%c0_4, %c0_5] : memref<576x128xbf16, #tpu.memory_space<vmem>>, vector<576x128xbf16>
    %cst = arith.constant dense<0.000000e+00> : vector<128x128xf32>
    %6 = tpu.matmul %4, %5, %cst {dimension_numbers = #tpu.dot_dimension_numbers<[1], [0], [0], [1], [0, 0, 1, 1], [], []>} : vector<128x576xbf16>, vector<576x128xbf16>, vector<128x128xf32> -> vector<128x128xf32>
    %7 = arith.addf %3, %6 : vector<128x128xf32>
    %c0_6 = arith.constant 0 : index
    %c0_7 = arith.constant 0 : index
    %8 = vector.load %arg7[%c0_6, %c0_7] : memref<128x128xf32, #tpu.memory_space<vmem>>, vector<128x128xf32>
    tpu.vector_store %arg7[%c0_6, %c0_7], %7 {strides = array<i32>} : memref<128x128xf32, #tpu.memory_space<vmem>>, vector<128x128xf32>,
    %c0_i32_8 = arith.constant 0 : i32
    %9 = arith.cmpi eq, %arg1, %c0_i32_8 : i32
    %10 = arith.extui %9 : i1 to i32
    %c0_i32_9 = arith.constant 0 : i32
    %11 = arith.cmpi ne, %10, %c0_i32_9 : i32
    scf.if %11 {
      %c0_10 = arith.constant 0 : index
      %c0_11 = arith.constant 0 : index
      %12 = vector.load %arg7[%c0_10, %c0_11] : memref<128x128xf32, #tpu.memory_space<vmem>>, vector<128x128xf32>
      %c0_12 = arith.constant 0 : index
      %c0_13 = arith.constant 0 : index
      %13 = vector.load %arg4[%c0_12, %c0_13] : memref<1x128xf32, #tpu.memory_space<vmem>>, vector<1x128xf32>
      %14 = vector.broadcast %13 : vector<1x128xf32> to vector<128x128xf32>
      %15 = arith.addf %12, %14 : vector<128x128xf32>
      %cst_14 = arith.constant 0.000000e+00 : f32
      %16 = vector.broadcast %cst_14 : f32 to vector<128x128xf32>
      %17 = arith.cmpf oge, %15, %16 : vector<128x128xf32>
      %c0_15 = arith.constant 0 : index
      %c0_16 = arith.constant 0 : index
      %18 = vector.load %arg5[%c0_15, %c0_16] : memref<1x128xf32, #tpu.memory_space<vmem>>, vector<1x128xf32>
      %19 = vector.broadcast %18 : vector<1x128xf32> to vector<128x128xf32>
      %20 = arith.mulf %19, %15 : vector<128x128xf32>
      %21 = arith.select %17, %15, %20 : vector<128x128xi1>, vector<128x128xf32>
      %22 = arith.truncf %21 : vector<128x128xf32> to vector<128x128xbf16>
      %c0_17 = arith.constant 0 : index
      %c0_18 = arith.constant 0 : index
      %23 = vector.load %arg6[%c0_17, %c0_18] : memref<128x128xbf16, #tpu.memory_space<vmem>>, vector<128x128xbf16>
      tpu.vector_store %arg6[%c0_17, %c0_18], %22 {strides = array<i32>} : memref<128x128xbf16, #tpu.memory_space<vmem>>, vector<128x128xbf16>,
    } else {
    }
    return
  }
  func.func @transform_0(%arg0: i32, %arg1: i32) -> (i32, i32) {
    %c0_i32 = arith.constant 0 : i32
    return %arg0, %arg1 : i32, i32
  }
  func.func @transform_1(%arg0: i32, %arg1: i32) -> (i32, i32) {
    %c0_i32 = arith.constant 0 : i32
    %c0_i32_0 = arith.constant 0 : i32
    return %arg1, %c0_i32 : i32, i32
  }
  func.func @transform_2(%arg0: i32, %arg1: i32) -> (i32, i32) {
    %c0_i32 = arith.constant 0 : i32
    %c0_i32_0 = arith.constant 0 : i32
    %c0_i32_1 = arith.constant 0 : i32
    return %c0_i32, %c0_i32_0 : i32, i32
  }
  func.func @transform_3(%arg0: i32, %arg1: i32) -> (i32, i32) {
    %c0_i32 = arith.constant 0 : i32
    %c0_i32_0 = arith.constant 0 : i32
    %c0_i32_1 = arith.constant 0 : i32
    return %c0_i32, %c0_i32_0 : i32, i32
  }
  func.func @transform_4(%arg0: i32, %arg1: i32) -> (i32, i32) {
    %c0_i32 = arith.constant 0 : i32
    %c0_i32_0 = arith.constant 0 : i32
    return %arg0, %c0_i32 : i32, i32
  }
}

module attributes {stable_mosaic.version = 11 : i64} {
  func.func @_mm_bias_prelu_kernel(%arg0: i32, %arg1: i32, %arg2: memref<128x256xbf16, #tpu.memory_space<vmem>>, %arg3: memref<256x256xbf16, #tpu.memory_space<vmem>>, %arg4: memref<1x256xf32, #tpu.memory_space<vmem>>, %arg5: memref<1x256xf32, #tpu.memory_space<vmem>>, %arg6: memref<128x256xbf16, #tpu.memory_space<vmem>>, %arg7: memref<128x256xf32, #tpu.memory_space<vmem>>) attributes {dimension_semantics = [#tpu.dimension_semantics<parallel>, #tpu.dimension_semantics<arbitrary>], iteration_bounds = array<i64: 1, 1>, scalar_prefetch = 0 : i64, scratch_operands = 1 : i64, tpu.core_type = #tpu.core_type<tc>, window_params = [{transform_indices = @transform_0, window_bounds = array<i64: 128, 256>}, {transform_indices = @transform_1, window_bounds = array<i64: 256, 256>}, {pipeline_mode = #tpu.pipeline_mode<synchronous>, transform_indices = @transform_2, window_bounds = array<i64: 1, 256>}, {pipeline_mode = #tpu.pipeline_mode<synchronous>, transform_indices = @transform_3, window_bounds = array<i64: 1, 256>}, {transform_indices = @transform_4, window_bounds = array<i64: 128, 256>}]} {
    %c0_i32 = arith.constant 0 : i32
    %0 = arith.cmpi eq, %arg1, %c0_i32 : i32
    %1 = arith.extui %0 : i1 to i32
    %c0_i32_0 = arith.constant 0 : i32
    %2 = arith.cmpi ne, %1, %c0_i32_0 : i32
    scf.if %2 {
      %cst_10 = arith.constant 0.000000e+00 : f32
      %12 = vector.broadcast %cst_10 : f32 to vector<128x256xf32>
      %c0_11 = arith.constant 0 : index
      %c0_12 = arith.constant 0 : index
      %13 = vector.load %arg7[%c0_11, %c0_12] : memref<128x256xf32, #tpu.memory_space<vmem>>, vector<128x256xf32>
      tpu.vector_store %arg7[%c0_11, %c0_12], %12 {strides = array<i32>} : memref<128x256xf32, #tpu.memory_space<vmem>>, vector<128x256xf32>,
    } else {
    }
    %c0 = arith.constant 0 : index
    %c0_1 = arith.constant 0 : index
    %3 = vector.load %arg7[%c0, %c0_1] : memref<128x256xf32, #tpu.memory_space<vmem>>, vector<128x256xf32>
    %c0_2 = arith.constant 0 : index
    %c0_3 = arith.constant 0 : index
    %4 = vector.load %arg2[%c0_2, %c0_3] : memref<128x256xbf16, #tpu.memory_space<vmem>>, vector<128x256xbf16>
    %c0_4 = arith.constant 0 : index
    %c0_5 = arith.constant 0 : index
    %5 = vector.load %arg3[%c0_4, %c0_5] : memref<256x256xbf16, #tpu.memory_space<vmem>>, vector<256x256xbf16>
    %cst = arith.constant dense<0.000000e+00> : vector<128x256xf32>
    %6 = tpu.matmul %4, %5, %cst {dimension_numbers = #tpu.dot_dimension_numbers<[1], [0], [0], [1], [0, 0, 1, 1], [], []>} : vector<128x256xbf16>, vector<256x256xbf16>, vector<128x256xf32> -> vector<128x256xf32>
    %7 = arith.addf %3, %6 : vector<128x256xf32>
    %c0_6 = arith.constant 0 : index
    %c0_7 = arith.constant 0 : index
    %8 = vector.load %arg7[%c0_6, %c0_7] : memref<128x256xf32, #tpu.memory_space<vmem>>, vector<128x256xf32>
    tpu.vector_store %arg7[%c0_6, %c0_7], %7 {strides = array<i32>} : memref<128x256xf32, #tpu.memory_space<vmem>>, vector<128x256xf32>,
    %c0_i32_8 = arith.constant 0 : i32
    %9 = arith.cmpi eq, %arg1, %c0_i32_8 : i32
    %10 = arith.extui %9 : i1 to i32
    %c0_i32_9 = arith.constant 0 : i32
    %11 = arith.cmpi ne, %10, %c0_i32_9 : i32
    scf.if %11 {
      %c0_10 = arith.constant 0 : index
      %c0_11 = arith.constant 0 : index
      %12 = vector.load %arg7[%c0_10, %c0_11] : memref<128x256xf32, #tpu.memory_space<vmem>>, vector<128x256xf32>
      %c0_12 = arith.constant 0 : index
      %c0_13 = arith.constant 0 : index
      %13 = vector.load %arg4[%c0_12, %c0_13] : memref<1x256xf32, #tpu.memory_space<vmem>>, vector<1x256xf32>
      %14 = vector.broadcast %13 : vector<1x256xf32> to vector<128x256xf32>
      %15 = arith.addf %12, %14 : vector<128x256xf32>
      %cst_14 = arith.constant 0.000000e+00 : f32
      %16 = vector.broadcast %cst_14 : f32 to vector<128x256xf32>
      %17 = arith.cmpf oge, %15, %16 : vector<128x256xf32>
      %c0_15 = arith.constant 0 : index
      %c0_16 = arith.constant 0 : index
      %18 = vector.load %arg5[%c0_15, %c0_16] : memref<1x256xf32, #tpu.memory_space<vmem>>, vector<1x256xf32>
      %19 = vector.broadcast %18 : vector<1x256xf32> to vector<128x256xf32>
      %20 = arith.mulf %19, %15 : vector<128x256xf32>
      %21 = arith.select %17, %15, %20 : vector<128x256xi1>, vector<128x256xf32>
      %22 = arith.truncf %21 : vector<128x256xf32> to vector<128x256xbf16>
      %c0_17 = arith.constant 0 : index
      %c0_18 = arith.constant 0 : index
      %23 = vector.load %arg6[%c0_17, %c0_18] : memref<128x256xbf16, #tpu.memory_space<vmem>>, vector<128x256xbf16>
      tpu.vector_store %arg6[%c0_17, %c0_18], %22 {strides = array<i32>} : memref<128x256xbf16, #tpu.memory_space<vmem>>, vector<128x256xbf16>,
    } else {
    }
    return
  }
  func.func @transform_0(%arg0: i32, %arg1: i32) -> (i32, i32) {
    %c0_i32 = arith.constant 0 : i32
    return %arg0, %arg1 : i32, i32
  }
  func.func @transform_1(%arg0: i32, %arg1: i32) -> (i32, i32) {
    %c0_i32 = arith.constant 0 : i32
    %c0_i32_0 = arith.constant 0 : i32
    return %arg1, %c0_i32 : i32, i32
  }
  func.func @transform_2(%arg0: i32, %arg1: i32) -> (i32, i32) {
    %c0_i32 = arith.constant 0 : i32
    %c0_i32_0 = arith.constant 0 : i32
    %c0_i32_1 = arith.constant 0 : i32
    return %c0_i32, %c0_i32_0 : i32, i32
  }
  func.func @transform_3(%arg0: i32, %arg1: i32) -> (i32, i32) {
    %c0_i32 = arith.constant 0 : i32
    %c0_i32_0 = arith.constant 0 : i32
    %c0_i32_1 = arith.constant 0 : i32
    return %c0_i32, %c0_i32_0 : i32, i32
  }
  func.func @transform_4(%arg0: i32, %arg1: i32) -> (i32, i32) {
    %c0_i32 = arith.constant 0 : i32
    %c0_i32_0 = arith.constant 0 : i32
    return %arg0, %c0_i32 : i32, i32
  }
}

module attributes {stable_mosaic.version = 11 : i64} {
  func.func @_mm2_bias_prelu_kernel(%arg0: i32, %arg1: memref<256x576xbf16, #tpu.memory_space<vmem>>, %arg2: memref<576x128xbf16, #tpu.memory_space<vmem>>, %arg3: memref<256x40xbf16, #tpu.memory_space<vmem>>, %arg4: memref<40x128xbf16, #tpu.memory_space<vmem>>, %arg5: memref<1x128xf32, #tpu.memory_space<vmem>>, %arg6: memref<1x128xf32, #tpu.memory_space<vmem>>, %arg7: memref<256x128xbf16, #tpu.memory_space<vmem>>) attributes {dimension_semantics = [#tpu.dimension_semantics<parallel>], iteration_bounds = array<i64: 2>, scalar_prefetch = 0 : i64, scratch_operands = 0 : i64, tpu.core_type = #tpu.core_type<tc>, window_params = [{transform_indices = @transform_0, window_bounds = array<i64: 256, 576>}, {pipeline_mode = #tpu.pipeline_mode<synchronous>, transform_indices = @transform_1, window_bounds = array<i64: 576, 128>}, {transform_indices = @transform_2, window_bounds = array<i64: 256, 40>}, {pipeline_mode = #tpu.pipeline_mode<synchronous>, transform_indices = @transform_3, window_bounds = array<i64: 40, 128>}, {pipeline_mode = #tpu.pipeline_mode<synchronous>, transform_indices = @transform_4, window_bounds = array<i64: 1, 128>}, {pipeline_mode = #tpu.pipeline_mode<synchronous>, transform_indices = @transform_5, window_bounds = array<i64: 1, 128>}, {transform_indices = @transform_6, window_bounds = array<i64: 256, 128>}]} {
    %c0 = arith.constant 0 : index
    %c0_0 = arith.constant 0 : index
    %0 = vector.load %arg1[%c0, %c0_0] : memref<256x576xbf16, #tpu.memory_space<vmem>>, vector<256x576xbf16>
    %c0_1 = arith.constant 0 : index
    %c0_2 = arith.constant 0 : index
    %1 = vector.load %arg2[%c0_1, %c0_2] : memref<576x128xbf16, #tpu.memory_space<vmem>>, vector<576x128xbf16>
    %cst = arith.constant dense<0.000000e+00> : vector<256x128xf32>
    %2 = tpu.matmul %0, %1, %cst {dimension_numbers = #tpu.dot_dimension_numbers<[1], [0], [0], [1], [0, 0, 1, 1], [], []>} : vector<256x576xbf16>, vector<576x128xbf16>, vector<256x128xf32> -> vector<256x128xf32>
    %c0_3 = arith.constant 0 : index
    %c0_4 = arith.constant 0 : index
    %3 = vector.load %arg3[%c0_3, %c0_4] : memref<256x40xbf16, #tpu.memory_space<vmem>>, vector<256x40xbf16>
    %c0_5 = arith.constant 0 : index
    %c0_6 = arith.constant 0 : index
    %4 = vector.load %arg4[%c0_5, %c0_6] : memref<40x128xbf16, #tpu.memory_space<vmem>>, vector<40x128xbf16>
    %cst_7 = arith.constant dense<0.000000e+00> : vector<256x128xf32>
    %5 = tpu.matmul %3, %4, %cst_7 {dimension_numbers = #tpu.dot_dimension_numbers<[1], [0], [0], [1], [0, 0, 1, 1], [], []>} : vector<256x40xbf16>, vector<40x128xbf16>, vector<256x128xf32> -> vector<256x128xf32>
    %6 = arith.addf %2, %5 : vector<256x128xf32>
    %c0_8 = arith.constant 0 : index
    %c0_9 = arith.constant 0 : index
    %7 = vector.load %arg5[%c0_8, %c0_9] : memref<1x128xf32, #tpu.memory_space<vmem>>, vector<1x128xf32>
    %8 = vector.broadcast %7 : vector<1x128xf32> to vector<256x128xf32>
    %9 = arith.addf %6, %8 : vector<256x128xf32>
    %cst_10 = arith.constant 0.000000e+00 : f32
    %10 = vector.broadcast %cst_10 : f32 to vector<256x128xf32>
    %11 = arith.cmpf oge, %9, %10 : vector<256x128xf32>
    %c0_11 = arith.constant 0 : index
    %c0_12 = arith.constant 0 : index
    %12 = vector.load %arg6[%c0_11, %c0_12] : memref<1x128xf32, #tpu.memory_space<vmem>>, vector<1x128xf32>
    %13 = vector.broadcast %12 : vector<1x128xf32> to vector<256x128xf32>
    %14 = arith.mulf %13, %9 : vector<256x128xf32>
    %15 = arith.select %11, %9, %14 : vector<256x128xi1>, vector<256x128xf32>
    %16 = arith.truncf %15 : vector<256x128xf32> to vector<256x128xbf16>
    %c0_13 = arith.constant 0 : index
    %c0_14 = arith.constant 0 : index
    %17 = vector.load %arg7[%c0_13, %c0_14] : memref<256x128xbf16, #tpu.memory_space<vmem>>, vector<256x128xbf16>
    tpu.vector_store %arg7[%c0_13, %c0_14], %16 {strides = array<i32>} : memref<256x128xbf16, #tpu.memory_space<vmem>>, vector<256x128xbf16>,
    return
  }
  func.func @transform_0(%arg0: i32) -> (i32, i32) {
    %c0_i32 = arith.constant 0 : i32
    %c0_i32_0 = arith.constant 0 : i32
    return %arg0, %c0_i32 : i32, i32
  }
  func.func @transform_1(%arg0: i32) -> (i32, i32) {
    %c0_i32 = arith.constant 0 : i32
    %c0_i32_0 = arith.constant 0 : i32
    %c0_i32_1 = arith.constant 0 : i32
    return %c0_i32, %c0_i32_0 : i32, i32
  }
  func.func @transform_2(%arg0: i32) -> (i32, i32) {
    %c0_i32 = arith.constant 0 : i32
    %c0_i32_0 = arith.constant 0 : i32
    return %arg0, %c0_i32 : i32, i32
  }
  func.func @transform_3(%arg0: i32) -> (i32, i32) {
    %c0_i32 = arith.constant 0 : i32
    %c0_i32_0 = arith.constant 0 : i32
    %c0_i32_1 = arith.constant 0 : i32
    return %c0_i32, %c0_i32_0 : i32, i32
  }
  func.func @transform_4(%arg0: i32) -> (i32, i32) {
    %c0_i32 = arith.constant 0 : i32
    %c0_i32_0 = arith.constant 0 : i32
    %c0_i32_1 = arith.constant 0 : i32
    return %c0_i32, %c0_i32_0 : i32, i32
  }
  func.func @transform_5(%arg0: i32) -> (i32, i32) {
    %c0_i32 = arith.constant 0 : i32
    %c0_i32_0 = arith.constant 0 : i32
    %c0_i32_1 = arith.constant 0 : i32
    return %c0_i32, %c0_i32_0 : i32, i32
  }
  func.func @transform_6(%arg0: i32) -> (i32, i32) {
    %c0_i32 = arith.constant 0 : i32
    %c0_i32_0 = arith.constant 0 : i32
    return %arg0, %c0_i32 : i32, i32
  }
}

module attributes {stable_mosaic.version = 11 : i64} {
  func.func @_mm_bias_prelu_kernel(%arg0: i32, %arg1: i32, %arg2: memref<256x576xbf16, #tpu.memory_space<vmem>>, %arg3: memref<576x128xbf16, #tpu.memory_space<vmem>>, %arg4: memref<1x128xf32, #tpu.memory_space<vmem>>, %arg5: memref<1x128xf32, #tpu.memory_space<vmem>>, %arg6: memref<256x128xbf16, #tpu.memory_space<vmem>>, %arg7: memref<256x128xf32, #tpu.memory_space<vmem>>) attributes {dimension_semantics = [#tpu.dimension_semantics<parallel>, #tpu.dimension_semantics<arbitrary>], iteration_bounds = array<i64: 2, 1>, scalar_prefetch = 0 : i64, scratch_operands = 1 : i64, tpu.core_type = #tpu.core_type<tc>, window_params = [{transform_indices = @transform_0, window_bounds = array<i64: 256, 576>}, {transform_indices = @transform_1, window_bounds = array<i64: 576, 128>}, {pipeline_mode = #tpu.pipeline_mode<synchronous>, transform_indices = @transform_2, window_bounds = array<i64: 1, 128>}, {pipeline_mode = #tpu.pipeline_mode<synchronous>, transform_indices = @transform_3, window_bounds = array<i64: 1, 128>}, {transform_indices = @transform_4, window_bounds = array<i64: 256, 128>}]} {
    %c0_i32 = arith.constant 0 : i32
    %0 = arith.cmpi eq, %arg1, %c0_i32 : i32
    %1 = arith.extui %0 : i1 to i32
    %c0_i32_0 = arith.constant 0 : i32
    %2 = arith.cmpi ne, %1, %c0_i32_0 : i32
    scf.if %2 {
      %cst_10 = arith.constant 0.000000e+00 : f32
      %12 = vector.broadcast %cst_10 : f32 to vector<256x128xf32>
      %c0_11 = arith.constant 0 : index
      %c0_12 = arith.constant 0 : index
      %13 = vector.load %arg7[%c0_11, %c0_12] : memref<256x128xf32, #tpu.memory_space<vmem>>, vector<256x128xf32>
      tpu.vector_store %arg7[%c0_11, %c0_12], %12 {strides = array<i32>} : memref<256x128xf32, #tpu.memory_space<vmem>>, vector<256x128xf32>,
    } else {
    }
    %c0 = arith.constant 0 : index
    %c0_1 = arith.constant 0 : index
    %3 = vector.load %arg7[%c0, %c0_1] : memref<256x128xf32, #tpu.memory_space<vmem>>, vector<256x128xf32>
    %c0_2 = arith.constant 0 : index
    %c0_3 = arith.constant 0 : index
    %4 = vector.load %arg2[%c0_2, %c0_3] : memref<256x576xbf16, #tpu.memory_space<vmem>>, vector<256x576xbf16>
    %c0_4 = arith.constant 0 : index
    %c0_5 = arith.constant 0 : index
    %5 = vector.load %arg3[%c0_4, %c0_5] : memref<576x128xbf16, #tpu.memory_space<vmem>>, vector<576x128xbf16>
    %cst = arith.constant dense<0.000000e+00> : vector<256x128xf32>
    %6 = tpu.matmul %4, %5, %cst {dimension_numbers = #tpu.dot_dimension_numbers<[1], [0], [0], [1], [0, 0, 1, 1], [], []>} : vector<256x576xbf16>, vector<576x128xbf16>, vector<256x128xf32> -> vector<256x128xf32>
    %7 = arith.addf %3, %6 : vector<256x128xf32>
    %c0_6 = arith.constant 0 : index
    %c0_7 = arith.constant 0 : index
    %8 = vector.load %arg7[%c0_6, %c0_7] : memref<256x128xf32, #tpu.memory_space<vmem>>, vector<256x128xf32>
    tpu.vector_store %arg7[%c0_6, %c0_7], %7 {strides = array<i32>} : memref<256x128xf32, #tpu.memory_space<vmem>>, vector<256x128xf32>,
    %c0_i32_8 = arith.constant 0 : i32
    %9 = arith.cmpi eq, %arg1, %c0_i32_8 : i32
    %10 = arith.extui %9 : i1 to i32
    %c0_i32_9 = arith.constant 0 : i32
    %11 = arith.cmpi ne, %10, %c0_i32_9 : i32
    scf.if %11 {
      %c0_10 = arith.constant 0 : index
      %c0_11 = arith.constant 0 : index
      %12 = vector.load %arg7[%c0_10, %c0_11] : memref<256x128xf32, #tpu.memory_space<vmem>>, vector<256x128xf32>
      %c0_12 = arith.constant 0 : index
      %c0_13 = arith.constant 0 : index
      %13 = vector.load %arg4[%c0_12, %c0_13] : memref<1x128xf32, #tpu.memory_space<vmem>>, vector<1x128xf32>
      %14 = vector.broadcast %13 : vector<1x128xf32> to vector<256x128xf32>
      %15 = arith.addf %12, %14 : vector<256x128xf32>
      %cst_14 = arith.constant 0.000000e+00 : f32
      %16 = vector.broadcast %cst_14 : f32 to vector<256x128xf32>
      %17 = arith.cmpf oge, %15, %16 : vector<256x128xf32>
      %c0_15 = arith.constant 0 : index
      %c0_16 = arith.constant 0 : index
      %18 = vector.load %arg5[%c0_15, %c0_16] : memref<1x128xf32, #tpu.memory_space<vmem>>, vector<1x128xf32>
      %19 = vector.broadcast %18 : vector<1x128xf32> to vector<256x128xf32>
      %20 = arith.mulf %19, %15 : vector<256x128xf32>
      %21 = arith.select %17, %15, %20 : vector<256x128xi1>, vector<256x128xf32>
      %22 = arith.truncf %21 : vector<256x128xf32> to vector<256x128xbf16>
      %c0_17 = arith.constant 0 : index
      %c0_18 = arith.constant 0 : index
      %23 = vector.load %arg6[%c0_17, %c0_18] : memref<256x128xbf16, #tpu.memory_space<vmem>>, vector<256x128xbf16>
      tpu.vector_store %arg6[%c0_17, %c0_18], %22 {strides = array<i32>} : memref<256x128xbf16, #tpu.memory_space<vmem>>, vector<256x128xbf16>,
    } else {
    }
    return
  }
  func.func @transform_0(%arg0: i32, %arg1: i32) -> (i32, i32) {
    %c0_i32 = arith.constant 0 : i32
    return %arg0, %arg1 : i32, i32
  }
  func.func @transform_1(%arg0: i32, %arg1: i32) -> (i32, i32) {
    %c0_i32 = arith.constant 0 : i32
    %c0_i32_0 = arith.constant 0 : i32
    return %arg1, %c0_i32 : i32, i32
  }
  func.func @transform_2(%arg0: i32, %arg1: i32) -> (i32, i32) {
    %c0_i32 = arith.constant 0 : i32
    %c0_i32_0 = arith.constant 0 : i32
    %c0_i32_1 = arith.constant 0 : i32
    return %c0_i32, %c0_i32_0 : i32, i32
  }
  func.func @transform_3(%arg0: i32, %arg1: i32) -> (i32, i32) {
    %c0_i32 = arith.constant 0 : i32
    %c0_i32_0 = arith.constant 0 : i32
    %c0_i32_1 = arith.constant 0 : i32
    return %c0_i32, %c0_i32_0 : i32, i32
  }
  func.func @transform_4(%arg0: i32, %arg1: i32) -> (i32, i32) {
    %c0_i32 = arith.constant 0 : i32
    %c0_i32_0 = arith.constant 0 : i32
    return %arg0, %c0_i32 : i32, i32
  }
}

</mosaic_0001>

<bundles_post_ra>
// kernel: gen_forward.30
= control target key start
LH: loop header
LB: loop body
LE: loop exit
PB: predicated region body
PF: predicated region fallthrough
CT: control target
= control target key end

     0   :  { %s1510_s15 = smov 0   ;;  %s1512_s16 = smov 0   ;;  %s1689_s0 = inlined_call_operand.vmem [shape: bf16[512,40], index: 0, kind: input, shape index: {}]   ;;  %s1690_s1 = inlined_call_operand.vmem [shape: bf16[40,128], index: 1, kind: input, shape index: {}]   ;;  %s1691_s2 = inlined_call_operand.vmem [shape: f32[1,128], index: 2, kind: input, shape index: {}]   ;;  %s1692_s3 = inlined_call_operand.vmem [shape: f32[1,128], index: 3, kind: input, shape index: {}]   ;;  %s1693_s4 = inlined_call_operand.vmem [shape: bf16[512,128], index: 4, kind: output, shape index: {}]  }
   0x1   :  { %s1514_s17 = smov 0  }
   0x2 LB: > { %s26_s18 = sadd.s32 1, %s1479_s16  ;;  %p1150_p0 = scmp.ge.s32.totalorder %s1483_s17, 1  ;;  %s1483_s17 = sphi %s1514_s17, %s14_s17   ;;  %s1479_s16 = sphi %s1512_s16, %s1695_s16   ;;  %s1475_s15 = sphi %s1510_s15, %s1694_s15  }
   0x3   : > { %p28_p1 = scmp.ge.s32.totalorder %s26_s18, 2  ;;  %p191_p2 = scmp.lt.s32.totalorder %s1483_s17, 3 }
   0x5   : > { %s1697_s18 = smov (%p28_p1, %s26_s18), 0  ;;  %p192_p3 = pnand %p1150_p0, %p191_p2 }
   0x6   : > { %s1151_s23 = sshll.u32 (!%p192_p3), %s1475_s15, 5 }
   0x7   : > { %195 = sbr.rel (%p192_p3) target bundleno = 260 (0x104), region = 36  ;;  %p226_p4 = scmp.lt.s32.totalorder (!%p192_p3), %s1151_s23, 63 }
   0xc   : > { %v1442_v0 = vld [vmem:[%s1690_s1 + $0x10] ss:$0 sps:$4 sm:$0xff]   ;;  %vm496_vm0 = vcmask 1043456   ;;  %v1443_v1 = vld [vmem:[%s1690_s1 + $0x8] sm:$0xff]   ;;  %v1444_v3 = vld [vmem:[%s1690_s1] sm:$0xff]   ;;  %s1699_s23 = smov (!%p226_p4, %s1151_s23), 63 }
   0xd   : > { %1416 = vmatprep.subr.msk.bf16.mxu0 %vm496_vm0, %v1442_v0  ;;  %1417 = vmatprep.subr.msk.bf16.mxu1 %vm496_vm0, %v1442_v0  ;;  %v498_v2 = vsel %vm496_vm0, %v1442_v0, 0  ;;  %s1152_s26 = sshll.u32 %s1699_s23, 2  ;;  %vm447_vm1 = vcmask 326656   ;;  %v1582_v20 = vld [vmem:[%s1691_s2] ss:$0 sm:$0xff] }
   0xe   : > { %1373 = vmatpush3.bf16.msra.mxu0 %v498_v2  ;;  %1413 = vmatpush3.bf16.msra.mxu1 %v498_v2  ;;  %s1545_s29 = scalar_lea.vmem %s1689_s0, %s1152_s26  ;;  %v1587_v22 = vld [vmem:[%s1692_s3] ss:$0 sm:$0xff]  ;;  %s1608_s10 = scalar_lea.vmem %s1693_s4, %s1152_s26 }
   0xf   : > { %1374 = vmatprep.subr.bf16.mxu0 %v1443_v1  ;;  %1411 = vmatprep.subr.bf16.mxu1 %v1443_v1  ;;  %v1445_v4 = vld [vmem:[%s1545_s29] sm:$0xff]   ;;  %v1447_v6 = vld [vmem:[%s1545_s29 + $0x8] sm:$0xff]   ;;  %v1449_v8 = vld [vmem:[%s1545_s29 + $0x10] sm:$0xff]  }
  0x10   : > { %v1446_v5 = vld [vmem:[%s1545_s29 + $0x40] sm:$0xff]   ;;  %1378 = vmatprep.mubr.msk.bf16.mxu0 %vm447_vm1, %v1445_v4  ;;  %v1448_v7 = vld [vmem:[%s1545_s29 + $0x48] sm:$0xff]   ;;  %v1450_v9 = vld [vmem:[%s1545_s29 + $0x50] sm:$0xff]  }
  0x11   : > { %1394 = vmatprep.mubr.msk.bf16.mxu1 %vm447_vm1, %v1446_v5  ;;  %v1451_v10 = vld [vmem:[%s1545_s29 + $0x18] sm:$0xff]   ;;  %v1453_v12 = vld [vmem:[%s1545_s29 + $0x20] sm:$0xff]   ;;  %v1455_v14 = vld [vmem:[%s1545_s29 + $0x28] sm:$0xff]  }
  0x12   : > { %1375 = vmatpush3.bf16.msra.mxu0 %v1443_v1  ;;  %1414 = vmatpush3.bf16.msra.mxu1 %v1443_v1  ;;  %v1452_v11 = vld [vmem:[%s1545_s29 + $0x58] sm:$0xff]   ;;  %v1454_v13 = vld [vmem:[%s1545_s29 + $0x60] sm:$0xff]   ;;  %v1456_v15 = vld [vmem:[%s1545_s29 + $0x68] sm:$0xff]  }
  0x13   : > { %1376 = vmatprep.subr.bf16.mxu0 %v1444_v3  ;;  %1412 = vmatprep.subr.bf16.mxu1 %v1444_v3  ;;  %v1457_v16 = vld [vmem:[%s1545_s29 + $0x30] sm:$0xff]   ;;  %v1459_v18 = vld [vmem:[%s1545_s29 + $0x38] sm:$0xff]  }
  0x14   : > { %v1458_v17 = vld [vmem:[%s1545_s29 + $0x70] sm:$0xff]   ;;  %v1460_v19 = vld [vmem:[%s1545_s29 + $0x78] sm:$0xff]  }
  0x16   : > { %1377 = vmatpush3.bf16.msra.mxu0 %v1444_v3  ;;  %1415 = vmatpush3.bf16.msra.mxu1 %v1444_v3 }
  0x19   : > { %1379 = vmatmul.mubr.msk.bf16.vlgmr.msra.gmra.mxu0 %vm447_vm1, %v1447_v6  ;;  %1395 = vmatmul.mubr.msk.bf16.vlgmr.msra.gmra.mxu1 %vm447_vm1, %v1448_v7 }
  0x1a   : > { %1382 = vmatprep.mubr.msk.bf16.mxu0 %vm447_vm1, %v1449_v8  ;;  %1398 = vmatprep.mubr.msk.bf16.mxu1 %vm447_vm1, %v1450_v9 }
  0x21   : > { %1383 = vmatmul.mubr.msk.bf16.gmra.mxu0 %vm447_vm1, %v1451_v10  ;;  %1399 = vmatmul.mubr.msk.bf16.gmra.mxu1 %vm447_vm1, %v1452_v11 }
  0x22   : > { %1386 = vmatprep.mubr.msk.bf16.mxu0 %vm447_vm1, %v1453_v12  ;;  %1402 = vmatprep.mubr.msk.bf16.mxu1 %vm447_vm1, %v1454_v13 }
  0x29   : > { %1387 = vmatmul.mubr.msk.bf16.gmra.mxu0 %vm447_vm1, %v1455_v14  ;;  %1403 = vmatmul.mubr.msk.bf16.gmra.mxu1 %vm447_vm1, %v1456_v15 }
  0x2a   : > { %1390 = vmatprep.mubr.msk.bf16.mxu0 %vm447_vm1, %v1457_v16  ;;  %1406 = vmatprep.mubr.msk.bf16.mxu1 %vm447_vm1, %v1458_v17 }
  0x31   : > { %1391 = vmatmul.mubr.msk.bf16.gmra.mxu0 %vm447_vm1, %v1459_v18  ;;  %1407 = vmatmul.mubr.msk.bf16.gmra.mxu1 %vm447_vm1, %v1460_v19 }
  0xd9   : > { %v1380_v21 = vpop.f32.mrf.mxu0  ;;  %v1396_v23 = vpop.f32.mrf.mxu1 }
  0xda   : > { %v769_v24 = vadd.f32 %v1380_v21, %v1582_v20  ;;  %v785_v25 = vadd.f32 %v1396_v23, %v1582_v20 }
  0xdb   : > { %v534_v26 = vpop.f32.mrf.mxu0  ;;  %v598_v27 = vpop.f32.mrf.mxu1 }
  0xdc   : > { %vm801_vm2 = vcmp.ge.f32.partialorder %v769_v24, 0.0  ;;  %v840_v28 = vmul.f32 %v1587_v22, %v769_v24  ;;  %vm817_vm3 = vcmp.ge.f32.partialorder %v785_v25, 0.0  ;;  %v856_v29 = vmul.f32 %v1587_v22, %v785_v25 }
  0xdd   : > { %v767_v30 = vadd.f32 %v1582_v20, %v534_v26  ;;  %v783_v31 = vadd.f32 %v1582_v20, %v598_v27  ;;  %v1381_v32 = vpop.f32.mrf.mxu0  ;;  %v1397_v33 = vpop.f32.mrf.mxu1 }
  0xde   : > { %v872_v34 = vsel %vm801_vm2, %v769_v24, %v840_v28  ;;  %v770_v35 = vadd.f32 %v1381_v32, %v1582_v20  ;;  %v786_v36 = vadd.f32 %v1397_v33, %v1582_v20  ;;  %v888_v37 = vsel %vm817_vm3, %v785_v25, %v856_v29 }
  0xdf   : > { %vm799_vm4 = vcmp.ge.f32.partialorder %v767_v30, 0.0  ;;  %v838_v38 = vmul.f32 %v1587_v22, %v767_v30  ;;  %vm815_vm5 = vcmp.ge.f32.partialorder %v783_v31, 0.0  ;;  %v537_v39 = vpop.f32.mrf.mxu0  ;;  %v601_v40 = vpop.f32.mrf.mxu1  ;;  %v854_v44 = vmul.f32 %v1587_v22, %v783_v31 }
  0xe0   : > { %vm802_vm6 = vcmp.ge.f32.partialorder %v770_v35, 0.0  ;;  %v841_v41 = vmul.f32 %v1587_v22, %v770_v35  ;;  %vm818_vm7 = vcmp.ge.f32.partialorder %v786_v36, 0.0  ;;  %v857_v42 = vmul.f32 %v1587_v22, %v786_v36 }
  0xe1   : > { %v870_v43 = vsel %vm799_vm4, %v767_v30, %v838_v38  ;;  %v768_v45 = vadd.f32 %v1582_v20, %v537_v39  ;;  %v784_v46 = vadd.f32 %v1582_v20, %v601_v40  ;;  %v1384_v47 = vpop.f32.mrf.mxu0  ;;  %v1400_v48 = vpop.f32.mrf.mxu1  ;;  %v886_v60 = vsel %vm815_vm5, %v783_v31, %v854_v44 }
  0xe2   : > { %v873_v49 = vsel %vm802_vm6, %v770_v35, %v841_v41  ;;  %v889_v50 = vsel %vm818_vm7, %v786_v36, %v857_v42  ;;  %v773_v51 = vadd.f32 %v1384_v47, %v1582_v20  ;;  %v789_v52 = vadd.f32 %v1400_v48, %v1582_v20 }
  0xe3   : > { %v1266_v53 = vpack.c.bf16 %v873_v49, %v872_v34  ;;  %v1306_v54 = vpack.c.bf16 %v889_v50, %v888_v37  ;;  %vm800_vm8 = vcmp.ge.f32.partialorder %v768_v45, 0.0  ;;  %v839_v55 = vmul.f32 %v1587_v22, %v768_v45  ;;  %v550_v56 = vpop.f32.mrf.mxu0  ;;  %v614_v57 = vpop.f32.mrf.mxu1 }
  0xe4   : > { %vm816_vm9 = vcmp.ge.f32.partialorder %v784_v46, 0.0  ;;  %v855_v58 = vmul.f32 %v1587_v22, %v784_v46  ;;  %vm805_vm10 = vcmp.ge.f32.partialorder %v773_v51, 0.0  ;;  %v844_v59 = vmul.f32 %v1587_v22, %v773_v51 }
  0xe5   : > { %1338 = vst [vmem:[%s1608_s10 + $0x8] sm:$0xff] %v1266_v53   ;;  %1346 = vst [vmem:[%s1608_s10 + $0x48] sm:$0xff] %v1306_v54   ;;  %v871_v61 = vsel %vm800_vm8, %v768_v45, %v839_v55  ;;  %v860_v62 = vmul.f32 %v1587_v22, %v789_v52  ;;  %v771_v63 = vadd.f32 %v1582_v20, %v550_v56  ;;  %v1385_v0 = vpop.f32.mrf.mxu0  ;;  %v1401_v1 = vpop.f32.mrf.mxu1  ;;  %vm821_vm11 = vcmp.ge.f32.partialorder %v789_v52, 0.0 }
  0xe6   : > { %v1261_v2 = vpack.c.bf16 %v871_v61, %v870_v43  ;;  %v887_v3 = vsel %vm816_vm9, %v784_v46, %v855_v58  ;;  %v787_v4 = vadd.f32 %v1582_v20, %v614_v57  ;;  %v876_v6 = vsel %vm805_vm10, %v773_v51, %v844_v59 }
  0xe7   : > { %v1301_v5 = vpack.c.bf16 %v887_v3, %v886_v60  ;;  %vm803_vm12 = vcmp.ge.f32.partialorder %v771_v63, 0.0  ;;  %v842_v7 = vmul.f32 %v1587_v22, %v771_v63  ;;  %v553_v8 = vpop.f32.mrf.mxu0  ;;  %v617_v9 = vpop.f32.mrf.mxu1  ;;  %v774_v11 = vadd.f32 %v1385_v0, %v1582_v20 }
  0xe8   : > { %1262 = vst [vmem:[%s1608_s10] sm:$0xff] %v1261_v2   ;;  %vm819_vm13 = vcmp.ge.f32.partialorder %v787_v4, 0.0  ;;  %v858_v10 = vmul.f32 %v1587_v22, %v787_v4  ;;  %v790_v12 = vadd.f32 %v1401_v1, %v1582_v20  ;;  %v892_v13 = vsel %vm821_vm11, %v789_v52, %v860_v62 }
  0xe9   : > { %1345 = vst [vmem:[%s1608_s10 + $0x40] sm:$0xff] %v1301_v5   ;;  %v874_v14 = vsel %vm803_vm12, %v771_v63, %v842_v7  ;;  %v772_v15 = vadd.f32 %v1582_v20, %v553_v8  ;;  %v788_v16 = vadd.f32 %v1582_v20, %v617_v9  ;;  %v1388_v17 = vpop.f32.mrf.mxu0  ;;  %v1404_v18 = vpop.f32.mrf.mxu1  ;;  %vm806_vm14 = vcmp.ge.f32.partialorder %v774_v11, 0.0 }
  0xea   : > { %v890_v19 = vsel %vm819_vm13, %v787_v4, %v858_v10  ;;  %v845_v21 = vmul.f32 %v1587_v22, %v774_v11  ;;  %vm822_vm15 = vcmp.ge.f32.partialorder %v790_v12, 0.0  ;;  %v861_v23 = vmul.f32 %v1587_v22, %v790_v12 }
  0xeb   : > { %vm804_vm0 = vcmp.ge.f32.partialorder %v772_v15, 0.0  ;;  %v843_v24 = vmul.f32 %v1587_v22, %v772_v15  ;;  %vm820_vm1 = vcmp.ge.f32.partialorder %v788_v16, 0.0  ;;  %v566_v25 = vpop.f32.mrf.mxu0  ;;  %v630_v26 = vpop.f32.mrf.mxu1  ;;  %v859_v28 = vmul.f32 %v1587_v22, %v788_v16 }
  0xec   : > { %v877_v27 = vsel %vm806_vm14, %v774_v11, %v845_v21  ;;  %v777_v29 = vadd.f32 %v1388_v17, %v1582_v20  ;;  %v793_v30 = vadd.f32 %v1404_v18, %v1582_v20  ;;  %v893_v32 = vsel %vm822_vm15, %v790_v12, %v861_v23 }
  0xed   : > { %v1276_v31 = vpack.c.bf16 %v877_v27, %v876_v6  ;;  %v875_v33 = vsel %vm804_vm0, %v772_v15, %v843_v24  ;;  %v775_v34 = vadd.f32 %v1582_v20, %v566_v25  ;;  %v1389_v35 = vpop.f32.mrf.mxu0  ;;  %v1405_v36 = vpop.f32.mrf.mxu1  ;;  %v1316_v37 = vpack.c.bf16 %v893_v32, %v892_v13 }
  0xee   : > { %v1271_v38 = vpack.c.bf16 %v875_v33, %v874_v14  ;;  %v891_v39 = vsel %vm820_vm1, %v788_v16, %v859_v28  ;;  %vm809_vm2 = vcmp.ge.f32.partialorder %v777_v29, 0.0  ;;  %v848_v41 = vmul.f32 %v1587_v22, %v777_v29 }
  0xef   : > { %1340 = vst [vmem:[%s1608_s10 + $0x18] sm:$0xff] %v1276_v31   ;;  %v1311_v40 = vpack.c.bf16 %v891_v39, %v890_v19  ;;  %vm825_vm3 = vcmp.ge.f32.partialorder %v793_v30, 0.0  ;;  %v864_v42 = vmul.f32 %v1587_v22, %v793_v30  ;;  %v569_v43 = vpop.f32.mrf.mxu0  ;;  %v633_v44 = vpop.f32.mrf.mxu1  ;;  %1348 = vst [vmem:[%s1608_s10 + $0x58] sm:$0xff] %v1316_v37   ;;  %vm807_vm4 = vcmp.ge.f32.partialorder %v775_v34, 0.0 }
  0xf0   : > { %1339 = vst [vmem:[%s1608_s10 + $0x10] sm:$0xff] %v1271_v38   ;;  %v846_v45 = vmul.f32 %v1587_v22, %v775_v34  ;;  %v791_v46 = vadd.f32 %v1582_v20, %v630_v26  ;;  %v778_v47 = vadd.f32 %v1389_v35, %v1582_v20  ;;  %v880_v48 = vsel %vm809_vm2, %v777_v29, %v848_v41 }
  0xf1   : > { %1347 = vst [vmem:[%s1608_s10 + $0x50] sm:$0xff] %v1311_v40   ;;  %v794_v49 = vadd.f32 %v1405_v36, %v1582_v20  ;;  %v776_v50 = vadd.f32 %v1582_v20, %v569_v43  ;;  %v1392_v51 = vpop.f32.mrf.mxu0  ;;  %v1408_v52 = vpop.f32.mrf.mxu1  ;;  %v896_v53 = vsel %vm825_vm3, %v793_v30, %v864_v42  ;;  %v792_v61 = vadd.f32 %v1582_v20, %v633_v44 }
  0xf2   : > { %v878_v54 = vsel %vm807_vm4, %v775_v34, %v846_v45  ;;  %vm823_vm5 = vcmp.ge.f32.partialorder %v791_v46, 0.0  ;;  %vm810_vm6 = vcmp.ge.f32.partialorder %v778_v47, 0.0  ;;  %v849_v55 = vmul.f32 %v1587_v22, %v778_v47 }
  0xf3   : > { %vm826_vm7 = vcmp.ge.f32.partialorder %v794_v49, 0.0  ;;  %v865_v56 = vmul.f32 %v1587_v22, %v794_v49  ;;  %vm808_vm8 = vcmp.ge.f32.partialorder %v776_v50, 0.0  ;;  %v582_v57 = vpop.f32.mrf.mxu0  ;;  %v646_v58 = vpop.f32.mrf.mxu1  ;;  %v862_v59 = vmul.f32 %v1587_v22, %v791_v46 }
  0xf4   : > { %v847_v60 = vmul.f32 %v1587_v22, %v776_v50  ;;  %v781_v62 = vadd.f32 %v1392_v51, %v1582_v20  ;;  %v881_v63 = vsel %vm810_vm6, %v778_v47, %v849_v55  ;;  %v797_v1 = vadd.f32 %v1408_v52, %v1582_v20 }
  0xf5   : > { %v897_v0 = vsel %vm826_vm7, %v794_v49, %v865_v56  ;;  %v779_v2 = vadd.f32 %v1582_v20, %v582_v57  ;;  %v1393_v3 = vpop.f32.mrf.mxu0  ;;  %v1409_v4 = vpop.f32.mrf.mxu1  ;;  %v1286_v5 = vpack.c.bf16 %v881_v63, %v880_v48  ;;  %vm824_vm9 = vcmp.ge.f32.partialorder %v792_v61, 0.0 }
  0xf6   : > { %v1326_v6 = vpack.c.bf16 %v897_v0, %v896_v53  ;;  %v879_v7 = vsel %vm808_vm8, %v776_v50, %v847_v60  ;;  %v863_v9 = vmul.f32 %v1587_v22, %v792_v61  ;;  %v852_v10 = vmul.f32 %v1587_v22, %v781_v62 }
  0xf7   : > { %v1281_v8 = vpack.c.bf16 %v879_v7, %v878_v54  ;;  %v894_v11 = vsel %vm823_vm5, %v791_v46, %v862_v59  ;;  %1342 = vst [vmem:[%s1608_s10 + $0x28] sm:$0xff] %v1286_v5   ;;  %vm813_vm10 = vcmp.ge.f32.partialorder %v781_v62, 0.0  ;;  %v868_v13 = vmul.f32 %v1587_v22, %v797_v1  ;;  %v585_v16 = vpop.f32.mrf.mxu0  ;;  %v649_v17 = vpop.f32.mrf.mxu1 }
  0xf8   : > { %1350 = vst [vmem:[%s1608_s10 + $0x68] sm:$0xff] %v1326_v6   ;;  %v895_v12 = vsel %vm824_vm9, %v792_v61, %v863_v9  ;;  %v795_v14 = vadd.f32 %v1582_v20, %v646_v58  ;;  %v782_v15 = vadd.f32 %v1393_v3, %v1582_v20  ;;  %vm829_vm11 = vcmp.ge.f32.partialorder %v797_v1, 0.0 }
  0xf9   : > { %1341 = vst [vmem:[%s1608_s10 + $0x20] sm:$0xff] %v1281_v8   ;;  %v1321_v18 = vpack.c.bf16 %v895_v12, %v894_v11  ;;  %vm811_vm12 = vcmp.ge.f32.partialorder %v779_v2, 0.0  ;;  %v798_v19 = vadd.f32 %v1409_v4, %v1582_v20  ;;  %v884_v21 = vsel %vm813_vm10, %v781_v62, %v852_v10 }
  0xfa   : > { %v850_v23 = vmul.f32 %v1587_v22, %v779_v2  ;;  %vm814_vm13 = vcmp.ge.f32.partialorder %v782_v15, 0.0  ;;  %v853_v24 = vmul.f32 %v1587_v22, %v782_v15  ;;  %v780_v26 = vadd.f32 %v1582_v20, %v585_v16 }
  0xfb   : > { %1349 = vst [vmem:[%s1608_s10 + $0x60] sm:$0xff] %v1321_v18   ;;  %vm830_vm14 = vcmp.ge.f32.partialorder %v798_v19, 0.0  ;;  %v869_v25 = vmul.f32 %v1587_v22, %v798_v19  ;;  %v796_v27 = vadd.f32 %v1582_v20, %v649_v17  ;;  %v900_v28 = vsel %vm829_vm11, %v797_v1, %v868_v13 }
  0xfc   : > { %vm827_vm15 = vcmp.ge.f32.partialorder %v795_v14, 0.0  ;;  %v866_v29 = vmul.f32 %v1587_v22, %v795_v14  ;;  %v885_v30 = vsel %vm814_vm13, %v782_v15, %v853_v24  ;;  %vm812_vm0 = vcmp.ge.f32.partialorder %v780_v26, 0.0 }
  0xfd   : > { %v1296_v31 = vpack.c.bf16 %v885_v30, %v884_v21  ;;  %v901_v32 = vsel %vm830_vm14, %v798_v19, %v869_v25  ;;  %v851_v33 = vmul.f32 %v1587_v22, %v780_v26  ;;  %vm828_vm1 = vcmp.ge.f32.partialorder %v796_v27, 0.0 }
  0xfe   : > { %v1336_v34 = vpack.c.bf16 %v901_v32, %v900_v28  ;;  %v867_v35 = vmul.f32 %v1587_v22, %v796_v27  ;;  %v882_v36 = vsel %vm811_vm12, %v779_v2, %v850_v23  ;;  %v898_v37 = vsel %vm827_vm15, %v795_v14, %v866_v29 }
  0xff   : > { %1344 = vst [vmem:[%s1608_s10 + $0x38] sm:$0xff] %v1296_v31   ;;  %v883_v20 = vsel %vm812_vm0, %v780_v26, %v851_v33 }
 0x100   : > { %1352 = vst [vmem:[%s1608_s10 + $0x78] sm:$0xff] %v1336_v34   ;;  %v1291_v38 = vpack.c.bf16 %v883_v20, %v882_v36  ;;  %v899_v39 = vsel %vm828_vm1, %v796_v27, %v867_v35 }
 0x101   : > { %v1331_v40 = vpack.c.bf16 %v899_v39, %v898_v37 }
 0x102   : > { %1343 = vst [vmem:[%s1608_s10 + $0x30] sm:$0xff] %v1291_v38  }
 0x103   : > { %1351 = vst [vmem:[%s1608_s10 + $0x70] sm:$0xff] %v1331_v40  }
 0x104 PF: > { %s14_s17 = sadd.s32 1, %s1483_s17   ;;  %s1694_s15 = smov %s1479_s16 }
 0x105   : > { %p11_p5 = scmp.ge.s32.totalorder %s14_s17, 4   ;;  %s1695_s16 = smov %s1697_s18 }
 0x107   :  { %13 = sbr.rel (!%p11_p5) target bundleno = 2 (0x2), region = 77 }

// kernel: gen_forward.25
= control target key start
LH: loop header
LB: loop body
LE: loop exit
PB: predicated region body
PF: predicated region fallthrough
CT: control target
= control target key end

     0   :  { %s2222_s15 = smov 0   ;;  %s2224_s16 = smov 0   ;;  %s2513_s0 = inlined_call_operand.vmem [shape: bf16[512,288], index: 0, kind: input, shape index: {}]   ;;  %s2514_s1 = inlined_call_operand.vmem [shape: bf16[288,128], index: 1, kind: input, shape index: {}]   ;;  %s2515_s2 = inlined_call_operand.vmem [shape: f32[1,128], index: 2, kind: input, shape index: {}]   ;;  %s2516_s3 = inlined_call_operand.vmem [shape: f32[1,128], index: 3, kind: input, shape index: {}]   ;;  %s2517_s4 = inlined_call_operand.vmem [shape: bf16[512,128], index: 4, kind: output, shape index: {}]  }
   0x1   :  { %s2226_s17 = smov 0  }
   0x2 LB: > { %s26_s18 = sadd.s32 1, %s2191_s16  ;;  %p1634_p0 = scmp.ge.s32.totalorder %s2195_s17, 1  ;;  %s2195_s17 = sphi %s2226_s17, %s14_s17   ;;  %s2191_s16 = sphi %s2224_s16, %s2519_s16   ;;  %s2187_s15 = sphi %s2222_s15, %s2518_s15  }
   0x3   : > { %p28_p1 = scmp.ge.s32.totalorder %s26_s18, 2  ;;  %p194_p2 = scmp.lt.s32.totalorder %s2195_s17, 3 }
   0x5   : > { %s2521_s18 = smov (%p28_p1, %s26_s18), 0  ;;  %p195_p3 = pnand %p1634_p0, %p194_p2 }
   0x6   : > { %s1635_s21 = sshll.u32 (!%p195_p3), %s2187_s15, 5 }
   0x7   : > { %198 = sbr.rel (%p195_p3) target bundleno = 344 (0x158), region = 36  ;;  %p232_p4 = scmp.lt.s32.totalorder (!%p195_p3), %s1635_s21, 63 }
   0xc   : > { %v2091_v0 = vld [vmem:[%s2514_s1 + $0x78] sm:$0xff]   ;;  %v2093_v2 = vld [vmem:[%s2514_s1 + $0x70] sm:$0xff]   ;;  %v2095_v4 = vld [vmem:[%s2514_s1 + $0x68] sm:$0xff]   ;;  %s2523_s21 = smov (!%p232_p4, %s1635_s21), 63  ;;  %vm771_vm0 = vcmask 261120  }
   0xd   : > { %v2092_v1 = vld [vmem:[%s2514_s1 + $0x38] sm:$0xff]   ;;  %1884 = vmatprep.subr.bf16.mxu0 %v2091_v0  ;;  %2050 = vmatprep.subr.bf16.mxu1 %v2091_v0  ;;  %v2094_v3 = vld [vmem:[%s2514_s1 + $0x30] sm:$0xff]   ;;  %v2096_v5 = vld [vmem:[%s2514_s1 + $0x28] sm:$0xff]   ;;  %s2066_s8 = smul.u32 12, %s2523_s21  ;;  %s1638_s19 = sshll.u32 %s2523_s21, 2 }
   0xe   : > { %1885 = vmatpush3.bf16.msra.mxu0 %v2092_v1  ;;  %2058 = vmatpush3.bf16.msra.mxu1 %v2092_v1  ;;  %v2097_v6 = vld [vmem:[%s2514_s1 + $0x60] sm:$0xff]   ;;  %v2099_v8 = vld [vmem:[%s2514_s1 + $0x58] sm:$0xff]   ;;  %v2101_v10 = vld [vmem:[%s2514_s1 + $0x50] sm:$0xff]   ;;  %s2409_s21 = scalar_lea.vmem %s2517_s4, %s1638_s19 }
   0xf   : > { %1886 = vmatprep.subr.bf16.mxu0 %v2093_v2  ;;  %2051 = vmatprep.subr.bf16.mxu1 %v2093_v2  ;;  %v2098_v7 = vld [vmem:[%s2514_s1 + $0x20] sm:$0xff]   ;;  %s2273_s15 = scalar_lea.vmem %s2513_s0, %s2066_s8  ;;  %v2100_v9 = vld [vmem:[%s2514_s1 + $0x18] sm:$0xff]   ;;  %v2102_v13 = vld [vmem:[%s2514_s1 + $0x10] sm:$0xff]  }
  0x10   : > { %v2109_v11 = vld [vmem:[%s2273_s15 + $0x4] ss:$12 sps:$4 sm:$0xff]   ;;  %v2103_v14 = vld [vmem:[%s2514_s1 + $0x48] sm:$0xff]   ;;  %v2120_v26 = vld [vmem:[%s2273_s15 + $0x34] ss:$12 sps:$4 sm:$0xff]  }
  0x11   : > { %v2112_v12 = vld [vmem:[%s2273_s15 + $0x124] ss:$12 sps:$4 sm:$0xff]   ;;  %852 = vmatprep.mubr.bf16.mxu0 %v2109_v11  ;;  %v2104_v15 = vld [vmem:[%s2514_s1 + $0x8] sm:$0xff]   ;;  %v2122_v27 = vld [vmem:[%s2273_s15 + $0x154] ss:$12 sps:$4 sm:$0xff]  }
  0x12   : > { %1887 = vmatpush3.bf16.msra.mxu0 %v2094_v3  ;;  %2059 = vmatpush3.bf16.msra.mxu1 %v2094_v3  ;;  %v2105_v16 = vld [vmem:[%s2514_s1 + $0x40] sm:$0xff]   ;;  %v2113_v18 = vld [vmem:[%s2514_s1 + $0x88] sm:$0xff]   ;;  %v2124_v28 = vld [vmem:[%s2273_s15 + $0x30] ss:$12 sps:$4 sm:$0xff]  }
  0x13   : > { %1888 = vmatprep.subr.bf16.mxu0 %v2095_v4  ;;  %2052 = vmatprep.subr.bf16.mxu1 %v2095_v4  ;;  %v2106_v17 = vld [vmem:[%s2514_s1] sm:$0xff]   ;;  %v2114_v21 = vld [vmem:[%s2273_s15 + $0x1c] ss:$12 sps:$4 sm:$0xff]   ;;  %v2127_v30 = vld [vmem:[%s2273_s15 + $0x4c] ss:$12 sps:$4 sm:$0xff]  }
  0x14   : > { %948 = vmatprep.mubr.bf16.mxu1 %v2112_v12  ;;  %v2107_v19 = vld [vmem:[%s2273_s15] ss:$12 sps:$4 sm:$0xff]   ;;  %v2116_v22 = vld [vmem:[%s2273_s15 + $0x13c] ss:$12 sps:$4 sm:$0xff]   ;;  %v2118_v24 = vld [vmem:[%s2273_s15 + $0x18] ss:$12 sps:$4 sm:$0xff]  }
  0x15   : > { %v2110_v20 = vld [vmem:[%s2273_s15 + $0x120] ss:$12 sps:$4 sm:$0xff]   ;;  %v2119_v25 = vld [vmem:[%s2273_s15 + $0x138] ss:$12 sps:$4 sm:$0xff]   ;;  %v2125_v29 = vld [vmem:[%s2273_s15 + $0x150] ss:$12 sps:$4 sm:$0xff]  }
  0x16   : > { %1889 = vmatpush3.bf16.msra.mxu0 %v2096_v5  ;;  %2060 = vmatpush3.bf16.msra.mxu1 %v2096_v5  ;;  %v2126_v23 = vld [vmem:[%s2514_s1 + $0x80] sm:$0xff]   ;;  %v2129_v31 = vld [vmem:[%s2273_s15 + $0x16c] ss:$12 sps:$4 sm:$0xff]   ;;  %v2131_v32 = vld [vmem:[%s2273_s15 + $0x48] ss:$12 sps:$4 sm:$0xff]  }
  0x17   : > { %1890 = vmatprep.subr.bf16.mxu0 %v2097_v6  ;;  %2053 = vmatprep.subr.bf16.mxu1 %v2097_v6  ;;  %v2132_v33 = vld [vmem:[%s2273_s15 + $0x168] ss:$12 sps:$4 sm:$0xff]   ;;  %v2133_v34 = vld [vmem:[%s2273_s15 + $0x64] ss:$12 sps:$4 sm:$0xff]   ;;  %v2136_v36 = vld [vmem:[%s2273_s15 + $0x60] ss:$12 sps:$4 sm:$0xff]  }
  0x18   : > { %v2135_v35 = vld [vmem:[%s2273_s15 + $0x8] ss:$12 sps:$4 sm:$0xff]   ;;  %v2137_v37 = vld [vmem:[%s2273_s15 + $0x20] ss:$12 sps:$4 sm:$0xff]   ;;  %v2140_v39 = vld [vmem:[%s2273_s15 + $0x38] ss:$12 sps:$4 sm:$0xff]  }
  0x19   : > { %v2138_v38 = vld [vmem:[%s2273_s15 + $0x7c] ss:$12 sps:$4 sm:$0xff]   ;;  %v2141_v40 = vld [vmem:[%s2273_s15 + $0x78] ss:$12 sps:$4 sm:$0xff]   ;;  %v2143_v42 = vld [vmem:[%s2273_s15 + $0x94] ss:$12 sps:$4 sm:$0xff]  }
  0x1a   : > { %1891 = vmatpush3.bf16.msra.mxu0 %v2098_v7  ;;  %2061 = vmatpush3.bf16.msra.mxu1 %v2098_v7  ;;  %v2142_v41 = vld [vmem:[%s2273_s15 + $0x50] ss:$12 sps:$4 sm:$0xff]   ;;  %v2145_v43 = vld [vmem:[%s2273_s15 + $0x68] ss:$12 sps:$4 sm:$0xff]   ;;  %v2147_v45 = vld [vmem:[%s2273_s15 + $0x80] ss:$12 sps:$4 sm:$0xff]  }
  0x1b   : > { %1892 = vmatprep.subr.bf16.mxu0 %v2099_v8  ;;  %2054 = vmatprep.subr.bf16.mxu1 %v2099_v8  ;;  %v2146_v44 = vld [vmem:[%s2273_s15 + $0x90] ss:$12 sps:$4 sm:$0xff]   ;;  %v2148_v46 = vld [vmem:[%s2273_s15 + $0xac] ss:$12 sps:$4 sm:$0xff]   ;;  %v2151_v48 = vld [vmem:[%s2273_s15 + $0xa8] ss:$12 sps:$4 sm:$0xff]  }
  0x1c   : > { %v2150_v47 = vld [vmem:[%s2273_s15 + $0x98] ss:$12 sps:$4 sm:$0xff]   ;;  %v2152_v49 = vld [vmem:[%s2273_s15 + $0xb0] ss:$12 sps:$4 sm:$0xff]   ;;  %v2155_v51 = vld [vmem:[%s2273_s15 + $0xc8] ss:$12 sps:$4 sm:$0xff]  }
  0x1d   : > { %v2153_v50 = vld [vmem:[%s2273_s15 + $0xc4] ss:$12 sps:$4 sm:$0xff]   ;;  %v2156_v52 = vld [vmem:[%s2273_s15 + $0xc0] ss:$12 sps:$4 sm:$0xff]   ;;  %v2158_v54 = vld [vmem:[%s2273_s15 + $0xdc] ss:$12 sps:$4 sm:$0xff]  }
  0x1e   : > { %1893 = vmatpush3.bf16.msra.mxu0 %v2100_v9  ;;  %2062 = vmatpush3.bf16.msra.mxu1 %v2100_v9  ;;  %v2157_v53 = vld [vmem:[%s2273_s15 + $0xe0] ss:$12 sps:$4 sm:$0xff]   ;;  %v2160_v55 = vld [vmem:[%s2273_s15 + $0xf8] ss:$12 sps:$4 sm:$0xff]   ;;  %v2162_v57 = vld [vmem:[%s2273_s15 + $0x110] ss:$12 sps:$4 sm:$0xff]  }
  0x1f   : > { %1894 = vmatprep.subr.bf16.mxu0 %v2101_v10  ;;  %2055 = vmatprep.subr.bf16.mxu1 %v2101_v10  ;;  %v2161_v56 = vld [vmem:[%s2273_s15 + $0xd8] ss:$12 sps:$4 sm:$0xff]   ;;  %v2163_v58 = vld [vmem:[%s2273_s15 + $0xf4] ss:$12 sps:$4 sm:$0xff]   ;;  %v2166_v60 = vld [vmem:[%s2273_s15 + $0xf0] ss:$12 sps:$4 sm:$0xff]  }
  0x20   : > { %v2165_v59 = vld [vmem:[%s2273_s15 + $0x128] ss:$12 sps:$4 sm:$0xff]   ;;  %v2167_v61 = vld [vmem:[%s2273_s15 + $0x140] ss:$12 sps:$4 sm:$0xff]   ;;  %v2170_v63 = vld [vmem:[%s2273_s15 + $0x158] ss:$12 sps:$4 sm:$0xff]  }
  0x21   : > { %v2168_v62 = vld [vmem:[%s2273_s15 + $0x10c] ss:$12 sps:$4 sm:$0xff]   ;;  %v2171_v0 = vld [vmem:[%s2273_s15 + $0x108] ss:$12 sps:$4 sm:$0xff]   ;;  %v2172_v1 = vld [vmem:[%s2273_s15 + $0x170] ss:$12 sps:$4 sm:$0xff]  }
  0x22   : > { %1895 = vmatpush3.bf16.msra.mxu0 %v2102_v13  ;;  %2063 = vmatpush3.bf16.msra.mxu1 %v2102_v13 }
  0x23   : > { %1896 = vmatprep.subr.bf16.mxu0 %v2103_v14  ;;  %2056 = vmatprep.subr.bf16.mxu1 %v2103_v14 }
  0x26   : > { %1897 = vmatpush3.bf16.msra.mxu0 %v2104_v15  ;;  %2064 = vmatpush3.bf16.msra.mxu1 %v2104_v15 }
  0x27   : > { %1898 = vmatprep.subr.bf16.mxu0 %v2105_v16  ;;  %2057 = vmatprep.subr.bf16.mxu1 %v2105_v16 }
  0x2a   : > { %1899 = vmatpush3.bf16.msra.mxu0 %v2106_v17  ;;  %2065 = vmatpush3.bf16.msra.mxu1 %v2106_v17 }
  0x2b   : > { %2014 = vmatprep.subr.bf16.mxu1 %v2113_v18 }
  0x2d   : > { %853 = vmatmul.mubr.bf16.vlgmr.msra.gmra.mxu0 %v2107_v19  ;;  %949 = vmatmul.mubr.bf16.vlgmr.msra.gmra.mxu1 %v2110_v20 }
  0x2e   : > { %2015 = vmatpush3.bf16.msra.mxu1 %v2113_v18  ;;  %860 = vmatprep.mubr.bf16.mxu0 %v2114_v21 }
  0x2f   : > { %956 = vmatprep.mubr.bf16.mxu1 %v2116_v22  ;;  %2016 = vmatprep.subr.bf16.mxu1 %v2126_v23 }
  0x32   : > { %2017 = vmatpush3.bf16.msra.mxu1 %v2126_v23 }
  0x35   : > { %861 = vmatmul.mubr.bf16.gmra.mxu0 %v2118_v24  ;;  %957 = vmatmul.mubr.bf16.gmra.mxu1 %v2119_v25 }
  0x36   : > { %868 = vmatprep.mubr.bf16.mxu0 %v2120_v26  ;;  %964 = vmatprep.mubr.bf16.mxu1 %v2122_v27 }
  0x3d   : > { %869 = vmatmul.mubr.bf16.gmra.mxu0 %v2124_v28  ;;  %965 = vmatmul.mubr.bf16.gmra.mxu1 %v2125_v29 }
  0x3e   : > { %876 = vmatprep.mubr.bf16.mxu0 %v2127_v30  ;;  %972 = vmatprep.mubr.bf16.mxu1 %v2129_v31 }
  0x45   : > { %877 = vmatmul.mubr.bf16.gmra.mxu0 %v2131_v32  ;;  %973 = vmatmul.mubr.bf16.gmra.mxu1 %v2132_v33 }
  0x46   : > { %884 = vmatprep.mubr.bf16.mxu0 %v2133_v34  ;;  %2018 = vmatprep.mubr.msk.bf16.mxu1 %vm771_vm0, %v2135_v35 }
  0x4d   : > { %885 = vmatmul.mubr.bf16.gmra.mxu0 %v2136_v36  ;;  %2019 = vmatmul.mubr.msk.bf16.vlgmr.msra.gmra.mxu1 %vm771_vm0, %v2137_v37 }
  0x4e   : > { %892 = vmatprep.mubr.bf16.mxu0 %v2138_v38  ;;  %2022 = vmatprep.mubr.msk.bf16.mxu1 %vm771_vm0, %v2140_v39 }
  0x55   : > { %893 = vmatmul.mubr.bf16.gmra.mxu0 %v2141_v40  ;;  %2023 = vmatmul.mubr.msk.bf16.gmra.mxu1 %vm771_vm0, %v2142_v41 }
  0x56   : > { %900 = vmatprep.mubr.bf16.mxu0 %v2143_v42  ;;  %2026 = vmatprep.mubr.msk.bf16.mxu1 %vm771_vm0, %v2145_v43 }
  0x5d   : > { %901 = vmatmul.mubr.bf16.gmra.mxu0 %v2146_v44  ;;  %2027 = vmatmul.mubr.msk.bf16.gmra.mxu1 %vm771_vm0, %v2147_v45  ;;  %v2387_v44 = vld [vmem:[%s2515_s2] ss:$0 sm:$0xff] }
  0x5e   : > { %908 = vmatprep.mubr.bf16.mxu0 %v2148_v46  ;;  %2030 = vmatprep.mubr.msk.bf16.mxu1 %vm771_vm0, %v2150_v47 }
  0x65   : > { %909 = vmatmul.mubr.bf16.gmra.mxu0 %v2151_v48  ;;  %2031 = vmatmul.mubr.msk.bf16.gmra.mxu1 %vm771_vm0, %v2152_v49 }
  0x66   : > { %916 = vmatprep.mubr.bf16.mxu0 %v2153_v50  ;;  %2034 = vmatprep.mubr.msk.bf16.mxu1 %vm771_vm0, %v2155_v51  ;;  %v2393_v51 = vld [vmem:[%s2516_s3] ss:$0 sm:$0xff] }
  0x6d   : > { %917 = vmatmul.mubr.bf16.gmra.mxu0 %v2156_v52  ;;  %2035 = vmatmul.mubr.msk.bf16.gmra.mxu1 %vm771_vm0, %v2157_v53 }
  0x6e   : > { %924 = vmatprep.mubr.bf16.mxu0 %v2158_v54  ;;  %2038 = vmatprep.mubr.msk.bf16.mxu1 %vm771_vm0, %v2160_v55 }
  0x75   : > { %925 = vmatmul.mubr.bf16.gmra.mxu0 %v2161_v56  ;;  %2039 = vmatmul.mubr.msk.bf16.gmra.mxu1 %vm771_vm0, %v2162_v57 }
  0x76   : > { %932 = vmatprep.mubr.bf16.mxu0 %v2163_v58  ;;  %2042 = vmatprep.mubr.msk.bf16.mxu1 %vm771_vm0, %v2165_v59 }
  0x7d   : > { %933 = vmatmul.mubr.bf16.gmra.mxu0 %v2166_v60  ;;  %2043 = vmatmul.mubr.msk.bf16.gmra.mxu1 %vm771_vm0, %v2167_v61 }
  0x7e   : > { %940 = vmatprep.mubr.bf16.mxu0 %v2168_v62  ;;  %2046 = vmatprep.mubr.msk.bf16.mxu1 %vm771_vm0, %v2170_v63 }
  0x85   : > { %941 = vmatmul.mubr.bf16.gmra.mxu0 %v2171_v0  ;;  %2047 = vmatmul.mubr.msk.bf16.gmra.mxu1 %vm771_vm0, %v2172_v1 }
  0xed   : > { %v1900_v2 = vpop.f32.mrf.mxu0  ;;  %v1972_v3 = vpop.f32.mrf.mxu1 }
  0xef   : > { %v1901_v4 = vpop.f32.mrf.mxu0  ;;  %v1973_v5 = vpop.f32.mrf.mxu1 }
  0xf0   : > { %v2366_v6 = vadd.f32 %v1973_v5, %v1972_v3  ;;  %v1902_v45 = vadd.f32 %v1901_v4, %v1900_v2 }
  0xf1   : > { %v1903_v7 = vpop.f32.mrf.mxu0  ;;  %v1975_v8 = vpop.f32.mrf.mxu1 }
  0xf3   : > { %v1904_v9 = vpop.f32.mrf.mxu0  ;;  %v1976_v10 = vpop.f32.mrf.mxu1 }
  0xf4   : > { %v2368_v11 = vadd.f32 %v1976_v10, %v1975_v8  ;;  %v1905_v56 = vadd.f32 %v1904_v9, %v1903_v7 }
  0xf5   : > { %v1906_v12 = vpop.f32.mrf.mxu0  ;;  %v1978_v13 = vpop.f32.mrf.mxu1 }
  0xf7   : > { %v1907_v14 = vpop.f32.mrf.mxu0  ;;  %v1979_v15 = vpop.f32.mrf.mxu1 }
  0xf8   : > { %v2370_v16 = vadd.f32 %v1979_v15, %v1978_v13  ;;  %v1908_v41 = vadd.f32 %v1907_v14, %v1906_v12 }
  0xf9   : > { %v1909_v17 = vpop.f32.mrf.mxu0  ;;  %v1981_v18 = vpop.f32.mrf.mxu1 }
  0xfb   : > { %v1910_v19 = vpop.f32.mrf.mxu0  ;;  %v1982_v20 = vpop.f32.mrf.mxu1 }
  0xfc   : > { %v2372_v21 = vadd.f32 %v1982_v20, %v1981_v18  ;;  %v1911_v49 = vadd.f32 %v1910_v19, %v1909_v17 }
  0xfd   : > { %v1912_v22 = vpop.f32.mrf.mxu0  ;;  %v1984_v23 = vpop.f32.mrf.mxu1 }
  0xff   : > { %v1913_v24 = vpop.f32.mrf.mxu0  ;;  %v1985_v25 = vpop.f32.mrf.mxu1 }
 0x100   : > { %v2374_v26 = vadd.f32 %v1985_v25, %v1984_v23  ;;  %v1914_v2 = vadd.f32 %v1913_v24, %v1912_v22 }
 0x101   : > { %v1915_v27 = vpop.f32.mrf.mxu0  ;;  %v1987_v28 = vpop.f32.mrf.mxu1 }
 0x103   : > { %v1916_v29 = vpop.f32.mrf.mxu0  ;;  %v1988_v30 = vpop.f32.mrf.mxu1 }
 0x104   : > { %v2376_v31 = vadd.f32 %v1988_v30, %v1987_v28  ;;  %v1917_v23 = vadd.f32 %v1916_v29, %v1915_v27 }
 0x105   : > { %v1918_v32 = vpop.f32.mrf.mxu0  ;;  %v1990_v33 = vpop.f32.mrf.mxu1 }
 0x107   : > { %v1919_v34 = vpop.f32.mrf.mxu0  ;;  %v1991_v35 = vpop.f32.mrf.mxu1 }
 0x108   : > { %v2378_v36 = vadd.f32 %v1991_v35, %v1990_v33  ;;  %v1920_v61 = vadd.f32 %v1919_v34, %v1918_v32 }
 0x109   : > { %v1921_v37 = vpop.f32.mrf.mxu0  ;;  %v2380_v38 = vpop.f32.mrf.mxu1 }
 0x10b   : > { %v1922_v39 = vpop.f32.mrf.mxu0  ;;  %v2382_v40 = vpop.f32.mrf.mxu1 }
 0x10c   : > { %v1923_v5 = vadd.f32 %v1922_v39, %v1921_v37 }
 0x10d   : > { %v1924_v42 = vpop.f32.mrf.mxu0  ;;  %v2020_v43 = vpop.f32.mrf.mxu1 }
 0x10e   : > { %v1024_v46 = vadd.f32 %v2020_v43, %v1908_v41 }
 0x10f   : > { %v1925_v47 = vpop.f32.mrf.mxu0  ;;  %v1015_v48 = vpop.f32.mrf.mxu1 }
 0x110   : > { %v1250_v50 = vadd.f32 %v2387_v44, %v1024_v46  ;;  %v1016_v52 = vadd.f32 %v1902_v45, %v1015_v48  ;;  %v1926_v45 = vadd.f32 %v1925_v47, %v1924_v42 }
 0x111   : > { %v2395_v53 = vpop.f32.mrf.mxu0  ;;  %v2021_v54 = vpop.f32.mrf.mxu1 }
 0x112   : > { %v1027_v55 = vadd.f32 %v2021_v54, %v1911_v49  ;;  %v1321_v57 = vmul.f32 %v2393_v51, %v1250_v50  ;;  %v1248_v58 = vadd.f32 %v2387_v44, %v1016_v52  ;;  %vm1282_vm1 = vcmp.ge.f32.partialorder %v1250_v50, 0.0 }
 0x113   : > { %v2399_v59 = vpop.f32.mrf.mxu0  ;;  %v1018_v60 = vpop.f32.mrf.mxu1 }
 0x114   : > { %v1251_v62 = vadd.f32 %v2387_v44, %v1027_v55  ;;  %v1019_v63 = vadd.f32 %v1905_v56, %v1018_v60  ;;  %v1353_v7 = vsel %vm1282_vm1, %v1250_v50, %v1321_v57  ;;  %v1319_v8 = vmul.f32 %v2393_v51, %v1248_v58 }
 0x115   : > { %v1930_v0 = vpop.f32.mrf.mxu0  ;;  %v2024_v1 = vpop.f32.mrf.mxu1  ;;  %vm1280_vm3 = vcmp.ge.f32.partialorder %v1248_v58, 0.0  ;;  %v1929_v60 = vadd.f32 %v2399_v59, %v2395_v53 }
 0x116   : > { %vm1283_vm2 = vcmp.ge.f32.partialorder %v1251_v62, 0.0  ;;  %v1322_v3 = vmul.f32 %v2393_v51, %v1251_v62  ;;  %v1040_v4 = vadd.f32 %v2024_v1, %v1920_v61  ;;  %v1249_v9 = vadd.f32 %v2387_v44, %v1019_v63 }
 0x117   : > { %v1931_v10 = vpop.f32.mrf.mxu0  ;;  %v1031_v12 = vpop.f32.mrf.mxu1  ;;  %v1351_v24 = vsel %vm1280_vm3, %v1248_v58, %v1319_v8 }
 0x118   : > { %v1354_v13 = vsel %vm1283_vm2, %v1251_v62, %v1322_v3  ;;  %v1254_v14 = vadd.f32 %v2387_v44, %v1040_v4  ;;  %v1032_v15 = vadd.f32 %v1914_v2, %v1031_v12  ;;  %vm1281_vm4 = vcmp.ge.f32.partialorder %v1249_v9, 0.0 }
 0x119   : > { %v1797_v17 = vpack.c.bf16 %v1354_v13, %v1353_v7  ;;  %v1320_v18 = vmul.f32 %v2393_v51, %v1249_v9  ;;  %v1933_v19 = vpop.f32.mrf.mxu0  ;;  %v2025_v20 = vpop.f32.mrf.mxu1  ;;  %v1932_v35 = vadd.f32 %v1931_v10, %v1930_v0 }
 0x11a   : > { %v1043_v22 = vadd.f32 %v2025_v20, %v1923_v5  ;;  %v1252_v28 = vadd.f32 %v2387_v44, %v1032_v15  ;;  %v1325_v34 = vmul.f32 %v2393_v51, %v1254_v14  ;;  %vm1286_vm5 = vcmp.ge.f32.partialorder %v1254_v14, 0.0 }
 0x11b   : > { %1869 = vst [vmem:[%s2409_s21 + $0x8] sm:$0xff] %v1797_v17   ;;  %v1352_v25 = vsel %vm1281_vm4, %v1249_v9, %v1320_v18  ;;  %v1934_v30 = vpop.f32.mrf.mxu0  ;;  %v1034_v32 = vpop.f32.mrf.mxu1 }
 0x11c   : > { %v1792_v33 = vpack.c.bf16 %v1352_v25, %v1351_v24  ;;  %v1255_v37 = vadd.f32 %v2387_v44, %v1043_v22  ;;  %v1035_v39 = vadd.f32 %v1917_v23, %v1034_v32  ;;  %v1323_v29 = vmul.f32 %v2393_v51, %v1252_v28 }
 0x11d   : > { %v1936_v41 = vpop.f32.mrf.mxu0  ;;  %v2028_v43 = vpop.f32.mrf.mxu1  ;;  %v1357_v52 = vsel %vm1286_vm5, %v1254_v14, %v1325_v34  ;;  %vm1284_vm7 = vcmp.ge.f32.partialorder %v1252_v28, 0.0  ;;  %v1935_v54 = vadd.f32 %v1934_v30, %v1933_v19 }
 0x11e   : > { %1793 = vst [vmem:[%s2409_s21] sm:$0xff] %v1792_v33   ;;  %v1056_v27 = vadd.f32 %v2028_v43, %v1932_v35  ;;  %vm1287_vm6 = vcmp.ge.f32.partialorder %v1255_v37, 0.0  ;;  %v1326_v46 = vmul.f32 %v2393_v51, %v1255_v37  ;;  %v1253_v48 = vadd.f32 %v2387_v44, %v1035_v39 }
 0x11f   : > { %v1937_v49 = vpop.f32.mrf.mxu0  ;;  %v1047_v50 = vpop.f32.mrf.mxu1  ;;  %v1355_v62 = vsel %vm1284_vm7, %v1252_v28, %v1323_v29 }
 0x120   : > { %v1048_v55 = vadd.f32 %v1926_v45, %v1047_v50  ;;  %v1358_v56 = vsel %vm1287_vm6, %v1255_v37, %v1326_v46  ;;  %vm1285_vm8 = vcmp.ge.f32.partialorder %v1253_v48, 0.0  ;;  %v1324_v42 = vmul.f32 %v2393_v51, %v1253_v48 }
 0x121   : > { %v1258_v47 = vadd.f32 %v2387_v44, %v1056_v27  ;;  %v1939_v57 = vpop.f32.mrf.mxu0  ;;  %v2029_v58 = vpop.f32.mrf.mxu1  ;;  %v1807_v61 = vpack.c.bf16 %v1358_v56, %v1357_v52  ;;  %v1938_v53 = vadd.f32 %v1937_v49, %v1936_v41 }
 0x122   : > { %v1356_v63 = vsel %vm1285_vm8, %v1253_v48, %v1324_v42  ;;  %v1256_v0 = vadd.f32 %v2387_v44, %v1048_v55  ;;  %v1059_v1 = vadd.f32 %v2029_v58, %v1935_v54 }
 0x123   : > { %v1940_v2 = vpop.f32.mrf.mxu0  ;;  %v1050_v3 = vpop.f32.mrf.mxu1  ;;  %1871 = vst [vmem:[%s2409_s21 + $0x18] sm:$0xff] %v1807_v61   ;;  %v1802_v4 = vpack.c.bf16 %v1356_v63, %v1355_v62  ;;  %v1329_v5 = vmul.f32 %v2393_v51, %v1258_v47  ;;  %vm1290_vm9 = vcmp.ge.f32.partialorder %v1258_v47, 0.0 }
 0x124   : > { %v1259_v7 = vadd.f32 %v2387_v44, %v1059_v1  ;;  %v1051_v8 = vadd.f32 %v1929_v60, %v1050_v3  ;;  %v1327_v59 = vmul.f32 %v2393_v51, %v1256_v0  ;;  %vm1288_vm11 = vcmp.ge.f32.partialorder %v1256_v0, 0.0 }
 0x125   : > { %v1942_v9 = vpop.f32.mrf.mxu0  ;;  %v2032_v10 = vpop.f32.mrf.mxu1  ;;  %1870 = vst [vmem:[%s2409_s21 + $0x10] sm:$0xff] %v1802_v4   ;;  %v1361_v19 = vsel %vm1290_vm9, %v1258_v47, %v1329_v5  ;;  %v1941_v32 = vadd.f32 %v1940_v2, %v1939_v57 }
 0x126   : > { %vm1291_vm10 = vcmp.ge.f32.partialorder %v1259_v7, 0.0  ;;  %v1330_v12 = vmul.f32 %v2393_v51, %v1259_v7  ;;  %v1257_v13 = vadd.f32 %v2387_v44, %v1051_v8  ;;  %v1359_v30 = vsel %vm1288_vm11, %v1256_v0, %v1327_v59 }
 0x127   : > { %v1943_v14 = vpop.f32.mrf.mxu0  ;;  %v1063_v15 = vpop.f32.mrf.mxu1 }
 0x128   : > { %v1944_v17 = vadd.f32 %v1943_v14, %v1942_v9  ;;  %v1064_v18 = vadd.f32 %v1938_v53, %v1063_v15  ;;  %v1362_v20 = vsel %vm1291_vm10, %v1259_v7, %v1330_v12  ;;  %vm1289_vm12 = vcmp.ge.f32.partialorder %v1257_v13, 0.0 }
 0x129   : > { %v1328_v22 = vmul.f32 %v2393_v51, %v1257_v13  ;;  %v1945_v23 = vpop.f32.mrf.mxu0  ;;  %v2033_v24 = vpop.f32.mrf.mxu1  ;;  %v1817_v25 = vpack.c.bf16 %v1362_v20, %v1361_v19 }
 0x12a   : > { %v1072_v28 = vadd.f32 %v2032_v10, %v1944_v17  ;;  %v1260_v34 = vadd.f32 %v2387_v44, %v1064_v18 }
 0x12b   : > { %v1360_v33 = vsel %vm1289_vm12, %v1257_v13, %v1328_v22  ;;  %v1946_v35 = vpop.f32.mrf.mxu0  ;;  %v1066_v37 = vpop.f32.mrf.mxu1  ;;  %1873 = vst [vmem:[%s2409_s21 + $0x28] sm:$0xff] %v1817_v25  }
 0x12c   : > { %v1812_v39 = vpack.c.bf16 %v1360_v33, %v1359_v30  ;;  %v1262_v41 = vadd.f32 %v2387_v44, %v1072_v28  ;;  %v1947_v43 = vadd.f32 %v1946_v35, %v1945_v23  ;;  %v1067_v45 = vadd.f32 %v1941_v32, %v1066_v37 }
 0x12d   : > { %v1948_v27 = vpop.f32.mrf.mxu0  ;;  %v2036_v29 = vpop.f32.mrf.mxu1  ;;  %v1331_v46 = vmul.f32 %v2393_v51, %v1260_v34  ;;  %vm1292_vm13 = vcmp.ge.f32.partialorder %v1260_v34, 0.0 }
 0x12e   : > { %1872 = vst [vmem:[%s2409_s21 + $0x20] sm:$0xff] %v1812_v39   ;;  %v1075_v48 = vadd.f32 %v2033_v24, %v1947_v43  ;;  %v1261_v49 = vadd.f32 %v2387_v44, %v1067_v45  ;;  %v1333_v55 = vmul.f32 %v2393_v51, %v1262_v41  ;;  %vm1294_vm15 = vcmp.ge.f32.partialorder %v1262_v41, 0.0 }
 0x12f   : > { %v1949_v50 = vpop.f32.mrf.mxu0  ;;  %v1079_v52 = vpop.f32.mrf.mxu1  ;;  %v1363_v60 = vsel %vm1292_vm13, %v1260_v34, %v1331_v46 }
 0x130   : > { %v1950_v54 = vadd.f32 %v1949_v50, %v1948_v27  ;;  %v1263_v56 = vadd.f32 %v2387_v44, %v1075_v48  ;;  %vm1293_vm14 = vcmp.ge.f32.partialorder %v1261_v49, 0.0  ;;  %v1332_v42 = vmul.f32 %v2393_v51, %v1261_v49 }
 0x131   : > { %v1951_v47 = vpop.f32.mrf.mxu0  ;;  %v2037_v57 = vpop.f32.mrf.mxu1  ;;  %v1365_v4 = vsel %vm1294_vm15, %v1262_v41, %v1333_v55 }
 0x132   : > { %v1080_v58 = vadd.f32 %v1950_v54, %v1079_v52  ;;  %vm1295_vm0 = vcmp.ge.f32.partialorder %v1263_v56, 0.0  ;;  %v1334_v61 = vmul.f32 %v2393_v51, %v1263_v56  ;;  %v1364_v62 = vsel %vm1293_vm14, %v1261_v49, %v1332_v42 }
 0x133   : > { %v1952_v63 = vpop.f32.mrf.mxu0  ;;  %v1082_v0 = vpop.f32.mrf.mxu1  ;;  %v1822_v1 = vpack.c.bf16 %v1364_v62, %v1363_v60 }
 0x134   : > { %v1264_v2 = vadd.f32 %v2387_v44, %v1080_v58  ;;  %v1953_v3 = vadd.f32 %v1952_v63, %v1951_v47  ;;  %v1366_v5 = vsel %vm1295_vm0, %v1263_v56, %v1334_v61 }
 0x135   : > { %v1954_v7 = vpop.f32.mrf.mxu0  ;;  %v2445_v8 = vpop.f32.mrf.mxu1  ;;  %v1827_v9 = vpack.c.bf16 %v1366_v5, %v1365_v4  ;;  %1874 = vst [vmem:[%s2409_s21 + $0x30] sm:$0xff] %v1822_v1  }
 0x136   : > { %v1083_v10 = vadd.f32 %v1953_v3, %v1082_v0  ;;  %v1335_v12 = vmul.f32 %v2393_v51, %v1264_v2  ;;  %vm1296_vm1 = vcmp.ge.f32.partialorder %v1264_v2, 0.0 }
 0x137   : > { %v1955_v53 = vpop.f32.mrf.mxu0  ;;  %v1095_v59 = vpop.f32.mrf.mxu1  ;;  %1875 = vst [vmem:[%s2409_s21 + $0x38] sm:$0xff] %v1827_v9  }
 0x138   : > { %v1265_v13 = vadd.f32 %v2387_v44, %v1083_v10  ;;  %v1956_v14 = vadd.f32 %v1955_v53, %v1954_v7  ;;  %v1367_v23 = vsel %vm1296_vm1, %v1264_v2, %v1335_v12  ;;  %v1995_v2 = vadd.f32 %v2382_v40, %v2380_v38 }
 0x139   : > { %v1957_v15 = vpop.f32.mrf.mxu0  ;;  %v2451_v17 = vpop.f32.mrf.mxu1 }
 0x13a   : > { %vm1297_vm2 = vcmp.ge.f32.partialorder %v1265_v13, 0.0  ;;  %v1336_v18 = vmul.f32 %v2393_v51, %v1265_v13  ;;  %v1088_v19 = vadd.f32 %v2036_v29, %v1956_v14 }
 0x13b   : > { %v1958_v20 = vpop.f32.mrf.mxu0  ;;  %v1098_v22 = vpop.f32.mrf.mxu1 }
 0x13c   : > { %v1368_v24 = vsel %vm1297_vm2, %v1265_v13, %v1336_v18  ;;  %v1266_v25 = vadd.f32 %v2387_v44, %v1088_v19  ;;  %v1959_v28 = vadd.f32 %v1958_v20, %v1957_v15 }
 0x13d   : > { %v1832_v30 = vpack.c.bf16 %v1368_v24, %v1367_v23  ;;  %v1960_v32 = vpop.f32.mrf.mxu0  ;;  %v2044_v33 = vpop.f32.mrf.mxu1 }
 0x13e   : > { %v1091_v34 = vadd.f32 %v2037_v57, %v1959_v28  ;;  %v1120_v35 = vadd.f32 %v2044_v33, %v2370_v16  ;;  %v1337_v37 = vmul.f32 %v2393_v51, %v1266_v25  ;;  %vm1298_vm3 = vcmp.ge.f32.partialorder %v1266_v25, 0.0 }
 0x13f   : > { %1876 = vst [vmem:[%s2409_s21 + $0x40] sm:$0xff] %v1832_v30   ;;  %v1961_v39 = vpop.f32.mrf.mxu0  ;;  %v1111_v41 = vpop.f32.mrf.mxu1 }
 0x140   : > { %v1267_v43 = vadd.f32 %v2387_v44, %v1091_v34  ;;  %v1274_v45 = vadd.f32 %v2387_v44, %v1120_v35  ;;  %v1962_v27 = vadd.f32 %v1961_v39, %v1960_v32  ;;  %v1112_v29 = vadd.f32 %v2366_v6, %v1111_v41 }
 0x141   : > { %v1963_v46 = vpop.f32.mrf.mxu0  ;;  %v2045_v48 = vpop.f32.mrf.mxu1  ;;  %v1369_v50 = vsel %vm1298_vm3, %v1266_v25, %v1337_v37 }
 0x142   : > { %vm1299_vm4 = vcmp.ge.f32.partialorder %v1267_v43, 0.0  ;;  %v1338_v49 = vmul.f32 %v2393_v51, %v1267_v43  ;;  %v1096_v16 = vadd.f32 %v1962_v27, %v1095_v59  ;;  %v1272_v52 = vadd.f32 %v2387_v44, %v1112_v29 }
 0x143   : > { %v1123_v54 = vadd.f32 %v2045_v48, %v2372_v21  ;;  %v1964_v55 = vpop.f32.mrf.mxu0  ;;  %v1114_v56 = vpop.f32.mrf.mxu1  ;;  %vm1306_vm5 = vcmp.ge.f32.partialorder %v1274_v45, 0.0  ;;  %v1345_v58 = vmul.f32 %v2393_v51, %v1274_v45 }
 0x144   : > { %v1370_v42 = vsel %vm1299_vm4, %v1267_v43, %v1338_v49  ;;  %v1965_v47 = vadd.f32 %v1964_v55, %v1963_v46  ;;  %v1115_v57 = vadd.f32 %v2368_v11, %v1114_v56  ;;  %v1268_v60 = vadd.f32 %v2387_v44, %v1096_v16 }
 0x145   : > { %v1837_v6 = vpack.c.bf16 %v1370_v42, %v1369_v50  ;;  %v1343_v61 = vmul.f32 %v2393_v51, %v1272_v52  ;;  %v1966_v62 = vpop.f32.mrf.mxu0  ;;  %v2048_v63 = vpop.f32.mrf.mxu1  ;;  %vm1304_vm6 = vcmp.ge.f32.partialorder %v1272_v52, 0.0  ;;  %v1275_v21 = vadd.f32 %v2387_v44, %v1123_v54 }
 0x146   : > { %v1099_v0 = vadd.f32 %v1965_v47, %v1098_v22  ;;  %v1273_v1 = vadd.f32 %v2387_v44, %v1115_v57  ;;  %vm1300_vm7 = vcmp.ge.f32.partialorder %v1268_v60, 0.0  ;;  %v1339_v11 = vmul.f32 %v2393_v51, %v1268_v60 }
 0x147   : > { %1877 = vst [vmem:[%s2409_s21 + $0x48] sm:$0xff] %v1837_v6   ;;  %v1136_v3 = vadd.f32 %v2048_v63, %v2378_v36  ;;  %v1967_v4 = vpop.f32.mrf.mxu0  ;;  %v1127_v5 = vpop.f32.mrf.mxu1  ;;  %vm1307_vm8 = vcmp.ge.f32.partialorder %v1275_v21, 0.0  ;;  %v1346_v7 = vmul.f32 %v2393_v51, %v1275_v21  ;;  %v1377_v10 = vsel %vm1306_vm5, %v1274_v45, %v1345_v58 }
 0x148   : > { %v1269_v9 = vadd.f32 %v2387_v44, %v1099_v0  ;;  %vm1305_vm9 = vcmp.ge.f32.partialorder %v1273_v1, 0.0  ;;  %v1375_v53 = vsel %vm1304_vm6, %v1272_v52, %v1343_v61  ;;  %v1344_v38 = vmul.f32 %v2393_v51, %v1273_v1 }
 0x149   : > { %v1968_v40 = vadd.f32 %v1967_v4, %v1966_v62  ;;  %v1969_v59 = vpop.f32.mrf.mxu0  ;;  %v2049_v12 = vpop.f32.mrf.mxu1  ;;  %v1378_v13 = vsel %vm1307_vm8, %v1275_v21, %v1346_v7  ;;  %v1128_v14 = vadd.f32 %v2374_v26, %v1127_v5  ;;  %v1371_v15 = vsel %vm1300_vm7, %v1268_v60, %v1339_v11 }
 0x14a   : > { %vm1301_vm10 = vcmp.ge.f32.partialorder %v1269_v9, 0.0  ;;  %v1340_v36 = vmul.f32 %v2393_v51, %v1269_v9  ;;  %v1857_v18 = vpack.c.bf16 %v1378_v13, %v1377_v10  ;;  %v1376_v19 = vsel %vm1305_vm9, %v1273_v1, %v1344_v38 }
 0x14b   : > { %v1278_v20 = vadd.f32 %v2387_v44, %v1136_v3  ;;  %v1970_v22 = vpop.f32.mrf.mxu0  ;;  %v1130_v23 = vpop.f32.mrf.mxu1  ;;  %v1852_v25 = vpack.c.bf16 %v1376_v19, %v1375_v53  ;;  %v1104_v28 = vadd.f32 %v2445_v8, %v1968_v40  ;;  %v1276_v30 = vadd.f32 %v2387_v44, %v1128_v14 }
 0x14c   : > { %v1372_v24 = vsel %vm1301_vm10, %v1269_v9, %v1340_v36  ;;  %1881 = vst [vmem:[%s2409_s21 + $0x68] sm:$0xff] %v1857_v18   ;;  %v1139_v33 = vadd.f32 %v2049_v12, %v1995_v2  ;;  %v1971_v34 = vadd.f32 %v1970_v22, %v1969_v59  ;;  %v1131_v35 = vadd.f32 %v2376_v31, %v1130_v23 }
 0x14d   : > { %v1842_v32 = vpack.c.bf16 %v1372_v24, %v1371_v15  ;;  %1880 = vst [vmem:[%s2409_s21 + $0x60] sm:$0xff] %v1852_v25   ;;  %v1270_v26 = vadd.f32 %v2387_v44, %v1104_v28  ;;  %v1349_v37 = vmul.f32 %v2393_v51, %v1278_v20  ;;  %vm1310_vm11 = vcmp.ge.f32.partialorder %v1278_v20, 0.0 }
 0x14e   : > { %v1279_v39 = vadd.f32 %v2387_v44, %v1139_v33  ;;  %v1107_v41 = vadd.f32 %v2451_v17, %v1971_v34  ;;  %vm1308_vm12 = vcmp.ge.f32.partialorder %v1276_v30, 0.0  ;;  %v1347_v8 = vmul.f32 %v2393_v51, %v1276_v30 }
 0x14f   : > { %1878 = vst [vmem:[%s2409_s21 + $0x50] sm:$0xff] %v1842_v32   ;;  %v1277_v43 = vadd.f32 %v2387_v44, %v1131_v35  ;;  %v1341_v45 = vmul.f32 %v2393_v51, %v1270_v26  ;;  %vm1302_vm14 = vcmp.ge.f32.partialorder %v1270_v26, 0.0  ;;  %v1381_v29 = vsel %vm1310_vm11, %v1278_v20, %v1349_v37 }
 0x150   : > { %vm1311_vm13 = vcmp.ge.f32.partialorder %v1279_v39, 0.0  ;;  %v1350_v27 = vmul.f32 %v2393_v51, %v1279_v39  ;;  %v1271_v31 = vadd.f32 %v2387_v44, %v1107_v41  ;;  %v1379_v49 = vsel %vm1308_vm12, %v1276_v30, %v1347_v8 }
 0x151   : > { %vm1309_vm15 = vcmp.ge.f32.partialorder %v1277_v43, 0.0  ;;  %v1348_v17 = vmul.f32 %v2393_v51, %v1277_v43  ;;  %v1373_v52 = vsel %vm1302_vm14, %v1270_v26, %v1341_v45 }
 0x152   : > { %v1382_v46 = vsel %vm1311_vm13, %v1279_v39, %v1350_v27  ;;  %vm1303_vm0 = vcmp.ge.f32.partialorder %v1271_v31, 0.0  ;;  %v1342_v48 = vmul.f32 %v2393_v51, %v1271_v31 }
 0x153   : > { %v1867_v50 = vpack.c.bf16 %v1382_v46, %v1381_v29  ;;  %v1380_v16 = vsel %vm1309_vm15, %v1277_v43, %v1348_v17 }
 0x154   : > { %v1374_v54 = vsel %vm1303_vm0, %v1271_v31, %v1342_v48  ;;  %v1862_v55 = vpack.c.bf16 %v1380_v16, %v1379_v49 }
 0x155   : > { %1883 = vst [vmem:[%s2409_s21 + $0x78] sm:$0xff] %v1867_v50   ;;  %v1847_v56 = vpack.c.bf16 %v1374_v54, %v1373_v52 }
 0x156   : > { %1882 = vst [vmem:[%s2409_s21 + $0x70] sm:$0xff] %v1862_v55  }
 0x157   : > { %1879 = vst [vmem:[%s2409_s21 + $0x58] sm:$0xff] %v1847_v56  }
 0x158 PF: > { %s14_s17 = sadd.s32 1, %s2195_s17   ;;  %s2518_s15 = smov %s2191_s16 }
 0x159   : > { %p11_p5 = scmp.ge.s32.totalorder %s14_s17, 4   ;;  %s2519_s16 = smov %s2521_s18 }
 0x15b   :  { %13 = sbr.rel (!%p11_p5) target bundleno = 2 (0x2), region = 77 }

// kernel: gen_forward.26
= control target key start
LH: loop header
LB: loop body
LE: loop exit
PB: predicated region body
PF: predicated region fallthrough
CT: control target
= control target key end

     0   :  { %s1545_s1 = inlined_call_operand.vmem [shape: bf16[512,128], index: 1, kind: input, shape index: {}]   ;;  %s1546_s0 = inlined_call_operand.vmem [shape: bf16[128,512], index: 0, kind: input, shape index: {}]   ;;  %s1547_s2 = inlined_call_operand.vmem [shape: f32[1,128], index: 2, kind: input, shape index: {}]   ;;  %s1548_s3 = inlined_call_operand.vmem [shape: f32[1,128], index: 3, kind: input, shape index: {}]   ;;  %s1549_s4 = inlined_call_operand.vmem [shape: bf16[128,128], index: 4, kind: output, shape index: {}]  }
   0x1   :  { %v1182_v0 = vld [vmem:[%s1545_s1 + $0x78] sm:$0xff]   ;;  %v1186_v4 = vld [vmem:[%s1545_s1 + $0x70] sm:$0xff]   ;;  %v1190_v8 = vld [vmem:[%s1545_s1 + $0x68] sm:$0xff]  }
   0x2   :  { %v1183_v1 = vld [vmem:[%s1545_s1 + $0xf8] sm:$0xff]   ;;  %1054 = vmatprep.subr.bf16.mxu0 %v1182_v0  ;;  %v1187_v5 = vld [vmem:[%s1545_s1 + $0xf0] sm:$0xff]   ;;  %v1191_v9 = vld [vmem:[%s1545_s1 + $0xe8] sm:$0xff]  }
   0x3   :  { %v1184_v2 = vld [vmem:[%s1545_s1 + $0x38] sm:$0xff]   ;;  %1118 = vmatprep.subr.bf16.mxu1 %v1183_v1  ;;  %v1188_v6 = vld [vmem:[%s1545_s1 + $0x30] sm:$0xff]   ;;  %v1192_v10 = vld [vmem:[%s1545_s1 + $0x28] sm:$0xff]  }
   0x4   :  { %v1185_v3 = vld [vmem:[%s1545_s1 + $0xb8] sm:$0xff]   ;;  %1055 = vmatpush3.bf16.msra.mxu0 %v1184_v2  ;;  %v1189_v7 = vld [vmem:[%s1545_s1 + $0xb0] sm:$0xff]   ;;  %v1193_v11 = vld [vmem:[%s1545_s1 + $0xa8] sm:$0xff]  }
   0x5   :  { %1119 = vmatpush3.bf16.msra.mxu1 %v1185_v3  ;;  %1056 = vmatprep.subr.bf16.mxu0 %v1186_v4  ;;  %v1194_v12 = vld [vmem:[%s1545_s1 + $0x60] sm:$0xff]   ;;  %v1198_v16 = vld [vmem:[%s1545_s1 + $0x58] sm:$0xff]   ;;  %v1202_v20 = vld [vmem:[%s1545_s1 + $0x50] sm:$0xff]  }
   0x6   :  { %1120 = vmatprep.subr.bf16.mxu1 %v1187_v5  ;;  %v1195_v13 = vld [vmem:[%s1545_s1 + $0xe0] sm:$0xff]   ;;  %v1199_v17 = vld [vmem:[%s1545_s1 + $0xd8] sm:$0xff]   ;;  %v1203_v21 = vld [vmem:[%s1545_s1 + $0xd0] sm:$0xff]  }
   0x7   :  { %v1196_v14 = vld [vmem:[%s1545_s1 + $0x20] sm:$0xff]   ;;  %v1200_v18 = vld [vmem:[%s1545_s1 + $0x18] sm:$0xff]   ;;  %v1204_v22 = vld [vmem:[%s1545_s1 + $0x10] sm:$0xff]  }
   0x8   :  { %1057 = vmatpush3.bf16.msra.mxu0 %v1188_v6  ;;  %v1197_v15 = vld [vmem:[%s1545_s1 + $0xa0] sm:$0xff]   ;;  %v1201_v19 = vld [vmem:[%s1545_s1 + $0x98] sm:$0xff]   ;;  %v1205_v23 = vld [vmem:[%s1545_s1 + $0x90] sm:$0xff]  }
   0x9   :  { %1121 = vmatpush3.bf16.msra.mxu1 %v1189_v7  ;;  %1058 = vmatprep.subr.bf16.mxu0 %v1190_v8  ;;  %v1206_v24 = vld [vmem:[%s1545_s1 + $0x48] sm:$0xff]   ;;  %v1210_v28 = vld [vmem:[%s1545_s1 + $0x40] sm:$0xff]  }
   0xa   :  { %1122 = vmatprep.subr.bf16.mxu1 %v1191_v9  ;;  %v1207_v25 = vld [vmem:[%s1545_s1 + $0xc8] sm:$0xff]   ;;  %v1211_v29 = vld [vmem:[%s1545_s1 + $0xc0] sm:$0xff]  }
   0xb   :  { %v1208_v26 = vld [vmem:[%s1545_s1 + $0x8] sm:$0xff]   ;;  %v1212_v30 = vld [vmem:[%s1545_s1] sm:$0xff]  }
   0xc   :  { %1059 = vmatpush3.bf16.msra.mxu0 %v1192_v10  ;;  %v1209_v27 = vld [vmem:[%s1545_s1 + $0x88] sm:$0xff]   ;;  %v1213_v31 = vld [vmem:[%s1545_s1 + $0x80] sm:$0xff]  }
   0xd   :  { %1123 = vmatpush3.bf16.msra.mxu1 %v1193_v11  ;;  %1060 = vmatprep.subr.bf16.mxu0 %v1194_v12  ;;  %v1214_v32 = vld [vmem:[%s1546_s0] ss:$16 sps:$4 sm:$0xff]   ;;  %v1216_v33 = vld [vmem:[%s1546_s0 + $0x4] ss:$16 sps:$4 sm:$0xff]   ;;  %v1217_v34 = vld [vmem:[%s1546_s0 + $0x8] ss:$16 sps:$4 sm:$0xff]  }
   0xe   :  { %1124 = vmatprep.subr.bf16.mxu1 %v1195_v13  ;;  %v1219_v35 = vld [vmem:[%s1546_s0 + $0xc] ss:$16 sps:$4 sm:$0xff]   ;;  %534 = vmatprep.mubr.bf16.mxu0 %v1216_v33  ;;  %v1220_v36 = vld [vmem:[%s1546_s0 + $0x24] ss:$16 sps:$4 sm:$0xff]   ;;  %v1224_v38 = vld [vmem:[%s1546_s0 + $0x20] ss:$16 sps:$4 sm:$0xff]  }
   0xf   :  { %631 = vmatprep.mubr.bf16.mxu1 %v1219_v35  ;;  %v1222_v37 = vld [vmem:[%s1546_s0 + $0x2c] ss:$16 sps:$4 sm:$0xff]   ;;  %v1225_v39 = vld [vmem:[%s1546_s0 + $0x28] ss:$16 sps:$4 sm:$0xff]   ;;  %v1226_v40 = vld [vmem:[%s1546_s0 + $0x44] ss:$16 sps:$4 sm:$0xff]  }
  0x10   :  { %1061 = vmatpush3.bf16.msra.mxu0 %v1196_v14  ;;  %v1228_v41 = vld [vmem:[%s1546_s0 + $0x4c] ss:$16 sps:$4 sm:$0xff]   ;;  %v1230_v42 = vld [vmem:[%s1546_s0 + $0x40] ss:$16 sps:$4 sm:$0xff]   ;;  %v1231_v43 = vld [vmem:[%s1546_s0 + $0x48] ss:$16 sps:$4 sm:$0xff]  }
  0x11   :  { %1125 = vmatpush3.bf16.msra.mxu1 %v1197_v15  ;;  %1062 = vmatprep.subr.bf16.mxu0 %v1198_v16  ;;  %v1232_v44 = vld [vmem:[%s1546_s0 + $0x64] ss:$16 sps:$4 sm:$0xff]   ;;  %v1234_v45 = vld [vmem:[%s1546_s0 + $0x6c] ss:$16 sps:$4 sm:$0xff]   ;;  %v1236_v46 = vld [vmem:[%s1546_s0 + $0x60] ss:$16 sps:$4 sm:$0xff]  }
  0x12   :  { %1126 = vmatprep.subr.bf16.mxu1 %v1199_v17  ;;  %v1237_v47 = vld [vmem:[%s1546_s0 + $0x68] ss:$16 sps:$4 sm:$0xff]   ;;  %v1238_v48 = vld [vmem:[%s1546_s0 + $0x84] ss:$16 sps:$4 sm:$0xff]   ;;  %v1240_v49 = vld [vmem:[%s1546_s0 + $0x8c] ss:$16 sps:$4 sm:$0xff]  }
  0x13   :  { %v1242_v50 = vld [vmem:[%s1546_s0 + $0x80] ss:$16 sps:$4 sm:$0xff]   ;;  %v1243_v51 = vld [vmem:[%s1546_s0 + $0x88] ss:$16 sps:$4 sm:$0xff]   ;;  %v1244_v52 = vld [vmem:[%s1546_s0 + $0xa4] ss:$16 sps:$4 sm:$0xff]  }
  0x14   :  { %1063 = vmatpush3.bf16.msra.mxu0 %v1200_v18  ;;  %v1246_v53 = vld [vmem:[%s1546_s0 + $0xac] ss:$16 sps:$4 sm:$0xff]   ;;  %v1248_v54 = vld [vmem:[%s1546_s0 + $0xa0] ss:$16 sps:$4 sm:$0xff]   ;;  %v1249_v55 = vld [vmem:[%s1546_s0 + $0xa8] ss:$16 sps:$4 sm:$0xff]  }
  0x15   :  { %1127 = vmatpush3.bf16.msra.mxu1 %v1201_v19  ;;  %1064 = vmatprep.subr.bf16.mxu0 %v1202_v20  ;;  %v1250_v56 = vld [vmem:[%s1546_s0 + $0xc4] ss:$16 sps:$4 sm:$0xff]   ;;  %v1252_v57 = vld [vmem:[%s1546_s0 + $0xcc] ss:$16 sps:$4 sm:$0xff]   ;;  %v1254_v58 = vld [vmem:[%s1546_s0 + $0xc0] ss:$16 sps:$4 sm:$0xff]  }
  0x16   :  { %1128 = vmatprep.subr.bf16.mxu1 %v1203_v21  ;;  %v1255_v59 = vld [vmem:[%s1546_s0 + $0xc8] ss:$16 sps:$4 sm:$0xff]   ;;  %v1256_v60 = vld [vmem:[%s1546_s0 + $0xe4] ss:$16 sps:$4 sm:$0xff]   ;;  %v1258_v61 = vld [vmem:[%s1546_s0 + $0xec] ss:$16 sps:$4 sm:$0xff]  }
  0x17   :  { %v1260_v62 = vld [vmem:[%s1546_s0 + $0xe0] ss:$16 sps:$4 sm:$0xff]   ;;  %v1261_v63 = vld [vmem:[%s1546_s0 + $0xe8] ss:$16 sps:$4 sm:$0xff]  }
  0x18   :  { %1065 = vmatpush3.bf16.msra.mxu0 %v1204_v22  ;;  %v1482_v7 = vld [vmem:[%s1547_s2] ss:$0 sm:$0xff] }
  0x19   :  { %1129 = vmatpush3.bf16.msra.mxu1 %v1205_v23  ;;  %1066 = vmatprep.subr.bf16.mxu0 %v1206_v24  ;;  %v1488_v16 = vld [vmem:[%s1548_s3] ss:$0 sm:$0xff] }
  0x1a   :  { %1130 = vmatprep.subr.bf16.mxu1 %v1207_v25 }
  0x1c   :  { %1067 = vmatpush3.bf16.msra.mxu0 %v1208_v26 }
  0x1d   :  { %1131 = vmatpush3.bf16.msra.mxu1 %v1209_v27  ;;  %1068 = vmatprep.subr.bf16.mxu0 %v1210_v28 }
  0x1e   :  { %1132 = vmatprep.subr.bf16.mxu1 %v1211_v29 }
  0x20   :  { %1069 = vmatpush3.bf16.msra.mxu0 %v1212_v30 }
  0x21   :  { %1133 = vmatpush3.bf16.msra.mxu1 %v1213_v31 }
  0x23   :  { %535 = vmatmul.mubr.bf16.vlgmr.msra.gmra.mxu0 %v1214_v32 }
  0x24   :  { %632 = vmatmul.mubr.bf16.vlgmr.msra.gmra.mxu1 %v1217_v34  ;;  %542 = vmatprep.mubr.bf16.mxu0 %v1220_v36 }
  0x25   :  { %639 = vmatprep.mubr.bf16.mxu1 %v1222_v37 }
  0x2b   :  { %543 = vmatmul.mubr.bf16.gmra.mxu0 %v1224_v38 }
  0x2c   :  { %640 = vmatmul.mubr.bf16.gmra.mxu1 %v1225_v39  ;;  %550 = vmatprep.mubr.bf16.mxu0 %v1226_v40 }
  0x2d   :  { %647 = vmatprep.mubr.bf16.mxu1 %v1228_v41 }
  0x33   :  { %551 = vmatmul.mubr.bf16.gmra.mxu0 %v1230_v42 }
  0x34   :  { %648 = vmatmul.mubr.bf16.gmra.mxu1 %v1231_v43  ;;  %558 = vmatprep.mubr.bf16.mxu0 %v1232_v44 }
  0x35   :  { %655 = vmatprep.mubr.bf16.mxu1 %v1234_v45 }
  0x3b   :  { %559 = vmatmul.mubr.bf16.gmra.mxu0 %v1236_v46 }
  0x3c   :  { %656 = vmatmul.mubr.bf16.gmra.mxu1 %v1237_v47  ;;  %566 = vmatprep.mubr.bf16.mxu0 %v1238_v48 }
  0x3d   :  { %663 = vmatprep.mubr.bf16.mxu1 %v1240_v49 }
  0x43   :  { %567 = vmatmul.mubr.bf16.gmra.mxu0 %v1242_v50 }
  0x44   :  { %664 = vmatmul.mubr.bf16.gmra.mxu1 %v1243_v51  ;;  %574 = vmatprep.mubr.bf16.mxu0 %v1244_v52 }
  0x45   :  { %671 = vmatprep.mubr.bf16.mxu1 %v1246_v53 }
  0x4b   :  { %575 = vmatmul.mubr.bf16.gmra.mxu0 %v1248_v54 }
  0x4c   :  { %672 = vmatmul.mubr.bf16.gmra.mxu1 %v1249_v55  ;;  %582 = vmatprep.mubr.bf16.mxu0 %v1250_v56 }
  0x4d   :  { %679 = vmatprep.mubr.bf16.mxu1 %v1252_v57 }
  0x53   :  { %583 = vmatmul.mubr.bf16.gmra.mxu0 %v1254_v58 }
  0x54   :  { %680 = vmatmul.mubr.bf16.gmra.mxu1 %v1255_v59  ;;  %590 = vmatprep.mubr.bf16.mxu0 %v1256_v60 }
  0x55   :  { %687 = vmatprep.mubr.bf16.mxu1 %v1258_v61 }
  0x5b   :  { %591 = vmatmul.mubr.bf16.gmra.mxu0 %v1260_v62 }
  0x5c   :  { %688 = vmatmul.mubr.bf16.gmra.mxu1 %v1261_v63 }
  0xe3   :  { %v1070_v0 = vpop.f32.mrf.mxu0 }
  0xe4   :  { %v1134_v1 = vpop.f32.mrf.mxu1 }
  0xe5   :  { %v1071_v2 = vpop.f32.mrf.mxu0 }
  0xe6   :  { %v1072_v3 = vadd.f32 %v1071_v2, %v1070_v0  ;;  %v1135_v4 = vpop.f32.mrf.mxu1 }
  0xe7   :  { %v1136_v5 = vadd.f32 %v1135_v4, %v1134_v1  ;;  %v1073_v6 = vpop.f32.mrf.mxu0 }
  0xe8   :  { %v1137_v8 = vpop.f32.mrf.mxu1 }
  0xe9   :  { %v634_v9 = vadd.f32 %v1136_v5, %v1072_v3  ;;  %v1074_v10 = vpop.f32.mrf.mxu0 }
  0xea   :  { %v1075_v11 = vadd.f32 %v1074_v10, %v1073_v6  ;;  %v1138_v12 = vpop.f32.mrf.mxu1 }
  0xeb   :  { %v754_v13 = vadd.f32 %v1482_v7, %v634_v9  ;;  %v1139_v14 = vadd.f32 %v1138_v12, %v1137_v8  ;;  %v1076_v15 = vpop.f32.mrf.mxu0 }
  0xec   :  { %v1140_v17 = vpop.f32.mrf.mxu1 }
  0xed   :  { %v637_v18 = vadd.f32 %v1139_v14, %v1075_v11  ;;  %v1077_v19 = vpop.f32.mrf.mxu0  ;;  %v793_v22 = vmul.f32 %v1488_v16, %v754_v13  ;;  %vm770_vm0 = vcmp.ge.f32.partialorder %v754_v13, 0.0 }
  0xee   :  { %v1078_v20 = vadd.f32 %v1077_v19, %v1076_v15  ;;  %v1141_v21 = vpop.f32.mrf.mxu1 }
  0xef   :  { %v755_v23 = vadd.f32 %v1482_v7, %v637_v18  ;;  %v1142_v24 = vadd.f32 %v1141_v21, %v1140_v17  ;;  %v1079_v25 = vpop.f32.mrf.mxu0  ;;  %v809_v32 = vsel %vm770_vm0, %v754_v13, %v793_v22 }
  0xf0   :  { %v1143_v26 = vpop.f32.mrf.mxu1 }
  0xf1   :  { %vm771_vm1 = vcmp.ge.f32.partialorder %v755_v23, 0.0  ;;  %v794_v27 = vmul.f32 %v1488_v16, %v755_v23  ;;  %v642_v28 = vadd.f32 %v1142_v24, %v1078_v20  ;;  %v1080_v29 = vpop.f32.mrf.mxu0 }
  0xf2   :  { %v1081_v30 = vadd.f32 %v1080_v29, %v1079_v25  ;;  %v1144_v31 = vpop.f32.mrf.mxu1 }
  0xf3   :  { %v810_v33 = vsel %vm771_vm1, %v755_v23, %v794_v27  ;;  %v756_v34 = vadd.f32 %v1482_v7, %v642_v28  ;;  %v1145_v35 = vadd.f32 %v1144_v31, %v1143_v26  ;;  %v1082_v36 = vpop.f32.mrf.mxu0 }
  0xf4   :  { %v1010_v37 = vpack.c.bf16 %v810_v33, %v809_v32  ;;  %v1146_v38 = vpop.f32.mrf.mxu1 }
  0xf5   :  { %v645_v39 = vadd.f32 %v1145_v35, %v1081_v30  ;;  %v1083_v40 = vpop.f32.mrf.mxu0  ;;  %v795_v43 = vmul.f32 %v1488_v16, %v756_v34  ;;  %vm772_vm2 = vcmp.ge.f32.partialorder %v756_v34, 0.0 }
  0xf6   :  { %1011 = vst [vmem:[%s1549_s4] sm:$0xff] %v1010_v37   ;;  %v1084_v41 = vadd.f32 %v1083_v40, %v1082_v36  ;;  %v1147_v42 = vpop.f32.mrf.mxu1 }
  0xf7   :  { %v757_v44 = vadd.f32 %v1482_v7, %v645_v39  ;;  %v1148_v45 = vadd.f32 %v1147_v42, %v1146_v38  ;;  %v1085_v46 = vpop.f32.mrf.mxu0  ;;  %v811_v53 = vsel %vm772_vm2, %v756_v34, %v795_v43 }
  0xf8   :  { %v1149_v47 = vpop.f32.mrf.mxu1 }
  0xf9   :  { %vm773_vm3 = vcmp.ge.f32.partialorder %v757_v44, 0.0  ;;  %v796_v48 = vmul.f32 %v1488_v16, %v757_v44  ;;  %v650_v49 = vadd.f32 %v1148_v45, %v1084_v41  ;;  %v1086_v50 = vpop.f32.mrf.mxu0 }
  0xfa   :  { %v1087_v51 = vadd.f32 %v1086_v50, %v1085_v46  ;;  %v1150_v52 = vpop.f32.mrf.mxu1 }
  0xfb   :  { %v812_v54 = vsel %vm773_vm3, %v757_v44, %v796_v48  ;;  %v758_v55 = vadd.f32 %v1482_v7, %v650_v49  ;;  %v1151_v56 = vadd.f32 %v1150_v52, %v1149_v47  ;;  %v1088_v57 = vpop.f32.mrf.mxu0 }
  0xfc   :  { %v1015_v58 = vpack.c.bf16 %v812_v54, %v811_v53  ;;  %v1152_v59 = vpop.f32.mrf.mxu1 }
  0xfd   :  { %v653_v60 = vadd.f32 %v1151_v56, %v1087_v51  ;;  %v1089_v61 = vpop.f32.mrf.mxu0  ;;  %v797_v0 = vmul.f32 %v1488_v16, %v758_v55  ;;  %vm774_vm4 = vcmp.ge.f32.partialorder %v758_v55, 0.0 }
  0xfe   :  { %1047 = vst [vmem:[%s1549_s4 + $0x8] sm:$0xff] %v1015_v58   ;;  %v1090_v62 = vadd.f32 %v1089_v61, %v1088_v57  ;;  %v1153_v63 = vpop.f32.mrf.mxu1 }
  0xff   :  { %v759_v1 = vadd.f32 %v1482_v7, %v653_v60  ;;  %v1154_v2 = vadd.f32 %v1153_v63, %v1152_v59  ;;  %v1091_v3 = vpop.f32.mrf.mxu0  ;;  %v813_v11 = vsel %vm774_vm4, %v758_v55, %v797_v0 }
 0x100   :  { %v1155_v4 = vpop.f32.mrf.mxu1 }
 0x101   :  { %vm775_vm5 = vcmp.ge.f32.partialorder %v759_v1, 0.0  ;;  %v798_v5 = vmul.f32 %v1488_v16, %v759_v1  ;;  %v658_v6 = vadd.f32 %v1154_v2, %v1090_v62  ;;  %v1092_v8 = vpop.f32.mrf.mxu0 }
 0x102   :  { %v1093_v9 = vadd.f32 %v1092_v8, %v1091_v3  ;;  %v1156_v10 = vpop.f32.mrf.mxu1 }
 0x103   :  { %v814_v12 = vsel %vm775_vm5, %v759_v1, %v798_v5  ;;  %v760_v13 = vadd.f32 %v1482_v7, %v658_v6  ;;  %v1157_v14 = vadd.f32 %v1156_v10, %v1155_v4  ;;  %v1094_v15 = vpop.f32.mrf.mxu0 }
 0x104   :  { %v1020_v17 = vpack.c.bf16 %v814_v12, %v813_v11  ;;  %v1158_v18 = vpop.f32.mrf.mxu1 }
 0x105   :  { %v661_v19 = vadd.f32 %v1157_v14, %v1093_v9  ;;  %v1095_v20 = vpop.f32.mrf.mxu0  ;;  %v799_v23 = vmul.f32 %v1488_v16, %v760_v13  ;;  %vm776_vm6 = vcmp.ge.f32.partialorder %v760_v13, 0.0 }
 0x106   :  { %1048 = vst [vmem:[%s1549_s4 + $0x10] sm:$0xff] %v1020_v17   ;;  %v1096_v21 = vadd.f32 %v1095_v20, %v1094_v15  ;;  %v1159_v22 = vpop.f32.mrf.mxu1 }
 0x107   :  { %v761_v24 = vadd.f32 %v1482_v7, %v661_v19  ;;  %v1160_v25 = vadd.f32 %v1159_v22, %v1158_v18  ;;  %v1097_v26 = vpop.f32.mrf.mxu0  ;;  %v815_v33 = vsel %vm776_vm6, %v760_v13, %v799_v23 }
 0x108   :  { %v1161_v27 = vpop.f32.mrf.mxu1 }
 0x109   :  { %vm777_vm7 = vcmp.ge.f32.partialorder %v761_v24, 0.0  ;;  %v800_v28 = vmul.f32 %v1488_v16, %v761_v24  ;;  %v666_v29 = vadd.f32 %v1160_v25, %v1096_v21  ;;  %v1098_v30 = vpop.f32.mrf.mxu0 }
 0x10a   :  { %v1099_v31 = vadd.f32 %v1098_v30, %v1097_v26  ;;  %v1162_v32 = vpop.f32.mrf.mxu1 }
 0x10b   :  { %v816_v34 = vsel %vm777_vm7, %v761_v24, %v800_v28  ;;  %v762_v35 = vadd.f32 %v1482_v7, %v666_v29  ;;  %v1163_v36 = vadd.f32 %v1162_v32, %v1161_v27  ;;  %v1100_v37 = vpop.f32.mrf.mxu0 }
 0x10c   :  { %v1025_v38 = vpack.c.bf16 %v816_v34, %v815_v33  ;;  %v1164_v39 = vpop.f32.mrf.mxu1 }
 0x10d   :  { %v669_v40 = vadd.f32 %v1163_v36, %v1099_v31  ;;  %v1101_v41 = vpop.f32.mrf.mxu0  ;;  %v801_v44 = vmul.f32 %v1488_v16, %v762_v35  ;;  %vm778_vm8 = vcmp.ge.f32.partialorder %v762_v35, 0.0 }
 0x10e   :  { %1049 = vst [vmem:[%s1549_s4 + $0x18] sm:$0xff] %v1025_v38   ;;  %v1102_v42 = vadd.f32 %v1101_v41, %v1100_v37  ;;  %v1165_v43 = vpop.f32.mrf.mxu1 }
 0x10f   :  { %v763_v45 = vadd.f32 %v1482_v7, %v669_v40  ;;  %v1166_v46 = vadd.f32 %v1165_v43, %v1164_v39  ;;  %v1103_v47 = vpop.f32.mrf.mxu0  ;;  %v817_v54 = vsel %vm778_vm8, %v762_v35, %v801_v44 }
 0x110   :  { %v1167_v48 = vpop.f32.mrf.mxu1 }
 0x111   :  { %vm779_vm9 = vcmp.ge.f32.partialorder %v763_v45, 0.0  ;;  %v802_v49 = vmul.f32 %v1488_v16, %v763_v45  ;;  %v674_v50 = vadd.f32 %v1166_v46, %v1102_v42  ;;  %v1104_v51 = vpop.f32.mrf.mxu0 }
 0x112   :  { %v1105_v52 = vadd.f32 %v1104_v51, %v1103_v47  ;;  %v1168_v53 = vpop.f32.mrf.mxu1 }
 0x113   :  { %v818_v55 = vsel %vm779_vm9, %v763_v45, %v802_v49  ;;  %v764_v56 = vadd.f32 %v1482_v7, %v674_v50  ;;  %v1169_v57 = vadd.f32 %v1168_v53, %v1167_v48  ;;  %v1106_v58 = vpop.f32.mrf.mxu0 }
 0x114   :  { %v1030_v59 = vpack.c.bf16 %v818_v55, %v817_v54  ;;  %v1170_v60 = vpop.f32.mrf.mxu1 }
 0x115   :  { %v677_v61 = vadd.f32 %v1169_v57, %v1105_v52  ;;  %v1107_v62 = vpop.f32.mrf.mxu0  ;;  %v803_v1 = vmul.f32 %v1488_v16, %v764_v56  ;;  %vm780_vm10 = vcmp.ge.f32.partialorder %v764_v56, 0.0 }
 0x116   :  { %1050 = vst [vmem:[%s1549_s4 + $0x20] sm:$0xff] %v1030_v59   ;;  %v1108_v63 = vadd.f32 %v1107_v62, %v1106_v58  ;;  %v1171_v0 = vpop.f32.mrf.mxu1 }
 0x117   :  { %v765_v2 = vadd.f32 %v1482_v7, %v677_v61  ;;  %v1172_v3 = vadd.f32 %v1171_v0, %v1170_v60  ;;  %v1109_v4 = vpop.f32.mrf.mxu0  ;;  %v819_v12 = vsel %vm780_vm10, %v764_v56, %v803_v1 }
 0x118   :  { %v1173_v5 = vpop.f32.mrf.mxu1 }
 0x119   :  { %vm781_vm11 = vcmp.ge.f32.partialorder %v765_v2, 0.0  ;;  %v804_v6 = vmul.f32 %v1488_v16, %v765_v2  ;;  %v682_v8 = vadd.f32 %v1172_v3, %v1108_v63  ;;  %v1110_v9 = vpop.f32.mrf.mxu0 }
 0x11a   :  { %v1111_v10 = vadd.f32 %v1110_v9, %v1109_v4  ;;  %v1174_v11 = vpop.f32.mrf.mxu1 }
 0x11b   :  { %v820_v13 = vsel %vm781_vm11, %v765_v2, %v804_v6  ;;  %v766_v14 = vadd.f32 %v1482_v7, %v682_v8  ;;  %v1175_v15 = vadd.f32 %v1174_v11, %v1173_v5  ;;  %v1112_v17 = vpop.f32.mrf.mxu0 }
 0x11c   :  { %v1035_v18 = vpack.c.bf16 %v820_v13, %v819_v12  ;;  %v1176_v19 = vpop.f32.mrf.mxu1 }
 0x11d   :  { %v685_v20 = vadd.f32 %v1175_v15, %v1111_v10  ;;  %v1113_v21 = vpop.f32.mrf.mxu0  ;;  %v805_v24 = vmul.f32 %v1488_v16, %v766_v14  ;;  %vm782_vm12 = vcmp.ge.f32.partialorder %v766_v14, 0.0 }
 0x11e   :  { %1051 = vst [vmem:[%s1549_s4 + $0x28] sm:$0xff] %v1035_v18   ;;  %v1114_v22 = vadd.f32 %v1113_v21, %v1112_v17  ;;  %v1177_v23 = vpop.f32.mrf.mxu1 }
 0x11f   :  { %v767_v25 = vadd.f32 %v1482_v7, %v685_v20  ;;  %v1178_v26 = vadd.f32 %v1177_v23, %v1176_v19  ;;  %v1115_v27 = vpop.f32.mrf.mxu0  ;;  %v821_v34 = vsel %vm782_vm12, %v766_v14, %v805_v24 }
 0x120   :  { %v1179_v28 = vpop.f32.mrf.mxu1 }
 0x121   :  { %vm783_vm13 = vcmp.ge.f32.partialorder %v767_v25, 0.0  ;;  %v806_v29 = vmul.f32 %v1488_v16, %v767_v25  ;;  %v690_v30 = vadd.f32 %v1178_v26, %v1114_v22  ;;  %v1116_v31 = vpop.f32.mrf.mxu0 }
 0x122   :  { %v1117_v32 = vadd.f32 %v1116_v31, %v1115_v27  ;;  %v1180_v33 = vpop.f32.mrf.mxu1 }
 0x123   :  { %v822_v35 = vsel %vm783_vm13, %v767_v25, %v806_v29  ;;  %v768_v36 = vadd.f32 %v1482_v7, %v690_v30  ;;  %v1181_v37 = vadd.f32 %v1180_v33, %v1179_v28 }
 0x124   :  { %v1040_v38 = vpack.c.bf16 %v822_v35, %v821_v34 }
 0x125   :  { %v693_v39 = vadd.f32 %v1181_v37, %v1117_v32  ;;  %v807_v40 = vmul.f32 %v1488_v16, %v768_v36  ;;  %vm784_vm14 = vcmp.ge.f32.partialorder %v768_v36, 0.0 }
 0x126   :  { %1052 = vst [vmem:[%s1549_s4 + $0x30] sm:$0xff] %v1040_v38  }
 0x127   :  { %v769_v41 = vadd.f32 %v1482_v7, %v693_v39  ;;  %v823_v43 = vsel %vm784_vm14, %v768_v36, %v807_v40 }
 0x129   :  { %vm785_vm15 = vcmp.ge.f32.partialorder %v769_v41, 0.0  ;;  %v808_v42 = vmul.f32 %v1488_v16, %v769_v41 }
 0x12b   :  { %v824_v44 = vsel %vm785_vm15, %v769_v41, %v808_v42 }
 0x12c   :  { %v1045_v45 = vpack.c.bf16 %v824_v44, %v823_v43 }
 0x12e   :  { %1053 = vst [vmem:[%s1549_s4 + $0x38] sm:$0xff] %v1045_v45  }

// kernel: gen_forward.33
= control target key start
LH: loop header
LB: loop body
LE: loop exit
PB: predicated region body
PF: predicated region fallthrough
CT: control target
= control target key end

     0   :  { %vm350_vm0 = vcmask 261120   ;;  %s1322_s1 = inlined_call_operand.vmem [shape: bf16[288,128], index: 1, kind: input, shape index: {}]   ;;  %s1323_s0 = inlined_call_operand.vmem [shape: bf16[128,288], index: 0, kind: input, shape index: {}]   ;;  %s1324_s2 = inlined_call_operand.vmem [shape: f32[1,128], index: 2, kind: input, shape index: {}]   ;;  %s1325_s3 = inlined_call_operand.vmem [shape: f32[1,128], index: 3, kind: input, shape index: {}]   ;;  %s1326_s4 = inlined_call_operand.vmem [shape: bf16[128,128], index: 4, kind: output, shape index: {}]  }
   0x1   :  { %v1023_v0 = vld [vmem:[%s1322_s1 + $0x78] sm:$0xff]   ;;  %v1025_v2 = vld [vmem:[%s1322_s1 + $0x70] sm:$0xff]   ;;  %v1027_v4 = vld [vmem:[%s1322_s1 + $0x68] sm:$0xff]  }
   0x2   :  { %v1024_v1 = vld [vmem:[%s1322_s1 + $0x38] sm:$0xff]   ;;  %913 = vmatprep.subr.bf16.mxu0 %v1023_v0  ;;  %1007 = vmatprep.subr.bf16.mxu1 %v1023_v0  ;;  %v1026_v3 = vld [vmem:[%s1322_s1 + $0x30] sm:$0xff]   ;;  %v1028_v5 = vld [vmem:[%s1322_s1 + $0x28] sm:$0xff]  }
   0x3   :  { %914 = vmatpush3.bf16.msra.mxu0 %v1024_v1  ;;  %1015 = vmatpush3.bf16.msra.mxu1 %v1024_v1  ;;  %v1029_v6 = vld [vmem:[%s1322_s1 + $0x60] sm:$0xff]   ;;  %v1031_v8 = vld [vmem:[%s1322_s1 + $0x58] sm:$0xff]   ;;  %v1033_v10 = vld [vmem:[%s1322_s1 + $0x50] sm:$0xff]  }
   0x4   :  { %915 = vmatprep.subr.bf16.mxu0 %v1025_v2  ;;  %1008 = vmatprep.subr.bf16.mxu1 %v1025_v2  ;;  %v1030_v7 = vld [vmem:[%s1322_s1 + $0x20] sm:$0xff]   ;;  %v1032_v9 = vld [vmem:[%s1322_s1 + $0x18] sm:$0xff]   ;;  %v1034_v13 = vld [vmem:[%s1322_s1 + $0x10] sm:$0xff]  }
   0x5   :  { %v1041_v11 = vld [vmem:[%s1323_s0 + $0x4] ss:$12 sps:$4 sm:$0xff]   ;;  %v1044_v12 = vld [vmem:[%s1323_s0 + $0x94] ss:$12 sps:$4 sm:$0xff]   ;;  %v1035_v14 = vld [vmem:[%s1322_s1 + $0x48] sm:$0xff]  }
   0x6   :  { %407 = vmatprep.mubr.bf16.mxu0 %v1041_v11  ;;  %455 = vmatprep.mubr.bf16.mxu1 %v1044_v12  ;;  %v1036_v15 = vld [vmem:[%s1322_s1 + $0x8] sm:$0xff]   ;;  %v1037_v16 = vld [vmem:[%s1322_s1 + $0x40] sm:$0xff]   ;;  %v1042_v20 = vld [vmem:[%s1323_s0 + $0x90] ss:$12 sps:$4 sm:$0xff]  }
   0x7   :  { %916 = vmatpush3.bf16.msra.mxu0 %v1026_v3  ;;  %1016 = vmatpush3.bf16.msra.mxu1 %v1026_v3  ;;  %v1038_v17 = vld [vmem:[%s1322_s1] sm:$0xff]   ;;  %v1045_v19 = vld [vmem:[%s1322_s1 + $0x88] sm:$0xff]   ;;  %v1056_v28 = vld [vmem:[%s1323_s0 + $0x30] ss:$12 sps:$4 sm:$0xff]  }
   0x8   :  { %917 = vmatprep.subr.bf16.mxu0 %v1027_v4  ;;  %1009 = vmatprep.subr.bf16.mxu1 %v1027_v4  ;;  %v1039_v18 = vld [vmem:[%s1323_s0] ss:$12 sps:$4 sm:$0xff]   ;;  %v1046_v21 = vld [vmem:[%s1323_s0 + $0x1c] ss:$12 sps:$4 sm:$0xff]   ;;  %v1050_v24 = vld [vmem:[%s1323_s0 + $0x18] ss:$12 sps:$4 sm:$0xff]  }
   0x9   :  { %v1048_v22 = vld [vmem:[%s1323_s0 + $0xac] ss:$12 sps:$4 sm:$0xff]   ;;  %v1052_v23 = vld [vmem:[%s1322_s1 + $0x80] sm:$0xff]   ;;  %v1051_v25 = vld [vmem:[%s1323_s0 + $0xa8] ss:$12 sps:$4 sm:$0xff]  }
   0xa   :  { %v1053_v26 = vld [vmem:[%s1323_s0 + $0x34] ss:$12 sps:$4 sm:$0xff]   ;;  %v1058_v30 = vld [vmem:[%s1323_s0 + $0x4c] ss:$12 sps:$4 sm:$0xff]   ;;  %v1062_v33 = vld [vmem:[%s1323_s0 + $0x50] ss:$12 sps:$4 sm:$0xff]  }
   0xb   :  { %918 = vmatpush3.bf16.msra.mxu0 %v1028_v5  ;;  %1017 = vmatpush3.bf16.msra.mxu1 %v1028_v5  ;;  %v1055_v27 = vld [vmem:[%s1323_s0 + $0x8] ss:$12 sps:$4 sm:$0xff]   ;;  %v1057_v29 = vld [vmem:[%s1323_s0 + $0x20] ss:$12 sps:$4 sm:$0xff]   ;;  %v1060_v31 = vld [vmem:[%s1323_s0 + $0x38] ss:$12 sps:$4 sm:$0xff]  }
   0xc   :  { %919 = vmatprep.subr.bf16.mxu0 %v1029_v6  ;;  %1010 = vmatprep.subr.bf16.mxu1 %v1029_v6  ;;  %v1061_v32 = vld [vmem:[%s1323_s0 + $0x48] ss:$12 sps:$4 sm:$0xff]   ;;  %v1063_v34 = vld [vmem:[%s1323_s0 + $0x64] ss:$12 sps:$4 sm:$0xff]   ;;  %v1066_v36 = vld [vmem:[%s1323_s0 + $0x60] ss:$12 sps:$4 sm:$0xff]  }
   0xd   :  { %v1065_v35 = vld [vmem:[%s1323_s0 + $0x68] ss:$12 sps:$4 sm:$0xff]   ;;  %v1067_v37 = vld [vmem:[%s1323_s0 + $0x80] ss:$12 sps:$4 sm:$0xff]   ;;  %v1070_v39 = vld [vmem:[%s1323_s0 + $0x98] ss:$12 sps:$4 sm:$0xff]  }
   0xe   :  { %v1068_v38 = vld [vmem:[%s1323_s0 + $0x7c] ss:$12 sps:$4 sm:$0xff]   ;;  %v1071_v40 = vld [vmem:[%s1323_s0 + $0x78] ss:$12 sps:$4 sm:$0xff]   ;;  %v1251_v61 = vld [vmem:[%s1324_s2] ss:$0 sm:$0xff] }
   0xf   :  { %920 = vmatpush3.bf16.msra.mxu0 %v1030_v7  ;;  %1018 = vmatpush3.bf16.msra.mxu1 %v1030_v7  ;;  %v1072_v41 = vld [vmem:[%s1323_s0 + $0xb0] ss:$12 sps:$4 sm:$0xff]   ;;  %v1257_v4 = vld [vmem:[%s1325_s3] ss:$0 sm:$0xff] }
  0x10   :  { %921 = vmatprep.subr.bf16.mxu0 %v1031_v8  ;;  %1011 = vmatprep.subr.bf16.mxu1 %v1031_v8 }
  0x13   :  { %922 = vmatpush3.bf16.msra.mxu0 %v1032_v9  ;;  %1019 = vmatpush3.bf16.msra.mxu1 %v1032_v9 }
  0x14   :  { %923 = vmatprep.subr.bf16.mxu0 %v1033_v10  ;;  %1012 = vmatprep.subr.bf16.mxu1 %v1033_v10 }
  0x17   :  { %924 = vmatpush3.bf16.msra.mxu0 %v1034_v13  ;;  %1020 = vmatpush3.bf16.msra.mxu1 %v1034_v13 }
  0x18   :  { %925 = vmatprep.subr.bf16.mxu0 %v1035_v14  ;;  %1013 = vmatprep.subr.bf16.mxu1 %v1035_v14 }
  0x1b   :  { %926 = vmatpush3.bf16.msra.mxu0 %v1036_v15  ;;  %1021 = vmatpush3.bf16.msra.mxu1 %v1036_v15 }
  0x1c   :  { %927 = vmatprep.subr.bf16.mxu0 %v1037_v16  ;;  %1014 = vmatprep.subr.bf16.mxu1 %v1037_v16 }
  0x1f   :  { %928 = vmatpush3.bf16.msra.mxu0 %v1038_v17  ;;  %1022 = vmatpush3.bf16.msra.mxu1 %v1038_v17 }
  0x20   :  { %987 = vmatprep.subr.bf16.mxu1 %v1045_v19 }
  0x22   :  { %408 = vmatmul.mubr.bf16.vlgmr.msra.gmra.mxu0 %v1039_v18  ;;  %456 = vmatmul.mubr.bf16.vlgmr.msra.gmra.mxu1 %v1042_v20 }
  0x23   :  { %988 = vmatpush3.bf16.msra.mxu1 %v1045_v19  ;;  %415 = vmatprep.mubr.bf16.mxu0 %v1046_v21 }
  0x24   :  { %463 = vmatprep.mubr.bf16.mxu1 %v1048_v22  ;;  %989 = vmatprep.subr.bf16.mxu1 %v1052_v23 }
  0x27   :  { %990 = vmatpush3.bf16.msra.mxu1 %v1052_v23 }
  0x2a   :  { %416 = vmatmul.mubr.bf16.gmra.mxu0 %v1050_v24  ;;  %464 = vmatmul.mubr.bf16.gmra.mxu1 %v1051_v25 }
  0x2b   :  { %423 = vmatprep.mubr.bf16.mxu0 %v1053_v26  ;;  %991 = vmatprep.mubr.msk.bf16.mxu1 %vm350_vm0, %v1055_v27 }
  0x32   :  { %424 = vmatmul.mubr.bf16.gmra.mxu0 %v1056_v28  ;;  %992 = vmatmul.mubr.msk.bf16.vlgmr.msra.gmra.mxu1 %vm350_vm0, %v1057_v29 }
  0x33   :  { %431 = vmatprep.mubr.bf16.mxu0 %v1058_v30  ;;  %995 = vmatprep.mubr.msk.bf16.mxu1 %vm350_vm0, %v1060_v31 }
  0x3a   :  { %432 = vmatmul.mubr.bf16.gmra.mxu0 %v1061_v32  ;;  %996 = vmatmul.mubr.msk.bf16.gmra.mxu1 %vm350_vm0, %v1062_v33 }
  0x3b   :  { %439 = vmatprep.mubr.bf16.mxu0 %v1063_v34  ;;  %999 = vmatprep.mubr.msk.bf16.mxu1 %vm350_vm0, %v1065_v35 }
  0x42   :  { %440 = vmatmul.mubr.bf16.gmra.mxu0 %v1066_v36  ;;  %1000 = vmatmul.mubr.msk.bf16.gmra.mxu1 %vm350_vm0, %v1067_v37 }
  0x43   :  { %447 = vmatprep.mubr.bf16.mxu0 %v1068_v38  ;;  %1003 = vmatprep.mubr.msk.bf16.mxu1 %vm350_vm0, %v1070_v39 }
  0x4a   :  { %448 = vmatmul.mubr.bf16.gmra.mxu0 %v1071_v40  ;;  %1004 = vmatmul.mubr.msk.bf16.gmra.mxu1 %vm350_vm0, %v1072_v41 }
  0xe2   :  { %v929_v42 = vpop.f32.mrf.mxu0  ;;  %v1232_v43 = vpop.f32.mrf.mxu1 }
  0xe4   :  { %v930_v44 = vpop.f32.mrf.mxu0  ;;  %v1234_v45 = vpop.f32.mrf.mxu1 }
  0xe5   :  { %v931_v62 = vadd.f32 %v930_v44, %v929_v42 }
  0xe6   :  { %v932_v46 = vpop.f32.mrf.mxu0  ;;  %v1236_v47 = vpop.f32.mrf.mxu1 }
  0xe8   :  { %v933_v48 = vpop.f32.mrf.mxu0  ;;  %v1238_v49 = vpop.f32.mrf.mxu1 }
  0xe9   :  { %v934_v9 = vadd.f32 %v933_v48, %v932_v46 }
  0xea   :  { %v935_v50 = vpop.f32.mrf.mxu0  ;;  %v1240_v51 = vpop.f32.mrf.mxu1 }
  0xec   :  { %v936_v52 = vpop.f32.mrf.mxu0  ;;  %v1242_v53 = vpop.f32.mrf.mxu1 }
  0xed   :  { %v937_v58 = vadd.f32 %v936_v52, %v935_v50 }
  0xee   :  { %v938_v54 = vpop.f32.mrf.mxu0  ;;  %v1244_v55 = vpop.f32.mrf.mxu1 }
  0xf0   :  { %v939_v56 = vpop.f32.mrf.mxu0  ;;  %v1246_v57 = vpop.f32.mrf.mxu1 }
  0xf1   :  { %v940_v2 = vadd.f32 %v939_v56, %v938_v54 }
  0xf2   :  { %v941_v59 = vpop.f32.mrf.mxu0  ;;  %v993_v60 = vpop.f32.mrf.mxu1 }
  0xf3   :  { %v515_v63 = vadd.f32 %v993_v60, %v937_v58 }
  0xf4   :  { %v942_v0 = vpop.f32.mrf.mxu0  ;;  %v506_v1 = vpop.f32.mrf.mxu1 }
  0xf5   :  { %v629_v3 = vadd.f32 %v1251_v61, %v515_v63  ;;  %v507_v5 = vadd.f32 %v931_v62, %v506_v1  ;;  %v943_v18 = vadd.f32 %v942_v0, %v941_v59 }
  0xf6   :  { %v944_v6 = vpop.f32.mrf.mxu0  ;;  %v994_v7 = vpop.f32.mrf.mxu1 }
  0xf7   :  { %v518_v8 = vadd.f32 %v994_v7, %v940_v2  ;;  %v668_v10 = vmul.f32 %v1257_v4, %v629_v3  ;;  %v627_v11 = vadd.f32 %v1251_v61, %v507_v5  ;;  %vm645_vm1 = vcmp.ge.f32.partialorder %v629_v3, 0.0 }
  0xf8   :  { %v945_v12 = vpop.f32.mrf.mxu0  ;;  %v509_v13 = vpop.f32.mrf.mxu1 }
  0xf9   :  { %v630_v14 = vadd.f32 %v1251_v61, %v518_v8  ;;  %v510_v15 = vadd.f32 %v934_v9, %v509_v13  ;;  %v684_v20 = vsel %vm645_vm1, %v629_v3, %v668_v10  ;;  %v666_v21 = vmul.f32 %v1257_v4, %v627_v11 }
  0xfa   :  { %v947_v16 = vpop.f32.mrf.mxu0  ;;  %v997_v17 = vpop.f32.mrf.mxu1  ;;  %vm643_vm3 = vcmp.ge.f32.partialorder %v627_v11, 0.0  ;;  %v946_v34 = vadd.f32 %v945_v12, %v944_v6 }
  0xfb   :  { %vm646_vm2 = vcmp.ge.f32.partialorder %v630_v14, 0.0  ;;  %v669_v19 = vmul.f32 %v1257_v4, %v630_v14  ;;  %v628_v22 = vadd.f32 %v1251_v61, %v510_v15  ;;  %v682_v33 = vsel %vm643_vm3, %v627_v11, %v666_v21 }
  0xfc   :  { %v948_v23 = vpop.f32.mrf.mxu0  ;;  %v522_v24 = vpop.f32.mrf.mxu1  ;;  %v973_v11 = vadd.f32 %v1242_v53, %v1240_v51 }
  0xfd   :  { %v685_v25 = vsel %vm646_vm2, %v630_v14, %v669_v19  ;;  %v949_v26 = vadd.f32 %v948_v23, %v947_v16  ;;  %v523_v27 = vadd.f32 %v943_v18, %v522_v24  ;;  %vm644_vm4 = vcmp.ge.f32.partialorder %v628_v22, 0.0 }
  0xfe   :  { %v874_v28 = vpack.c.bf16 %v685_v25, %v684_v20  ;;  %v667_v29 = vmul.f32 %v1257_v4, %v628_v22  ;;  %v950_v30 = vpop.f32.mrf.mxu0  ;;  %v998_v31 = vpop.f32.mrf.mxu1  ;;  %v967_v16 = vadd.f32 %v1234_v45, %v1232_v43  ;;  %v976_v43 = vadd.f32 %v1246_v57, %v1244_v55 }
  0xff   :  { %v531_v32 = vadd.f32 %v997_v17, %v949_v26  ;;  %v631_v36 = vadd.f32 %v1251_v61, %v523_v27 }
 0x100   :  { %906 = vst [vmem:[%s1326_s4 + $0x8] sm:$0xff] %v874_v28   ;;  %v683_v35 = vsel %vm644_vm4, %v628_v22, %v667_v29  ;;  %v951_v37 = vpop.f32.mrf.mxu0  ;;  %v525_v38 = vpop.f32.mrf.mxu1  ;;  %v970_v28 = vadd.f32 %v1238_v49, %v1236_v47 }
 0x101   :  { %v869_v39 = vpack.c.bf16 %v683_v35, %v682_v33  ;;  %v633_v40 = vadd.f32 %v1251_v61, %v531_v32  ;;  %v952_v41 = vadd.f32 %v951_v37, %v950_v30  ;;  %v526_v42 = vadd.f32 %v946_v34, %v525_v38 }
 0x102   :  { %v953_v44 = vpop.f32.mrf.mxu0  ;;  %v1001_v46 = vpop.f32.mrf.mxu1  ;;  %v670_v48 = vmul.f32 %v1257_v4, %v631_v36  ;;  %vm647_vm5 = vcmp.ge.f32.partialorder %v631_v36, 0.0 }
 0x103   :  { %870 = vst [vmem:[%s1326_s4] sm:$0xff] %v869_v39   ;;  %v534_v50 = vadd.f32 %v998_v31, %v952_v41  ;;  %v632_v52 = vadd.f32 %v1251_v61, %v526_v42  ;;  %v672_v59 = vmul.f32 %v1257_v4, %v633_v40  ;;  %vm649_vm7 = vcmp.ge.f32.partialorder %v633_v40, 0.0 }
 0x104   :  { %v954_v54 = vpop.f32.mrf.mxu0  ;;  %v538_v56 = vpop.f32.mrf.mxu1  ;;  %v686_v2 = vsel %vm647_vm5, %v631_v36, %v670_v48 }
 0x105   :  { %v955_v58 = vadd.f32 %v954_v54, %v953_v44  ;;  %v634_v60 = vadd.f32 %v1251_v61, %v534_v50  ;;  %vm648_vm6 = vcmp.ge.f32.partialorder %v632_v52, 0.0  ;;  %v671_v62 = vmul.f32 %v1257_v4, %v632_v52 }
 0x106   :  { %v956_v63 = vpop.f32.mrf.mxu0  ;;  %v1002_v0 = vpop.f32.mrf.mxu1  ;;  %v688_v12 = vsel %vm649_vm7, %v633_v40, %v672_v59 }
 0x107   :  { %v539_v1 = vadd.f32 %v955_v58, %v538_v56  ;;  %vm650_vm8 = vcmp.ge.f32.partialorder %v634_v60, 0.0  ;;  %v673_v3 = vmul.f32 %v1257_v4, %v634_v60  ;;  %v687_v5 = vsel %vm648_vm6, %v632_v52, %v671_v62 }
 0x108   :  { %v957_v6 = vpop.f32.mrf.mxu0  ;;  %v541_v7 = vpop.f32.mrf.mxu1  ;;  %v879_v8 = vpack.c.bf16 %v687_v5, %v686_v2 }
 0x109   :  { %v635_v9 = vadd.f32 %v1251_v61, %v539_v1  ;;  %v958_v10 = vadd.f32 %v957_v6, %v956_v63  ;;  %v689_v13 = vsel %vm650_vm8, %v634_v60, %v673_v3 }
 0x10a   :  { %v959_v14 = vpop.f32.mrf.mxu0  ;;  %v1005_v15 = vpop.f32.mrf.mxu1  ;;  %v884_v17 = vpack.c.bf16 %v689_v13, %v688_v12  ;;  %907 = vst [vmem:[%s1326_s4 + $0x10] sm:$0xff] %v879_v8  }
 0x10b   :  { %v542_v18 = vadd.f32 %v958_v10, %v541_v7  ;;  %v563_v19 = vadd.f32 %v1005_v15, %v973_v11  ;;  %v674_v51 = vmul.f32 %v1257_v4, %v635_v9  ;;  %vm651_vm9 = vcmp.ge.f32.partialorder %v635_v9, 0.0 }
 0x10c   :  { %v960_v20 = vpop.f32.mrf.mxu0  ;;  %v554_v21 = vpop.f32.mrf.mxu1  ;;  %908 = vst [vmem:[%s1326_s4 + $0x18] sm:$0xff] %v884_v17  }
 0x10d   :  { %v636_v53 = vadd.f32 %v1251_v61, %v542_v18  ;;  %v961_v22 = vadd.f32 %v960_v20, %v959_v14  ;;  %v555_v23 = vadd.f32 %v967_v16, %v554_v21  ;;  %v641_v45 = vadd.f32 %v1251_v61, %v563_v19 }
 0x10e   :  { %v962_v24 = vpop.f32.mrf.mxu0  ;;  %v1006_v25 = vpop.f32.mrf.mxu1  ;;  %v690_v32 = vsel %vm651_vm9, %v635_v9, %v674_v51 }
 0x10f   :  { %vm652_vm10 = vcmp.ge.f32.partialorder %v636_v53, 0.0  ;;  %v675_v26 = vmul.f32 %v1257_v4, %v636_v53  ;;  %v547_v27 = vadd.f32 %v1001_v46, %v961_v22  ;;  %v566_v29 = vadd.f32 %v1006_v25, %v976_v43 }
 0x110   :  { %v963_v30 = vpop.f32.mrf.mxu0  ;;  %v557_v31 = vpop.f32.mrf.mxu1  ;;  %v680_v34 = vmul.f32 %v1257_v4, %v641_v45  ;;  %v639_v55 = vadd.f32 %v1251_v61, %v555_v23  ;;  %vm657_vm11 = vcmp.ge.f32.partialorder %v641_v45, 0.0 }
 0x111   :  { %v691_v33 = vsel %vm652_vm10, %v636_v53, %v675_v26  ;;  %v637_v35 = vadd.f32 %v1251_v61, %v547_v27  ;;  %v642_v36 = vadd.f32 %v1251_v61, %v566_v29  ;;  %v964_v37 = vadd.f32 %v963_v30, %v962_v24 }
 0x112   :  { %v889_v57 = vpack.c.bf16 %v691_v33, %v690_v32  ;;  %v558_v38 = vadd.f32 %v970_v28, %v557_v31  ;;  %vm655_vm13 = vcmp.ge.f32.partialorder %v639_v55, 0.0  ;;  %v678_v39 = vmul.f32 %v1257_v4, %v639_v55 }
 0x113   :  { %vm658_vm12 = vcmp.ge.f32.partialorder %v642_v36, 0.0  ;;  %v681_v47 = vmul.f32 %v1257_v4, %v642_v36  ;;  %v550_v49 = vadd.f32 %v1002_v0, %v964_v37  ;;  %v696_v41 = vsel %vm657_vm11, %v641_v45, %v680_v34 }
 0x114   :  { %909 = vst [vmem:[%s1326_s4 + $0x20] sm:$0xff] %v889_v57   ;;  %v640_v40 = vadd.f32 %v1251_v61, %v558_v38  ;;  %v676_v42 = vmul.f32 %v1257_v4, %v637_v35  ;;  %vm653_vm14 = vcmp.ge.f32.partialorder %v637_v35, 0.0  ;;  %v694_v54 = vsel %vm655_vm13, %v639_v55, %v678_v39 }
 0x115   :  { %v697_v44 = vsel %vm658_vm12, %v642_v36, %v681_v47  ;;  %v638_v46 = vadd.f32 %v1251_v61, %v550_v49 }
 0x116   :  { %v904_v48 = vpack.c.bf16 %v697_v44, %v696_v41  ;;  %vm656_vm15 = vcmp.ge.f32.partialorder %v640_v40, 0.0  ;;  %v679_v50 = vmul.f32 %v1257_v4, %v640_v40  ;;  %v692_v58 = vsel %vm653_vm14, %v637_v35, %v676_v42 }
 0x117   :  { %vm654_vm0 = vcmp.ge.f32.partialorder %v638_v46, 0.0  ;;  %v677_v52 = vmul.f32 %v1257_v4, %v638_v46 }
 0x118   :  { %912 = vst [vmem:[%s1326_s4 + $0x38] sm:$0xff] %v904_v48   ;;  %v695_v56 = vsel %vm656_vm15, %v640_v40, %v679_v50 }
 0x119   :  { %v693_v59 = vsel %vm654_vm0, %v638_v46, %v677_v52  ;;  %v899_v60 = vpack.c.bf16 %v695_v56, %v694_v54 }
 0x11a   :  { %v894_v62 = vpack.c.bf16 %v693_v59, %v692_v58 }
 0x11b   :  { %911 = vst [vmem:[%s1326_s4 + $0x30] sm:$0xff] %v899_v60  }
 0x11c   :  { %910 = vst [vmem:[%s1326_s4 + $0x28] sm:$0xff] %v894_v62  }

// kernel: gen_forward.34
= control target key start
LH: loop header
LB: loop body
LE: loop exit
PB: predicated region body
PF: predicated region fallthrough
CT: control target
= control target key end

     0   :  { %s819_s1 = inlined_call_operand.vmem [shape: bf16[512,128], index: 1, kind: input, shape index: {}]   ;;  %s820_s0 = inlined_call_operand.vmem [shape: bf16[32,512], index: 0, kind: input, shape index: {}]   ;;  %s821_s2 = inlined_call_operand.vmem [shape: f32[1,128], index: 2, kind: input, shape index: {}]   ;;  %s822_s3 = inlined_call_operand.vmem [shape: f32[1,128], index: 3, kind: input, shape index: {}]   ;;  %s823_s4 = inlined_call_operand.vmem [shape: bf16[32,128], index: 4, kind: output, shape index: {}]  }
   0x1   :  { %v618_v0 = vld [vmem:[%s819_s1 + $0x78] sm:$0xff]   ;;  %v622_v4 = vld [vmem:[%s819_s1 + $0x70] sm:$0xff]   ;;  %v626_v8 = vld [vmem:[%s819_s1 + $0x68] sm:$0xff]  }
   0x2   :  { %v619_v1 = vld [vmem:[%s819_s1 + $0xf8] sm:$0xff]   ;;  %562 = vmatprep.subr.bf16.mxu0 %v618_v0  ;;  %v623_v5 = vld [vmem:[%s819_s1 + $0xf0] sm:$0xff]   ;;  %v627_v9 = vld [vmem:[%s819_s1 + $0xe8] sm:$0xff]  }
   0x3   :  { %v620_v2 = vld [vmem:[%s819_s1 + $0x38] sm:$0xff]   ;;  %590 = vmatprep.subr.bf16.mxu1 %v619_v1  ;;  %v624_v6 = vld [vmem:[%s819_s1 + $0x30] sm:$0xff]   ;;  %v628_v10 = vld [vmem:[%s819_s1 + $0x28] sm:$0xff]  }
   0x4   :  { %v621_v3 = vld [vmem:[%s819_s1 + $0xb8] sm:$0xff]   ;;  %563 = vmatpush3.bf16.msra.mxu0 %v620_v2  ;;  %v625_v7 = vld [vmem:[%s819_s1 + $0xb0] sm:$0xff]   ;;  %v629_v11 = vld [vmem:[%s819_s1 + $0xa8] sm:$0xff]  }
   0x5   :  { %591 = vmatpush3.bf16.msra.mxu1 %v621_v3  ;;  %564 = vmatprep.subr.bf16.mxu0 %v622_v4  ;;  %v630_v12 = vld [vmem:[%s819_s1 + $0x60] sm:$0xff]   ;;  %v634_v16 = vld [vmem:[%s819_s1 + $0x58] sm:$0xff]   ;;  %v638_v20 = vld [vmem:[%s819_s1 + $0x50] sm:$0xff]  }
   0x6   :  { %592 = vmatprep.subr.bf16.mxu1 %v623_v5  ;;  %v631_v13 = vld [vmem:[%s819_s1 + $0xe0] sm:$0xff]   ;;  %v635_v17 = vld [vmem:[%s819_s1 + $0xd8] sm:$0xff]   ;;  %v639_v21 = vld [vmem:[%s819_s1 + $0xd0] sm:$0xff]  }
   0x7   :  { %v632_v14 = vld [vmem:[%s819_s1 + $0x20] sm:$0xff]   ;;  %v636_v18 = vld [vmem:[%s819_s1 + $0x18] sm:$0xff]   ;;  %v640_v22 = vld [vmem:[%s819_s1 + $0x10] sm:$0xff]  }
   0x8   :  { %565 = vmatpush3.bf16.msra.mxu0 %v624_v6  ;;  %v633_v15 = vld [vmem:[%s819_s1 + $0xa0] sm:$0xff]   ;;  %v637_v19 = vld [vmem:[%s819_s1 + $0x98] sm:$0xff]   ;;  %v641_v23 = vld [vmem:[%s819_s1 + $0x90] sm:$0xff]  }
   0x9   :  { %593 = vmatpush3.bf16.msra.mxu1 %v625_v7  ;;  %566 = vmatprep.subr.bf16.mxu0 %v626_v8  ;;  %v642_v24 = vld [vmem:[%s819_s1 + $0x48] sm:$0xff]   ;;  %v646_v28 = vld [vmem:[%s819_s1 + $0x40] sm:$0xff]  }
   0xa   :  { %594 = vmatprep.subr.bf16.mxu1 %v627_v9  ;;  %v643_v25 = vld [vmem:[%s819_s1 + $0xc8] sm:$0xff]   ;;  %v647_v29 = vld [vmem:[%s819_s1 + $0xc0] sm:$0xff]  }
   0xb   :  { %v644_v26 = vld [vmem:[%s819_s1 + $0x8] sm:$0xff]   ;;  %v648_v30 = vld [vmem:[%s819_s1] sm:$0xff]  }
   0xc   :  { %567 = vmatpush3.bf16.msra.mxu0 %v628_v10  ;;  %v645_v27 = vld [vmem:[%s819_s1 + $0x88] sm:$0xff]   ;;  %v649_v31 = vld [vmem:[%s819_s1 + $0x80] sm:$0xff]  }
   0xd   :  { %595 = vmatpush3.bf16.msra.mxu1 %v629_v11  ;;  %568 = vmatprep.subr.bf16.mxu0 %v630_v12  ;;  %v650_v32 = vld [vmem:[%s820_s0] ss:$16 sps:$4 sm:$0xff]   ;;  %v652_v33 = vld [vmem:[%s820_s0 + $0x4] ss:$16 sps:$4 sm:$0xff]   ;;  %v653_v34 = vld [vmem:[%s820_s0 + $0x8] ss:$16 sps:$4 sm:$0xff]  }
   0xe   :  { %596 = vmatprep.subr.bf16.mxu1 %v631_v13  ;;  %v655_v35 = vld [vmem:[%s820_s0 + $0xc] ss:$16 sps:$4 sm:$0xff]   ;;  %366 = vmatprep.mubr.bf16.mxu0 %v652_v33  ;;  %v656_v36 = vld [vmem:[%s820_s0 + $0x24] ss:$16 sps:$4 sm:$0xff]   ;;  %v660_v38 = vld [vmem:[%s820_s0 + $0x20] ss:$16 sps:$4 sm:$0xff]  }
   0xf   :  { %415 = vmatprep.mubr.bf16.mxu1 %v655_v35  ;;  %v658_v37 = vld [vmem:[%s820_s0 + $0x2c] ss:$16 sps:$4 sm:$0xff]   ;;  %v661_v39 = vld [vmem:[%s820_s0 + $0x28] ss:$16 sps:$4 sm:$0xff]   ;;  %v541_v47 = vld [vmem:[%s821_s2] ss:$0 sm:$0xff] }
  0x10   :  { %569 = vmatpush3.bf16.msra.mxu0 %v632_v14  ;;  %v542_v56 = vld [vmem:[%s822_s3] ss:$0 sm:$0xff] }
  0x11   :  { %597 = vmatpush3.bf16.msra.mxu1 %v633_v15  ;;  %570 = vmatprep.subr.bf16.mxu0 %v634_v16 }
  0x12   :  { %598 = vmatprep.subr.bf16.mxu1 %v635_v17 }
  0x14   :  { %571 = vmatpush3.bf16.msra.mxu0 %v636_v18 }
  0x15   :  { %599 = vmatpush3.bf16.msra.mxu1 %v637_v19  ;;  %572 = vmatprep.subr.bf16.mxu0 %v638_v20 }
  0x16   :  { %600 = vmatprep.subr.bf16.mxu1 %v639_v21 }
  0x18   :  { %573 = vmatpush3.bf16.msra.mxu0 %v640_v22 }
  0x19   :  { %601 = vmatpush3.bf16.msra.mxu1 %v641_v23  ;;  %574 = vmatprep.subr.bf16.mxu0 %v642_v24 }
  0x1a   :  { %602 = vmatprep.subr.bf16.mxu1 %v643_v25 }
  0x1c   :  { %575 = vmatpush3.bf16.msra.mxu0 %v644_v26 }
  0x1d   :  { %603 = vmatpush3.bf16.msra.mxu1 %v645_v27  ;;  %576 = vmatprep.subr.bf16.mxu0 %v646_v28 }
  0x1e   :  { %604 = vmatprep.subr.bf16.mxu1 %v647_v29 }
  0x20   :  { %577 = vmatpush3.bf16.msra.mxu0 %v648_v30 }
  0x21   :  { %605 = vmatpush3.bf16.msra.mxu1 %v649_v31 }
  0x23   :  { %367 = vmatmul.mubr.bf16.vlgmr.msra.gmra.mxu0 %v650_v32 }
  0x24   :  { %416 = vmatmul.mubr.bf16.vlgmr.msra.gmra.mxu1 %v653_v34  ;;  %374 = vmatprep.mubr.bf16.mxu0 %v656_v36 }
  0x25   :  { %423 = vmatprep.mubr.bf16.mxu1 %v658_v37 }
  0x2b   :  { %375 = vmatmul.mubr.bf16.gmra.mxu0 %v660_v38 }
  0x2c   :  { %424 = vmatmul.mubr.bf16.gmra.mxu1 %v661_v39 }
  0xe3   :  { %v578_v40 = vpop.f32.mrf.mxu0 }
  0xe4   :  { %v606_v41 = vpop.f32.mrf.mxu1 }
  0xe5   :  { %v579_v42 = vpop.f32.mrf.mxu0 }
  0xe6   :  { %v580_v43 = vadd.f32 %v579_v42, %v578_v40  ;;  %v607_v44 = vpop.f32.mrf.mxu1 }
  0xe7   :  { %v608_v45 = vadd.f32 %v607_v44, %v606_v41  ;;  %v581_v46 = vpop.f32.mrf.mxu0 }
  0xe8   :  { %v609_v48 = vpop.f32.mrf.mxu1 }
  0xe9   :  { %v418_v49 = vadd.f32 %v608_v45, %v580_v43  ;;  %v582_v50 = vpop.f32.mrf.mxu0 }
  0xea   :  { %v583_v51 = vadd.f32 %v582_v50, %v581_v46  ;;  %v610_v52 = vpop.f32.mrf.mxu1 }
  0xeb   :  { %v454_v53 = vadd.f32 %v541_v47, %v418_v49  ;;  %v611_v54 = vadd.f32 %v610_v52, %v609_v48  ;;  %v584_v55 = vpop.f32.mrf.mxu0 }
  0xec   :  { %v612_v57 = vpop.f32.mrf.mxu1 }
  0xed   :  { %v421_v58 = vadd.f32 %v611_v54, %v583_v51  ;;  %v585_v59 = vpop.f32.mrf.mxu0  ;;  %v469_v62 = vmul.f32 %v542_v56, %v454_v53  ;;  %vm458_vm0 = vcmp.ge.f32.partialorder %v454_v53, 0.0 }
  0xee   :  { %v586_v60 = vadd.f32 %v585_v59, %v584_v55  ;;  %v613_v61 = vpop.f32.mrf.mxu1 }
  0xef   :  { %v455_v63 = vadd.f32 %v541_v47, %v421_v58  ;;  %v614_v0 = vadd.f32 %v613_v61, %v612_v57  ;;  %v587_v1 = vpop.f32.mrf.mxu0  ;;  %v473_v8 = vsel %vm458_vm0, %v454_v53, %v469_v62 }
  0xf0   :  { %v615_v2 = vpop.f32.mrf.mxu1 }
  0xf1   :  { %vm459_vm1 = vcmp.ge.f32.partialorder %v455_v63, 0.0  ;;  %v470_v3 = vmul.f32 %v542_v56, %v455_v63  ;;  %v426_v4 = vadd.f32 %v614_v0, %v586_v60  ;;  %v588_v5 = vpop.f32.mrf.mxu0 }
  0xf2   :  { %v589_v6 = vadd.f32 %v588_v5, %v587_v1  ;;  %v616_v7 = vpop.f32.mrf.mxu1 }
  0xf3   :  { %v474_v9 = vsel %vm459_vm1, %v455_v63, %v470_v3  ;;  %v456_v10 = vadd.f32 %v541_v47, %v426_v4  ;;  %v617_v11 = vadd.f32 %v616_v7, %v615_v2 }
  0xf4   :  { %v554_v12 = vpack.c.bf16 %v474_v9, %v473_v8 }
  0xf5   :  { %v429_v13 = vadd.f32 %v617_v11, %v589_v6  ;;  %v471_v14 = vmul.f32 %v542_v56, %v456_v10  ;;  %vm460_vm2 = vcmp.ge.f32.partialorder %v456_v10, 0.0 }
  0xf6   :  { %555 = vst [vmem:[%s823_s4] sm:$0xff] %v554_v12  }
  0xf7   :  { %v457_v15 = vadd.f32 %v541_v47, %v429_v13  ;;  %v475_v17 = vsel %vm460_vm2, %v456_v10, %v471_v14 }
  0xf9   :  { %vm461_vm3 = vcmp.ge.f32.partialorder %v457_v15, 0.0  ;;  %v472_v16 = vmul.f32 %v542_v56, %v457_v15 }
  0xfb   :  { %v476_v18 = vsel %vm461_vm3, %v457_v15, %v472_v16 }
  0xfc   :  { %v559_v19 = vpack.c.bf16 %v476_v18, %v475_v17 }
  0xfe   :  { %561 = vst [vmem:[%s823_s4 + $0x8] sm:$0xff] %v559_v19  }

// kernel: gen_forward.35
= control target key start
LH: loop header
LB: loop body
LE: loop exit
PB: predicated region body
PF: predicated region fallthrough
CT: control target
= control target key end

     0   :  { %vm250_vm0 = vcmask 261120   ;;  %s1051_s3 = inlined_call_operand.vmem [shape: bf16[288,128], index: 3, kind: input, shape index: {}]   ;;  %s1052_s2 = inlined_call_operand.vmem [shape: bf16[32,288], index: 2, kind: input, shape index: {}]   ;;  %s1053_s1 = inlined_call_operand.vmem [shape: bf16[288,128], index: 1, kind: input, shape index: {}]   ;;  %s1054_s0 = inlined_call_operand.vmem [shape: bf16[32,288], index: 0, kind: input, shape index: {}]   ;;  %s1055_s4 = inlined_call_operand.vmem [shape: f32[1,128], index: 4, kind: input, shape index: {}]   ;;  %s1056_s5 = inlined_call_operand.vmem [shape: f32[1,128], index: 5, kind: input, shape index: {}]   ;;  %s1057_s6 = inlined_call_operand.vmem [shape: bf16[32,128], index: 6, kind: output, shape index: {}]  }
   0x1   :  { %v804_v0 = vld [vmem:[%s1051_s3 + $0x78] sm:$0xff]   ;;  %v805_v1 = vld [vmem:[%s1051_s3 + $0x88] sm:$0xff]   ;;  %v807_v3 = vld [vmem:[%s1051_s3 + $0x70] sm:$0xff]  }
   0x2   :  { %724 = vmatprep.subr.bf16.mxu0 %v804_v0  ;;  %v806_v2 = vld [vmem:[%s1051_s3 + $0x38] sm:$0xff]   ;;  %788 = vmatprep.subr.bf16.mxu1 %v805_v1  ;;  %v808_v4 = vld [vmem:[%s1051_s3 + $0x80] sm:$0xff]   ;;  %v809_v5 = vld [vmem:[%s1051_s3 + $0x30] sm:$0xff]  }
   0x3   :  { %725 = vmatpush3.bf16.msra.mxu0 %v806_v2  ;;  %789 = vmatpush3.bf16.msra.mxu1 %v805_v1  ;;  %v810_v6 = vld [vmem:[%s1052_s2 + $0x8] ss:$12 sps:$4 sm:$0xff]   ;;  %v812_v8 = vld [vmem:[%s1052_s2 + $0x20] ss:$12 sps:$4 sm:$0xff]   ;;  %v813_v9 = vld [vmem:[%s1053_s1 + $0x78] sm:$0xff]  }
   0x4   :  { %726 = vmatprep.subr.bf16.mxu0 %v807_v3  ;;  %790 = vmatprep.subr.bf16.mxu1 %v808_v4  ;;  %v811_v7 = vld [vmem:[%s1051_s3 + $0x68] sm:$0xff]   ;;  %v815_v11 = vld [vmem:[%s1053_s1 + $0x38] sm:$0xff]   ;;  %v816_v12 = vld [vmem:[%s1051_s3 + $0x60] sm:$0xff]  }
   0x5   :  { %792 = vmatprep.mubr.msk.bf16.mxu1 %vm250_vm0, %v810_v6  ;;  %v814_v10 = vld [vmem:[%s1051_s3 + $0x28] sm:$0xff]   ;;  %v817_v13 = vld [vmem:[%s1053_s1 + $0x70] sm:$0xff]   ;;  %v818_v14 = vld [vmem:[%s1051_s3 + $0x20] sm:$0xff]  }
   0x6   :  { %v819_v15 = vld [vmem:[%s1053_s1 + $0x30] sm:$0xff]   ;;  %v820_v16 = vld [vmem:[%s1051_s3 + $0x58] sm:$0xff]   ;;  %v821_v17 = vld [vmem:[%s1053_s1 + $0x68] sm:$0xff]  }
   0x7   :  { %727 = vmatpush3.bf16.msra.mxu0 %v809_v5  ;;  %791 = vmatpush3.bf16.msra.mxu1 %v808_v4  ;;  %v822_v18 = vld [vmem:[%s1051_s3 + $0x18] sm:$0xff]   ;;  %v823_v19 = vld [vmem:[%s1053_s1 + $0x28] sm:$0xff]   ;;  %v824_v20 = vld [vmem:[%s1051_s3 + $0x50] sm:$0xff]  }
   0x8   :  { %728 = vmatprep.subr.bf16.mxu0 %v811_v7  ;;  %756 = vmatprep.subr.bf16.mxu1 %v813_v9  ;;  %v825_v21 = vld [vmem:[%s1053_s1 + $0x60] sm:$0xff]   ;;  %v826_v22 = vld [vmem:[%s1051_s3 + $0x10] sm:$0xff]   ;;  %v828_v24 = vld [vmem:[%s1051_s3 + $0x48] sm:$0xff]  }
   0x9   :  { %v827_v23 = vld [vmem:[%s1053_s1 + $0x20] sm:$0xff]   ;;  %v829_v25 = vld [vmem:[%s1053_s1 + $0x58] sm:$0xff]   ;;  %v830_v26 = vld [vmem:[%s1051_s3 + $0x8] sm:$0xff]  }
   0xa   :  { %793 = vmatmul.mubr.msk.bf16.vlgmr.msra.gmra.mxu1 %vm250_vm0, %v812_v8  ;;  %v831_v27 = vld [vmem:[%s1053_s1 + $0x18] sm:$0xff]   ;;  %v832_v28 = vld [vmem:[%s1051_s3 + $0x40] sm:$0xff]   ;;  %v833_v29 = vld [vmem:[%s1053_s1 + $0x50] sm:$0xff]  }
   0xb   :  { %729 = vmatpush3.bf16.msra.mxu0 %v814_v10  ;;  %757 = vmatpush3.bf16.msra.mxu1 %v815_v11  ;;  %v834_v30 = vld [vmem:[%s1051_s3] sm:$0xff]   ;;  %v835_v31 = vld [vmem:[%s1053_s1 + $0x10] sm:$0xff]   ;;  %v839_v34 = vld [vmem:[%s1053_s1 + $0x48] sm:$0xff]  }
   0xc   :  { %730 = vmatprep.subr.bf16.mxu0 %v816_v12  ;;  %758 = vmatprep.subr.bf16.mxu1 %v817_v13  ;;  %v836_v32 = vld [vmem:[%s1052_s2] ss:$12 sps:$4 sm:$0xff]   ;;  %v838_v33 = vld [vmem:[%s1052_s2 + $0x4] ss:$12 sps:$4 sm:$0xff]   ;;  %v844_v39 = vld [vmem:[%s1052_s2 + $0x1c] ss:$12 sps:$4 sm:$0xff]  }
   0xd   :  { %289 = vmatprep.mubr.bf16.mxu0 %v838_v33  ;;  %v840_v35 = vld [vmem:[%s1053_s1 + $0x8] sm:$0xff]   ;;  %v842_v37 = vld [vmem:[%s1053_s1 + $0x40] sm:$0xff]  }
   0xe   :  { %v841_v36 = vld [vmem:[%s1053_s1 + $0x88] sm:$0xff]   ;;  %v843_v38 = vld [vmem:[%s1053_s1] sm:$0xff]  }
   0xf   :  { %731 = vmatpush3.bf16.msra.mxu0 %v818_v14  ;;  %759 = vmatpush3.bf16.msra.mxu1 %v819_v15  ;;  %v846_v40 = vld [vmem:[%s1054_s0] ss:$12 sps:$4 sm:$0xff]   ;;  %v848_v41 = vld [vmem:[%s1054_s0 + $0x4] ss:$12 sps:$4 sm:$0xff]   ;;  %v851_v44 = vld [vmem:[%s1054_s0 + $0x1c] ss:$12 sps:$4 sm:$0xff]  }
  0x10   :  { %732 = vmatprep.subr.bf16.mxu0 %v820_v16  ;;  %760 = vmatprep.subr.bf16.mxu1 %v821_v17  ;;  %v849_v42 = vld [vmem:[%s1052_s2 + $0x18] ss:$12 sps:$4 sm:$0xff]   ;;  %v853_v45 = vld [vmem:[%s1054_s0 + $0x8] ss:$12 sps:$4 sm:$0xff]   ;;  %v855_v47 = vld [vmem:[%s1054_s0 + $0x20] ss:$12 sps:$4 sm:$0xff]  }
  0x11   :  { %v850_v43 = vld [vmem:[%s1053_s1 + $0x80] sm:$0xff]   ;;  %531 = vmatprep.mubr.bf16.mxu1 %v848_v41 }
  0x12   :  { %v854_v46 = vld [vmem:[%s1054_s0 + $0x18] ss:$12 sps:$4 sm:$0xff]   ;;  %v703_v14 = vld [vmem:[%s1055_s4] ss:$0 sm:$0xff] }
  0x13   :  { %733 = vmatpush3.bf16.msra.mxu0 %v822_v18  ;;  %761 = vmatpush3.bf16.msra.mxu1 %v823_v19 }
  0x14   :  { %734 = vmatprep.subr.bf16.mxu0 %v824_v20  ;;  %762 = vmatprep.subr.bf16.mxu1 %v825_v21 }
  0x17   :  { %735 = vmatpush3.bf16.msra.mxu0 %v826_v22  ;;  %763 = vmatpush3.bf16.msra.mxu1 %v827_v23 }
  0x18   :  { %736 = vmatprep.subr.bf16.mxu0 %v828_v24  ;;  %764 = vmatprep.subr.bf16.mxu1 %v829_v25 }
  0x1b   :  { %737 = vmatpush3.bf16.msra.mxu0 %v830_v26  ;;  %765 = vmatpush3.bf16.msra.mxu1 %v831_v27  ;;  %v704_v26 = vld [vmem:[%s1056_s5] ss:$0 sm:$0xff] }
  0x1c   :  { %738 = vmatprep.subr.bf16.mxu0 %v832_v28  ;;  %766 = vmatprep.subr.bf16.mxu1 %v833_v29 }
  0x1f   :  { %739 = vmatpush3.bf16.msra.mxu0 %v834_v30  ;;  %767 = vmatpush3.bf16.msra.mxu1 %v835_v31 }
  0x20   :  { %768 = vmatprep.subr.bf16.mxu1 %v839_v34  ;;  %796 = vmatprep.subr.bf16.mxu0 %v841_v36 }
  0x22   :  { %290 = vmatmul.mubr.bf16.vlgmr.msra.gmra.mxu0 %v836_v32 }
  0x23   :  { %769 = vmatpush3.bf16.msra.mxu1 %v840_v35  ;;  %797 = vmatpush3.bf16.msra.mxu0 %v841_v36 }
  0x24   :  { %770 = vmatprep.subr.bf16.mxu1 %v842_v37  ;;  %297 = vmatprep.mubr.bf16.mxu0 %v844_v39 }
  0x25   :  { %798 = vmatprep.subr.bf16.mxu0 %v850_v43 }
  0x27   :  { %771 = vmatpush3.bf16.msra.mxu1 %v843_v38  ;;  %799 = vmatpush3.bf16.msra.mxu0 %v850_v43 }
  0x2a   :  { %298 = vmatmul.mubr.bf16.gmra.mxu0 %v849_v42  ;;  %532 = vmatmul.mubr.bf16.vlgmr.msra.gmra.mxu1 %v846_v40 }
  0x2b   :  { %539 = vmatprep.mubr.bf16.mxu1 %v851_v44  ;;  %800 = vmatprep.mubr.msk.bf16.mxu0 %vm250_vm0, %v853_v45 }
  0x32   :  { %540 = vmatmul.mubr.bf16.gmra.mxu1 %v854_v46  ;;  %801 = vmatmul.mubr.msk.bf16.vlgmr.msra.gmra.mxu0 %vm250_vm0, %v855_v47 }
  0xca   :  { %v794_v48 = vpop.f32.mrf.mxu1 }
  0xcc   :  { %v340_v49 = vpop.f32.mrf.mxu1 }
  0xce   :  { %v795_v51 = vpop.f32.mrf.mxu1 }
  0xd0   :  { %v343_v54 = vpop.f32.mrf.mxu1 }
  0xe2   :  { %v740_v50 = vpop.f32.mrf.mxu0 }
  0xe4   :  { %v741_v52 = vpop.f32.mrf.mxu0 }
  0xe5   :  { %v742_v60 = vadd.f32 %v741_v52, %v740_v50 }
  0xe6   :  { %v743_v53 = vpop.f32.mrf.mxu0 }
  0xe7   :  { %v341_v2 = vadd.f32 %v742_v60, %v340_v49 }
  0xe8   :  { %v744_v55 = vpop.f32.mrf.mxu0 }
  0xe9   :  { %v745_v4 = vadd.f32 %v744_v55, %v743_v53 }
  0xea   :  { %v746_v56 = vpop.f32.mrf.mxu0  ;;  %v772_v57 = vpop.f32.mrf.mxu1 }
  0xeb   :  { %v344_v16 = vadd.f32 %v745_v4, %v343_v54 }
  0xec   :  { %v747_v58 = vpop.f32.mrf.mxu0  ;;  %v773_v59 = vpop.f32.mrf.mxu1 }
  0xed   :  { %v774_v63 = vadd.f32 %v773_v59, %v772_v57  ;;  %v748_v3 = vadd.f32 %v747_v58, %v746_v56 }
  0xee   :  { %v749_v61 = vpop.f32.mrf.mxu0  ;;  %v775_v62 = vpop.f32.mrf.mxu1 }
  0xef   :  { %v534_v7 = vadd.f32 %v774_v63, %v341_v2  ;;  %v349_v11 = vadd.f32 %v794_v48, %v748_v3 }
  0xf0   :  { %v750_v0 = vpop.f32.mrf.mxu0  ;;  %v776_v1 = vpop.f32.mrf.mxu1 }
  0xf1   :  { %v777_v8 = vadd.f32 %v776_v1, %v775_v62  ;;  %v751_v12 = vadd.f32 %v750_v0, %v749_v61 }
  0xf2   :  { %v778_v5 = vpop.f32.mrf.mxu1  ;;  %v802_v6 = vpop.f32.mrf.mxu0 }
  0xf3   :  { %v537_v22 = vadd.f32 %v777_v8, %v344_v16  ;;  %v352_v24 = vadd.f32 %v795_v51, %v751_v12 }
  0xf4   :  { %v779_v9 = vpop.f32.mrf.mxu1  ;;  %v582_v10 = vpop.f32.mrf.mxu0 }
  0xf5   :  { %v780_v13 = vadd.f32 %v779_v9, %v778_v5  ;;  %v583_v15 = vadd.f32 %v582_v10, %v534_v7 }
  0xf6   :  { %v781_v17 = vpop.f32.mrf.mxu1  ;;  %v803_v18 = vpop.f32.mrf.mxu0 }
  0xf7   :  { %v542_v19 = vadd.f32 %v780_v13, %v349_v11  ;;  %v604_v20 = vadd.f32 %v703_v14, %v583_v15 }
  0xf8   :  { %v782_v21 = vpop.f32.mrf.mxu1  ;;  %v585_v23 = vpop.f32.mrf.mxu0 }
  0xf9   :  { %v591_v25 = vadd.f32 %v802_v6, %v542_v19  ;;  %v783_v27 = vadd.f32 %v782_v21, %v781_v17  ;;  %v586_v28 = vadd.f32 %v585_v23, %v537_v22  ;;  %v619_v31 = vmul.f32 %v704_v26, %v604_v20 }
  0xfa   :  { %vm608_vm1 = vcmp.ge.f32.partialorder %v604_v20, 0.0 }
  0xfb   :  { %v606_v29 = vadd.f32 %v703_v14, %v591_v25  ;;  %v545_v30 = vadd.f32 %v783_v27, %v352_v24  ;;  %v605_v32 = vadd.f32 %v703_v14, %v586_v28  ;;  %v623_v37 = vsel %vm608_vm1, %v604_v20, %v619_v31 }
  0xfd   :  { %v594_v33 = vadd.f32 %v803_v18, %v545_v30  ;;  %vm609_vm2 = vcmp.ge.f32.partialorder %v605_v32, 0.0  ;;  %v620_v34 = vmul.f32 %v704_v26, %v605_v32  ;;  %v621_v35 = vmul.f32 %v704_v26, %v606_v29 }
  0xfe   :  { %vm610_vm3 = vcmp.ge.f32.partialorder %v606_v29, 0.0 }
  0xff   :  { %v607_v36 = vadd.f32 %v703_v14, %v594_v33  ;;  %v624_v38 = vsel %vm609_vm2, %v605_v32, %v620_v34  ;;  %v625_v41 = vsel %vm610_vm3, %v606_v29, %v621_v35 }
 0x100   :  { %v716_v40 = vpack.c.bf16 %v624_v38, %v623_v37 }
 0x101   :  { %vm611_vm4 = vcmp.ge.f32.partialorder %v607_v36, 0.0  ;;  %v622_v39 = vmul.f32 %v704_v26, %v607_v36 }
 0x102   :  { %717 = vst [vmem:[%s1057_s6] sm:$0xff] %v716_v40  }
 0x103   :  { %v626_v42 = vsel %vm611_vm4, %v607_v36, %v622_v39 }
 0x104   :  { %v721_v43 = vpack.c.bf16 %v626_v42, %v625_v41 }
 0x106   :  { %723 = vst [vmem:[%s1057_s6 + $0x8] sm:$0xff] %v721_v43  }

// kernel: gen_forward.36
= control target key start
LH: loop header
LB: loop body
LE: loop exit
PB: predicated region body
PF: predicated region fallthrough
CT: control target
= control target key end

     0   :  { %s660_s1 = inlined_call_operand.vmem [shape: bf16[512,128], index: 1, kind: input, shape index: {}]   ;;  %s661_s0 = inlined_call_operand.vmem [shape: bf16[8,512], index: 0, kind: input, shape index: {}]   ;;  %s662_s2 = inlined_call_operand.vmem [shape: f32[1,128], index: 2, kind: input, shape index: {}]   ;;  %s663_s3 = inlined_call_operand.vmem [shape: f32[1,128], index: 3, kind: input, shape index: {}]   ;;  %s664_s4 = inlined_call_operand.vmem [shape: bf16[8,128], index: 4, kind: output, shape index: {}]  }
   0x1   :  { %v488_v0 = vld [vmem:[%s660_s1 + $0x78] sm:$0xff]   ;;  %v492_v4 = vld [vmem:[%s660_s1 + $0x70] sm:$0xff]   ;;  %v496_v8 = vld [vmem:[%s660_s1 + $0x68] sm:$0xff]  }
   0x2   :  { %v489_v1 = vld [vmem:[%s660_s1 + $0xf8] sm:$0xff]   ;;  %444 = vmatprep.subr.bf16.mxu0 %v488_v0  ;;  %v493_v5 = vld [vmem:[%s660_s1 + $0xf0] sm:$0xff]   ;;  %v497_v9 = vld [vmem:[%s660_s1 + $0xe8] sm:$0xff]  }
   0x3   :  { %v490_v2 = vld [vmem:[%s660_s1 + $0x38] sm:$0xff]   ;;  %466 = vmatprep.subr.bf16.mxu1 %v489_v1  ;;  %v494_v6 = vld [vmem:[%s660_s1 + $0x30] sm:$0xff]   ;;  %v498_v10 = vld [vmem:[%s660_s1 + $0x28] sm:$0xff]  }
   0x4   :  { %v491_v3 = vld [vmem:[%s660_s1 + $0xb8] sm:$0xff]   ;;  %445 = vmatpush3.bf16.msra.mxu0 %v490_v2  ;;  %v495_v7 = vld [vmem:[%s660_s1 + $0xb0] sm:$0xff]   ;;  %v499_v11 = vld [vmem:[%s660_s1 + $0xa8] sm:$0xff]  }
   0x5   :  { %467 = vmatpush3.bf16.msra.mxu1 %v491_v3  ;;  %446 = vmatprep.subr.bf16.mxu0 %v492_v4  ;;  %v500_v12 = vld [vmem:[%s660_s1 + $0x60] sm:$0xff]   ;;  %v504_v16 = vld [vmem:[%s660_s1 + $0x58] sm:$0xff]   ;;  %v508_v20 = vld [vmem:[%s660_s1 + $0x50] sm:$0xff]  }
   0x6   :  { %468 = vmatprep.subr.bf16.mxu1 %v493_v5  ;;  %v501_v13 = vld [vmem:[%s660_s1 + $0xe0] sm:$0xff]   ;;  %v505_v17 = vld [vmem:[%s660_s1 + $0xd8] sm:$0xff]   ;;  %v509_v21 = vld [vmem:[%s660_s1 + $0xd0] sm:$0xff]  }
   0x7   :  { %v502_v14 = vld [vmem:[%s660_s1 + $0x20] sm:$0xff]   ;;  %v506_v18 = vld [vmem:[%s660_s1 + $0x18] sm:$0xff]   ;;  %v510_v22 = vld [vmem:[%s660_s1 + $0x10] sm:$0xff]  }
   0x8   :  { %447 = vmatpush3.bf16.msra.mxu0 %v494_v6  ;;  %v503_v15 = vld [vmem:[%s660_s1 + $0xa0] sm:$0xff]   ;;  %v507_v19 = vld [vmem:[%s660_s1 + $0x98] sm:$0xff]   ;;  %v511_v23 = vld [vmem:[%s660_s1 + $0x90] sm:$0xff]  }
   0x9   :  { %469 = vmatpush3.bf16.msra.mxu1 %v495_v7  ;;  %448 = vmatprep.subr.bf16.mxu0 %v496_v8  ;;  %v512_v24 = vld [vmem:[%s660_s1 + $0x48] sm:$0xff]   ;;  %v516_v28 = vld [vmem:[%s660_s1 + $0x40] sm:$0xff]  }
   0xa   :  { %470 = vmatprep.subr.bf16.mxu1 %v497_v9  ;;  %v513_v25 = vld [vmem:[%s660_s1 + $0xc8] sm:$0xff]   ;;  %v517_v29 = vld [vmem:[%s660_s1 + $0xc0] sm:$0xff]  }
   0xb   :  { %v514_v26 = vld [vmem:[%s660_s1 + $0x8] sm:$0xff]   ;;  %v518_v30 = vld [vmem:[%s660_s1] sm:$0xff]  }
   0xc   :  { %449 = vmatpush3.bf16.msra.mxu0 %v498_v10  ;;  %v515_v27 = vld [vmem:[%s660_s1 + $0x88] sm:$0xff]   ;;  %v519_v31 = vld [vmem:[%s660_s1 + $0x80] sm:$0xff]  }
   0xd   :  { %471 = vmatpush3.bf16.msra.mxu1 %v499_v11  ;;  %450 = vmatprep.subr.bf16.mxu0 %v500_v12  ;;  %v24_v32 = vld [vmem:[%s661_s0] sm:$0xff]  ;;  %v25_v33 = vld [vmem:[%s661_s0 + $0x8] sm:$0xff] }
   0xe   :  { %472 = vmatprep.subr.bf16.mxu1 %v501_v13  ;;  %v406_v34 = vcombine.low %v24_v32, %v24_v32  ;;  %v407_v35 = vcombine.high %v24_v32, %v24_v32  ;;  %v408_v36 = vcombine.low %v25_v33, %v25_v33  ;;  %v409_v37 = vcombine.high %v25_v33, %v25_v33  ;;  %v442_v44 = vld [vmem:[%s662_s2] ss:$0 sm:$0xff] }
   0xf   :  { %v443_v48 = vld [vmem:[%s663_s3] ss:$0 sm:$0xff] }
  0x10   :  { %451 = vmatpush3.bf16.msra.mxu0 %v502_v14  ;;  %328 = vmatprep.mubr.bf16.mxu0 %v407_v35 }
  0x11   :  { %473 = vmatpush3.bf16.msra.mxu1 %v503_v15  ;;  %452 = vmatprep.subr.bf16.mxu0 %v504_v16 }
  0x12   :  { %474 = vmatprep.subr.bf16.mxu1 %v505_v17  ;;  %368 = vmatprep.mubr.bf16.mxu1 %v409_v37 }
  0x14   :  { %453 = vmatpush3.bf16.msra.mxu0 %v506_v18 }
  0x15   :  { %475 = vmatpush3.bf16.msra.mxu1 %v507_v19  ;;  %454 = vmatprep.subr.bf16.mxu0 %v508_v20 }
  0x16   :  { %476 = vmatprep.subr.bf16.mxu1 %v509_v21 }
  0x18   :  { %455 = vmatpush3.bf16.msra.mxu0 %v510_v22 }
  0x19   :  { %477 = vmatpush3.bf16.msra.mxu1 %v511_v23  ;;  %456 = vmatprep.subr.bf16.mxu0 %v512_v24 }
  0x1a   :  { %478 = vmatprep.subr.bf16.mxu1 %v513_v25 }
  0x1c   :  { %457 = vmatpush3.bf16.msra.mxu0 %v514_v26 }
  0x1d   :  { %479 = vmatpush3.bf16.msra.mxu1 %v515_v27  ;;  %458 = vmatprep.subr.bf16.mxu0 %v516_v28 }
  0x1e   :  { %480 = vmatprep.subr.bf16.mxu1 %v517_v29 }
  0x20   :  { %459 = vmatpush3.bf16.msra.mxu0 %v518_v30 }
  0x21   :  { %481 = vmatpush3.bf16.msra.mxu1 %v519_v31 }
  0x23   :  { %329 = vmatmul.mubr.bf16.vlgmr.msra.gmra.mxu0 %v406_v34 }
  0x24   :  { %369 = vmatmul.mubr.bf16.vlgmr.msra.gmra.mxu1 %v408_v36 }
  0xe3   :  { %v460_v38 = vpop.f32.mrf.mxu0 }
  0xe4   :  { %v482_v39 = vpop.f32.mrf.mxu1 }
  0xe5   :  { %v461_v40 = vpop.f32.mrf.mxu0 }
  0xe6   :  { %v483_v41 = vpop.f32.mrf.mxu1  ;;  %v462_v42 = vadd.f32 %v461_v40, %v460_v38 }
  0xe7   :  { %v484_v43 = vadd.f32 %v483_v41, %v482_v39  ;;  %v463_v45 = vpop.f32.mrf.mxu0 }
  0xe8   :  { %v485_v46 = vpop.f32.mrf.mxu1 }
  0xe9   :  { %v371_v47 = vadd.f32 %v484_v43, %v462_v42  ;;  %v464_v49 = vpop.f32.mrf.mxu0 }
  0xea   :  { %v486_v50 = vpop.f32.mrf.mxu1 }
  0xeb   :  { %v389_v51 = vadd.f32 %v442_v44, %v371_v47 }
  0xed   :  { %vm390_vm0 = vcmp.ge.f32.partialorder %v389_v51, 0.0  ;;  %v398_v52 = vmul.f32 %v443_v48, %v389_v51 }
  0xef   :  { %v399_v53 = vsel %vm390_vm0, %v389_v51, %v398_v52 }
  0xf0   :  { %v400_v54 = vpack.c.bf16 %v399_v53, %v399_v53 }
  0xf2   :  { %401 = vst [vmem:[%s664_s4] sm:$0xf] %v400_v54 }

// kernel: gen_forward.32
= control target key start
LH: loop header
LB: loop body
LE: loop exit
PB: predicated region body
PF: predicated region fallthrough
CT: control target
= control target key end

     0   :  { %s915_s15 = smov 0   ;;  %s917_s16 = smov 0   ;;  %s1001_s0 = inlined_call_operand.vmem [shape: bf16[8,2048], index: 0, kind: input, shape index: {}]   ;;  %s1002_s1 = inlined_call_operand.vmem [shape: bf16[2048,128], index: 1, kind: input, shape index: {}]   ;;  %s1003_s2 = inlined_call_operand.vmem [shape: f32[1,128], index: 2, kind: input, shape index: {}]   ;;  %s1004_s3 = inlined_call_operand.vmem [shape: f32[1,128], index: 3, kind: input, shape index: {}]   ;;  %s1005_s4 = inlined_call_operand.vmem [shape: bf16[8,128], index: 4, kind: output, shape index: {}]  }
   0x1   :  { %s919_s17 = smov 0  }
   0x2 LB: > { %s23_s18 = sadd.s32 1, %s883_s16  ;;  %p712_p0 = scmp.ge.s32.totalorder %s887_s17, 1  ;;  %s887_s17 = sphi %s919_s17, %s14_s17   ;;  %s883_s16 = sphi %s917_s16, %s1007_s16   ;;  %s879_s15 = sphi %s915_s15, %s1006_s15  }
   0x3   : > { %p24_p1 = scmp.ge.s32.totalorder %s23_s18, 4  ;;  %p192_p2 = scmp.lt.s32.totalorder %s887_s17, 5 }
   0x5   : > { %s1009_s18 = smov (%p24_p1, %s23_s18), 0  ;;  %p193_p3 = pnand %p712_p0, %p192_p2 }
   0x6   : > { %s713_s19 = sshll.u32 (!%p193_p3), %s879_s15, 2  ;;  %s715_s20 = sshll.u32 (!%p193_p3), %s879_s15, 6 }
   0x7   : > { %196 = sbr.rel (%p193_p3) target bundleno = 274 (0x112), region = 36  ;;  %p229_p4 = scmp.lt.s32.totalorder (!%p193_p3), %s713_s19, 15 }
   0x8   : > { %p237_p5 = scmp.lt.s32.totalorder (!%p193_p3), %s715_s20, 255  ;;  %p717_p6 = scmp.ne.s32.totalorder (!%p193_p3), %s879_s15, 0 }
   0xc   : > { %s1011_s19 = smov (!%p229_p4, %s713_s19), 15  ;;  %s1013_s20 = smov (!%p237_p5, %s715_s20), 255 }
   0xd   : > { %s714_s21 = sshll.u32 %s1011_s19, 2  ;;  %s716_s25 = sshll.u32 %s1013_s20, 2 }
   0xe   : > { %s940_s24 = scalar_lea.vmem %s1001_s0, %s714_s21  ;;  %s945_s28 = scalar_lea.vmem %s1002_s1, %s716_s25 }
   0xf   : > { %250 = sbr.rel (%p717_p6) target bundleno = 22 (0x16), region = 40 }
  0x14   : > { %v889_v0 = vmov 0.0  }
  0x15   : > { %251 = vst [vmem:[#allocation2] sm:$0xff] %v889_v0 }
  0x16 PF: > { %v829_v1 = vld [vmem:[%s945_s28 + $0x78] sm:$0xff]   ;;  %v833_v5 = vld [vmem:[%s945_s28 + $0x70] sm:$0xff]   ;;  %v837_v9 = vld [vmem:[%s945_s28 + $0x68] sm:$0xff]   ;;  %p754_p7 = scmp.ne.s32.totalorder %s879_s15, 3 }
  0x17   : > { %v830_v2 = vld [vmem:[%s945_s28 + $0xf8] sm:$0xff]   ;;  %760 = vmatprep.subr.bf16.mxu0 %v829_v1  ;;  %v834_v6 = vld [vmem:[%s945_s28 + $0xf0] sm:$0xff]   ;;  %v838_v10 = vld [vmem:[%s945_s28 + $0xe8] sm:$0xff]  }
  0x18   : > { %v831_v3 = vld [vmem:[%s945_s28 + $0x38] sm:$0xff]   ;;  %782 = vmatprep.subr.bf16.mxu1 %v830_v2  ;;  %v835_v7 = vld [vmem:[%s945_s28 + $0x30] sm:$0xff]   ;;  %v839_v11 = vld [vmem:[%s945_s28 + $0x28] sm:$0xff]  }
  0x19   : > { %v832_v4 = vld [vmem:[%s945_s28 + $0xb8] sm:$0xff]   ;;  %761 = vmatpush3.bf16.msra.mxu0 %v831_v3  ;;  %v836_v8 = vld [vmem:[%s945_s28 + $0xb0] sm:$0xff]   ;;  %v840_v12 = vld [vmem:[%s945_s28 + $0xa8] sm:$0xff]  }
  0x1a   : > { %783 = vmatpush3.bf16.msra.mxu1 %v832_v4  ;;  %762 = vmatprep.subr.bf16.mxu0 %v833_v5  ;;  %v841_v13 = vld [vmem:[%s945_s28 + $0x60] sm:$0xff]   ;;  %v845_v17 = vld [vmem:[%s945_s28 + $0x58] sm:$0xff]   ;;  %v849_v21 = vld [vmem:[%s945_s28 + $0x50] sm:$0xff]  }
  0x1b   : > { %784 = vmatprep.subr.bf16.mxu1 %v834_v6  ;;  %v842_v14 = vld [vmem:[%s945_s28 + $0xe0] sm:$0xff]   ;;  %v846_v18 = vld [vmem:[%s945_s28 + $0xd8] sm:$0xff]   ;;  %v850_v22 = vld [vmem:[%s945_s28 + $0xd0] sm:$0xff]  }
  0x1c   : > { %v843_v15 = vld [vmem:[%s945_s28 + $0x20] sm:$0xff]   ;;  %v847_v19 = vld [vmem:[%s945_s28 + $0x18] sm:$0xff]   ;;  %v851_v23 = vld [vmem:[%s945_s28 + $0x10] sm:$0xff]  }
  0x1d   : > { %763 = vmatpush3.bf16.msra.mxu0 %v835_v7  ;;  %v844_v16 = vld [vmem:[%s945_s28 + $0xa0] sm:$0xff]   ;;  %v848_v20 = vld [vmem:[%s945_s28 + $0x98] sm:$0xff]   ;;  %v852_v24 = vld [vmem:[%s945_s28 + $0x90] sm:$0xff]  }
  0x1e   : > { %785 = vmatpush3.bf16.msra.mxu1 %v836_v8  ;;  %764 = vmatprep.subr.bf16.mxu0 %v837_v9  ;;  %v853_v25 = vld [vmem:[%s945_s28 + $0x48] sm:$0xff]   ;;  %v857_v29 = vld [vmem:[%s945_s28 + $0x40] sm:$0xff]  }
  0x1f   : > { %786 = vmatprep.subr.bf16.mxu1 %v838_v10  ;;  %v854_v26 = vld [vmem:[%s945_s28 + $0xc8] sm:$0xff]   ;;  %v858_v30 = vld [vmem:[%s945_s28 + $0xc0] sm:$0xff]  }
  0x20   : > { %v855_v27 = vld [vmem:[%s945_s28 + $0x8] sm:$0xff]   ;;  %v859_v31 = vld [vmem:[%s945_s28] sm:$0xff]  }
  0x21   : > { %765 = vmatpush3.bf16.msra.mxu0 %v839_v11  ;;  %v856_v28 = vld [vmem:[%s945_s28 + $0x88] sm:$0xff]   ;;  %v860_v32 = vld [vmem:[%s945_s28 + $0x80] sm:$0xff]  }
  0x22   : > { %787 = vmatpush3.bf16.msra.mxu1 %v840_v12  ;;  %766 = vmatprep.subr.bf16.mxu0 %v841_v13  ;;  %v253_v33 = vld [vmem:[%s940_s24] sm:$0xff]  ;;  %v254_v34 = vld [vmem:[%s940_s24 + $0x8] sm:$0xff] }
  0x23   : > { %788 = vmatprep.subr.bf16.mxu1 %v842_v14  ;;  %v718_v35 = vcombine.low %v253_v33, %v253_v33  ;;  %v719_v36 = vcombine.high %v253_v33, %v253_v33  ;;  %v720_v37 = vcombine.low %v254_v34, %v254_v34  ;;  %v721_v38 = vcombine.high %v254_v34, %v254_v34  ;;  %v252_v45 = vld [vmem:[#allocation2] sm:$0xff] }
  0x25   : > { %767 = vmatpush3.bf16.msra.mxu0 %v843_v15  ;;  %557 = vmatprep.mubr.bf16.mxu0 %v719_v36 }
  0x26   : > { %789 = vmatpush3.bf16.msra.mxu1 %v844_v16  ;;  %768 = vmatprep.subr.bf16.mxu0 %v845_v17 }
  0x27   : > { %790 = vmatprep.subr.bf16.mxu1 %v846_v18  ;;  %597 = vmatprep.mubr.bf16.mxu1 %v721_v38 }
  0x29   : > { %769 = vmatpush3.bf16.msra.mxu0 %v847_v19 }
  0x2a   : > { %791 = vmatpush3.bf16.msra.mxu1 %v848_v20  ;;  %770 = vmatprep.subr.bf16.mxu0 %v849_v21 }
  0x2b   : > { %792 = vmatprep.subr.bf16.mxu1 %v850_v22 }
  0x2d   : > { %771 = vmatpush3.bf16.msra.mxu0 %v851_v23 }
  0x2e   : > { %793 = vmatpush3.bf16.msra.mxu1 %v852_v24  ;;  %772 = vmatprep.subr.bf16.mxu0 %v853_v25 }
  0x2f   : > { %794 = vmatprep.subr.bf16.mxu1 %v854_v26 }
  0x31   : > { %773 = vmatpush3.bf16.msra.mxu0 %v855_v27 }
  0x32   : > { %795 = vmatpush3.bf16.msra.mxu1 %v856_v28  ;;  %774 = vmatprep.subr.bf16.mxu0 %v857_v29 }
  0x33   : > { %796 = vmatprep.subr.bf16.mxu1 %v858_v30 }
  0x35   : > { %775 = vmatpush3.bf16.msra.mxu0 %v859_v31 }
  0x36   : > { %797 = vmatpush3.bf16.msra.mxu1 %v860_v32 }
  0x38   : > { %558 = vmatmul.mubr.bf16.vlgmr.msra.gmra.mxu0 %v718_v35 }
  0x39   : > { %598 = vmatmul.mubr.bf16.vlgmr.msra.gmra.mxu1 %v720_v37 }
  0xf8   : > { %v776_v39 = vpop.f32.mrf.mxu0 }
  0xf9   : > { %v798_v40 = vpop.f32.mrf.mxu1 }
  0xfa   : > { %v777_v41 = vpop.f32.mrf.mxu0 }
  0xfb   : > { %v799_v42 = vpop.f32.mrf.mxu1  ;;  %v778_v43 = vadd.f32 %v777_v41, %v776_v39 }
  0xfc   : > { %v800_v44 = vadd.f32 %v799_v42, %v798_v40  ;;  %v779_v46 = vpop.f32.mrf.mxu0 }
  0xfd   : > { %v801_v47 = vpop.f32.mrf.mxu1 }
  0xfe   : > { %v600_v48 = vadd.f32 %v800_v44, %v778_v43  ;;  %v780_v49 = vpop.f32.mrf.mxu0  ;;  %610 = sbr.rel (%p754_p7) target bundleno = 274 (0x112), region = 44 }
  0xff   : > { %v802_v50 = vpop.f32.mrf.mxu1 }
 0x100   : > { %v605_v51 = vadd.f32 %v600_v48, %v252_v45 }
 0x102   : > { %606 = vst [vmem:[#allocation2] sm:$0xff] %v605_v51 }
 0x103   : > { %v755_v53 = vld [vmem:[%s1003_s2] ss:$0 sm:$0xff] }
 0x104   : > { %v756_v54 = vld [vmem:[%s1004_s3] ss:$0 sm:$0xff] }
 0x109   : > { %v611_v52 = vld [vmem:[#allocation2] sm:$0xff] }
 0x10a   : > { %v619_v55 = vadd.f32 %v755_v53, %v611_v52 }
 0x10c   : > { %vm620_vm0 = vcmp.ge.f32.partialorder %v619_v55, 0.0  ;;  %v628_v56 = vmul.f32 %v756_v54, %v619_v55 }
 0x10e   : > { %v629_v57 = vsel %vm620_vm0, %v619_v55, %v628_v56 }
 0x10f   : > { %v630_v58 = vpack.c.bf16 %v629_v57, %v629_v57 }
 0x111   : > { %631 = vst [vmem:[%s1005_s4] sm:$0xf] %v630_v58 }
 0x112 PF: > { %s14_s17 = sadd.s32 1, %s887_s17   ;;  %s1006_s15 = smov %s883_s16 }
 0x113   : > { %p11_p8 = scmp.ge.s32.totalorder %s14_s17, 6   ;;  %s1007_s16 = smov %s1009_s18 }
 0x115   :  { %13 = sbr.rel (!%p11_p8) target bundleno = 2 (0x2), region = 77 }

// kernel: gen_forward.37
= control target key start
LH: loop header
LB: loop body
LE: loop exit
PB: predicated region body
PF: predicated region fallthrough
CT: control target
= control target key end

     0   :  { %v683_v0 = vmov 0.0   ;;  %vm684_vm0 = vmmov 0   ;;  %vm218_vm1 = vcmask 261120   ;;  %s859_s3 = inlined_call_operand.vmem [shape: bf16[288,128], index: 3, kind: input, shape index: {}]   ;;  %s860_s2 = inlined_call_operand.vmem [shape: bf16[8,288], index: 2, kind: input, shape index: {}]   ;;  %s861_s1 = inlined_call_operand.vmem [shape: bf16[288,128], index: 1, kind: input, shape index: {}]   ;;  %s862_s0 = inlined_call_operand.vmem [shape: bf16[8,288], index: 0, kind: input, shape index: {}]   ;;  %s863_s4 = inlined_call_operand.vmem [shape: f32[1,128], index: 4, kind: input, shape index: {}]   ;;  %s864_s5 = inlined_call_operand.vmem [shape: f32[1,128], index: 5, kind: input, shape index: {}]   ;;  %s865_s6 = inlined_call_operand.vmem [shape: bf16[8,128], index: 6, kind: output, shape index: {}]  }
   0x1   :  { %623 = vmatprep.subr.bf16.mxu1 %v683_v0  ;;  %v641_v1 = vld [vmem:[%s859_s3 + $0x78] sm:$0xff]   ;;  %627 = vmatprep.mubr.msk.bf16.mxu1 %vm684_vm0, %v683_v0  ;;  %v642_v2 = vld [vmem:[%s859_s3 + $0x88] sm:$0xff]   ;;  %v644_v4 = vld [vmem:[%s859_s3 + $0x70] sm:$0xff]  }
   0x2   :  { %573 = vmatprep.subr.bf16.mxu0 %v641_v1  ;;  %v643_v3 = vld [vmem:[%s859_s3 + $0x38] sm:$0xff]   ;;  %624 = vmatpush3.bf16.msra.mxu1 %v642_v2  ;;  %v645_v5 = vld [vmem:[%s859_s3 + $0x80] sm:$0xff]   ;;  %v646_v6 = vld [vmem:[%s859_s3 + $0x30] sm:$0xff]  }
   0x3   :  { %574 = vmatpush3.bf16.msra.mxu0 %v643_v3  ;;  %625 = vmatprep.subr.bf16.mxu1 %v683_v0  ;;  %v647_v7 = vld [vmem:[%s860_s2 + $0x8] ss:$0 sps:$4 sm:$0xff]   ;;  %v648_v8 = vld [vmem:[%s861_s1 + $0x78] sm:$0xff]   ;;  %v652_v12 = vld [vmem:[%s861_s1 + $0x70] sm:$0xff]  }
   0x4   :  { %575 = vmatprep.subr.bf16.mxu0 %v644_v4  ;;  %v649_v9 = vld [vmem:[%s859_s3 + $0x68] sm:$0xff]   ;;  %v650_v10 = vld [vmem:[%s861_s1 + $0x38] sm:$0xff]   ;;  %v653_v13 = vld [vmem:[%s859_s3 + $0x60] sm:$0xff]  }
   0x5   :  { %v651_v11 = vld [vmem:[%s859_s3 + $0x28] sm:$0xff]   ;;  %v654_v14 = vld [vmem:[%s861_s1 + $0x30] sm:$0xff]   ;;  %v655_v15 = vld [vmem:[%s859_s3 + $0x20] sm:$0xff]  }
   0x6   :  { %626 = vmatpush3.bf16.msra.mxu1 %v645_v5  ;;  %v656_v16 = vld [vmem:[%s861_s1 + $0x68] sm:$0xff]   ;;  %v657_v17 = vld [vmem:[%s859_s3 + $0x58] sm:$0xff]   ;;  %v660_v20 = vld [vmem:[%s861_s1 + $0x60] sm:$0xff]  }
   0x7   :  { %576 = vmatpush3.bf16.msra.mxu0 %v646_v6  ;;  %598 = vmatprep.subr.bf16.mxu1 %v648_v8  ;;  %v658_v18 = vld [vmem:[%s861_s1 + $0x28] sm:$0xff]   ;;  %v659_v19 = vld [vmem:[%s859_s3 + $0x18] sm:$0xff]   ;;  %v661_v21 = vld [vmem:[%s859_s3 + $0x50] sm:$0xff]  }
   0x8   :  { %577 = vmatprep.subr.bf16.mxu0 %v649_v9  ;;  %v662_v22 = vld [vmem:[%s861_s1 + $0x20] sm:$0xff]   ;;  %v663_v23 = vld [vmem:[%s859_s3 + $0x10] sm:$0xff]   ;;  %v664_v24 = vld [vmem:[%s861_s1 + $0x58] sm:$0xff]  }
   0x9   :  { %628 = vmatmul.mubr.msk.bf16.vlgmr.msra.gmra.mxu1 %vm218_vm1, %v647_v7  ;;  %v665_v25 = vld [vmem:[%s859_s3 + $0x48] sm:$0xff]   ;;  %v666_v26 = vld [vmem:[%s861_s1 + $0x18] sm:$0xff]   ;;  %v668_v28 = vld [vmem:[%s861_s1 + $0x50] sm:$0xff]  }
   0xa   :  { %599 = vmatpush3.bf16.msra.mxu1 %v650_v10  ;;  %v667_v27 = vld [vmem:[%s859_s3 + $0x8] sm:$0xff]   ;;  %v669_v29 = vld [vmem:[%s859_s3 + $0x40] sm:$0xff]   ;;  %v670_v30 = vld [vmem:[%s861_s1 + $0x10] sm:$0xff]  }
   0xb   :  { %578 = vmatpush3.bf16.msra.mxu0 %v651_v11  ;;  %600 = vmatprep.subr.bf16.mxu1 %v652_v12  ;;  %v671_v31 = vld [vmem:[%s859_s3] sm:$0xff]   ;;  %v674_v35 = vld [vmem:[%s861_s1 + $0x48] sm:$0xff]  }
   0xc   :  { %579 = vmatprep.subr.bf16.mxu0 %v653_v13  ;;  %v62_v32 = vld [vmem:[%s860_s2] sm:$0xff]  ;;  %v675_v36 = vld [vmem:[%s861_s1 + $0x8] sm:$0xff]  }
   0xd   :  { %v527_v33 = vcombine.low %v62_v32, %v62_v32  ;;  %v528_v34 = vcombine.high %v62_v32, %v62_v32  ;;  %v676_v37 = vld [vmem:[%s861_s1 + $0x88] sm:$0xff]   ;;  %v677_v38 = vld [vmem:[%s861_s1 + $0x40] sm:$0xff]  }
   0xe   :  { %601 = vmatpush3.bf16.msra.mxu1 %v654_v14  ;;  %v678_v39 = vld [vmem:[%s861_s1] sm:$0xff]   ;;  %v682_v44 = vld [vmem:[%s862_s0 + $0x8] ss:$0 sps:$4 sm:$0xff]  }
   0xf   :  { %580 = vmatpush3.bf16.msra.mxu0 %v655_v15  ;;  %602 = vmatprep.subr.bf16.mxu1 %v656_v16  ;;  %v679_v40 = vld [vmem:[%s861_s1 + $0x80] sm:$0xff]  }
  0x10   :  { %581 = vmatprep.subr.bf16.mxu0 %v657_v17  ;;  %254 = vmatprep.mubr.bf16.mxu0 %v528_v34  ;;  %v24_v41 = vld [vmem:[%s862_s0] sm:$0xff] }
  0x11   :  { %v549_v42 = vcombine.low %v24_v41, %v24_v41  ;;  %v550_v43 = vcombine.high %v24_v41, %v24_v41  ;;  %v571_v63 = vld [vmem:[%s863_s4] ss:$0 sm:$0xff] }
  0x12   :  { %603 = vmatpush3.bf16.msra.mxu1 %v658_v18  ;;  %v572_v3 = vld [vmem:[%s864_s5] ss:$0 sm:$0xff] }
  0x13   :  { %582 = vmatpush3.bf16.msra.mxu0 %v659_v19  ;;  %604 = vmatprep.subr.bf16.mxu1 %v660_v20 }
  0x14   :  { %583 = vmatprep.subr.bf16.mxu0 %v661_v21  ;;  %455 = vmatprep.mubr.bf16.mxu1 %v550_v43 }
  0x16   :  { %605 = vmatpush3.bf16.msra.mxu1 %v662_v22 }
  0x17   :  { %584 = vmatpush3.bf16.msra.mxu0 %v663_v23  ;;  %606 = vmatprep.subr.bf16.mxu1 %v664_v24 }
  0x18   :  { %585 = vmatprep.subr.bf16.mxu0 %v665_v25 }
  0x1a   :  { %607 = vmatpush3.bf16.msra.mxu1 %v666_v26 }
  0x1b   :  { %586 = vmatpush3.bf16.msra.mxu0 %v667_v27  ;;  %608 = vmatprep.subr.bf16.mxu1 %v668_v28 }
  0x1c   :  { %587 = vmatprep.subr.bf16.mxu0 %v669_v29 }
  0x1e   :  { %609 = vmatpush3.bf16.msra.mxu1 %v670_v30 }
  0x1f   :  { %588 = vmatpush3.bf16.msra.mxu0 %v671_v31  ;;  %610 = vmatprep.subr.bf16.mxu1 %v674_v35 }
  0x20   :  { %631 = vmatprep.subr.bf16.mxu0 %v683_v0 }
  0x22   :  { %255 = vmatmul.mubr.bf16.vlgmr.msra.gmra.mxu0 %v527_v33  ;;  %611 = vmatpush3.bf16.msra.mxu1 %v675_v36 }
  0x23   :  { %632 = vmatpush3.bf16.msra.mxu0 %v676_v37  ;;  %612 = vmatprep.subr.bf16.mxu1 %v677_v38 }
  0x24   :  { %633 = vmatprep.subr.bf16.mxu0 %v683_v0  ;;  %635 = vmatprep.mubr.msk.bf16.mxu0 %vm684_vm0, %v683_v0 }
  0x26   :  { %613 = vmatpush3.bf16.msra.mxu1 %v678_v39 }
  0x27   :  { %634 = vmatpush3.bf16.msra.mxu0 %v679_v40 }
  0x29   :  { %456 = vmatmul.mubr.bf16.vlgmr.msra.gmra.mxu1 %v549_v42 }
  0x2a   :  { %636 = vmatmul.mubr.msk.bf16.vlgmr.msra.gmra.mxu0 %vm218_vm1, %v682_v44 }
  0xc9   :  { %v296_v45 = vpop.f32.mrf.mxu1 }
  0xcb   :  { %v629_v46 = vpop.f32.mrf.mxu1 }
  0xcd   :  { %v299_v47 = vpop.f32.mrf.mxu1 }
  0xcf   :  { %v630_v48 = vpop.f32.mrf.mxu1 }
  0xe2   :  { %v589_v49 = vpop.f32.mrf.mxu0 }
  0xe4   :  { %v590_v50 = vpop.f32.mrf.mxu0 }
  0xe5   :  { %v591_v52 = vadd.f32 %v590_v50, %v589_v49 }
  0xe6   :  { %v592_v51 = vpop.f32.mrf.mxu0 }
  0xe7   :  { %v297_v57 = vadd.f32 %v591_v52, %v296_v45 }
  0xe8   :  { %v593_v53 = vpop.f32.mrf.mxu0 }
  0xe9   :  { %v614_v54 = vpop.f32.mrf.mxu1 }
  0xea   :  { %v497_v55 = vpop.f32.mrf.mxu0 }
  0xeb   :  { %v615_v56 = vpop.f32.mrf.mxu1 }
  0xec   :  { %v616_v58 = vadd.f32 %v615_v56, %v614_v54  ;;  %v637_v59 = vpop.f32.mrf.mxu0 }
  0xed   :  { %v617_v60 = vpop.f32.mrf.mxu1 }
  0xee   :  { %v458_v61 = vadd.f32 %v616_v58, %v297_v57  ;;  %v500_v62 = vpop.f32.mrf.mxu0 }
  0xef   :  { %v618_v0 = vpop.f32.mrf.mxu1 }
  0xf0   :  { %v498_v1 = vadd.f32 %v497_v55, %v458_v61  ;;  %v638_v2 = vpop.f32.mrf.mxu0 }
  0xf2   :  { %v510_v4 = vadd.f32 %v571_v63, %v498_v1 }
  0xf4   :  { %vm511_vm2 = vcmp.ge.f32.partialorder %v510_v4, 0.0  ;;  %v519_v5 = vmul.f32 %v572_v3, %v510_v4 }
  0xf6   :  { %v520_v6 = vsel %vm511_vm2, %v510_v4, %v519_v5 }
  0xf7   :  { %v521_v7 = vpack.c.bf16 %v520_v6, %v520_v6 }
  0xf9   :  { %522 = vst [vmem:[%s865_s6] sm:$0xf] %v521_v7 }

// kernel: gen_forward.38
= control target key start
LH: loop header
LB: loop body
LE: loop exit
PB: predicated region body
PF: predicated region fallthrough
CT: control target
= control target key end

     0   :  { %v208_v0 = vmov 0.0   ;;  %vm209_vm0 = vmmov 0   ;;  %s271_s1 = inlined_call_operand.vmem [shape: bf16[128,128], index: 1, kind: input, shape index: {}]   ;;  %s272_s0 = inlined_call_operand.vmem [shape: bf16[8,128], index: 0, kind: input, shape index: {}]   ;;  %s273_s2 = inlined_call_operand.vmem [shape: f32[1,128], index: 2, kind: input, shape index: {}]   ;;  %s274_s3 = inlined_call_operand.vmem [shape: f32[1,128], index: 3, kind: input, shape index: {}]   ;;  %s275_s4 = inlined_call_operand.vmem [shape: bf16[8,128], index: 4, kind: output, shape index: {}]  }
   0x1   :  { %178 = vmatprep.subr.bf16.mxu0 %v208_v0  ;;  %v200_v1 = vld [vmem:[%s271_s1 + $0x38] sm:$0xff]   ;;  %194 = vmatprep.mubr.msk.bf16.mxu0 %vm209_vm0, %v208_v0  ;;  %v201_v2 = vld [vmem:[%s271_s1 + $0x30] sm:$0xff]   ;;  %v202_v3 = vld [vmem:[%s271_s1 + $0x28] sm:$0xff]  }
   0x2   :  { %179 = vmatpush3.bf16.msra.mxu0 %v200_v1  ;;  %v203_v4 = vld [vmem:[%s271_s1 + $0x20] sm:$0xff]   ;;  %v204_v5 = vld [vmem:[%s271_s1 + $0x18] sm:$0xff]   ;;  %v205_v6 = vld [vmem:[%s271_s1 + $0x10] sm:$0xff]  }
   0x3   :  { %180 = vmatprep.subr.bf16.mxu0 %v208_v0  ;;  %v206_v7 = vld [vmem:[%s271_s1 + $0x8] sm:$0xff]   ;;  %v207_v8 = vld [vmem:[%s271_s1] sm:$0xff]  }
   0x4   :  { %v24_v9 = vld [vmem:[%s272_s0] sm:$0xf] }
   0x5   :  { %v167_v10 = vld [vmem:[%s273_s2] ss:$0 sm:$0xff] }
   0x6   :  { %181 = vmatpush3.bf16.msra.mxu0 %v201_v2  ;;  %v168_v12 = vld [vmem:[%s274_s3] ss:$0 sm:$0xff] }
   0x7   :  { %182 = vmatprep.subr.bf16.mxu0 %v208_v0 }
   0xa   :  { %183 = vmatpush3.bf16.msra.mxu0 %v202_v3 }
   0xb   :  { %184 = vmatprep.subr.bf16.mxu0 %v208_v0 }
   0xe   :  { %185 = vmatpush3.bf16.msra.mxu0 %v203_v4 }
   0xf   :  { %186 = vmatprep.subr.bf16.mxu0 %v208_v0 }
  0x12   :  { %187 = vmatpush3.bf16.msra.mxu0 %v204_v5 }
  0x13   :  { %188 = vmatprep.subr.bf16.mxu0 %v208_v0 }
  0x16   :  { %189 = vmatpush3.bf16.msra.mxu0 %v205_v6 }
  0x17   :  { %190 = vmatprep.subr.bf16.mxu0 %v208_v0 }
  0x1a   :  { %191 = vmatpush3.bf16.msra.mxu0 %v206_v7 }
  0x1b   :  { %192 = vmatprep.subr.bf16.mxu0 %v208_v0 }
  0x1e   :  { %193 = vmatpush3.bf16.msra.mxu0 %v207_v8 }
  0x21   :  { %195 = vmatmul.mubr.bf16.vlgmr.msra.gmra.mxu0 %v24_v9 }
  0xe1   :  { %v123_v11 = vpop.f32.mrf.mxu0 }
  0xe2   :  { %v142_v13 = vadd.f32 %v167_v10, %v123_v11 }
  0xe3   :  { %v196_v14 = vpop.f32.mrf.mxu0 }
  0xe4   :  { %vm143_vm1 = vcmp.ge.f32.partialorder %v142_v13, 0.0  ;;  %v151_v15 = vmul.f32 %v168_v12, %v142_v13 }
  0xe5   :  { %v126_v16 = vpop.f32.mrf.mxu0 }
  0xe6   :  { %v152_v17 = vsel %vm143_vm1, %v142_v13, %v151_v15 }
  0xe7   :  { %v153_v18 = vpack.c.bf16 %v152_v17, %v152_v17  ;;  %v197_v19 = vpop.f32.mrf.mxu0 }
  0xe9   :  { %154 = vst [vmem:[%s275_s4] sm:$0xf] %v153_v18 }

// kernel: gen_forward.40
= control target key start
LH: loop header
LB: loop body
LE: loop exit
PB: predicated region body
PF: predicated region fallthrough
CT: control target
= control target key end

     0   :  { %vm380_vm0 = vcmask 523264   ;;  %s971_s1 = inlined_call_operand.vmem [shape: bf16[576,128], index: 1, kind: input, shape index: {}]   ;;  %s972_s0 = inlined_call_operand.vmem [shape: bf16[32,576], index: 0, kind: input, shape index: {}]   ;;  %s973_s2 = inlined_call_operand.vmem [shape: f32[1,128], index: 2, kind: input, shape index: {}]   ;;  %s974_s3 = inlined_call_operand.vmem [shape: f32[1,128], index: 3, kind: input, shape index: {}]   ;;  %s975_s4 = inlined_call_operand.vmem [shape: bf16[32,128], index: 4, kind: output, shape index: {}]  }
   0x1   :  { %v746_v0 = vld [vmem:[%s971_s1 + $0x78] sm:$0xff]   ;;  %v750_v4 = vld [vmem:[%s971_s1 + $0x70] sm:$0xff]   ;;  %v754_v8 = vld [vmem:[%s971_s1 + $0x68] sm:$0xff]  }
   0x2   :  { %v747_v1 = vld [vmem:[%s971_s1 + $0xf8] sm:$0xff]   ;;  %672 = vmatprep.subr.bf16.mxu0 %v746_v0  ;;  %v751_v5 = vld [vmem:[%s971_s1 + $0xf0] sm:$0xff]   ;;  %v755_v9 = vld [vmem:[%s971_s1 + $0xe8] sm:$0xff]  }
   0x3   :  { %v748_v2 = vld [vmem:[%s971_s1 + $0x38] sm:$0xff]   ;;  %700 = vmatprep.subr.bf16.mxu1 %v747_v1  ;;  %v752_v6 = vld [vmem:[%s971_s1 + $0x30] sm:$0xff]   ;;  %v756_v10 = vld [vmem:[%s971_s1 + $0x28] sm:$0xff]  }
   0x4   :  { %v749_v3 = vld [vmem:[%s971_s1 + $0xb8] sm:$0xff]   ;;  %673 = vmatpush3.bf16.msra.mxu0 %v748_v2  ;;  %v753_v7 = vld [vmem:[%s971_s1 + $0xb0] sm:$0xff]   ;;  %v757_v11 = vld [vmem:[%s971_s1 + $0xa8] sm:$0xff]  }
   0x5   :  { %701 = vmatpush3.bf16.msra.mxu1 %v749_v3  ;;  %674 = vmatprep.subr.bf16.mxu0 %v750_v4  ;;  %v758_v12 = vld [vmem:[%s971_s1 + $0x60] sm:$0xff]   ;;  %v762_v16 = vld [vmem:[%s971_s1 + $0x58] sm:$0xff]   ;;  %v766_v20 = vld [vmem:[%s971_s1 + $0x50] sm:$0xff]  }
   0x6   :  { %702 = vmatprep.subr.bf16.mxu1 %v751_v5  ;;  %v759_v13 = vld [vmem:[%s971_s1 + $0xe0] sm:$0xff]   ;;  %v763_v17 = vld [vmem:[%s971_s1 + $0xd8] sm:$0xff]   ;;  %v767_v21 = vld [vmem:[%s971_s1 + $0xd0] sm:$0xff]  }
   0x7   :  { %v760_v14 = vld [vmem:[%s971_s1 + $0x20] sm:$0xff]   ;;  %v764_v18 = vld [vmem:[%s971_s1 + $0x18] sm:$0xff]   ;;  %v768_v22 = vld [vmem:[%s971_s1 + $0x10] sm:$0xff]  }
   0x8   :  { %675 = vmatpush3.bf16.msra.mxu0 %v752_v6  ;;  %v761_v15 = vld [vmem:[%s971_s1 + $0xa0] sm:$0xff]   ;;  %v765_v19 = vld [vmem:[%s971_s1 + $0x98] sm:$0xff]   ;;  %v769_v23 = vld [vmem:[%s971_s1 + $0x90] sm:$0xff]  }
   0x9   :  { %703 = vmatpush3.bf16.msra.mxu1 %v753_v7  ;;  %676 = vmatprep.subr.bf16.mxu0 %v754_v8  ;;  %v770_v24 = vld [vmem:[%s971_s1 + $0x48] sm:$0xff]   ;;  %v774_v28 = vld [vmem:[%s971_s1 + $0x40] sm:$0xff]   ;;  %v784_v36 = vld [vmem:[%s971_s1 + $0x118] sm:$0xff]  }
   0xa   :  { %704 = vmatprep.subr.bf16.mxu1 %v755_v9  ;;  %v771_v25 = vld [vmem:[%s971_s1 + $0xc8] sm:$0xff]   ;;  %v775_v29 = vld [vmem:[%s971_s1 + $0xc0] sm:$0xff]   ;;  %v785_v37 = vld [vmem:[%s971_s1 + $0x110] sm:$0xff]  }
   0xb   :  { %v772_v26 = vld [vmem:[%s971_s1 + $0x8] sm:$0xff]   ;;  %v776_v30 = vld [vmem:[%s971_s1] sm:$0xff]  }
   0xc   :  { %677 = vmatpush3.bf16.msra.mxu0 %v756_v10  ;;  %v773_v27 = vld [vmem:[%s971_s1 + $0x88] sm:$0xff]   ;;  %v777_v31 = vld [vmem:[%s971_s1 + $0x80] sm:$0xff]  }
   0xd   :  { %705 = vmatpush3.bf16.msra.mxu1 %v757_v11  ;;  %678 = vmatprep.subr.bf16.mxu0 %v758_v12  ;;  %v778_v32 = vld [vmem:[%s972_s0] ss:$20 sps:$4 sm:$0xff]   ;;  %v780_v33 = vld [vmem:[%s972_s0 + $0x4] ss:$20 sps:$4 sm:$0xff]   ;;  %v781_v34 = vld [vmem:[%s972_s0 + $0x8] ss:$20 sps:$4 sm:$0xff]  }
   0xe   :  { %706 = vmatprep.subr.bf16.mxu1 %v759_v13  ;;  %v783_v35 = vld [vmem:[%s972_s0 + $0xc] ss:$20 sps:$4 sm:$0xff]   ;;  %419 = vmatprep.mubr.bf16.mxu0 %v780_v33  ;;  %v788_v39 = vld [vmem:[%s972_s0 + $0x34] ss:$20 sps:$4 sm:$0xff]   ;;  %v791_v42 = vld [vmem:[%s972_s0 + $0x30] ss:$20 sps:$4 sm:$0xff]  }
   0xf   :  { %468 = vmatprep.mubr.bf16.mxu1 %v783_v35  ;;  %v786_v38 = vld [vmem:[%s972_s0 + $0x2c] ss:$20 sps:$4 sm:$0xff]   ;;  %v790_v40 = vld [vmem:[%s972_s0 + $0x28] ss:$20 sps:$4 sm:$0xff]   ;;  %v794_v43 = vld [vmem:[%s972_s0 + $0x10] ss:$20 sps:$4 sm:$0xff]  }
  0x10   :  { %679 = vmatpush3.bf16.msra.mxu0 %v760_v14  ;;  %v792_v41 = vld [vmem:[%s971_s1 + $0x108] sm:$0xff]   ;;  %v793_v44 = vld [vmem:[%s971_s1 + $0x100] sm:$0xff]  }
  0x11   :  { %707 = vmatpush3.bf16.msra.mxu1 %v761_v15  ;;  %680 = vmatprep.subr.bf16.mxu0 %v762_v16  ;;  %v795_v45 = vld [vmem:[%s972_s0 + $0x38] ss:$20 sps:$4 sm:$0xff]   ;;  %v651_v6 = vld [vmem:[%s973_s2] ss:$0 sm:$0xff] }
  0x12   :  { %708 = vmatprep.subr.bf16.mxu1 %v763_v17  ;;  %v652_v15 = vld [vmem:[%s974_s3] ss:$0 sm:$0xff] }
  0x14   :  { %681 = vmatpush3.bf16.msra.mxu0 %v764_v18 }
  0x15   :  { %709 = vmatpush3.bf16.msra.mxu1 %v765_v19  ;;  %682 = vmatprep.subr.bf16.mxu0 %v766_v20 }
  0x16   :  { %710 = vmatprep.subr.bf16.mxu1 %v767_v21 }
  0x18   :  { %683 = vmatpush3.bf16.msra.mxu0 %v768_v22 }
  0x19   :  { %711 = vmatpush3.bf16.msra.mxu1 %v769_v23  ;;  %684 = vmatprep.subr.bf16.mxu0 %v770_v24 }
  0x1a   :  { %712 = vmatprep.subr.bf16.mxu1 %v771_v25 }
  0x1c   :  { %685 = vmatpush3.bf16.msra.mxu0 %v772_v26 }
  0x1d   :  { %713 = vmatpush3.bf16.msra.mxu1 %v773_v27  ;;  %686 = vmatprep.subr.bf16.mxu0 %v774_v28 }
  0x1e   :  { %714 = vmatprep.subr.bf16.mxu1 %v775_v29 }
  0x20   :  { %687 = vmatpush3.bf16.msra.mxu0 %v776_v30 }
  0x21   :  { %715 = vmatpush3.bf16.msra.mxu1 %v777_v31  ;;  %734 = vmatprep.subr.bf16.mxu0 %v784_v36 }
  0x23   :  { %420 = vmatmul.mubr.bf16.vlgmr.msra.gmra.mxu0 %v778_v32 }
  0x24   :  { %469 = vmatmul.mubr.bf16.vlgmr.msra.gmra.mxu1 %v781_v34  ;;  %735 = vmatpush3.bf16.msra.mxu0 %v784_v36 }
  0x25   :  { %736 = vmatprep.subr.bf16.mxu0 %v785_v37  ;;  %427 = vmatprep.mubr.bf16.mxu0 %v786_v38 }
  0x26   :  { %476 = vmatprep.mubr.bf16.mxu1 %v788_v39 }
  0x28   :  { %737 = vmatpush3.bf16.msra.mxu0 %v785_v37 }
  0x29   :  { %738 = vmatprep.subr.bf16.mxu0 %v792_v41 }
  0x2b   :  { %428 = vmatmul.mubr.bf16.gmra.mxu0 %v790_v40 }
  0x2c   :  { %477 = vmatmul.mubr.bf16.gmra.mxu1 %v791_v42  ;;  %742 = vmatprep.mubr.msk.bf16.mxu0 %vm380_vm0, %v794_v43 }
  0x2d   :  { %739 = vmatpush3.bf16.msra.mxu0 %v792_v41 }
  0x2e   :  { %740 = vmatprep.subr.bf16.mxu0 %v793_v44 }
  0x31   :  { %741 = vmatpush3.bf16.msra.mxu0 %v793_v44 }
  0x34   :  { %743 = vmatmul.mubr.msk.bf16.vlgmr.msra.gmra.mxu0 %vm380_vm0, %v795_v45 }
  0xe3   :  { %v688_v46 = vpop.f32.mrf.mxu0 }
  0xe4   :  { %v716_v47 = vpop.f32.mrf.mxu1 }
  0xe5   :  { %v689_v48 = vpop.f32.mrf.mxu0 }
  0xe6   :  { %v717_v49 = vpop.f32.mrf.mxu1  ;;  %v690_v62 = vadd.f32 %v689_v48, %v688_v46 }
  0xe7   :  { %v691_v50 = vpop.f32.mrf.mxu0  ;;  %v718_v63 = vadd.f32 %v717_v49, %v716_v47 }
  0xe8   :  { %v719_v51 = vpop.f32.mrf.mxu1 }
  0xe9   :  { %v692_v52 = vpop.f32.mrf.mxu0  ;;  %v471_v8 = vadd.f32 %v718_v63, %v690_v62 }
  0xea   :  { %v720_v53 = vpop.f32.mrf.mxu1  ;;  %v693_v9 = vadd.f32 %v692_v52, %v691_v50 }
  0xeb   :  { %v694_v54 = vpop.f32.mrf.mxu0  ;;  %v721_v10 = vadd.f32 %v720_v53, %v719_v51 }
  0xec   :  { %v722_v55 = vpop.f32.mrf.mxu1 }
  0xed   :  { %v695_v56 = vpop.f32.mrf.mxu0  ;;  %v474_v19 = vadd.f32 %v721_v10, %v693_v9 }
  0xee   :  { %v723_v57 = vpop.f32.mrf.mxu1  ;;  %v696_v58 = vadd.f32 %v695_v56, %v694_v54 }
  0xef   :  { %v724_v59 = vadd.f32 %v723_v57, %v722_v55  ;;  %v697_v60 = vpop.f32.mrf.mxu0 }
  0xf0   :  { %v725_v61 = vpop.f32.mrf.mxu1 }
  0xf1   :  { %v698_v0 = vpop.f32.mrf.mxu0  ;;  %v479_v4 = vadd.f32 %v724_v59, %v696_v58 }
  0xf2   :  { %v726_v1 = vpop.f32.mrf.mxu1  ;;  %v699_v2 = vadd.f32 %v698_v0, %v697_v60 }
  0xf3   :  { %v727_v3 = vadd.f32 %v726_v1, %v725_v61 }
  0xf4   :  { %v744_v5 = vpop.f32.mrf.mxu0 }
  0xf5   :  { %v528_v7 = vadd.f32 %v744_v5, %v479_v4  ;;  %v482_v14 = vadd.f32 %v727_v3, %v699_v2 }
  0xf6   :  { %v519_v11 = vpop.f32.mrf.mxu0 }
  0xf7   :  { %v558_v12 = vadd.f32 %v651_v6, %v528_v7  ;;  %v520_v13 = vadd.f32 %v519_v11, %v471_v8 }
  0xf8   :  { %v745_v16 = vpop.f32.mrf.mxu0 }
  0xf9   :  { %v531_v17 = vadd.f32 %v745_v16, %v482_v14  ;;  %v556_v18 = vadd.f32 %v651_v6, %v520_v13  ;;  %v573_v21 = vmul.f32 %v652_v15, %v558_v12  ;;  %vm562_vm1 = vcmp.ge.f32.partialorder %v558_v12, 0.0 }
  0xfa   :  { %v522_v20 = vpop.f32.mrf.mxu0 }
  0xfb   :  { %v559_v22 = vadd.f32 %v651_v6, %v531_v17  ;;  %v523_v23 = vadd.f32 %v522_v20, %v474_v19  ;;  %v571_v25 = vmul.f32 %v652_v15, %v556_v18  ;;  %v577_v27 = vsel %vm562_vm1, %v558_v12, %v573_v21 }
  0xfc   :  { %vm560_vm3 = vcmp.ge.f32.partialorder %v556_v18, 0.0 }
  0xfd   :  { %vm563_vm2 = vcmp.ge.f32.partialorder %v559_v22, 0.0  ;;  %v574_v24 = vmul.f32 %v652_v15, %v559_v22  ;;  %v557_v26 = vadd.f32 %v651_v6, %v523_v23  ;;  %v575_v31 = vsel %vm560_vm3, %v556_v18, %v571_v25 }
  0xff   :  { %v578_v28 = vsel %vm563_vm2, %v559_v22, %v574_v24  ;;  %vm561_vm4 = vcmp.ge.f32.partialorder %v557_v26, 0.0  ;;  %v572_v30 = vmul.f32 %v652_v15, %v557_v26 }
 0x100   :  { %v669_v29 = vpack.c.bf16 %v578_v28, %v577_v27 }
 0x101   :  { %v576_v32 = vsel %vm561_vm4, %v557_v26, %v572_v30 }
 0x102   :  { %671 = vst [vmem:[%s975_s4 + $0x8] sm:$0xff] %v669_v29   ;;  %v664_v33 = vpack.c.bf16 %v576_v32, %v575_v31 }
 0x104   :  { %665 = vst [vmem:[%s975_s4] sm:$0xff] %v664_v33  }

// kernel: gen_forward.41
= control target key start
LH: loop header
LB: loop body
LE: loop exit
PB: predicated region body
PF: predicated region fallthrough
CT: control target
= control target key end

     0   :  { %v335_v36 = vlaneseq  ;;  %s702_s1 = inlined_call_operand.vmem [shape: bf16[256,256], index: 1, kind: input, shape index: {}]   ;;  %s703_s0 = inlined_call_operand.vmem [shape: bf16[32,256], index: 0, kind: input, shape index: {}]   ;;  %s704_s2 = inlined_call_operand.vmem [shape: f32[1,256], index: 2, kind: input, shape index: {}]   ;;  %s705_s3 = inlined_call_operand.vmem [shape: f32[1,256], index: 3, kind: input, shape index: {}]   ;;  %s706_s4 = inlined_call_operand.vmem [shape: bf16[32,256], index: 4, kind: output, shape index: {}]  }
   0x1   :  { %v497_v0 = vld [vmem:[%s702_s1 + $0x74] ss:$8 sps:$4 sm:$0xff]   ;;  %v499_v1 = vld [vmem:[%s702_s1 + $0x70] ss:$8 sps:$4 sm:$0xff]   ;;  %v500_v2 = vld [vmem:[%s702_s1 + $0x64] ss:$8 sps:$4 sm:$0xff]  }
   0x2   :  { %253 = vmatprep.subr.bf16.mxu0 %v497_v0  ;;  %465 = vmatprep.subr.bf16.mxu1 %v497_v0  ;;  %v502_v3 = vld [vmem:[%s702_s1 + $0x60] ss:$8 sps:$4 sm:$0xff]   ;;  %v503_v4 = vld [vmem:[%s702_s1 + $0x54] ss:$8 sps:$4 sm:$0xff]   ;;  %v505_v5 = vld [vmem:[%s702_s1 + $0x50] ss:$8 sps:$4 sm:$0xff]  }
   0x3   :  { %254 = vmatpush1.bf16.msra.mxu0 %v499_v1  ;;  %481 = vmatpush1.bf16.msra.mxu1 %v499_v1  ;;  %v506_v6 = vld [vmem:[%s702_s1 + $0x44] ss:$8 sps:$4 sm:$0xff]   ;;  %v508_v7 = vld [vmem:[%s702_s1 + $0x40] ss:$8 sps:$4 sm:$0xff]   ;;  %v509_v8 = vld [vmem:[%s702_s1 + $0x34] ss:$8 sps:$4 sm:$0xff]  }
   0x4   :  { %255 = vmatprep.subr.bf16.mxu0 %v500_v2  ;;  %466 = vmatprep.subr.bf16.mxu1 %v500_v2  ;;  %v511_v9 = vld [vmem:[%s702_s1 + $0x30] ss:$8 sps:$4 sm:$0xff]   ;;  %v512_v10 = vld [vmem:[%s702_s1 + $0x24] ss:$8 sps:$4 sm:$0xff]   ;;  %v514_v11 = vld [vmem:[%s702_s1 + $0x20] ss:$8 sps:$4 sm:$0xff]  }
   0x5   :  { %v515_v12 = vld [vmem:[%s702_s1 + $0x14] ss:$8 sps:$4 sm:$0xff]   ;;  %v547_v13 = vld [vmem:[%s703_s0 + $0x4] ss:$8 sps:$4 sm:$0xff]   ;;  %v517_v14 = vld [vmem:[%s702_s1 + $0x10] ss:$8 sps:$4 sm:$0xff]  }
   0x6   :  { %v550_v15 = vld [vmem:[%s703_s0 + $0x14] ss:$8 sps:$4 sm:$0xff]   ;;  %v518_v16 = vld [vmem:[%s702_s1 + $0x4] ss:$8 sps:$4 sm:$0xff]   ;;  %285 = vmatprep.mubr.bf16.mxu0 %v547_v13  ;;  %v520_v17 = vld [vmem:[%s702_s1] ss:$8 sps:$4 sm:$0xff]  }
   0x7   :  { %256 = vmatpush1.bf16.msra.mxu0 %v502_v3  ;;  %482 = vmatpush1.bf16.msra.mxu1 %v502_v3  ;;  %v521_v18 = vld [vmem:[%s702_s1 + $0xf4] ss:$8 sps:$4 sm:$0xff]   ;;  %v523_v19 = vld [vmem:[%s702_s1 + $0xf0] ss:$8 sps:$4 sm:$0xff]   ;;  %v524_v20 = vld [vmem:[%s702_s1 + $0xe4] ss:$8 sps:$4 sm:$0xff]  }
   0x8   :  { %257 = vmatprep.subr.bf16.mxu0 %v503_v4  ;;  %467 = vmatprep.subr.bf16.mxu1 %v503_v4  ;;  %v526_v21 = vld [vmem:[%s702_s1 + $0xe0] ss:$8 sps:$4 sm:$0xff]   ;;  %v527_v22 = vld [vmem:[%s702_s1 + $0xd4] ss:$8 sps:$4 sm:$0xff]   ;;  %v529_v23 = vld [vmem:[%s702_s1 + $0xd0] ss:$8 sps:$4 sm:$0xff]  }
   0x9   :  { %295 = vmatprep.mubr.bf16.mxu1 %v550_v15  ;;  %v530_v24 = vld [vmem:[%s702_s1 + $0xc4] ss:$8 sps:$4 sm:$0xff]   ;;  %v532_v25 = vld [vmem:[%s702_s1 + $0xc0] ss:$8 sps:$4 sm:$0xff]   ;;  %v533_v26 = vld [vmem:[%s702_s1 + $0xb4] ss:$8 sps:$4 sm:$0xff]  }
   0xa   :  { %v535_v27 = vld [vmem:[%s702_s1 + $0xb0] ss:$8 sps:$4 sm:$0xff]   ;;  %v536_v28 = vld [vmem:[%s702_s1 + $0xa4] ss:$8 sps:$4 sm:$0xff]   ;;  %v538_v29 = vld [vmem:[%s702_s1 + $0xa0] ss:$8 sps:$4 sm:$0xff]  }
   0xb   :  { %258 = vmatpush1.bf16.msra.mxu0 %v505_v5  ;;  %483 = vmatpush1.bf16.msra.mxu1 %v505_v5  ;;  %v539_v30 = vld [vmem:[%s702_s1 + $0x94] ss:$8 sps:$4 sm:$0xff]   ;;  %v541_v31 = vld [vmem:[%s702_s1 + $0x90] ss:$8 sps:$4 sm:$0xff]   ;;  %v542_v32 = vld [vmem:[%s702_s1 + $0x84] ss:$8 sps:$4 sm:$0xff]  }
   0xc   :  { %259 = vmatprep.subr.bf16.mxu0 %v506_v6  ;;  %468 = vmatprep.subr.bf16.mxu1 %v506_v6  ;;  %v544_v33 = vld [vmem:[%s702_s1 + $0x80] ss:$8 sps:$4 sm:$0xff]   ;;  %v548_v35 = vld [vmem:[%s703_s0 + $0x10] ss:$8 sps:$4 sm:$0xff]   ;;  %v336_v37 = vshrl.u32 %v335_v36, 7 }
   0xd   :  { %v545_v34 = vld [vmem:[%s703_s0] ss:$8 sps:$4 sm:$0xff]  }
   0xe   :  { %v337_v38 = vsub.s32 0, %v336_v37  ;;  %v333_v39 = vld [vmem:[%s704_s2] sm:$0x3]  ;;  %v341_v41 = vsub.s32 1, %v336_v37 }
   0xf   :  { %260 = vmatpush1.bf16.msra.mxu0 %v508_v7  ;;  %484 = vmatpush1.bf16.msra.mxu1 %v508_v7  ;;  %v361_v40 = vld [vmem:[%s705_s3] sm:$0x3] }
  0x10   :  { %261 = vmatprep.subr.bf16.mxu0 %v509_v8  ;;  %469 = vmatprep.subr.bf16.mxu1 %v509_v8  ;;  %v338_v42 = vrot.slane %v333_v39, %v337_v38  ;;  %v366_v43 = vrot.slane %v361_v40, %v337_v38  ;;  %v342_v46 = vrot.slane %v333_v39, %v341_v41 }
  0x11   :  { %v370_v50 = vrot.slane %v361_v40, %v341_v41 }
  0x13   :  { %262 = vmatpush1.bf16.msra.mxu0 %v511_v9  ;;  %485 = vmatpush1.bf16.msra.mxu1 %v511_v9 }
  0x14   :  { %263 = vmatprep.subr.bf16.mxu0 %v512_v10  ;;  %470 = vmatprep.subr.bf16.mxu1 %v512_v10 }
  0x17   :  { %264 = vmatpush1.bf16.msra.mxu0 %v514_v11  ;;  %486 = vmatpush1.bf16.msra.mxu1 %v514_v11 }
  0x18   :  { %265 = vmatprep.subr.bf16.mxu0 %v515_v12  ;;  %471 = vmatprep.subr.bf16.mxu1 %v515_v12 }
  0x1b   :  { %266 = vmatpush1.bf16.msra.mxu0 %v517_v14  ;;  %487 = vmatpush1.bf16.msra.mxu1 %v517_v14 }
  0x1c   :  { %267 = vmatprep.subr.bf16.mxu0 %v518_v16  ;;  %472 = vmatprep.subr.bf16.mxu1 %v518_v16 }
  0x1f   :  { %268 = vmatpush1.bf16.msra.mxu0 %v520_v17  ;;  %488 = vmatpush1.bf16.msra.mxu1 %v520_v17 }
  0x20   :  { %269 = vmatprep.subr.bf16.mxu0 %v521_v18  ;;  %473 = vmatprep.subr.bf16.mxu1 %v521_v18 }
  0x23   :  { %270 = vmatpush2.bf16.msra.mxu0 %v523_v19  ;;  %489 = vmatpush2.bf16.msra.mxu1 %v523_v19 }
  0x24   :  { %271 = vmatprep.subr.bf16.mxu0 %v524_v20  ;;  %474 = vmatprep.subr.bf16.mxu1 %v524_v20 }
  0x27   :  { %272 = vmatpush2.bf16.msra.mxu0 %v526_v21  ;;  %490 = vmatpush2.bf16.msra.mxu1 %v526_v21 }
  0x28   :  { %273 = vmatprep.subr.bf16.mxu0 %v527_v22  ;;  %475 = vmatprep.subr.bf16.mxu1 %v527_v22 }
  0x2b   :  { %274 = vmatpush2.bf16.msra.mxu0 %v529_v23  ;;  %491 = vmatpush2.bf16.msra.mxu1 %v529_v23 }
  0x2c   :  { %275 = vmatprep.subr.bf16.mxu0 %v530_v24  ;;  %476 = vmatprep.subr.bf16.mxu1 %v530_v24 }
  0x2f   :  { %276 = vmatpush2.bf16.msra.mxu0 %v532_v25  ;;  %492 = vmatpush2.bf16.msra.mxu1 %v532_v25 }
  0x30   :  { %277 = vmatprep.subr.bf16.mxu0 %v533_v26  ;;  %477 = vmatprep.subr.bf16.mxu1 %v533_v26 }
  0x33   :  { %278 = vmatpush2.bf16.msra.mxu0 %v535_v27  ;;  %493 = vmatpush2.bf16.msra.mxu1 %v535_v27 }
  0x34   :  { %279 = vmatprep.subr.bf16.mxu0 %v536_v28  ;;  %478 = vmatprep.subr.bf16.mxu1 %v536_v28 }
  0x37   :  { %280 = vmatpush2.bf16.msra.mxu0 %v538_v29  ;;  %494 = vmatpush2.bf16.msra.mxu1 %v538_v29 }
  0x38   :  { %281 = vmatprep.subr.bf16.mxu0 %v539_v30  ;;  %479 = vmatprep.subr.bf16.mxu1 %v539_v30 }
  0x3b   :  { %282 = vmatpush2.bf16.msra.mxu0 %v541_v31  ;;  %495 = vmatpush2.bf16.msra.mxu1 %v541_v31 }
  0x3c   :  { %283 = vmatprep.subr.bf16.mxu0 %v542_v32  ;;  %480 = vmatprep.subr.bf16.mxu1 %v542_v32 }
  0x3f   :  { %284 = vmatpush2.bf16.msra.mxu0 %v544_v33  ;;  %496 = vmatpush2.bf16.msra.mxu1 %v544_v33 }
  0x42   :  { %286 = vmatmul.mubr.bf16.vlgmr.msra.gmra.mxu0 %v545_v34  ;;  %296 = vmatmul.mubr.bf16.vlgmr.msra.gmra.mxu1 %v548_v35 }
 0x102   :  { %v287_v44 = vpop.f32.mrf.mxu0  ;;  %v297_v45 = vpop.f32.mrf.mxu1 }
 0x103   :  { %v345_v47 = vadd.f32 %v338_v42, %v287_v44  ;;  %v349_v48 = vadd.f32 %v338_v42, %v297_v45 }
 0x104   :  { %v289_v49 = vpop.f32.mrf.mxu0  ;;  %v299_v51 = vpop.f32.mrf.mxu1 }
 0x105   :  { %v373_v52 = vmul.f32 %v366_v43, %v345_v47  ;;  %v377_v53 = vmul.f32 %v366_v43, %v349_v48  ;;  %vm353_vm0 = vcmp.ge.f32.partialorder %v345_v47, 0.0  ;;  %vm357_vm1 = vcmp.ge.f32.partialorder %v349_v48, 0.0 }
 0x106   :  { %v346_v54 = vadd.f32 %v342_v46, %v289_v49  ;;  %v350_v55 = vadd.f32 %v342_v46, %v299_v51  ;;  %v291_v56 = vpop.f32.mrf.mxu0  ;;  %v301_v57 = vpop.f32.mrf.mxu1 }
 0x107   :  { %v347_v58 = vadd.f32 %v338_v42, %v291_v56  ;;  %v351_v59 = vadd.f32 %v338_v42, %v301_v57  ;;  %v381_v0 = vsel %vm353_vm0, %v345_v47, %v373_v52  ;;  %v385_v1 = vsel %vm357_vm1, %v349_v48, %v377_v53 }
 0x108   :  { %vm354_vm2 = vcmp.ge.f32.partialorder %v346_v54, 0.0  ;;  %v374_v60 = vmul.f32 %v370_v50, %v346_v54  ;;  %vm358_vm3 = vcmp.ge.f32.partialorder %v350_v55, 0.0  ;;  %v378_v61 = vmul.f32 %v370_v50, %v350_v55  ;;  %v293_v62 = vpop.f32.mrf.mxu0  ;;  %v303_v63 = vpop.f32.mrf.mxu1 }
 0x109   :  { %v375_v2 = vmul.f32 %v366_v43, %v347_v58  ;;  %v379_v3 = vmul.f32 %v366_v43, %v351_v59  ;;  %v348_v6 = vadd.f32 %v342_v46, %v293_v62  ;;  %v352_v7 = vadd.f32 %v342_v46, %v303_v63 }
 0x10a   :  { %v382_v4 = vsel %vm354_vm2, %v346_v54, %v374_v60  ;;  %v386_v5 = vsel %vm358_vm3, %v350_v55, %v378_v61  ;;  %vm355_vm4 = vcmp.ge.f32.partialorder %v347_v58, 0.0  ;;  %vm359_vm5 = vcmp.ge.f32.partialorder %v351_v59, 0.0 }
 0x10b   :  { %v461_v8 = vpack.c.bf16 %v382_v4, %v381_v0  ;;  %v463_v9 = vpack.c.bf16 %v386_v5, %v385_v1  ;;  %vm356_vm6 = vcmp.ge.f32.partialorder %v348_v6, 0.0  ;;  %v376_v10 = vmul.f32 %v370_v50, %v348_v6 }
 0x10c   :  { %vm360_vm7 = vcmp.ge.f32.partialorder %v352_v7, 0.0  ;;  %v380_v11 = vmul.f32 %v370_v50, %v352_v7  ;;  %v383_v12 = vsel %vm355_vm4, %v347_v58, %v375_v2  ;;  %v387_v13 = vsel %vm359_vm5, %v351_v59, %v379_v3 }
 0x10d   :  { %413 = vst [vmem:[%s706_s4] sm:$0xff] %v461_v8  ;;  %415 = vst [vmem:[%s706_s4 + $0x10] sm:$0xff] %v463_v9  ;;  %v384_v14 = vsel %vm356_vm6, %v348_v6, %v376_v10 }
 0x10e   :  { %v388_v15 = vsel %vm360_vm7, %v352_v7, %v380_v11  ;;  %v462_v16 = vpack.c.bf16 %v384_v14, %v383_v12 }
 0x10f   :  { %v464_v17 = vpack.c.bf16 %v388_v15, %v387_v13 }
 0x110   :  { %414 = vst [vmem:[%s706_s4 + $0x8] sm:$0xff] %v462_v16 }
 0x111   :  { %416 = vst [vmem:[%s706_s4 + $0x18] sm:$0xff] %v464_v17 }

// kernel: gen_forward.43
= control target key start
LH: loop header
LB: loop body
LE: loop exit
PB: predicated region body
PF: predicated region fallthrough
CT: control target
= control target key end

     0   :  { %vm590_vm0 = vcmask 523264   ;;  %s1913_s1 = inlined_call_operand.vmem [shape: bf16[576,128], index: 1, kind: input, shape index: {}]   ;;  %s1914_s0 = inlined_call_operand.vmem [shape: bf16[128,576], index: 0, kind: input, shape index: {}]   ;;  %s1915_s2 = inlined_call_operand.vmem [shape: f32[1,128], index: 2, kind: input, shape index: {}]   ;;  %s1916_s3 = inlined_call_operand.vmem [shape: f32[1,128], index: 3, kind: input, shape index: {}]   ;;  %s1917_s4 = inlined_call_operand.vmem [shape: bf16[128,128], index: 4, kind: output, shape index: {}]  }
   0x1   :  { %v1456_v0 = vld [vmem:[%s1913_s1 + $0x78] sm:$0xff]   ;;  %v1460_v4 = vld [vmem:[%s1913_s1 + $0x70] sm:$0xff]   ;;  %v1464_v8 = vld [vmem:[%s1913_s1 + $0x68] sm:$0xff]  }
   0x2   :  { %v1457_v1 = vld [vmem:[%s1913_s1 + $0xf8] sm:$0xff]   ;;  %1284 = vmatprep.subr.bf16.mxu0 %v1456_v0  ;;  %v1461_v5 = vld [vmem:[%s1913_s1 + $0xf0] sm:$0xff]   ;;  %v1465_v9 = vld [vmem:[%s1913_s1 + $0xe8] sm:$0xff]  }
   0x3   :  { %v1458_v2 = vld [vmem:[%s1913_s1 + $0x38] sm:$0xff]   ;;  %1348 = vmatprep.subr.bf16.mxu1 %v1457_v1  ;;  %v1462_v6 = vld [vmem:[%s1913_s1 + $0x30] sm:$0xff]   ;;  %v1466_v10 = vld [vmem:[%s1913_s1 + $0x28] sm:$0xff]  }
   0x4   :  { %v1459_v3 = vld [vmem:[%s1913_s1 + $0xb8] sm:$0xff]   ;;  %1285 = vmatpush3.bf16.msra.mxu0 %v1458_v2  ;;  %v1463_v7 = vld [vmem:[%s1913_s1 + $0xb0] sm:$0xff]   ;;  %v1467_v11 = vld [vmem:[%s1913_s1 + $0xa8] sm:$0xff]  }
   0x5   :  { %1349 = vmatpush3.bf16.msra.mxu1 %v1459_v3  ;;  %1286 = vmatprep.subr.bf16.mxu0 %v1460_v4  ;;  %v1468_v12 = vld [vmem:[%s1913_s1 + $0x60] sm:$0xff]   ;;  %v1472_v16 = vld [vmem:[%s1913_s1 + $0x58] sm:$0xff]   ;;  %v1476_v20 = vld [vmem:[%s1913_s1 + $0x50] sm:$0xff]  }
   0x6   :  { %1350 = vmatprep.subr.bf16.mxu1 %v1461_v5  ;;  %v1469_v13 = vld [vmem:[%s1913_s1 + $0xe0] sm:$0xff]   ;;  %v1473_v17 = vld [vmem:[%s1913_s1 + $0xd8] sm:$0xff]   ;;  %v1477_v21 = vld [vmem:[%s1913_s1 + $0xd0] sm:$0xff]  }
   0x7   :  { %v1470_v14 = vld [vmem:[%s1913_s1 + $0x20] sm:$0xff]   ;;  %v1474_v18 = vld [vmem:[%s1913_s1 + $0x18] sm:$0xff]   ;;  %v1478_v22 = vld [vmem:[%s1913_s1 + $0x10] sm:$0xff]  }
   0x8   :  { %1287 = vmatpush3.bf16.msra.mxu0 %v1462_v6  ;;  %v1471_v15 = vld [vmem:[%s1913_s1 + $0xa0] sm:$0xff]   ;;  %v1475_v19 = vld [vmem:[%s1913_s1 + $0x98] sm:$0xff]   ;;  %v1479_v23 = vld [vmem:[%s1913_s1 + $0x90] sm:$0xff]  }
   0x9   :  { %1351 = vmatpush3.bf16.msra.mxu1 %v1463_v7  ;;  %1288 = vmatprep.subr.bf16.mxu0 %v1464_v8  ;;  %v1480_v24 = vld [vmem:[%s1913_s1 + $0x48] sm:$0xff]   ;;  %v1484_v28 = vld [vmem:[%s1913_s1 + $0x40] sm:$0xff]   ;;  %v1494_v36 = vld [vmem:[%s1913_s1 + $0x118] sm:$0xff]  }
   0xa   :  { %1352 = vmatprep.subr.bf16.mxu1 %v1465_v9  ;;  %v1481_v25 = vld [vmem:[%s1913_s1 + $0xc8] sm:$0xff]   ;;  %v1485_v29 = vld [vmem:[%s1913_s1 + $0xc0] sm:$0xff]   ;;  %v1507_v42 = vld [vmem:[%s1913_s1 + $0x110] sm:$0xff]  }
   0xb   :  { %v1482_v26 = vld [vmem:[%s1913_s1 + $0x8] sm:$0xff]   ;;  %v1486_v30 = vld [vmem:[%s1913_s1] sm:$0xff]   ;;  %v1503_v43 = vld [vmem:[%s1914_s0 + $0x5c] ss:$20 sps:$4 sm:$0xff]  }
   0xc   :  { %1289 = vmatpush3.bf16.msra.mxu0 %v1466_v10  ;;  %v1483_v27 = vld [vmem:[%s1913_s1 + $0x88] sm:$0xff]   ;;  %v1487_v31 = vld [vmem:[%s1913_s1 + $0x80] sm:$0xff]   ;;  %v1508_v47 = vld [vmem:[%s1914_s0 + $0x7c] ss:$20 sps:$4 sm:$0xff]  }
   0xd   :  { %1353 = vmatpush3.bf16.msra.mxu1 %v1467_v11  ;;  %1290 = vmatprep.subr.bf16.mxu0 %v1468_v12  ;;  %v1488_v32 = vld [vmem:[%s1914_s0] ss:$20 sps:$4 sm:$0xff]   ;;  %v1490_v33 = vld [vmem:[%s1914_s0 + $0x4] ss:$20 sps:$4 sm:$0xff]   ;;  %v1491_v34 = vld [vmem:[%s1914_s0 + $0x8] ss:$20 sps:$4 sm:$0xff]  }
   0xe   :  { %1354 = vmatprep.subr.bf16.mxu1 %v1469_v13  ;;  %v1493_v35 = vld [vmem:[%s1914_s0 + $0xc] ss:$20 sps:$4 sm:$0xff]   ;;  %647 = vmatprep.mubr.bf16.mxu0 %v1490_v33  ;;  %v1497_v38 = vld [vmem:[%s1914_s0 + $0x34] ss:$20 sps:$4 sm:$0xff]   ;;  %v1500_v40 = vld [vmem:[%s1914_s0 + $0x30] ss:$20 sps:$4 sm:$0xff]  }
   0xf   :  { %744 = vmatprep.mubr.bf16.mxu1 %v1493_v35  ;;  %v1495_v37 = vld [vmem:[%s1914_s0 + $0x2c] ss:$20 sps:$4 sm:$0xff]   ;;  %v1499_v39 = vld [vmem:[%s1914_s0 + $0x28] ss:$20 sps:$4 sm:$0xff]   ;;  %v1505_v44 = vld [vmem:[%s1914_s0 + $0x50] ss:$20 sps:$4 sm:$0xff]  }
  0x10   :  { %1291 = vmatpush3.bf16.msra.mxu0 %v1470_v14  ;;  %v1501_v41 = vld [vmem:[%s1914_s0 + $0x54] ss:$20 sps:$4 sm:$0xff]   ;;  %v1506_v45 = vld [vmem:[%s1914_s0 + $0x58] ss:$20 sps:$4 sm:$0xff]   ;;  %v1533_v49 = vld [vmem:[%s1913_s1 + $0x100] sm:$0xff]  }
  0x11   :  { %1355 = vmatpush3.bf16.msra.mxu1 %v1471_v15  ;;  %1292 = vmatprep.subr.bf16.mxu0 %v1472_v16  ;;  %v1520_v46 = vld [vmem:[%s1913_s1 + $0x108] sm:$0xff]   ;;  %v1510_v48 = vld [vmem:[%s1914_s0 + $0x84] ss:$20 sps:$4 sm:$0xff]   ;;  %v1513_v51 = vld [vmem:[%s1914_s0 + $0x80] ss:$20 sps:$4 sm:$0xff]  }
  0x12   :  { %1356 = vmatprep.subr.bf16.mxu1 %v1473_v17  ;;  %v1512_v50 = vld [vmem:[%s1914_s0 + $0x78] ss:$20 sps:$4 sm:$0xff]   ;;  %v1518_v54 = vld [vmem:[%s1914_s0 + $0xa0] ss:$20 sps:$4 sm:$0xff]   ;;  %v1519_v55 = vld [vmem:[%s1914_s0 + $0xa8] ss:$20 sps:$4 sm:$0xff]  }
  0x13   :  { %v1514_v52 = vld [vmem:[%s1914_s0 + $0xa4] ss:$20 sps:$4 sm:$0xff]   ;;  %v1516_v53 = vld [vmem:[%s1914_s0 + $0xac] ss:$20 sps:$4 sm:$0xff]   ;;  %v1523_v57 = vld [vmem:[%s1914_s0 + $0xd4] ss:$20 sps:$4 sm:$0xff]  }
  0x14   :  { %1293 = vmatpush3.bf16.msra.mxu0 %v1474_v18  ;;  %v1521_v56 = vld [vmem:[%s1914_s0 + $0xcc] ss:$20 sps:$4 sm:$0xff]   ;;  %v1525_v58 = vld [vmem:[%s1914_s0 + $0xc8] ss:$20 sps:$4 sm:$0xff]   ;;  %v1526_v59 = vld [vmem:[%s1914_s0 + $0xd0] ss:$20 sps:$4 sm:$0xff]  }
  0x15   :  { %1357 = vmatpush3.bf16.msra.mxu1 %v1475_v19  ;;  %1294 = vmatprep.subr.bf16.mxu0 %v1476_v20  ;;  %v1527_v60 = vld [vmem:[%s1914_s0 + $0xf4] ss:$20 sps:$4 sm:$0xff]   ;;  %v1529_v61 = vld [vmem:[%s1914_s0 + $0xfc] ss:$20 sps:$4 sm:$0xff]   ;;  %v1532_v63 = vld [vmem:[%s1914_s0 + $0xf8] ss:$20 sps:$4 sm:$0xff]  }
  0x16   :  { %1358 = vmatprep.subr.bf16.mxu1 %v1477_v21  ;;  %v1531_v62 = vld [vmem:[%s1914_s0 + $0xf0] ss:$20 sps:$4 sm:$0xff]   ;;  %v1538_v2 = vld [vmem:[%s1914_s0 + $0x118] ss:$20 sps:$4 sm:$0xff]   ;;  %v1539_v3 = vld [vmem:[%s1914_s0 + $0x120] ss:$20 sps:$4 sm:$0xff]  }
  0x17   :  { %v1534_v0 = vld [vmem:[%s1914_s0 + $0x11c] ss:$20 sps:$4 sm:$0xff]   ;;  %v1536_v1 = vld [vmem:[%s1914_s0 + $0x124] ss:$20 sps:$4 sm:$0xff]   ;;  %v1544_v8 = vld [vmem:[%s1914_s0 + $0x60] ss:$20 sps:$4 sm:$0xff]  }
  0x18   :  { %1295 = vmatpush3.bf16.msra.mxu0 %v1478_v22  ;;  %v1540_v4 = vld [vmem:[%s1914_s0 + $0x10] ss:$20 sps:$4 sm:$0xff]   ;;  %v1542_v6 = vld [vmem:[%s1914_s0 + $0x38] ss:$20 sps:$4 sm:$0xff]   ;;  %v1545_v9 = vld [vmem:[%s1914_s0 + $0x100] ss:$20 sps:$4 sm:$0xff]  }
  0x19   :  { %1359 = vmatpush3.bf16.msra.mxu1 %v1479_v23  ;;  %1296 = vmatprep.subr.bf16.mxu0 %v1480_v24  ;;  %v1541_v5 = vld [vmem:[%s1914_s0 + $0xb0] ss:$20 sps:$4 sm:$0xff]   ;;  %v1543_v7 = vld [vmem:[%s1914_s0 + $0xd8] ss:$20 sps:$4 sm:$0xff]   ;;  %v1546_v10 = vld [vmem:[%s1914_s0 + $0x88] ss:$20 sps:$4 sm:$0xff]  }
  0x1a   :  { %1360 = vmatprep.subr.bf16.mxu1 %v1481_v25  ;;  %v1547_v11 = vld [vmem:[%s1914_s0 + $0x128] ss:$20 sps:$4 sm:$0xff]  }
  0x1c   :  { %1297 = vmatpush3.bf16.msra.mxu0 %v1482_v26 }
  0x1d   :  { %1361 = vmatpush3.bf16.msra.mxu1 %v1483_v27  ;;  %1298 = vmatprep.subr.bf16.mxu0 %v1484_v28 }
  0x1e   :  { %1362 = vmatprep.subr.bf16.mxu1 %v1485_v29 }
  0x20   :  { %1299 = vmatpush3.bf16.msra.mxu0 %v1486_v30 }
  0x21   :  { %1363 = vmatpush3.bf16.msra.mxu1 %v1487_v31  ;;  %1424 = vmatprep.subr.bf16.mxu0 %v1494_v36 }
  0x22   :  { %1448 = vmatprep.subr.bf16.mxu1 %v1494_v36 }
  0x23   :  { %648 = vmatmul.mubr.bf16.vlgmr.msra.gmra.mxu0 %v1488_v32 }
  0x24   :  { %745 = vmatmul.mubr.bf16.vlgmr.msra.gmra.mxu1 %v1491_v34  ;;  %1425 = vmatpush3.bf16.msra.mxu0 %v1494_v36 }
  0x25   :  { %1452 = vmatpush3.bf16.msra.mxu1 %v1494_v36  ;;  %655 = vmatprep.mubr.bf16.mxu0 %v1495_v37 }
  0x26   :  { %752 = vmatprep.mubr.bf16.mxu1 %v1497_v38  ;;  %1426 = vmatprep.subr.bf16.mxu0 %v1507_v42 }
  0x27   :  { %1449 = vmatprep.subr.bf16.mxu1 %v1507_v42 }
  0x28   :  { %1427 = vmatpush3.bf16.msra.mxu0 %v1507_v42 }
  0x29   :  { %1453 = vmatpush3.bf16.msra.mxu1 %v1507_v42  ;;  %1428 = vmatprep.subr.bf16.mxu0 %v1520_v46 }
  0x2a   :  { %1450 = vmatprep.subr.bf16.mxu1 %v1520_v46 }
  0x2b   :  { %656 = vmatmul.mubr.bf16.gmra.mxu0 %v1499_v39 }
  0x2c   :  { %753 = vmatmul.mubr.bf16.gmra.mxu1 %v1500_v40  ;;  %663 = vmatprep.mubr.bf16.mxu0 %v1501_v41 }
  0x2d   :  { %760 = vmatprep.mubr.bf16.mxu1 %v1503_v43  ;;  %1429 = vmatpush3.bf16.msra.mxu0 %v1520_v46 }
  0x2e   :  { %1454 = vmatpush3.bf16.msra.mxu1 %v1520_v46  ;;  %1430 = vmatprep.subr.bf16.mxu0 %v1533_v49 }
  0x2f   :  { %1451 = vmatprep.subr.bf16.mxu1 %v1533_v49 }
  0x31   :  { %1431 = vmatpush3.bf16.msra.mxu0 %v1533_v49 }
  0x32   :  { %1455 = vmatpush3.bf16.msra.mxu1 %v1533_v49 }
  0x33   :  { %664 = vmatmul.mubr.bf16.gmra.mxu0 %v1505_v44 }
  0x34   :  { %761 = vmatmul.mubr.bf16.gmra.mxu1 %v1506_v45  ;;  %671 = vmatprep.mubr.bf16.mxu0 %v1508_v47 }
  0x35   :  { %768 = vmatprep.mubr.bf16.mxu1 %v1510_v48 }
  0x3b   :  { %672 = vmatmul.mubr.bf16.gmra.mxu0 %v1512_v50 }
  0x3c   :  { %769 = vmatmul.mubr.bf16.gmra.mxu1 %v1513_v51  ;;  %679 = vmatprep.mubr.bf16.mxu0 %v1514_v52 }
  0x3d   :  { %776 = vmatprep.mubr.bf16.mxu1 %v1516_v53 }
  0x43   :  { %680 = vmatmul.mubr.bf16.gmra.mxu0 %v1518_v54 }
  0x44   :  { %777 = vmatmul.mubr.bf16.gmra.mxu1 %v1519_v55  ;;  %687 = vmatprep.mubr.bf16.mxu0 %v1521_v56 }
  0x45   :  { %784 = vmatprep.mubr.bf16.mxu1 %v1523_v57 }
  0x4b   :  { %688 = vmatmul.mubr.bf16.gmra.mxu0 %v1525_v58 }
  0x4c   :  { %785 = vmatmul.mubr.bf16.gmra.mxu1 %v1526_v59  ;;  %695 = vmatprep.mubr.bf16.mxu0 %v1527_v60 }
  0x4d   :  { %792 = vmatprep.mubr.bf16.mxu1 %v1529_v61 }
  0x53   :  { %696 = vmatmul.mubr.bf16.gmra.mxu0 %v1531_v62 }
  0x54   :  { %793 = vmatmul.mubr.bf16.gmra.mxu1 %v1532_v63  ;;  %703 = vmatprep.mubr.bf16.mxu0 %v1534_v0 }
  0x55   :  { %800 = vmatprep.mubr.bf16.mxu1 %v1536_v1 }
  0x5b   :  { %704 = vmatmul.mubr.bf16.gmra.mxu0 %v1538_v2 }
  0x5c   :  { %801 = vmatmul.mubr.bf16.gmra.mxu1 %v1539_v3  ;;  %1432 = vmatprep.mubr.msk.bf16.mxu0 %vm590_vm0, %v1540_v4 }
  0x5d   :  { %1440 = vmatprep.mubr.msk.bf16.mxu1 %vm590_vm0, %v1541_v5 }
  0x63   :  { %1433 = vmatmul.mubr.msk.bf16.vlgmr.msra.gmra.mxu0 %vm590_vm0, %v1542_v6 }
  0x64   :  { %1441 = vmatmul.mubr.msk.bf16.vlgmr.msra.gmra.mxu1 %vm590_vm0, %v1543_v7  ;;  %1436 = vmatprep.mubr.msk.bf16.mxu0 %vm590_vm0, %v1544_v8 }
  0x65   :  { %1444 = vmatprep.mubr.msk.bf16.mxu1 %vm590_vm0, %v1545_v9 }
  0x6b   :  { %1437 = vmatmul.mubr.msk.bf16.gmra.mxu0 %vm590_vm0, %v1546_v10 }
  0x6c   :  { %1445 = vmatmul.mubr.msk.bf16.gmra.mxu1 %vm590_vm0, %v1547_v11 }
  0xe3   :  { %v1300_v12 = vpop.f32.mrf.mxu0 }
  0xe4   :  { %v1364_v13 = vpop.f32.mrf.mxu1 }
  0xe5   :  { %v1301_v14 = vpop.f32.mrf.mxu0 }
  0xe6   :  { %v1302_v15 = vadd.f32 %v1301_v14, %v1300_v12  ;;  %v1365_v16 = vpop.f32.mrf.mxu1 }
  0xe7   :  { %v1366_v17 = vadd.f32 %v1365_v16, %v1364_v13  ;;  %v1303_v18 = vpop.f32.mrf.mxu0 }
  0xe8   :  { %v1367_v19 = vpop.f32.mrf.mxu1 }
  0xe9   :  { %v1304_v20 = vpop.f32.mrf.mxu0  ;;  %v1809_v21 = vadd.f32 %v1366_v17, %v1302_v15 }
  0xea   :  { %v1368_v22 = vpop.f32.mrf.mxu1  ;;  %v1305_v8 = vadd.f32 %v1304_v20, %v1303_v18 }
  0xeb   :  { %1918 = vst [vmem:[#allocation3_spill] sm:$0xff] %v1809_v21  ;;  %v1306_v23 = vpop.f32.mrf.mxu0  ;;  %v1369_v9 = vadd.f32 %v1368_v22, %v1367_v19 }
  0xec   :  { %v1370_v24 = vpop.f32.mrf.mxu1 }
  0xed   :  { %v1307_v25 = vpop.f32.mrf.mxu0 }
  0xee   :  { %v1371_v26 = vpop.f32.mrf.mxu1  ;;  %v1308_v11 = vadd.f32 %v1307_v25, %v1306_v23 }
  0xef   :  { %v1309_v27 = vpop.f32.mrf.mxu0  ;;  %v1372_v12 = vadd.f32 %v1371_v26, %v1370_v24 }
  0xf0   :  { %v1373_v28 = vpop.f32.mrf.mxu1 }
  0xf1   :  { %v1310_v29 = vpop.f32.mrf.mxu0 }
  0xf2   :  { %v1374_v30 = vpop.f32.mrf.mxu1  ;;  %v1311_v13 = vadd.f32 %v1310_v29, %v1309_v27 }
  0xf3   :  { %v1312_v31 = vpop.f32.mrf.mxu0  ;;  %v1375_v14 = vadd.f32 %v1374_v30, %v1373_v28 }
  0xf4   :  { %v1376_v32 = vpop.f32.mrf.mxu1 }
  0xf5   :  { %v1313_v33 = vpop.f32.mrf.mxu0 }
  0xf6   :  { %v1377_v34 = vpop.f32.mrf.mxu1  ;;  %v1314_v16 = vadd.f32 %v1313_v33, %v1312_v31 }
  0xf7   :  { %v1811_v35 = vpop.f32.mrf.mxu0  ;;  %v1378_v17 = vadd.f32 %v1377_v34, %v1376_v32  ;;  %v755_v32 = vadd.f32 %v1372_v12, %v1308_v11  ;;  %v758_v34 = vadd.f32 %v1375_v14, %v1311_v13 }
  0xf8   :  { %1919 = vst [vmem:[#allocation4_spill] sm:$0xff] %v1811_v35  ;;  %v1813_v36 = vpop.f32.mrf.mxu1 }
  0xf9   :  { %1920 = vst [vmem:[#allocation5_spill] sm:$0xff] %v1813_v36  ;;  %v1815_v37 = vpop.f32.mrf.mxu0 }
  0xfa   :  { %1921 = vst [vmem:[#allocation6_spill] sm:$0xff] %v1815_v37  ;;  %v1817_v38 = vpop.f32.mrf.mxu1 }
  0xfb   :  { %1922 = vst [vmem:[#allocation7_spill] sm:$0xff] %v1817_v38  ;;  %v1318_v39 = vpop.f32.mrf.mxu0 }
  0xfc   :  { %v1382_v40 = vpop.f32.mrf.mxu1 }
  0xfd   :  { %v1319_v41 = vpop.f32.mrf.mxu0 }
  0xfe   :  { %v1383_v42 = vpop.f32.mrf.mxu1  ;;  %v1320_v21 = vadd.f32 %v1319_v41, %v1318_v39  ;;  %v750_v39 = vadd.f32 %v1369_v9, %v1305_v8 }
  0xff   :  { %v1321_v43 = vpop.f32.mrf.mxu0  ;;  %v1384_v38 = vadd.f32 %v1383_v42, %v1382_v40  ;;  %v1923_v40 = vld [vmem:[#allocation4_spill] sm:$0xff] }
 0x100   :  { %v1385_v44 = vpop.f32.mrf.mxu1 }
 0x101   :  { %v1322_v45 = vpop.f32.mrf.mxu0  ;;  %v1924_v41 = vld [vmem:[#allocation6_spill] sm:$0xff] }
 0x102   :  { %v1386_v46 = vpop.f32.mrf.mxu1  ;;  %v1323_v37 = vadd.f32 %v1322_v45, %v1321_v43  ;;  %v1821_v42 = vadd.f32 %v1924_v41, %v1923_v40  ;;  %v1925_v43 = vld [vmem:[#allocation5_spill] sm:$0xff] }
 0x103   :  { %v1324_v47 = vpop.f32.mrf.mxu0  ;;  %v1387_v35 = vadd.f32 %v1386_v46, %v1385_v44  ;;  %v1926_v44 = vld [vmem:[#allocation7_spill] sm:$0xff] }
 0x104   :  { %v1388_v48 = vpop.f32.mrf.mxu1  ;;  %v1825_v45 = vadd.f32 %v1926_v44, %v1925_v43 }
 0x105   :  { %v1325_v49 = vpop.f32.mrf.mxu0 }
 0x106   :  { %v1389_v50 = vpop.f32.mrf.mxu1  ;;  %v1326_v22 = vadd.f32 %v1325_v49, %v1324_v47  ;;  %v1830_v47 = vld [vmem:[%s1915_s2] ss:$0 sm:$0xff]  ;;  %v763_v49 = vadd.f32 %v1378_v17, %v1314_v16 }
 0x107   :  { %v1327_v51 = vpop.f32.mrf.mxu0  ;;  %v1390_v23 = vadd.f32 %v1389_v50, %v1388_v48 }
 0x108   :  { %v1391_v52 = vpop.f32.mrf.mxu1 }
 0x109   :  { %v1328_v53 = vpop.f32.mrf.mxu0 }
 0x10a   :  { %v1392_v54 = vpop.f32.mrf.mxu1  ;;  %v1329_v25 = vadd.f32 %v1328_v53, %v1327_v51  ;;  %v771_v53 = vadd.f32 %v1384_v38, %v1320_v21 }
 0x10b   :  { %v1330_v55 = vpop.f32.mrf.mxu0  ;;  %v1393_v24 = vadd.f32 %v1392_v54, %v1391_v52  ;;  %v779_v52 = vadd.f32 %v1390_v23, %v1326_v22  ;;  %v1832_v54 = vadd.f32 %v1387_v35, %v1323_v37 }
 0x10c   :  { %v1394_v56 = vpop.f32.mrf.mxu1 }
 0x10d   :  { %v1331_v57 = vpop.f32.mrf.mxu0 }
 0x10e   :  { %v1395_v58 = vpop.f32.mrf.mxu1  ;;  %v1332_v18 = vadd.f32 %v1331_v57, %v1330_v55  ;;  %v1837_v55 = vld [vmem:[%s1916_s3] ss:$0 sm:$0xff] }
 0x10f   :  { %v1333_v59 = vpop.f32.mrf.mxu0  ;;  %v1396_v20 = vadd.f32 %v1395_v58, %v1394_v56 }
 0x110   :  { %v1397_v60 = vpop.f32.mrf.mxu1 }
 0x111   :  { %v1334_v61 = vpop.f32.mrf.mxu0  ;;  %v787_v48 = vadd.f32 %v1396_v20, %v1332_v18 }
 0x112   :  { %v1398_v62 = vpop.f32.mrf.mxu1  ;;  %v1335_v27 = vadd.f32 %v1334_v61, %v1333_v59  ;;  %v782_v59 = vadd.f32 %v1393_v24, %v1329_v25 }
 0x113   :  { %v1336_v63 = vpop.f32.mrf.mxu0  ;;  %v1399_v29 = vadd.f32 %v1398_v62, %v1397_v60 }
 0x114   :  { %v1400_v0 = vpop.f32.mrf.mxu1 }
 0x115   :  { %v1337_v1 = vpop.f32.mrf.mxu0  ;;  %v790_v58 = vadd.f32 %v1399_v29, %v1335_v27 }
 0x116   :  { %v1401_v2 = vpop.f32.mrf.mxu1  ;;  %v1338_v28 = vadd.f32 %v1337_v1, %v1336_v63 }
 0x117   :  { %v1339_v3 = vpop.f32.mrf.mxu0  ;;  %v1402_v30 = vadd.f32 %v1401_v2, %v1400_v0  ;;  %v1927_v0 = vld [vmem:[#allocation3_spill] sm:$0xff] }
 0x118   :  { %v1403_v4 = vpop.f32.mrf.mxu1 }
 0x119   :  { %v1340_v5 = vpop.f32.mrf.mxu0  ;;  %v1839_v60 = vadd.f32 %v1402_v30, %v1338_v28 }
 0x11a   :  { %v1404_v6 = vpop.f32.mrf.mxu1  ;;  %v1843_v35 = vadd.f32 %v1340_v5, %v1339_v3 }
 0x11b   :  { %v1342_v7 = vpop.f32.mrf.mxu0  ;;  %v1845_v37 = vadd.f32 %v1404_v6, %v1403_v4 }
 0x11c   :  { %v1406_v10 = vpop.f32.mrf.mxu1 }
 0x11d   :  { %v1343_v15 = vpop.f32.mrf.mxu0 }
 0x11e   :  { %v1407_v36 = vpop.f32.mrf.mxu1  ;;  %v1344_v61 = vadd.f32 %v1343_v15, %v1342_v7 }
 0x11f   :  { %v1345_v19 = vpop.f32.mrf.mxu0  ;;  %v1408_v62 = vadd.f32 %v1407_v36, %v1406_v10 }
 0x120   :  { %v1409_v26 = vpop.f32.mrf.mxu1 }
 0x121   :  { %v1346_v31 = vpop.f32.mrf.mxu0  ;;  %v803_v15 = vadd.f32 %v1408_v62, %v1344_v61 }
 0x122   :  { %v1410_v33 = vpop.f32.mrf.mxu1  ;;  %v1347_v4 = vadd.f32 %v1346_v31, %v1345_v19 }
 0x123   :  { %v1434_v46 = vpop.f32.mrf.mxu0  ;;  %v1411_v6 = vadd.f32 %v1410_v33, %v1409_v26 }
 0x124   :  { %v852_v50 = vadd.f32 %v1434_v46, %v755_v32  ;;  %v1442_v51 = vpop.f32.mrf.mxu1 }
 0x125   :  { %v884_v56 = vadd.f32 %v1442_v51, %v787_v48  ;;  %v843_v57 = vpop.f32.mrf.mxu0 }
 0x126   :  { %v966_v63 = vadd.f32 %v1830_v47, %v852_v50  ;;  %v844_v1 = vadd.f32 %v843_v57, %v1927_v0  ;;  %v875_v21 = vpop.f32.mrf.mxu1 }
 0x127   :  { %v974_v38 = vadd.f32 %v1830_v47, %v884_v56  ;;  %v876_v2 = vadd.f32 %v875_v21, %v779_v52  ;;  %v1435_v8 = vpop.f32.mrf.mxu0  ;;  %v806_v52 = vadd.f32 %v1411_v6, %v1347_v4  ;;  %v766_v21 = vadd.f32 %v1825_v45, %v1821_v42 }
 0x128   :  { %vm982_vm1 = vcmp.ge.f32.partialorder %v966_v63, 0.0  ;;  %v1005_v9 = vmul.f32 %v1837_v55, %v966_v63  ;;  %v964_v11 = vadd.f32 %v1830_v47, %v844_v1  ;;  %v855_v7 = vadd.f32 %v1435_v8, %v758_v34  ;;  %v1443_v36 = vpop.f32.mrf.mxu1 }
 0x129   :  { %vm990_vm2 = vcmp.ge.f32.partialorder %v974_v38, 0.0  ;;  %v1013_v10 = vmul.f32 %v1837_v55, %v974_v38  ;;  %v972_v12 = vadd.f32 %v1830_v47, %v876_v2  ;;  %v887_v3 = vadd.f32 %v1443_v36, %v790_v58  ;;  %v846_v5 = vpop.f32.mrf.mxu0 }
 0x12a   :  { %v967_v13 = vadd.f32 %v1830_v47, %v855_v7  ;;  %v878_v14 = vpop.f32.mrf.mxu1  ;;  %v1021_v16 = vsel %vm982_vm1, %v966_v63, %v1005_v9  ;;  %vm980_vm3 = vcmp.ge.f32.partialorder %v964_v11, 0.0  ;;  %v1003_v17 = vmul.f32 %v1837_v55, %v964_v11 }
 0x12b   :  { %v975_v18 = vadd.f32 %v1830_v47, %v887_v3  ;;  %v1438_v20 = vpop.f32.mrf.mxu0  ;;  %v1029_v22 = vsel %vm990_vm2, %v974_v38, %v1013_v10  ;;  %v847_v25 = vadd.f32 %v846_v5, %v750_v39  ;;  %v1011_v19 = vmul.f32 %v1837_v55, %v972_v12 }
 0x12c   :  { %vm983_vm4 = vcmp.ge.f32.partialorder %v967_v13, 0.0  ;;  %v1006_v23 = vmul.f32 %v1837_v55, %v967_v13  ;;  %v1446_v24 = vpop.f32.mrf.mxu1  ;;  %v879_v27 = vadd.f32 %v878_v14, %v782_v59  ;;  %v868_v31 = vadd.f32 %v1438_v20, %v771_v53 }
 0x12d   :  { %vm991_vm5 = vcmp.ge.f32.partialorder %v975_v18, 0.0  ;;  %v1014_v26 = vmul.f32 %v1837_v55, %v975_v18  ;;  %v859_v29 = vpop.f32.mrf.mxu0  ;;  %v965_v30 = vadd.f32 %v1830_v47, %v847_v25  ;;  %v900_v33 = vadd.f32 %v1446_v24, %v803_v15 }
 0x12e   :  { %v1022_v28 = vsel %vm983_vm4, %v967_v13, %v1006_v23  ;;  %v891_v32 = vpop.f32.mrf.mxu1  ;;  %v973_v41 = vadd.f32 %v1830_v47, %v879_v27  ;;  %v860_v43 = vadd.f32 %v859_v29, %v763_v49  ;;  %vm988_vm6 = vcmp.ge.f32.partialorder %v972_v12, 0.0 }
 0x12f   :  { %v1245_v34 = vpack.c.bf16 %v1022_v28, %v1021_v16  ;;  %v1030_v40 = vsel %vm991_vm5, %v975_v18, %v1014_v26  ;;  %v1439_v39 = vpop.f32.mrf.mxu0  ;;  %vm981_vm7 = vcmp.ge.f32.partialorder %v965_v30, 0.0  ;;  %v1004_v46 = vmul.f32 %v1837_v55, %v965_v30 }
 0x130   :  { %v1265_v44 = vpack.c.bf16 %v1030_v40, %v1029_v22  ;;  %v1447_v48 = vpop.f32.mrf.mxu1  ;;  %vm989_vm8 = vcmp.ge.f32.partialorder %v973_v41, 0.0  ;;  %v1012_v50 = vmul.f32 %v1837_v55, %v973_v41  ;;  %v970_v51 = vadd.f32 %v1830_v47, %v868_v31 }
 0x131   :  { %1277 = vst [vmem:[%s1917_s4 + $0x8] sm:$0xff] %v1245_v34   ;;  %v1019_v53 = vsel %vm980_vm3, %v964_v11, %v1003_v17  ;;  %v1020_v49 = vsel %vm981_vm7, %v965_v30, %v1004_v46  ;;  %v978_v56 = vadd.f32 %v1830_v47, %v900_v33  ;;  %v892_v57 = vadd.f32 %v891_v32, %v1839_v60  ;;  %v862_v63 = vpop.f32.mrf.mxu0 }
 0x132   :  { %1281 = vst [vmem:[%s1917_s4 + $0x28] sm:$0xff] %v1265_v44   ;;  %v1027_v58 = vsel %vm988_vm6, %v972_v12, %v1011_v19  ;;  %v1240_v59 = vpack.c.bf16 %v1020_v49, %v1019_v53  ;;  %v1028_v61 = vsel %vm989_vm8, %v973_v41, %v1012_v50  ;;  %v968_v62 = vadd.f32 %v1830_v47, %v860_v43  ;;  %v894_v0 = vpop.f32.mrf.mxu1 }
 0x133   :  { %v1260_v1 = vpack.c.bf16 %v1028_v61, %v1027_v58  ;;  %v798_v38 = vadd.f32 %v1845_v37, %v1843_v35  ;;  %vm986_vm9 = vcmp.ge.f32.partialorder %v970_v51, 0.0  ;;  %v976_v60 = vadd.f32 %v1830_v47, %v892_v57 }
 0x134   :  { %1241 = vst [vmem:[%s1917_s4] sm:$0xff] %v1240_v59   ;;  %v871_v2 = vadd.f32 %v1439_v39, %v1832_v54  ;;  %v903_v8 = vadd.f32 %v1447_v48, %v806_v52  ;;  %v1009_v9 = vmul.f32 %v1837_v55, %v970_v51  ;;  %vm994_vm10 = vcmp.ge.f32.partialorder %v978_v56, 0.0 }
 0x135   :  { %1280 = vst [vmem:[%s1917_s4 + $0x20] sm:$0xff] %v1260_v1   ;;  %v863_v42 = vadd.f32 %v862_v63, %v766_v21  ;;  %v895_v45 = vadd.f32 %v894_v0, %v798_v38  ;;  %v1017_v35 = vmul.f32 %v1837_v55, %v978_v56  ;;  %vm984_vm11 = vcmp.ge.f32.partialorder %v968_v62, 0.0 }
 0x136   :  { %v971_v37 = vadd.f32 %v1830_v47, %v871_v2  ;;  %v979_v11 = vadd.f32 %v1830_v47, %v903_v8  ;;  %v1007_v7 = vmul.f32 %v1837_v55, %v968_v62  ;;  %vm992_vm12 = vcmp.ge.f32.partialorder %v976_v60, 0.0 }
 0x137   :  { %v969_v54 = vadd.f32 %v1830_v47, %v863_v42  ;;  %v977_v36 = vadd.f32 %v1830_v47, %v895_v45  ;;  %v1015_v10 = vmul.f32 %v1837_v55, %v976_v60  ;;  %v1025_v4 = vsel %vm986_vm9, %v970_v51, %v1009_v9 }
 0x138   :  { %vm987_vm13 = vcmp.ge.f32.partialorder %v971_v37, 0.0  ;;  %v1010_v12 = vmul.f32 %v1837_v55, %v971_v37  ;;  %vm995_vm14 = vcmp.ge.f32.partialorder %v979_v11, 0.0  ;;  %v1018_v3 = vmul.f32 %v1837_v55, %v979_v11 }
 0x139   :  { %vm985_vm15 = vcmp.ge.f32.partialorder %v969_v54, 0.0  ;;  %v1008_v5 = vmul.f32 %v1837_v55, %v969_v54  ;;  %vm993_vm0 = vcmp.ge.f32.partialorder %v977_v36, 0.0  ;;  %v1033_v6 = vsel %vm994_vm10, %v978_v56, %v1017_v35 }
 0x13a   :  { %v1026_v13 = vsel %vm987_vm13, %v971_v37, %v1010_v12  ;;  %v1016_v14 = vmul.f32 %v1837_v55, %v977_v36  ;;  %v1023_v47 = vsel %vm984_vm11, %v968_v62, %v1007_v7  ;;  %v1034_v16 = vsel %vm995_vm14, %v979_v11, %v1018_v3 }
 0x13b   :  { %v1255_v15 = vpack.c.bf16 %v1026_v13, %v1025_v4  ;;  %v1024_v17 = vsel %vm985_vm15, %v969_v54, %v1008_v5  ;;  %v1031_v18 = vsel %vm992_vm12, %v976_v60, %v1015_v10  ;;  %v1275_v20 = vpack.c.bf16 %v1034_v16, %v1033_v6 }
 0x13c   :  { %v1250_v22 = vpack.c.bf16 %v1024_v17, %v1023_v47  ;;  %v1032_v23 = vsel %vm993_vm0, %v977_v36, %v1016_v14 }
 0x13d   :  { %1279 = vst [vmem:[%s1917_s4 + $0x18] sm:$0xff] %v1255_v15   ;;  %v1270_v25 = vpack.c.bf16 %v1032_v23, %v1031_v18  ;;  %1283 = vst [vmem:[%s1917_s4 + $0x38] sm:$0xff] %v1275_v20  }
 0x13e   :  { %1278 = vst [vmem:[%s1917_s4 + $0x10] sm:$0xff] %v1250_v22  }
 0x13f   :  { %1282 = vst [vmem:[%s1917_s4 + $0x30] sm:$0xff] %v1270_v25  }

// kernel: gen_forward.42
= control target key start
LH: loop header
LB: loop body
LE: loop exit
PB: predicated region body
PF: predicated region fallthrough
CT: control target
= control target key end

     0   :  { %vm440_vm0 = vcmask 261120   ;;  %vm1075_vm1 = vcmask 523264   ;;  %s2832_s3 = inlined_call_operand.vmem [shape: bf16[288,128], index: 3, kind: input, shape index: {}]   ;;  %s2833_s2 = inlined_call_operand.vmem [shape: bf16[128,288], index: 2, kind: input, shape index: {}]   ;;  %s2834_s1 = inlined_call_operand.vmem [shape: bf16[576,128], index: 1, kind: input, shape index: {}]   ;;  %s2835_s0 = inlined_call_operand.vmem [shape: bf16[128,576], index: 0, kind: input, shape index: {}]   ;;  %s2836_s4 = inlined_call_operand.vmem [shape: f32[1,128], index: 4, kind: input, shape index: {}]   ;;  %s2837_s5 = inlined_call_operand.vmem [shape: f32[1,128], index: 5, kind: input, shape index: {}]   ;;  %s2838_s6 = inlined_call_operand.vmem [shape: bf16[128,128], index: 6, kind: output, shape index: {}]  }
   0x1   :  { %v2026_v0 = vld [vmem:[%s2832_s3 + $0x78] sm:$0xff]   ;;  %v2027_v1 = vld [vmem:[%s2832_s3 + $0x88] sm:$0xff]   ;;  %v2029_v3 = vld [vmem:[%s2832_s3 + $0x70] sm:$0xff]  }
   0x2   :  { %1768 = vmatprep.subr.bf16.mxu0 %v2026_v0  ;;  %v2028_v2 = vld [vmem:[%s2832_s3 + $0x38] sm:$0xff]   ;;  %1982 = vmatprep.subr.bf16.mxu1 %v2027_v1  ;;  %v2030_v4 = vld [vmem:[%s2832_s3 + $0x80] sm:$0xff]   ;;  %v2031_v5 = vld [vmem:[%s2832_s3 + $0x30] sm:$0xff]  }
   0x3   :  { %1769 = vmatpush3.bf16.msra.mxu0 %v2028_v2  ;;  %1983 = vmatpush3.bf16.msra.mxu1 %v2027_v1  ;;  %v2032_v6 = vld [vmem:[%s2833_s2 + $0x8] ss:$12 sps:$4 sm:$0xff]   ;;  %v2034_v8 = vld [vmem:[%s2833_s2 + $0x20] ss:$12 sps:$4 sm:$0xff]   ;;  %v2035_v9 = vld [vmem:[%s2834_s1 + $0x78] sm:$0xff]  }
   0x4   :  { %1770 = vmatprep.subr.bf16.mxu0 %v2029_v3  ;;  %1984 = vmatprep.subr.bf16.mxu1 %v2030_v4  ;;  %v2033_v7 = vld [vmem:[%s2832_s3 + $0x68] sm:$0xff]   ;;  %v2037_v11 = vld [vmem:[%s2834_s1 + $0x38] sm:$0xff]   ;;  %v2038_v12 = vld [vmem:[%s2832_s3 + $0x60] sm:$0xff]  }
   0x5   :  { %1986 = vmatprep.mubr.msk.bf16.mxu1 %vm440_vm0, %v2032_v6  ;;  %v2036_v10 = vld [vmem:[%s2832_s3 + $0x28] sm:$0xff]   ;;  %v2039_v13 = vld [vmem:[%s2834_s1 + $0x70] sm:$0xff]   ;;  %v2040_v14 = vld [vmem:[%s2832_s3 + $0x20] sm:$0xff]  }
   0x6   :  { %v2041_v15 = vld [vmem:[%s2834_s1 + $0x30] sm:$0xff]   ;;  %v2042_v16 = vld [vmem:[%s2833_s2 + $0x38] ss:$12 sps:$4 sm:$0xff]   ;;  %v2045_v19 = vld [vmem:[%s2834_s1 + $0x68] sm:$0xff]  }
   0x7   :  { %1771 = vmatpush3.bf16.msra.mxu0 %v2031_v5  ;;  %1985 = vmatpush3.bf16.msra.mxu1 %v2030_v4  ;;  %v2043_v17 = vld [vmem:[%s2832_s3 + $0x58] sm:$0xff]   ;;  %v2047_v21 = vld [vmem:[%s2834_s1 + $0x28] sm:$0xff]   ;;  %v2048_v22 = vld [vmem:[%s2832_s3 + $0x50] sm:$0xff]  }
   0x8   :  { %1772 = vmatprep.subr.bf16.mxu0 %v2033_v7  ;;  %1842 = vmatprep.subr.bf16.mxu1 %v2035_v9  ;;  %v2044_v18 = vld [vmem:[%s2833_s2 + $0x50] ss:$12 sps:$4 sm:$0xff]   ;;  %v2049_v23 = vld [vmem:[%s2834_s1 + $0x60] sm:$0xff]   ;;  %v2052_v26 = vld [vmem:[%s2833_s2 + $0x68] ss:$12 sps:$4 sm:$0xff]  }
   0x9   :  { %v2046_v20 = vld [vmem:[%s2832_s3 + $0x18] sm:$0xff]   ;;  %v2050_v24 = vld [vmem:[%s2832_s3 + $0x10] sm:$0xff]   ;;  %v2051_v25 = vld [vmem:[%s2834_s1 + $0x20] sm:$0xff]  }
   0xa   :  { %1987 = vmatmul.mubr.msk.bf16.vlgmr.msra.gmra.mxu1 %vm440_vm0, %v2034_v8  ;;  %v2053_v27 = vld [vmem:[%s2832_s3 + $0x48] sm:$0xff]   ;;  %v2055_v29 = vld [vmem:[%s2834_s1 + $0x58] sm:$0xff]   ;;  %v2058_v32 = vld [vmem:[%s2832_s3 + $0x40] sm:$0xff]  }
   0xb   :  { %1773 = vmatpush3.bf16.msra.mxu0 %v2036_v10  ;;  %1843 = vmatpush3.bf16.msra.mxu1 %v2037_v11  ;;  %v2054_v28 = vld [vmem:[%s2833_s2 + $0x80] ss:$12 sps:$4 sm:$0xff]   ;;  %v2057_v31 = vld [vmem:[%s2834_s1 + $0x18] sm:$0xff]   ;;  %v2059_v33 = vld [vmem:[%s2834_s1 + $0x50] sm:$0xff]  }
   0xc   :  { %1774 = vmatprep.subr.bf16.mxu0 %v2038_v12  ;;  %1844 = vmatprep.subr.bf16.mxu1 %v2039_v13  ;;  %v2056_v30 = vld [vmem:[%s2832_s3 + $0x8] sm:$0xff]   ;;  %v2060_v34 = vld [vmem:[%s2832_s3] sm:$0xff]   ;;  %v2061_v35 = vld [vmem:[%s2834_s1 + $0x10] sm:$0xff]  }
   0xd   :  { %1990 = vmatprep.mubr.msk.bf16.mxu1 %vm440_vm0, %v2042_v16  ;;  %v2062_v36 = vld [vmem:[%s2833_s2] ss:$12 sps:$4 sm:$0xff]   ;;  %v2064_v37 = vld [vmem:[%s2833_s2 + $0x4] ss:$12 sps:$4 sm:$0xff]   ;;  %v2068_v41 = vld [vmem:[%s2834_s1 + $0xf8] sm:$0xff]  }
   0xe   :  { %v2065_v38 = vld [vmem:[%s2833_s2 + $0x98] ss:$12 sps:$4 sm:$0xff]   ;;  %497 = vmatprep.mubr.bf16.mxu0 %v2064_v37  ;;  %v2066_v39 = vld [vmem:[%s2833_s2 + $0xb0] ss:$12 sps:$4 sm:$0xff]   ;;  %v2067_v40 = vld [vmem:[%s2834_s1 + $0x48] sm:$0xff]  }
   0xf   :  { %1775 = vmatpush3.bf16.msra.mxu0 %v2040_v14  ;;  %1845 = vmatpush3.bf16.msra.mxu1 %v2041_v15  ;;  %v2069_v42 = vld [vmem:[%s2834_s1 + $0x8] sm:$0xff]   ;;  %v2070_v43 = vld [vmem:[%s2834_s1 + $0xb8] sm:$0xff]   ;;  %v2071_v44 = vld [vmem:[%s2834_s1 + $0x40] sm:$0xff]  }
  0x10   :  { %1776 = vmatprep.subr.bf16.mxu0 %v2043_v17  ;;  %1846 = vmatprep.subr.bf16.mxu1 %v2045_v19  ;;  %v2072_v45 = vld [vmem:[%s2834_s1] sm:$0xff]   ;;  %v2073_v46 = vld [vmem:[%s2833_s2 + $0x1c] ss:$12 sps:$4 sm:$0xff]   ;;  %v2079_v50 = vld [vmem:[%s2834_s1 + $0xf0] sm:$0xff]  }
  0x11   :  { %v2075_v47 = vld [vmem:[%s2835_s0] ss:$20 sps:$4 sm:$0xff]   ;;  %v2077_v48 = vld [vmem:[%s2835_s0 + $0x4] ss:$20 sps:$4 sm:$0xff]   ;;  %v2085_v54 = vld [vmem:[%s2833_s2 + $0x30] ss:$12 sps:$4 sm:$0xff]  }
  0x12   :  { %1991 = vmatmul.mubr.msk.bf16.gmra.mxu1 %vm440_vm0, %v2044_v18  ;;  %v2078_v49 = vld [vmem:[%s2833_s2 + $0x18] ss:$12 sps:$4 sm:$0xff]   ;;  %v2080_v51 = vld [vmem:[%s2834_s1 + $0xb0] sm:$0xff]   ;;  %v2083_v53 = vld [vmem:[%s2835_s0 + $0x2c] ss:$20 sps:$4 sm:$0xff]  }
  0x13   :  { %1777 = vmatpush3.bf16.msra.mxu0 %v2046_v20  ;;  %1847 = vmatpush3.bf16.msra.mxu1 %v2047_v21  ;;  %v2081_v52 = vld [vmem:[%s2833_s2 + $0x34] ss:$12 sps:$4 sm:$0xff]   ;;  %v2086_v55 = vld [vmem:[%s2835_s0 + $0x28] ss:$20 sps:$4 sm:$0xff]   ;;  %v2089_v58 = vld [vmem:[%s2833_s2 + $0x4c] ss:$12 sps:$4 sm:$0xff]  }
  0x14   :  { %1778 = vmatprep.subr.bf16.mxu0 %v2048_v22  ;;  %1848 = vmatprep.subr.bf16.mxu1 %v2049_v23  ;;  %v2087_v56 = vld [vmem:[%s2834_s1 + $0xe8] sm:$0xff]   ;;  %v2095_v60 = vld [vmem:[%s2834_s1 + $0xe0] sm:$0xff]   ;;  %v2099_v1 = vld [vmem:[%s2835_s0 + $0x7c] ss:$20 sps:$4 sm:$0xff]  }
  0x15   :  { %1994 = vmatprep.mubr.msk.bf16.mxu1 %vm440_vm0, %v2052_v26  ;;  %v2088_v57 = vld [vmem:[%s2834_s1 + $0xa8] sm:$0xff]   ;;  %v2096_v61 = vld [vmem:[%s2834_s1 + $0xa0] sm:$0xff]   ;;  %v2103_v2 = vld [vmem:[%s2834_s1 + $0xd8] sm:$0xff]  }
  0x16   :  { %v2091_v59 = vld [vmem:[%s2835_s0 + $0x54] ss:$20 sps:$4 sm:$0xff]   ;;  %v2094_v63 = vld [vmem:[%s2835_s0 + $0x50] ss:$20 sps:$4 sm:$0xff]   ;;  %v2104_v3 = vld [vmem:[%s2834_s1 + $0x98] sm:$0xff]  }
  0x17   :  { %1779 = vmatpush3.bf16.msra.mxu0 %v2050_v24  ;;  %1849 = vmatpush3.bf16.msra.mxu1 %v2051_v25  ;;  %v2093_v62 = vld [vmem:[%s2833_s2 + $0x48] ss:$12 sps:$4 sm:$0xff]   ;;  %v2097_v0 = vld [vmem:[%s2833_s2 + $0x64] ss:$12 sps:$4 sm:$0xff]   ;;  %v2105_v4 = vld [vmem:[%s2834_s1 + $0x118] sm:$0xff]  }
  0x18   :  { %1780 = vmatprep.subr.bf16.mxu0 %v2053_v27  ;;  %1850 = vmatprep.subr.bf16.mxu1 %v2055_v29  ;;  %v2101_v5 = vld [vmem:[%s2833_s2 + $0x60] ss:$12 sps:$4 sm:$0xff]   ;;  %v2112_v6 = vld [vmem:[%s2834_s1 + $0xd0] sm:$0xff]   ;;  %v2106_v8 = vld [vmem:[%s2833_s2 + $0x7c] ss:$12 sps:$4 sm:$0xff]  }
  0x19   :  { %v2113_v7 = vld [vmem:[%s2834_s1 + $0x90] sm:$0xff]   ;;  %v2102_v9 = vld [vmem:[%s2835_s0 + $0x78] ss:$20 sps:$4 sm:$0xff]   ;;  %v2129_v17 = vld [vmem:[%s2834_s1 + $0xc0] sm:$0xff]  }
  0x1a   :  { %1995 = vmatmul.mubr.msk.bf16.gmra.mxu1 %vm440_vm0, %v2054_v28  ;;  %v2108_v10 = vld [vmem:[%s2835_s0 + $0xa4] ss:$20 sps:$4 sm:$0xff]   ;;  %v2120_v11 = vld [vmem:[%s2834_s1 + $0xc8] sm:$0xff]   ;;  %v2122_v13 = vld [vmem:[%s2834_s1 + $0x110] sm:$0xff]  }
  0x1b   :  { %1781 = vmatpush3.bf16.msra.mxu0 %v2056_v30  ;;  %1851 = vmatpush3.bf16.msra.mxu1 %v2057_v31  ;;  %v2121_v12 = vld [vmem:[%s2834_s1 + $0x88] sm:$0xff]   ;;  %v2110_v14 = vld [vmem:[%s2833_s2 + $0x78] ss:$12 sps:$4 sm:$0xff]   ;;  %v2111_v15 = vld [vmem:[%s2835_s0 + $0xa0] ss:$20 sps:$4 sm:$0xff]  }
  0x1c   :  { %1782 = vmatprep.subr.bf16.mxu0 %v2058_v32  ;;  %1852 = vmatprep.subr.bf16.mxu1 %v2059_v33  ;;  %v2114_v16 = vld [vmem:[%s2833_s2 + $0x94] ss:$12 sps:$4 sm:$0xff]   ;;  %v2137_v20 = vld [vmem:[%s2834_s1 + $0x108] sm:$0xff]   ;;  %v2118_v22 = vld [vmem:[%s2833_s2 + $0x90] ss:$12 sps:$4 sm:$0xff]  }
  0x1d   :  { %1998 = vmatprep.mubr.msk.bf16.mxu1 %vm440_vm0, %v2065_v38  ;;  %v2130_v18 = vld [vmem:[%s2834_s1 + $0x80] sm:$0xff]   ;;  %v2123_v23 = vld [vmem:[%s2833_s2 + $0xac] ss:$12 sps:$4 sm:$0xff]   ;;  %v2119_v24 = vld [vmem:[%s2835_s0 + $0xc8] ss:$20 sps:$4 sm:$0xff]  }
  0x1e   :  { %v2116_v19 = vld [vmem:[%s2835_s0 + $0xcc] ss:$20 sps:$4 sm:$0xff]   ;;  %v2125_v25 = vld [vmem:[%s2835_s0 + $0xf4] ss:$20 sps:$4 sm:$0xff]   ;;  %v2128_v28 = vld [vmem:[%s2835_s0 + $0xf0] ss:$20 sps:$4 sm:$0xff]  }
  0x1f   :  { %1783 = vmatpush3.bf16.msra.mxu0 %v2060_v34  ;;  %1853 = vmatpush3.bf16.msra.mxu1 %v2061_v35  ;;  %v2138_v21 = vld [vmem:[%s2834_s1 + $0x100] sm:$0xff]   ;;  %v2127_v26 = vld [vmem:[%s2833_s2 + $0xa8] ss:$12 sps:$4 sm:$0xff]   ;;  %v2131_v29 = vld [vmem:[%s2835_s0 + $0x11c] ss:$20 sps:$4 sm:$0xff]  }
  0x20   :  { %1854 = vmatprep.subr.bf16.mxu1 %v2067_v40  ;;  %1906 = vmatprep.subr.bf16.mxu0 %v2068_v41  ;;  %v2135_v27 = vld [vmem:[%s2835_s0 + $0xc] ss:$20 sps:$4 sm:$0xff]   ;;  %v2133_v30 = vld [vmem:[%s2835_s0 + $0x8] ss:$20 sps:$4 sm:$0xff]   ;;  %v2141_v33 = vld [vmem:[%s2835_s0 + $0x10] ss:$20 sps:$4 sm:$0xff]  }
  0x21   :  { %v2139_v31 = vld [vmem:[%s2835_s0 + $0x34] ss:$20 sps:$4 sm:$0xff]   ;;  %v2136_v32 = vld [vmem:[%s2835_s0 + $0x118] ss:$20 sps:$4 sm:$0xff]   ;;  %v2142_v34 = vld [vmem:[%s2835_s0 + $0x30] ss:$20 sps:$4 sm:$0xff]  }
  0x22   :  { %498 = vmatmul.mubr.bf16.vlgmr.msra.gmra.mxu0 %v2062_v36  ;;  %1999 = vmatmul.mubr.msk.bf16.gmra.mxu1 %vm440_vm0, %v2066_v39  ;;  %v2144_v35 = vld [vmem:[%s2835_s0 + $0x5c] ss:$20 sps:$4 sm:$0xff]   ;;  %v2143_v36 = vld [vmem:[%s2835_s0 + $0x38] ss:$20 sps:$4 sm:$0xff]   ;;  %v2147_v37 = vld [vmem:[%s2835_s0 + $0x60] ss:$20 sps:$4 sm:$0xff]  }
  0x23   :  { %1855 = vmatpush3.bf16.msra.mxu1 %v2069_v42  ;;  %1907 = vmatpush3.bf16.msra.mxu0 %v2070_v43  ;;  %v2146_v38 = vld [vmem:[%s2835_s0 + $0x58] ss:$20 sps:$4 sm:$0xff]   ;;  %v2148_v40 = vld [vmem:[%s2835_s0 + $0x88] ss:$20 sps:$4 sm:$0xff]   ;;  %v2155_v41 = vld [vmem:[%s2835_s0 + $0xb0] ss:$20 sps:$4 sm:$0xff]  }
  0x24   :  { %1856 = vmatprep.subr.bf16.mxu1 %v2071_v44  ;;  %505 = vmatprep.mubr.bf16.mxu0 %v2073_v46  ;;  %v2149_v39 = vld [vmem:[%s2835_s0 + $0x84] ss:$20 sps:$4 sm:$0xff]   ;;  %v2151_v42 = vld [vmem:[%s2835_s0 + $0x80] ss:$20 sps:$4 sm:$0xff]   ;;  %v2154_v46 = vld [vmem:[%s2835_s0 + $0xa8] ss:$20 sps:$4 sm:$0xff]  }
  0x25   :  { %1132 = vmatprep.mubr.bf16.mxu1 %v2077_v48  ;;  %1908 = vmatprep.subr.bf16.mxu0 %v2079_v50  ;;  %v2152_v43 = vld [vmem:[%s2835_s0 + $0xac] ss:$20 sps:$4 sm:$0xff]   ;;  %v2164_v48 = vld [vmem:[%s2835_s0 + $0x128] ss:$20 sps:$4 sm:$0xff]  }
  0x26   :  { %v2156_v44 = vld [vmem:[%s2835_s0 + $0xd8] ss:$20 sps:$4 sm:$0xff]   ;;  %v2160_v50 = vld [vmem:[%s2835_s0 + $0xfc] ss:$20 sps:$4 sm:$0xff]  }
  0x27   :  { %1857 = vmatpush3.bf16.msra.mxu1 %v2072_v45  ;;  %1909 = vmatpush3.bf16.msra.mxu0 %v2080_v51  ;;  %v2163_v45 = vld [vmem:[%s2835_s0 + $0x100] ss:$20 sps:$4 sm:$0xff]   ;;  %v2162_v51 = vld [vmem:[%s2835_s0 + $0xf8] ss:$20 sps:$4 sm:$0xff]  }
  0x28   :  { %1910 = vmatprep.subr.bf16.mxu0 %v2087_v56  ;;  %2002 = vmatprep.subr.bf16.mxu1 %v2105_v4 }
  0x2a   :  { %506 = vmatmul.mubr.bf16.gmra.mxu0 %v2078_v49  ;;  %1133 = vmatmul.mubr.bf16.vlgmr.msra.gmra.mxu1 %v2075_v47  ;;  %v2157_v47 = vld [vmem:[%s2835_s0 + $0xd4] ss:$20 sps:$4 sm:$0xff]   ;;  %v2159_v49 = vld [vmem:[%s2835_s0 + $0xd0] ss:$20 sps:$4 sm:$0xff]  }
  0x2b   :  { %513 = vmatprep.mubr.bf16.mxu0 %v2081_v52  ;;  %1140 = vmatprep.mubr.bf16.mxu1 %v2083_v53  ;;  %v2165_v52 = vld [vmem:[%s2835_s0 + $0x124] ss:$20 sps:$4 sm:$0xff]   ;;  %v2167_v53 = vld [vmem:[%s2835_s0 + $0x120] ss:$20 sps:$4 sm:$0xff]  }
  0x2c   :  { %1911 = vmatpush3.bf16.msra.mxu0 %v2088_v57  ;;  %2003 = vmatpush3.bf16.msra.mxu1 %v2105_v4 }
  0x2d   :  { %1912 = vmatprep.subr.bf16.mxu0 %v2095_v60  ;;  %2004 = vmatprep.subr.bf16.mxu1 %v2122_v13 }
  0x30   :  { %1913 = vmatpush3.bf16.msra.mxu0 %v2096_v61  ;;  %2005 = vmatpush3.bf16.msra.mxu1 %v2122_v13 }
  0x31   :  { %1914 = vmatprep.subr.bf16.mxu0 %v2103_v2  ;;  %2006 = vmatprep.subr.bf16.mxu1 %v2137_v20 }
  0x32   :  { %514 = vmatmul.mubr.bf16.gmra.mxu0 %v2085_v54  ;;  %1141 = vmatmul.mubr.bf16.gmra.mxu1 %v2086_v55 }
  0x33   :  { %521 = vmatprep.mubr.bf16.mxu0 %v2089_v58  ;;  %1148 = vmatprep.mubr.bf16.mxu1 %v2091_v59 }
  0x34   :  { %1915 = vmatpush3.bf16.msra.mxu0 %v2104_v3  ;;  %2007 = vmatpush3.bf16.msra.mxu1 %v2137_v20 }
  0x35   :  { %1916 = vmatprep.subr.bf16.mxu0 %v2112_v6  ;;  %2008 = vmatprep.subr.bf16.mxu1 %v2138_v21 }
  0x38   :  { %1917 = vmatpush3.bf16.msra.mxu0 %v2113_v7  ;;  %2009 = vmatpush3.bf16.msra.mxu1 %v2138_v21 }
  0x39   :  { %1918 = vmatprep.subr.bf16.mxu0 %v2120_v11 }
  0x3a   :  { %522 = vmatmul.mubr.bf16.gmra.mxu0 %v2093_v62  ;;  %1149 = vmatmul.mubr.bf16.gmra.mxu1 %v2094_v63 }
  0x3b   :  { %529 = vmatprep.mubr.bf16.mxu0 %v2097_v0  ;;  %1156 = vmatprep.mubr.bf16.mxu1 %v2099_v1 }
  0x3c   :  { %1919 = vmatpush3.bf16.msra.mxu0 %v2121_v12 }
  0x3d   :  { %1920 = vmatprep.subr.bf16.mxu0 %v2129_v17 }
  0x40   :  { %1921 = vmatpush3.bf16.msra.mxu0 %v2130_v18 }
  0x42   :  { %530 = vmatmul.mubr.bf16.gmra.mxu0 %v2101_v5  ;;  %1157 = vmatmul.mubr.bf16.gmra.mxu1 %v2102_v9 }
  0x43   :  { %537 = vmatprep.mubr.bf16.mxu0 %v2106_v8  ;;  %1164 = vmatprep.mubr.bf16.mxu1 %v2108_v10 }
  0x4a   :  { %538 = vmatmul.mubr.bf16.gmra.mxu0 %v2110_v14  ;;  %1165 = vmatmul.mubr.bf16.gmra.mxu1 %v2111_v15 }
  0x4b   :  { %545 = vmatprep.mubr.bf16.mxu0 %v2114_v16  ;;  %1172 = vmatprep.mubr.bf16.mxu1 %v2116_v19 }
  0x52   :  { %546 = vmatmul.mubr.bf16.gmra.mxu0 %v2118_v22  ;;  %1173 = vmatmul.mubr.bf16.gmra.mxu1 %v2119_v24 }
  0x53   :  { %553 = vmatprep.mubr.bf16.mxu0 %v2123_v23  ;;  %1180 = vmatprep.mubr.bf16.mxu1 %v2125_v25 }
  0x5a   :  { %554 = vmatmul.mubr.bf16.gmra.mxu0 %v2127_v26  ;;  %1181 = vmatmul.mubr.bf16.gmra.mxu1 %v2128_v28 }
  0x5b   :  { %1229 = vmatprep.mubr.bf16.mxu0 %v2135_v27  ;;  %1188 = vmatprep.mubr.bf16.mxu1 %v2131_v29 }
  0x62   :  { %1230 = vmatmul.mubr.bf16.vlgmr.msra.gmra.mxu0 %v2133_v30  ;;  %1189 = vmatmul.mubr.bf16.gmra.mxu1 %v2136_v32 }
  0x63   :  { %1237 = vmatprep.mubr.bf16.mxu0 %v2139_v31  ;;  %2010 = vmatprep.mubr.msk.bf16.mxu1 %vm1075_vm1, %v2141_v33 }
  0x6a   :  { %1238 = vmatmul.mubr.bf16.gmra.mxu0 %v2142_v34  ;;  %2011 = vmatmul.mubr.msk.bf16.vlgmr.msra.gmra.mxu1 %vm1075_vm1, %v2143_v36 }
  0x6b   :  { %1245 = vmatprep.mubr.bf16.mxu0 %v2144_v35  ;;  %2014 = vmatprep.mubr.msk.bf16.mxu1 %vm1075_vm1, %v2147_v37 }
  0x72   :  { %1246 = vmatmul.mubr.bf16.gmra.mxu0 %v2146_v38  ;;  %2015 = vmatmul.mubr.msk.bf16.gmra.mxu1 %vm1075_vm1, %v2148_v40 }
  0x73   :  { %1253 = vmatprep.mubr.bf16.mxu0 %v2149_v39  ;;  %2018 = vmatprep.mubr.msk.bf16.mxu1 %vm1075_vm1, %v2155_v41 }
  0x7a   :  { %1254 = vmatmul.mubr.bf16.gmra.mxu0 %v2151_v42  ;;  %2019 = vmatmul.mubr.msk.bf16.gmra.mxu1 %vm1075_vm1, %v2156_v44 }
  0x7b   :  { %1261 = vmatprep.mubr.bf16.mxu0 %v2152_v43  ;;  %2022 = vmatprep.mubr.msk.bf16.mxu1 %vm1075_vm1, %v2163_v45 }
  0x82   :  { %1262 = vmatmul.mubr.bf16.gmra.mxu0 %v2154_v46  ;;  %2023 = vmatmul.mubr.msk.bf16.gmra.mxu1 %vm1075_vm1, %v2164_v48 }
  0x83   :  { %1269 = vmatprep.mubr.bf16.mxu0 %v2157_v47 }
  0x8a   :  { %1270 = vmatmul.mubr.bf16.gmra.mxu0 %v2159_v49 }
  0x8b   :  { %1277 = vmatprep.mubr.bf16.mxu0 %v2160_v50 }
  0x92   :  { %1278 = vmatmul.mubr.bf16.gmra.mxu0 %v2162_v51 }
  0x93   :  { %1285 = vmatprep.mubr.bf16.mxu0 %v2165_v52 }
  0x9a   :  { %1286 = vmatmul.mubr.bf16.gmra.mxu0 %v2167_v53 }
  0xca   :  { %v1988_v54 = vpop.f32.mrf.mxu1 }
  0xcc   :  { %v596_v55 = vpop.f32.mrf.mxu1 }
  0xce   :  { %v2573_v56 = vpop.f32.mrf.mxu1 }
  0xd0   :  { %v599_v57 = vpop.f32.mrf.mxu1 }
  0xd2   :  { %v1992_v58 = vpop.f32.mrf.mxu1 }
  0xd4   :  { %v612_v59 = vpop.f32.mrf.mxu1 }
  0xd6   :  { %v2575_v60 = vpop.f32.mrf.mxu1 }
  0xd8   :  { %v2577_v61 = vpop.f32.mrf.mxu1 }
  0xda   :  { %v2579_v62 = vpop.f32.mrf.mxu1 }
  0xdc   :  { %v628_v63 = vpop.f32.mrf.mxu1 }
  0xde   :  { %v2581_v0 = vpop.f32.mrf.mxu1 }
  0xe0   :  { %v2583_v1 = vpop.f32.mrf.mxu1 }
  0xe2   :  { %v1784_v2 = vpop.f32.mrf.mxu0  ;;  %v2585_v3 = vpop.f32.mrf.mxu1 }
  0xe4   :  { %v1785_v4 = vpop.f32.mrf.mxu0  ;;  %v2587_v6 = vpop.f32.mrf.mxu1 }
  0xe5   :  { %v1786_v5 = vadd.f32 %v1785_v4, %v1784_v2 }
  0xe6   :  { %v1787_v7 = vpop.f32.mrf.mxu0  ;;  %v2589_v9 = vpop.f32.mrf.mxu1 }
  0xe7   :  { %v597_v8 = vadd.f32 %v1786_v5, %v596_v55  ;;  %2839 = vst [vmem:[#allocation2_spill] sm:$0xff] %v2589_v9 }
  0xe8   :  { %v1788_v10 = vpop.f32.mrf.mxu0  ;;  %v2591_v12 = vpop.f32.mrf.mxu1 }
  0xe9   :  { %v1789_v11 = vadd.f32 %v1788_v10, %v1787_v7  ;;  %2840 = vst [vmem:[#allocation3_spill] sm:$0xff] %v2591_v12 }
  0xea   :  { %v1790_v14 = vpop.f32.mrf.mxu0  ;;  %v1858_v15 = vpop.f32.mrf.mxu1 }
  0xeb   :  { %v2593_v13 = vadd.f32 %v1789_v11, %v599_v57 }
  0xec   :  { %v1791_v16 = vpop.f32.mrf.mxu0  ;;  %v1859_v18 = vpop.f32.mrf.mxu1 }
  0xed   :  { %v1792_v17 = vadd.f32 %v1791_v16, %v1790_v14  ;;  %v1860_v21 = vadd.f32 %v1859_v18, %v1858_v15 }
  0xee   :  { %v2595_v19 = vpop.f32.mrf.mxu0  ;;  %v2599_v22 = vpop.f32.mrf.mxu1 }
  0xef   :  { %v2597_v20 = vadd.f32 %v1988_v54, %v1792_v17  ;;  %v2603_v24 = vadd.f32 %v1860_v21, %v597_v8 }
  0xf0   :  { %v2601_v23 = vpop.f32.mrf.mxu0  ;;  %v2605_v25 = vpop.f32.mrf.mxu1 }
  0xf2   :  { %v1796_v26 = vpop.f32.mrf.mxu0  ;;  %v2607_v27 = vpop.f32.mrf.mxu1 }
  0xf4   :  { %v1797_v28 = vpop.f32.mrf.mxu0  ;;  %v2609_v30 = vpop.f32.mrf.mxu1 }
  0xf5   :  { %v1798_v29 = vadd.f32 %v1797_v28, %v1796_v26 }
  0xf6   :  { %v2611_v31 = vpop.f32.mrf.mxu0  ;;  %v2615_v33 = vpop.f32.mrf.mxu1 }
  0xf7   :  { %v2613_v32 = vadd.f32 %v1798_v29, %v612_v59 }
  0xf8   :  { %v2617_v34 = vpop.f32.mrf.mxu0  ;;  %v2619_v35 = vpop.f32.mrf.mxu1 }
  0xfa   :  { %v1802_v36 = vpop.f32.mrf.mxu0  ;;  %v2621_v37 = vpop.f32.mrf.mxu1 }
  0xfc   :  { %v1803_v38 = vpop.f32.mrf.mxu0  ;;  %v2623_v40 = vpop.f32.mrf.mxu1 }
  0xfd   :  { %v1804_v39 = vadd.f32 %v1803_v38, %v1802_v36 }
  0xfe   :  { %v2625_v41 = vpop.f32.mrf.mxu0  ;;  %v2629_v43 = vpop.f32.mrf.mxu1 }
  0xff   :  { %v2627_v42 = vadd.f32 %v1992_v58, %v1804_v39 }
 0x100   :  { %v2631_v44 = vpop.f32.mrf.mxu0  ;;  %v2633_v45 = vpop.f32.mrf.mxu1 }
 0x102   :  { %v1808_v46 = vpop.f32.mrf.mxu0  ;;  %v2635_v47 = vpop.f32.mrf.mxu1 }
 0x104   :  { %v1809_v48 = vpop.f32.mrf.mxu0  ;;  %v2637_v50 = vpop.f32.mrf.mxu1 }
 0x105   :  { %v1810_v49 = vadd.f32 %v1809_v48, %v1808_v46 }
 0x106   :  { %v2639_v51 = vpop.f32.mrf.mxu0  ;;  %v2643_v53 = vpop.f32.mrf.mxu1 }
 0x107   :  { %v2641_v52 = vadd.f32 %v1810_v49, %v628_v63 }
 0x108   :  { %v2645_v54 = vpop.f32.mrf.mxu0  ;;  %v2647_v55 = vpop.f32.mrf.mxu1 }
 0x10a   :  { %v1814_v57 = vpop.f32.mrf.mxu0  ;;  %v2649_v58 = vpop.f32.mrf.mxu1 }
 0x10c   :  { %v1815_v59 = vpop.f32.mrf.mxu0  ;;  %v2651_v4 = vpop.f32.mrf.mxu1 }
 0x10d   :  { %v1816_v2 = vadd.f32 %v1815_v59, %v1814_v57 }
 0x10e   :  { %v2653_v5 = vpop.f32.mrf.mxu0  ;;  %v2658_v63 = vpop.f32.mrf.mxu1 }
 0x10f   :  { %v2656_v7 = vadd.f32 %v2579_v62, %v1816_v2 }
 0x110   :  { %v2660_v8 = vpop.f32.mrf.mxu0  ;;  %v2662_v10 = vpop.f32.mrf.mxu1 }
 0x112   :  { %v1820_v11 = vpop.f32.mrf.mxu0  ;;  %v2664_v14 = vpop.f32.mrf.mxu1 }
 0x114   :  { %v1821_v15 = vpop.f32.mrf.mxu0  ;;  %v2666_v17 = vpop.f32.mrf.mxu1 }
 0x115   :  { %v1822_v16 = vadd.f32 %v1821_v15, %v1820_v11 }
 0x116   :  { %v2668_v18 = vpop.f32.mrf.mxu0  ;;  %v2673_v62 = vpop.f32.mrf.mxu1 }
 0x117   :  { %v2671_v21 = vadd.f32 %v1822_v16, %v2587_v6 }
 0x118   :  { %v2675_v26 = vpop.f32.mrf.mxu0  ;;  %v2677_v28 = vpop.f32.mrf.mxu1 }
 0x119   :  { %2841 = vst [vmem:[#allocation4_spill] sm:$0xff] %v2671_v21 }
 0x11a   :  { %v1826_v29 = vpop.f32.mrf.mxu0  ;;  %v2679_v36 = vpop.f32.mrf.mxu1 }
 0x11c   :  { %v1827_v38 = vpop.f32.mrf.mxu0  ;;  %v2681_v46 = vpop.f32.mrf.mxu1 }
 0x11d   :  { %v1828_v39 = vadd.f32 %v1827_v38, %v1826_v29 }
 0x11e   :  { %v2683_v48 = vpop.f32.mrf.mxu0  ;;  %v2688_v6 = vpop.f32.mrf.mxu1 }
 0x11f   :  { %2842 = vst [vmem:[#allocation5_spill] sm:$0xff] %v2683_v48  ;;  %v2686_v49 = vadd.f32 %v2585_v3, %v1828_v39  ;;  %2844 = vst [vmem:[#allocation7_spill] sm:$0xff] %v2688_v6  ;;  %v1866_v3 = vadd.f32 %v2609_v30, %v2607_v27 }
 0x120   :  { %v2690_v57 = vpop.f32.mrf.mxu0  ;;  %v2692_v59 = vpop.f32.mrf.mxu1 }
 0x121   :  { %2843 = vst [vmem:[#allocation6_spill] sm:$0xff] %v2686_v49  ;;  %2845 = vst [vmem:[#allocation8_spill] sm:$0xff] %v2690_v57  ;;  %v1795_v57 = vadd.f32 %v2601_v23, %v2595_v19  ;;  %v2716_v19 = vld [vmem:[%s2836_s4] ss:$0 sm:$0xff] }
 0x122   :  { %2846 = vst [vmem:[#allocation9_spill] sm:$0xff] %v2692_v59  ;;  %v1922_v2 = vpop.f32.mrf.mxu0  ;;  %v2694_v11 = vpop.f32.mrf.mxu1 }
 0x123   :  { %2847 = vst [vmem:[#allocation10_spill] sm:$0xff] %v2694_v11  ;;  %v1863_v11 = vadd.f32 %v2605_v25, %v2599_v22 }
 0x124   :  { %v1923_v15 = vpop.f32.mrf.mxu0  ;;  %v2696_v16 = vpop.f32.mrf.mxu1 }
 0x125   :  { %2848 = vst [vmem:[#allocation11_spill] sm:$0xff] %v2696_v16  ;;  %v1924_v39 = vadd.f32 %v1923_v15, %v1922_v2  ;;  %v1143_v16 = vadd.f32 %v1866_v3, %v2597_v20  ;;  %v1138_v20 = vadd.f32 %v1863_v11, %v2593_v13 }
 0x126   :  { %v1925_v29 = vpop.f32.mrf.mxu0  ;;  %v2698_v38 = vpop.f32.mrf.mxu1 }
 0x127   :  { %2849 = vst [vmem:[#allocation12_spill] sm:$0xff] %v2698_v38  ;;  %v1869_v38 = vadd.f32 %v2619_v35, %v2615_v33  ;;  %v1232_v27 = vadd.f32 %v1924_v39, %v2603_v24  ;;  %v1801_v33 = vadd.f32 %v2617_v34, %v2611_v31  ;;  %v2730_v31 = vld [vmem:[%s2837_s5] ss:$0 sm:$0xff] }
 0x128   :  { %v1926_v9 = vpop.f32.mrf.mxu0  ;;  %v2702_v49 = vpop.f32.mrf.mxu1 }
 0x129   :  { %2850 = vst [vmem:[#allocation13_spill] sm:$0xff] %v2702_v49  ;;  %v1927_v30 = vadd.f32 %v1926_v9, %v1925_v29  ;;  %v608_v49 = vadd.f32 %v2573_v56, %v1795_v57  ;;  %v1872_v56 = vadd.f32 %v2623_v40, %v2621_v37  ;;  %v616_v37 = vadd.f32 %v1801_v33, %v2577_v61 }
 0x12a   :  { %v1928_v48 = vpop.f32.mrf.mxu0  ;;  %v2012_v12 = vpop.f32.mrf.mxu1 }
 0x12b   :  { %v1146_v24 = vadd.f32 %v1869_v38, %v608_v49  ;;  %v1151_v11 = vadd.f32 %v1872_v56, %v2613_v32 }
 0x12c   :  { %v1929_v21 = vpop.f32.mrf.mxu0  ;;  %v1328_v2 = vpop.f32.mrf.mxu1 }
 0x12d   :  { %v1930_v59 = vadd.f32 %v1929_v21, %v1928_v48  ;;  %v1329_v22 = vadd.f32 %v1328_v2, %v1232_v27  ;;  %v1235_v48 = vadd.f32 %v1927_v30, %v1138_v20 }
 0x12e   :  { %v1931_v15 = vpop.f32.mrf.mxu0  ;;  %v2013_v23 = vpop.f32.mrf.mxu1 }
 0x12f   :  { %v1240_v6 = vadd.f32 %v1930_v59, %v1143_v16  ;;  %v1398_v21 = vadd.f32 %v2716_v19, %v1329_v22  ;;  %v1875_v16 = vadd.f32 %v2633_v45, %v2629_v43  ;;  %v1878_v22 = vadd.f32 %v2637_v50, %v2635_v47 }
 0x130   :  { %v1932_v25 = vpop.f32.mrf.mxu0  ;;  %v1331_v57 = vpop.f32.mrf.mxu1  ;;  %v1881_v47 = vadd.f32 %v2647_v55, %v2643_v53 }
 0x131   :  { %v1337_v9 = vadd.f32 %v2012_v12, %v1240_v6  ;;  %v1933_v35 = vadd.f32 %v1932_v25, %v1931_v15  ;;  %v1332_v34 = vadd.f32 %v1331_v57, %v1235_v48  ;;  %v1437_v29 = vmul.f32 %v2730_v31, %v1398_v21 }
 0x132   :  { %v1934_v59 = vpop.f32.mrf.mxu0  ;;  %v2016_v6 = vpop.f32.mrf.mxu1  ;;  %v1154_v39 = vadd.f32 %v1875_v16, %v616_v37  ;;  %vm1414_vm2 = vcmp.ge.f32.partialorder %v1398_v21, 0.0  ;;  %v1807_v25 = vadd.f32 %v2631_v44, %v2625_v41 }
 0x133   :  { %v1400_v13 = vadd.f32 %v2716_v19, %v1337_v9  ;;  %v1243_v12 = vadd.f32 %v1933_v35, %v1146_v24  ;;  %v1399_v43 = vadd.f32 %v2716_v19, %v1332_v34  ;;  %v1453_v33 = vsel %vm1414_vm2, %v1398_v21, %v1437_v29 }
 0x134   :  { %v1935_v49 = vpop.f32.mrf.mxu0  ;;  %v1344_v3 = vpop.f32.mrf.mxu1  ;;  %v624_v21 = vadd.f32 %v2575_v60, %v1807_v25 }
 0x135   :  { %v1340_v40 = vadd.f32 %v2013_v23, %v1243_v12  ;;  %v1936_v45 = vadd.f32 %v1935_v49, %v1934_v59  ;;  %v1439_v27 = vmul.f32 %v2730_v31, %v1400_v13  ;;  %vm1416_vm3 = vcmp.ge.f32.partialorder %v1400_v13, 0.0 }
 0x136   :  { %v1937_v38 = vpop.f32.mrf.mxu0  ;;  %vm1415_vm4 = vcmp.ge.f32.partialorder %v1399_v43, 0.0  ;;  %v1438_v61 = vmul.f32 %v2730_v31, %v1399_v43  ;;  %v2017_v32 = vpop.f32.mrf.mxu1  ;;  %v1159_v49 = vadd.f32 %v1878_v22, %v2627_v42 }
 0x137   :  { %v1401_v30 = vadd.f32 %v2716_v19, %v1340_v40  ;;  %v1248_v15 = vadd.f32 %v1936_v45, %v1151_v11  ;;  %v1455_v48 = vsel %vm1416_vm3, %v1400_v13, %v1439_v27  ;;  %v1162_v40 = vadd.f32 %v1881_v47, %v624_v21 }
 0x138   :  { %v1938_v2 = vpop.f32.mrf.mxu0  ;;  %v1454_v24 = vsel %vm1415_vm4, %v1399_v43, %v1438_v61  ;;  %v1347_v56 = vpop.f32.mrf.mxu1  ;;  %v1884_v11 = vadd.f32 %v2651_v4, %v2649_v58  ;;  %v1887_v58 = vadd.f32 %v2662_v10, %v2658_v63  ;;  %v1890_v10 = vadd.f32 %v2666_v17, %v2664_v14 }
 0x139   :  { %vm1417_vm5 = vcmp.ge.f32.partialorder %v1401_v30, 0.0  ;;  %v1440_v20 = vmul.f32 %v2730_v31, %v1401_v30  ;;  %v1939_v23 = vadd.f32 %v1938_v2, %v1937_v38  ;;  %v1345_v9 = vadd.f32 %v1344_v3, %v1248_v15 }
 0x13a   :  { %v1940_v35 = vpop.f32.mrf.mxu0  ;;  %v1724_v59 = vpack.c.bf16 %v1454_v24, %v1453_v33  ;;  %v2756_v53 = vpop.f32.mrf.mxu1  ;;  %v1813_v38 = vadd.f32 %v2645_v54, %v2639_v51  ;;  %v1893_v14 = vadd.f32 %v2677_v28, %v2673_v62  ;;  %v1896_v28 = vadd.f32 %v2681_v46, %v2679_v36  ;;  %v2852_v36 = vld [vmem:[#allocation9_spill] sm:$0xff] }
 0x13b   :  { %v1456_v57 = vsel %vm1417_vm5, %v1401_v30, %v1440_v20  ;;  %v1251_v16 = vadd.f32 %v1939_v23, %v1154_v39  ;;  %v1402_v12 = vadd.f32 %v2716_v19, %v1345_v9 }
 0x13c   :  { %v1729_v50 = vpack.c.bf16 %v1456_v57, %v1455_v48  ;;  %v1941_v34 = vpop.f32.mrf.mxu0  ;;  %1725 = vst [vmem:[%s2838_s6] sm:$0xff] %v1724_v59   ;;  %v1360_v39 = vpop.f32.mrf.mxu1  ;;  %v632_v23 = vadd.f32 %v1813_v38, %v2583_v1  ;;  %v2851_v38 = vld [vmem:[#allocation7_spill] sm:$0xff] }
 0x13d   :  { %v1942_v41 = vadd.f32 %v1941_v34, %v1940_v35  ;;  %v1348_v44 = vadd.f32 %v1347_v56, %v1251_v16  ;;  %v1441_v55 = vmul.f32 %v2730_v31, %v1402_v12  ;;  %vm1418_vm6 = vcmp.ge.f32.partialorder %v1402_v12, 0.0 }
 0x13e   :  { %1761 = vst [vmem:[%s2838_s6 + $0x8] sm:$0xff] %v1729_v50   ;;  %v1943_v13 = vpop.f32.mrf.mxu0  ;;  %v2021_v54 = vpop.f32.mrf.mxu1  ;;  %v1170_v63 = vadd.f32 %v1887_v58, %v632_v23  ;;  %v1819_v35 = vadd.f32 %v2660_v8, %v2653_v5  ;;  %v1899_v46 = vadd.f32 %v2852_v36, %v2851_v38  ;;  %v2856_v23 = vld [vmem:[#allocation11_spill] sm:$0xff] }
 0x13f   :  { %v1256_v37 = vadd.f32 %v1942_v41, %v1159_v49  ;;  %v1403_v42 = vadd.f32 %v2716_v19, %v1348_v44  ;;  %v1457_v27 = vsel %vm1418_vm6, %v1402_v12, %v1441_v55  ;;  %v1175_v12 = vadd.f32 %v1890_v10, %v2656_v7  ;;  %v2858_v10 = vld [vmem:[#allocation8_spill] sm:$0xff] }
 0x140   :  { %v1944_v29 = vpop.f32.mrf.mxu0  ;;  %v1363_v48 = vpop.f32.mrf.mxu1  ;;  %v640_v41 = vadd.f32 %v2581_v0, %v1819_v35 }
 0x141   :  { %v1353_v43 = vadd.f32 %v2016_v6, %v1256_v37  ;;  %vm1419_vm7 = vcmp.ge.f32.partialorder %v1403_v42, 0.0  ;;  %v1442_v60 = vmul.f32 %v2730_v31, %v1403_v42  ;;  %v1945_v45 = vadd.f32 %v1944_v29, %v1943_v13 }
 0x142   :  { %v1946_v3 = vpop.f32.mrf.mxu0  ;;  %v1167_v6 = vadd.f32 %v1884_v11, %v2641_v52  ;;  %v2024_v8 = vpop.f32.mrf.mxu1  ;;  %v1178_v62 = vadd.f32 %v1893_v14, %v640_v41 }
 0x143   :  { %v1404_v30 = vadd.f32 %v2716_v19, %v1353_v43  ;;  %v1458_v61 = vsel %vm1419_vm7, %v1403_v42, %v1442_v60  ;;  %v1259_v2 = vadd.f32 %v1945_v45, %v1162_v40  ;;  %v1825_v42 = vadd.f32 %v2675_v26, %v2668_v18 }
 0x144   :  { %v1734_v4 = vpack.c.bf16 %v1458_v61, %v1457_v27  ;;  %v1947_v15 = vpop.f32.mrf.mxu0  ;;  %v1376_v11 = vpop.f32.mrf.mxu1 }
 0x145   :  { %v1356_v22 = vadd.f32 %v2017_v32, %v1259_v2  ;;  %v1948_v20 = vadd.f32 %v1947_v15, %v1946_v3  ;;  %v1443_v25 = vmul.f32 %v2730_v31, %v1404_v30  ;;  %vm1420_vm8 = vcmp.ge.f32.partialorder %v1404_v30, 0.0  ;;  %v2854_v2 = vld [vmem:[#allocation3_spill] sm:$0xff] }
 0x146   :  { %1762 = vst [vmem:[%s2838_s6 + $0x10] sm:$0xff] %v1734_v4   ;;  %v1949_v51 = vpop.f32.mrf.mxu0  ;;  %v648_v58 = vadd.f32 %v1825_v42, %v2854_v2  ;;  %v2025_v26 = vpop.f32.mrf.mxu1 }
 0x147   :  { %v1405_v33 = vadd.f32 %v2716_v19, %v1356_v22  ;;  %v1264_v24 = vadd.f32 %v1948_v20, %v1167_v6  ;;  %v1459_v57 = vsel %vm1420_vm8, %v1404_v30, %v1443_v25  ;;  %v2855_v20 = vld [vmem:[#allocation10_spill] sm:$0xff] }
 0x148   :  { %v1950_v52 = vpop.f32.mrf.mxu0  ;;  %v1186_v22 = vadd.f32 %v1899_v46, %v648_v58 }
 0x149   :  { %vm1421_vm9 = vcmp.ge.f32.partialorder %v1405_v33, 0.0  ;;  %v1444_v1 = vmul.f32 %v2730_v31, %v1405_v33  ;;  %v1951_v32 = vadd.f32 %v1950_v52, %v1949_v51  ;;  %v1361_v9 = vadd.f32 %v1360_v39, %v1264_v24 }
 0x14a   :  { %v1952_v56 = vpop.f32.mrf.mxu0  ;;  %v1902_v51 = vadd.f32 %v2856_v23, %v2855_v20 }
 0x14b   :  { %v1460_v59 = vsel %vm1421_vm9, %v1405_v33, %v1444_v1  ;;  %v1406_v16 = vadd.f32 %v2716_v19, %v1361_v9  ;;  %v1267_v47 = vadd.f32 %v1951_v32, %v1170_v63  ;;  %v2857_v63 = vld [vmem:[#allocation5_spill] sm:$0xff]  ;;  %v1379_v32 = vpop.f32.mrf.mxu1 }
 0x14c   :  { %v1739_v17 = vpack.c.bf16 %v1460_v59, %v1459_v57  ;;  %v1953_v50 = vpop.f32.mrf.mxu0  ;;  %v1831_v52 = vadd.f32 %v2858_v10, %v2857_v63  ;;  %v2859_v57 = vld [vmem:[#allocation12_spill] sm:$0xff]  ;;  %v2860_v59 = vld [vmem:[#allocation13_spill] sm:$0xff] }
 0x14d   :  { %v1954_v34 = vadd.f32 %v1953_v50, %v1952_v56  ;;  %v1364_v49 = vadd.f32 %v1363_v48, %v1267_v47  ;;  %v1445_v44 = vmul.f32 %v2730_v31, %v1406_v16  ;;  %vm1422_vm10 = vcmp.ge.f32.partialorder %v1406_v16, 0.0 }
 0x14e   :  { %1763 = vst [vmem:[%s2838_s6 + $0x18] sm:$0xff] %v1739_v17   ;;  %v1955_v5 = vpop.f32.mrf.mxu0  ;;  %v2861_v17 = vld [vmem:[#allocation6_spill] sm:$0xff] }
 0x14f   :  { %v1272_v21 = vadd.f32 %v1954_v34, %v1175_v12  ;;  %v1407_v13 = vadd.f32 %v2716_v19, %v1364_v49  ;;  %v1461_v29 = vsel %vm1422_vm10, %v1406_v16, %v1445_v44  ;;  %v1905_v16 = vadd.f32 %v2860_v59, %v2859_v57  ;;  %v2862_v49 = vld [vmem:[#allocation2_spill] sm:$0xff] }
 0x150   :  { %v1956_v7 = vpop.f32.mrf.mxu0  ;;  %v1191_v50 = vadd.f32 %v1902_v51, %v2861_v17  ;;  %v656_v41 = vadd.f32 %v2862_v49, %v1831_v52 }
 0x151   :  { %v1369_v55 = vadd.f32 %v2756_v53, %v1272_v21  ;;  %vm1423_vm11 = vcmp.ge.f32.partialorder %v1407_v13, 0.0  ;;  %v1446_v0 = vmul.f32 %v2730_v31, %v1407_v13  ;;  %v1957_v37 = vadd.f32 %v1956_v7, %v1955_v5  ;;  %v2853_v53 = vld [vmem:[#allocation4_spill] sm:$0xff] }
 0x152   :  { %v1958_v40 = vpop.f32.mrf.mxu0  ;;  %v1183_v27 = vadd.f32 %v1896_v28, %v2853_v53 }
 0x153   :  { %v1408_v43 = vadd.f32 %v2716_v19, %v1369_v55  ;;  %v1462_v60 = vsel %vm1423_vm11, %v1407_v13, %v1446_v0  ;;  %v1275_v45 = vadd.f32 %v1957_v37, %v1178_v62  ;;  %v1194_v62 = vadd.f32 %v1905_v16, %v656_v41 }
 0x154   :  { %v1744_v3 = vpack.c.bf16 %v1462_v60, %v1461_v29  ;;  %v1959_v39 = vpop.f32.mrf.mxu0 }
 0x155   :  { %v1372_v30 = vadd.f32 %v2021_v54, %v1275_v45  ;;  %v1960_v61 = vadd.f32 %v1959_v39, %v1958_v40  ;;  %v1447_v4 = vmul.f32 %v2730_v31, %v1408_v43  ;;  %vm1424_vm12 = vcmp.ge.f32.partialorder %v1408_v43, 0.0 }
 0x156   :  { %1764 = vst [vmem:[%s2838_s6 + $0x20] sm:$0xff] %v1744_v3   ;;  %v1961_v18 = vpop.f32.mrf.mxu0 }
 0x157   :  { %v1409_v15 = vadd.f32 %v2716_v19, %v1372_v30  ;;  %v1280_v6 = vadd.f32 %v1960_v61, %v1183_v27  ;;  %v1463_v9 = vsel %vm1424_vm12, %v1408_v43, %v1447_v4 }
 0x158   :  { %v1962_v54 = vpop.f32.mrf.mxu0 }
 0x159   :  { %vm1425_vm13 = vcmp.ge.f32.partialorder %v1409_v15, 0.0  ;;  %v1448_v25 = vmul.f32 %v2730_v31, %v1409_v15  ;;  %v1963_v33 = vadd.f32 %v1962_v54, %v1961_v18  ;;  %v1377_v24 = vadd.f32 %v1376_v11, %v1280_v6 }
 0x15a   :  { %v1964_v1 = vpop.f32.mrf.mxu0 }
 0x15b   :  { %v1464_v35 = vsel %vm1425_vm13, %v1409_v15, %v1448_v25  ;;  %v1410_v56 = vadd.f32 %v2716_v19, %v1377_v24  ;;  %v1283_v48 = vadd.f32 %v1963_v33, %v1186_v22 }
 0x15c   :  { %v1749_v47 = vpack.c.bf16 %v1464_v35, %v1463_v9  ;;  %v1965_v14 = vpop.f32.mrf.mxu0 }
 0x15d   :  { %v1966_v12 = vadd.f32 %v1965_v14, %v1964_v1  ;;  %v1380_v34 = vadd.f32 %v1379_v32, %v1283_v48  ;;  %v1449_v44 = vmul.f32 %v2730_v31, %v1410_v56  ;;  %vm1426_vm14 = vcmp.ge.f32.partialorder %v1410_v56, 0.0 }
 0x15e   :  { %1765 = vst [vmem:[%s2838_s6 + $0x28] sm:$0xff] %v1749_v47   ;;  %v1967_v5 = vpop.f32.mrf.mxu0 }
 0x15f   :  { %v1288_v21 = vadd.f32 %v1966_v12, %v1191_v50  ;;  %v1411_v13 = vadd.f32 %v2716_v19, %v1380_v34  ;;  %v1465_v37 = vsel %vm1426_vm14, %v1410_v56, %v1449_v44 }
 0x160   :  { %v1968_v28 = vpop.f32.mrf.mxu0 }
 0x161   :  { %v1385_v7 = vadd.f32 %v2024_v8, %v1288_v21  ;;  %vm1427_vm15 = vcmp.ge.f32.partialorder %v1411_v13, 0.0  ;;  %v1450_v55 = vmul.f32 %v2730_v31, %v1411_v13  ;;  %v1969_v0 = vadd.f32 %v1968_v28, %v1967_v5 }
 0x163   :  { %v1412_v42 = vadd.f32 %v2716_v19, %v1385_v7  ;;  %v1466_v40 = vsel %vm1427_vm15, %v1411_v13, %v1450_v55  ;;  %v1291_v11 = vadd.f32 %v1969_v0, %v1194_v62 }
 0x164   :  { %v1754_v29 = vpack.c.bf16 %v1466_v40, %v1465_v37 }
 0x165   :  { %v1388_v43 = vadd.f32 %v2025_v26, %v1291_v11  ;;  %v1451_v60 = vmul.f32 %v2730_v31, %v1412_v42  ;;  %vm1428_vm0 = vcmp.ge.f32.partialorder %v1412_v42, 0.0 }
 0x166   :  { %1766 = vst [vmem:[%s2838_s6 + $0x30] sm:$0xff] %v1754_v29  }
 0x167   :  { %v1413_v45 = vadd.f32 %v2716_v19, %v1388_v43  ;;  %v1467_v38 = vsel %vm1428_vm0, %v1412_v42, %v1451_v60 }
 0x169   :  { %vm1429_vm1 = vcmp.ge.f32.partialorder %v1413_v45, 0.0  ;;  %v1452_v8 = vmul.f32 %v2730_v31, %v1413_v45 }
 0x16b   :  { %v1468_v36 = vsel %vm1429_vm1, %v1413_v45, %v1452_v8 }
 0x16c   :  { %v1759_v46 = vpack.c.bf16 %v1468_v36, %v1467_v38 }
 0x16e   :  { %1767 = vst [vmem:[%s2838_s6 + $0x38] sm:$0xff] %v1759_v46  }

// kernel: gen_forward.44
= control target key start
LH: loop header
LB: loop body
LE: loop exit
PB: predicated region body
PF: predicated region fallthrough
CT: control target
= control target key end

     0   :  { %v587_v48 = vlaneseq  ;;  %s1334_s1 = inlined_call_operand.vmem [shape: bf16[256,256], index: 1, kind: input, shape index: {}]   ;;  %s1335_s0 = inlined_call_operand.vmem [shape: bf16[128,256], index: 0, kind: input, shape index: {}]   ;;  %s1336_s2 = inlined_call_operand.vmem [shape: f32[1,256], index: 2, kind: input, shape index: {}]   ;;  %s1337_s3 = inlined_call_operand.vmem [shape: f32[1,256], index: 3, kind: input, shape index: {}]   ;;  %s1338_s4 = inlined_call_operand.vmem [shape: bf16[128,256], index: 4, kind: output, shape index: {}]  }
   0x1   :  { %v965_v0 = vld [vmem:[%s1334_s1 + $0x74] ss:$8 sps:$4 sm:$0xff]   ;;  %v967_v1 = vld [vmem:[%s1334_s1 + $0x70] ss:$8 sps:$4 sm:$0xff]   ;;  %v968_v2 = vld [vmem:[%s1334_s1 + $0x64] ss:$8 sps:$4 sm:$0xff]  }
   0x2   :  { %373 = vmatprep.subr.bf16.mxu0 %v965_v0  ;;  %933 = vmatprep.subr.bf16.mxu1 %v965_v0  ;;  %v970_v3 = vld [vmem:[%s1334_s1 + $0x60] ss:$8 sps:$4 sm:$0xff]   ;;  %v971_v4 = vld [vmem:[%s1334_s1 + $0x54] ss:$8 sps:$4 sm:$0xff]   ;;  %v973_v5 = vld [vmem:[%s1334_s1 + $0x50] ss:$8 sps:$4 sm:$0xff]  }
   0x3   :  { %374 = vmatpush1.bf16.msra.mxu0 %v967_v1  ;;  %949 = vmatpush1.bf16.msra.mxu1 %v967_v1  ;;  %v974_v6 = vld [vmem:[%s1334_s1 + $0x44] ss:$8 sps:$4 sm:$0xff]   ;;  %v976_v7 = vld [vmem:[%s1334_s1 + $0x40] ss:$8 sps:$4 sm:$0xff]   ;;  %v977_v8 = vld [vmem:[%s1334_s1 + $0x34] ss:$8 sps:$4 sm:$0xff]  }
   0x4   :  { %375 = vmatprep.subr.bf16.mxu0 %v968_v2  ;;  %934 = vmatprep.subr.bf16.mxu1 %v968_v2  ;;  %v979_v9 = vld [vmem:[%s1334_s1 + $0x30] ss:$8 sps:$4 sm:$0xff]   ;;  %v980_v10 = vld [vmem:[%s1334_s1 + $0x24] ss:$8 sps:$4 sm:$0xff]   ;;  %v982_v11 = vld [vmem:[%s1334_s1 + $0x20] ss:$8 sps:$4 sm:$0xff]  }
   0x5   :  { %v983_v12 = vld [vmem:[%s1334_s1 + $0x14] ss:$8 sps:$4 sm:$0xff]   ;;  %v1015_v13 = vld [vmem:[%s1335_s0 + $0x4] ss:$8 sps:$4 sm:$0xff]   ;;  %v985_v14 = vld [vmem:[%s1334_s1 + $0x10] ss:$8 sps:$4 sm:$0xff]  }
   0x6   :  { %v1018_v15 = vld [vmem:[%s1335_s0 + $0x44] ss:$8 sps:$4 sm:$0xff]   ;;  %405 = vmatprep.mubr.bf16.mxu0 %v1015_v13  ;;  %v988_v17 = vld [vmem:[%s1334_s1] ss:$8 sps:$4 sm:$0xff]   ;;  %v989_v18 = vld [vmem:[%s1334_s1 + $0xf4] ss:$8 sps:$4 sm:$0xff]  }
   0x7   :  { %376 = vmatpush1.bf16.msra.mxu0 %v970_v3  ;;  %950 = vmatpush1.bf16.msra.mxu1 %v970_v3  ;;  %v986_v16 = vld [vmem:[%s1334_s1 + $0x4] ss:$8 sps:$4 sm:$0xff]   ;;  %v991_v19 = vld [vmem:[%s1334_s1 + $0xf0] ss:$8 sps:$4 sm:$0xff]   ;;  %v994_v21 = vld [vmem:[%s1334_s1 + $0xe0] ss:$8 sps:$4 sm:$0xff]  }
   0x8   :  { %377 = vmatprep.subr.bf16.mxu0 %v971_v4  ;;  %935 = vmatprep.subr.bf16.mxu1 %v971_v4  ;;  %v992_v20 = vld [vmem:[%s1334_s1 + $0xe4] ss:$8 sps:$4 sm:$0xff]   ;;  %v995_v22 = vld [vmem:[%s1334_s1 + $0xd4] ss:$8 sps:$4 sm:$0xff]   ;;  %v997_v23 = vld [vmem:[%s1334_s1 + $0xd0] ss:$8 sps:$4 sm:$0xff]  }
   0x9   :  { %445 = vmatprep.mubr.bf16.mxu1 %v1018_v15  ;;  %v998_v24 = vld [vmem:[%s1334_s1 + $0xc4] ss:$8 sps:$4 sm:$0xff]   ;;  %v1000_v25 = vld [vmem:[%s1334_s1 + $0xc0] ss:$8 sps:$4 sm:$0xff]   ;;  %v1001_v26 = vld [vmem:[%s1334_s1 + $0xb4] ss:$8 sps:$4 sm:$0xff]  }
   0xa   :  { %v1003_v27 = vld [vmem:[%s1334_s1 + $0xb0] ss:$8 sps:$4 sm:$0xff]   ;;  %v1004_v28 = vld [vmem:[%s1334_s1 + $0xa4] ss:$8 sps:$4 sm:$0xff]   ;;  %v1006_v29 = vld [vmem:[%s1334_s1 + $0xa0] ss:$8 sps:$4 sm:$0xff]  }
   0xb   :  { %378 = vmatpush1.bf16.msra.mxu0 %v973_v5  ;;  %951 = vmatpush1.bf16.msra.mxu1 %v973_v5  ;;  %v1007_v30 = vld [vmem:[%s1334_s1 + $0x94] ss:$8 sps:$4 sm:$0xff]   ;;  %v1009_v31 = vld [vmem:[%s1334_s1 + $0x90] ss:$8 sps:$4 sm:$0xff]   ;;  %v1010_v32 = vld [vmem:[%s1334_s1 + $0x84] ss:$8 sps:$4 sm:$0xff]  }
   0xc   :  { %379 = vmatprep.subr.bf16.mxu0 %v974_v6  ;;  %936 = vmatprep.subr.bf16.mxu1 %v974_v6  ;;  %v1012_v33 = vld [vmem:[%s1334_s1 + $0x80] ss:$8 sps:$4 sm:$0xff]   ;;  %v1019_v36 = vld [vmem:[%s1335_s0 + $0x14] ss:$8 sps:$4 sm:$0xff]   ;;  %v1023_v38 = vld [vmem:[%s1335_s0 + $0x10] ss:$8 sps:$4 sm:$0xff]  }
   0xd   :  { %v1013_v34 = vld [vmem:[%s1335_s0] ss:$8 sps:$4 sm:$0xff]   ;;  %v1021_v37 = vld [vmem:[%s1335_s0 + $0x54] ss:$8 sps:$4 sm:$0xff]   ;;  %v1024_v39 = vld [vmem:[%s1335_s0 + $0x50] ss:$8 sps:$4 sm:$0xff]  }
   0xe   :  { %v1016_v35 = vld [vmem:[%s1335_s0 + $0x40] ss:$8 sps:$4 sm:$0xff]   ;;  %v1025_v40 = vld [vmem:[%s1335_s0 + $0x24] ss:$8 sps:$4 sm:$0xff]   ;;  %v1031_v44 = vld [vmem:[%s1335_s0 + $0x34] ss:$8 sps:$4 sm:$0xff]  }
   0xf   :  { %380 = vmatpush1.bf16.msra.mxu0 %v976_v7  ;;  %952 = vmatpush1.bf16.msra.mxu1 %v976_v7  ;;  %v1027_v41 = vld [vmem:[%s1335_s0 + $0x64] ss:$8 sps:$4 sm:$0xff]   ;;  %v1029_v42 = vld [vmem:[%s1335_s0 + $0x20] ss:$8 sps:$4 sm:$0xff]   ;;  %v1033_v45 = vld [vmem:[%s1335_s0 + $0x74] ss:$8 sps:$4 sm:$0xff]  }
  0x10   :  { %381 = vmatprep.subr.bf16.mxu0 %v977_v8  ;;  %937 = vmatprep.subr.bf16.mxu1 %v977_v8  ;;  %v1030_v43 = vld [vmem:[%s1335_s0 + $0x60] ss:$8 sps:$4 sm:$0xff]   ;;  %v1035_v46 = vld [vmem:[%s1335_s0 + $0x30] ss:$8 sps:$4 sm:$0xff]   ;;  %v588_v49 = vshrl.u32 %v587_v48, 7 }
  0x11   :  { %v1036_v47 = vld [vmem:[%s1335_s0 + $0x70] ss:$8 sps:$4 sm:$0xff]   ;;  %v585_v51 = vld [vmem:[%s1336_s2] sm:$0x3] }
  0x12   :  { %v589_v50 = vsub.s32 0, %v588_v49  ;;  %v661_v52 = vld [vmem:[%s1337_s3] sm:$0x3]  ;;  %v593_v53 = vsub.s32 1, %v588_v49 }
  0x13   :  { %382 = vmatpush1.bf16.msra.mxu0 %v979_v9  ;;  %953 = vmatpush1.bf16.msra.mxu1 %v979_v9 }
  0x14   :  { %383 = vmatprep.subr.bf16.mxu0 %v980_v10  ;;  %938 = vmatprep.subr.bf16.mxu1 %v980_v10  ;;  %v1212_v54 = vrot.slane %v585_v51, %v589_v50  ;;  %v1214_v55 = vrot.slane %v661_v52, %v589_v50  ;;  %v1216_v58 = vrot.slane %v585_v51, %v593_v53 }
  0x15   :  { %v1220_v62 = vrot.slane %v661_v52, %v593_v53 }
  0x17   :  { %384 = vmatpush1.bf16.msra.mxu0 %v982_v11  ;;  %954 = vmatpush1.bf16.msra.mxu1 %v982_v11 }
  0x18   :  { %385 = vmatprep.subr.bf16.mxu0 %v983_v12  ;;  %939 = vmatprep.subr.bf16.mxu1 %v983_v12 }
  0x1b   :  { %386 = vmatpush1.bf16.msra.mxu0 %v985_v14  ;;  %955 = vmatpush1.bf16.msra.mxu1 %v985_v14 }
  0x1c   :  { %387 = vmatprep.subr.bf16.mxu0 %v986_v16  ;;  %940 = vmatprep.subr.bf16.mxu1 %v986_v16 }
  0x1f   :  { %388 = vmatpush1.bf16.msra.mxu0 %v988_v17  ;;  %956 = vmatpush1.bf16.msra.mxu1 %v988_v17 }
  0x20   :  { %389 = vmatprep.subr.bf16.mxu0 %v989_v18  ;;  %941 = vmatprep.subr.bf16.mxu1 %v989_v18 }
  0x23   :  { %390 = vmatpush2.bf16.msra.mxu0 %v991_v19  ;;  %957 = vmatpush2.bf16.msra.mxu1 %v991_v19 }
  0x24   :  { %391 = vmatprep.subr.bf16.mxu0 %v992_v20  ;;  %942 = vmatprep.subr.bf16.mxu1 %v992_v20 }
  0x27   :  { %392 = vmatpush2.bf16.msra.mxu0 %v994_v21  ;;  %958 = vmatpush2.bf16.msra.mxu1 %v994_v21 }
  0x28   :  { %393 = vmatprep.subr.bf16.mxu0 %v995_v22  ;;  %943 = vmatprep.subr.bf16.mxu1 %v995_v22 }
  0x2b   :  { %394 = vmatpush2.bf16.msra.mxu0 %v997_v23  ;;  %959 = vmatpush2.bf16.msra.mxu1 %v997_v23 }
  0x2c   :  { %395 = vmatprep.subr.bf16.mxu0 %v998_v24  ;;  %944 = vmatprep.subr.bf16.mxu1 %v998_v24 }
  0x2f   :  { %396 = vmatpush2.bf16.msra.mxu0 %v1000_v25  ;;  %960 = vmatpush2.bf16.msra.mxu1 %v1000_v25 }
  0x30   :  { %397 = vmatprep.subr.bf16.mxu0 %v1001_v26  ;;  %945 = vmatprep.subr.bf16.mxu1 %v1001_v26 }
  0x33   :  { %398 = vmatpush2.bf16.msra.mxu0 %v1003_v27  ;;  %961 = vmatpush2.bf16.msra.mxu1 %v1003_v27 }
  0x34   :  { %399 = vmatprep.subr.bf16.mxu0 %v1004_v28  ;;  %946 = vmatprep.subr.bf16.mxu1 %v1004_v28 }
  0x37   :  { %400 = vmatpush2.bf16.msra.mxu0 %v1006_v29  ;;  %962 = vmatpush2.bf16.msra.mxu1 %v1006_v29 }
  0x38   :  { %401 = vmatprep.subr.bf16.mxu0 %v1007_v30  ;;  %947 = vmatprep.subr.bf16.mxu1 %v1007_v30 }
  0x3b   :  { %402 = vmatpush2.bf16.msra.mxu0 %v1009_v31  ;;  %963 = vmatpush2.bf16.msra.mxu1 %v1009_v31 }
  0x3c   :  { %403 = vmatprep.subr.bf16.mxu0 %v1010_v32  ;;  %948 = vmatprep.subr.bf16.mxu1 %v1010_v32 }
  0x3f   :  { %404 = vmatpush2.bf16.msra.mxu0 %v1012_v33  ;;  %964 = vmatpush2.bf16.msra.mxu1 %v1012_v33 }
  0x42   :  { %406 = vmatmul.mubr.bf16.vlgmr.msra.gmra.mxu0 %v1013_v34  ;;  %446 = vmatmul.mubr.bf16.vlgmr.msra.gmra.mxu1 %v1016_v35 }
  0x43   :  { %415 = vmatprep.mubr.bf16.mxu0 %v1019_v36  ;;  %455 = vmatprep.mubr.bf16.mxu1 %v1021_v37 }
  0x4a   :  { %416 = vmatmul.mubr.bf16.gmra.mxu0 %v1023_v38  ;;  %456 = vmatmul.mubr.bf16.gmra.mxu1 %v1024_v39 }
  0x4b   :  { %425 = vmatprep.mubr.bf16.mxu0 %v1025_v40  ;;  %465 = vmatprep.mubr.bf16.mxu1 %v1027_v41 }
  0x52   :  { %426 = vmatmul.mubr.bf16.gmra.mxu0 %v1029_v42  ;;  %466 = vmatmul.mubr.bf16.gmra.mxu1 %v1030_v43 }
  0x53   :  { %435 = vmatprep.mubr.bf16.mxu0 %v1031_v44  ;;  %475 = vmatprep.mubr.bf16.mxu1 %v1033_v45 }
  0x5a   :  { %436 = vmatmul.mubr.bf16.gmra.mxu0 %v1035_v46  ;;  %476 = vmatmul.mubr.bf16.gmra.mxu1 %v1036_v47 }
 0x102   :  { %v407_v56 = vpop.f32.mrf.mxu0  ;;  %v447_v57 = vpop.f32.mrf.mxu1 }
 0x103   :  { %v597_v59 = vadd.f32 %v1212_v54, %v407_v56  ;;  %v613_v60 = vadd.f32 %v1212_v54, %v447_v57 }
 0x104   :  { %v409_v61 = vpop.f32.mrf.mxu0  ;;  %v449_v63 = vpop.f32.mrf.mxu1 }
 0x105   :  { %v673_v0 = vmul.f32 %v1214_v55, %v597_v59  ;;  %v689_v1 = vmul.f32 %v1214_v55, %v613_v60  ;;  %vm629_vm0 = vcmp.ge.f32.partialorder %v597_v59, 0.0  ;;  %vm645_vm1 = vcmp.ge.f32.partialorder %v613_v60, 0.0 }
 0x106   :  { %v598_v2 = vadd.f32 %v1216_v58, %v409_v61  ;;  %v614_v3 = vadd.f32 %v1216_v58, %v449_v63  ;;  %v411_v4 = vpop.f32.mrf.mxu0  ;;  %v451_v5 = vpop.f32.mrf.mxu1 }
 0x107   :  { %v599_v6 = vadd.f32 %v1212_v54, %v411_v4  ;;  %v615_v7 = vadd.f32 %v1212_v54, %v451_v5  ;;  %v705_v12 = vsel %vm629_vm0, %v597_v59, %v673_v0  ;;  %v721_v13 = vsel %vm645_vm1, %v613_v60, %v689_v1 }
 0x108   :  { %vm630_vm2 = vcmp.ge.f32.partialorder %v598_v2, 0.0  ;;  %v674_v8 = vmul.f32 %v1220_v62, %v598_v2  ;;  %vm646_vm3 = vcmp.ge.f32.partialorder %v614_v3, 0.0  ;;  %v690_v9 = vmul.f32 %v1220_v62, %v614_v3  ;;  %v413_v10 = vpop.f32.mrf.mxu0  ;;  %v453_v11 = vpop.f32.mrf.mxu1 }
 0x109   :  { %v675_v14 = vmul.f32 %v1214_v55, %v599_v6  ;;  %v691_v15 = vmul.f32 %v1214_v55, %v615_v7  ;;  %v600_v18 = vadd.f32 %v1216_v58, %v413_v10  ;;  %v616_v19 = vadd.f32 %v1216_v58, %v453_v11 }
 0x10a   :  { %v706_v16 = vsel %vm630_vm2, %v598_v2, %v674_v8  ;;  %v722_v17 = vsel %vm646_vm3, %v614_v3, %v690_v9  ;;  %v417_v20 = vpop.f32.mrf.mxu0  ;;  %v457_v21 = vpop.f32.mrf.mxu1  ;;  %vm631_vm4 = vcmp.ge.f32.partialorder %v599_v6, 0.0  ;;  %vm647_vm5 = vcmp.ge.f32.partialorder %v615_v7, 0.0 }
 0x10b   :  { %v917_v22 = vpack.c.bf16 %v706_v16, %v705_v12  ;;  %v925_v23 = vpack.c.bf16 %v722_v17, %v721_v13  ;;  %vm632_vm6 = vcmp.ge.f32.partialorder %v600_v18, 0.0  ;;  %v676_v24 = vmul.f32 %v1220_v62, %v600_v18 }
 0x10c   :  { %vm648_vm7 = vcmp.ge.f32.partialorder %v616_v19, 0.0  ;;  %v692_v25 = vmul.f32 %v1220_v62, %v616_v19  ;;  %v419_v26 = vpop.f32.mrf.mxu0  ;;  %v459_v27 = vpop.f32.mrf.mxu1  ;;  %v601_v28 = vadd.f32 %v1212_v54, %v417_v20  ;;  %v617_v29 = vadd.f32 %v1212_v54, %v457_v21 }
 0x10d   :  { %833 = vst [vmem:[%s1338_s4] sm:$0xff] %v917_v22  ;;  %841 = vst [vmem:[%s1338_s4 + $0x40] sm:$0xff] %v925_v23  ;;  %v602_v30 = vadd.f32 %v1216_v58, %v419_v26  ;;  %v618_v31 = vadd.f32 %v1216_v58, %v459_v27  ;;  %v707_v32 = vsel %vm631_vm4, %v599_v6, %v675_v14 }
 0x10e   :  { %v723_v33 = vsel %vm647_vm5, %v615_v7, %v691_v15  ;;  %v708_v34 = vsel %vm632_vm6, %v600_v18, %v676_v24  ;;  %v724_v35 = vsel %vm648_vm7, %v616_v19, %v692_v25  ;;  %v421_v36 = vpop.f32.mrf.mxu0  ;;  %v461_v37 = vpop.f32.mrf.mxu1  ;;  %vm633_vm8 = vcmp.ge.f32.partialorder %v601_v28, 0.0 }
 0x10f   :  { %v918_v38 = vpack.c.bf16 %v708_v34, %v707_v32  ;;  %v926_v39 = vpack.c.bf16 %v724_v35, %v723_v33  ;;  %v677_v40 = vmul.f32 %v1214_v55, %v601_v28  ;;  %vm649_vm9 = vcmp.ge.f32.partialorder %v617_v29, 0.0 }
 0x110   :  { %v693_v41 = vmul.f32 %v1214_v55, %v617_v29  ;;  %vm634_vm10 = vcmp.ge.f32.partialorder %v602_v30, 0.0  ;;  %v678_v42 = vmul.f32 %v1220_v62, %v602_v30  ;;  %v423_v43 = vpop.f32.mrf.mxu0  ;;  %v463_v44 = vpop.f32.mrf.mxu1  ;;  %vm650_vm11 = vcmp.ge.f32.partialorder %v618_v31, 0.0 }
 0x111   :  { %834 = vst [vmem:[%s1338_s4 + $0x8] sm:$0xff] %v918_v38  ;;  %842 = vst [vmem:[%s1338_s4 + $0x48] sm:$0xff] %v926_v39  ;;  %v709_v45 = vsel %vm633_vm8, %v601_v28, %v677_v40  ;;  %v694_v46 = vmul.f32 %v1220_v62, %v618_v31  ;;  %v603_v47 = vadd.f32 %v1212_v54, %v421_v36 }
 0x112   :  { %v725_v48 = vsel %vm649_vm9, %v617_v29, %v693_v41  ;;  %v710_v49 = vsel %vm634_vm10, %v602_v30, %v678_v42  ;;  %v619_v50 = vadd.f32 %v1212_v54, %v461_v37  ;;  %v604_v51 = vadd.f32 %v1216_v58, %v423_v43  ;;  %v427_v52 = vpop.f32.mrf.mxu0  ;;  %v467_v53 = vpop.f32.mrf.mxu1 }
 0x113   :  { %v919_v56 = vpack.c.bf16 %v710_v49, %v709_v45  ;;  %v726_v57 = vsel %vm650_vm11, %v618_v31, %v694_v46  ;;  %vm635_vm12 = vcmp.ge.f32.partialorder %v603_v47, 0.0  ;;  %v679_v59 = vmul.f32 %v1214_v55, %v603_v47 }
 0x114   :  { %v927_v60 = vpack.c.bf16 %v726_v57, %v725_v48  ;;  %vm651_vm13 = vcmp.ge.f32.partialorder %v619_v50, 0.0  ;;  %v695_v61 = vmul.f32 %v1214_v55, %v619_v50  ;;  %vm636_vm14 = vcmp.ge.f32.partialorder %v604_v51, 0.0  ;;  %v429_v63 = vpop.f32.mrf.mxu0  ;;  %v469_v0 = vpop.f32.mrf.mxu1 }
 0x115   :  { %835 = vst [vmem:[%s1338_s4 + $0x10] sm:$0xff] %v919_v56  ;;  %v711_v1 = vsel %vm635_vm12, %v603_v47, %v679_v59  ;;  %v680_v2 = vmul.f32 %v1220_v62, %v604_v51  ;;  %v620_v3 = vadd.f32 %v1216_v58, %v463_v44  ;;  %v605_v4 = vadd.f32 %v1212_v54, %v427_v52 }
 0x116   :  { %843 = vst [vmem:[%s1338_s4 + $0x50] sm:$0xff] %v927_v60  ;;  %v727_v5 = vsel %vm651_vm13, %v619_v50, %v695_v61  ;;  %v621_v6 = vadd.f32 %v1212_v54, %v467_v53  ;;  %v606_v7 = vadd.f32 %v1216_v58, %v429_v63  ;;  %v622_v8 = vadd.f32 %v1216_v58, %v469_v0  ;;  %v431_v9 = vpop.f32.mrf.mxu0  ;;  %v471_v10 = vpop.f32.mrf.mxu1 }
 0x117   :  { %v712_v11 = vsel %vm636_vm14, %v604_v51, %v680_v2  ;;  %vm652_vm15 = vcmp.ge.f32.partialorder %v620_v3, 0.0  ;;  %v696_v12 = vmul.f32 %v1220_v62, %v620_v3  ;;  %vm637_vm0 = vcmp.ge.f32.partialorder %v605_v4, 0.0 }
 0x118   :  { %v920_v13 = vpack.c.bf16 %v712_v11, %v711_v1  ;;  %v681_v14 = vmul.f32 %v1214_v55, %v605_v4  ;;  %vm653_vm1 = vcmp.ge.f32.partialorder %v621_v6, 0.0  ;;  %v697_v15 = vmul.f32 %v1214_v55, %v621_v6  ;;  %v433_v16 = vpop.f32.mrf.mxu0  ;;  %v473_v17 = vpop.f32.mrf.mxu1 }
 0x119   :  { %v728_v18 = vsel %vm652_vm15, %v620_v3, %v696_v12  ;;  %vm638_vm2 = vcmp.ge.f32.partialorder %v606_v7, 0.0  ;;  %v682_v19 = vmul.f32 %v1220_v62, %v606_v7  ;;  %vm654_vm3 = vcmp.ge.f32.partialorder %v622_v8, 0.0 }
 0x11a   :  { %836 = vst [vmem:[%s1338_s4 + $0x18] sm:$0xff] %v920_v13  ;;  %v928_v20 = vpack.c.bf16 %v728_v18, %v727_v5  ;;  %v713_v21 = vsel %vm637_vm0, %v605_v4, %v681_v14  ;;  %v729_v22 = vsel %vm653_vm1, %v621_v6, %v697_v15  ;;  %v698_v23 = vmul.f32 %v1220_v62, %v622_v8  ;;  %v437_v24 = vpop.f32.mrf.mxu0  ;;  %v477_v25 = vpop.f32.mrf.mxu1 }
 0x11b   :  { %v714_v26 = vsel %vm638_vm2, %v606_v7, %v682_v19  ;;  %v607_v27 = vadd.f32 %v1212_v54, %v431_v9  ;;  %v623_v28 = vadd.f32 %v1212_v54, %v471_v10  ;;  %v608_v29 = vadd.f32 %v1216_v58, %v433_v16 }
 0x11c   :  { %844 = vst [vmem:[%s1338_s4 + $0x58] sm:$0xff] %v928_v20  ;;  %v921_v30 = vpack.c.bf16 %v714_v26, %v713_v21  ;;  %v730_v31 = vsel %vm654_vm3, %v622_v8, %v698_v23  ;;  %v624_v32 = vadd.f32 %v1216_v58, %v473_v17  ;;  %v609_v33 = vadd.f32 %v1212_v54, %v437_v24  ;;  %v439_v34 = vpop.f32.mrf.mxu0  ;;  %v479_v35 = vpop.f32.mrf.mxu1 }
 0x11d   :  { %v929_v36 = vpack.c.bf16 %v730_v31, %v729_v22  ;;  %vm639_vm4 = vcmp.ge.f32.partialorder %v607_v27, 0.0  ;;  %v683_v37 = vmul.f32 %v1214_v55, %v607_v27  ;;  %vm655_vm5 = vcmp.ge.f32.partialorder %v623_v28, 0.0 }
 0x11e   :  { %837 = vst [vmem:[%s1338_s4 + $0x20] sm:$0xff] %v921_v30  ;;  %v699_v38 = vmul.f32 %v1214_v55, %v623_v28  ;;  %vm640_vm6 = vcmp.ge.f32.partialorder %v608_v29, 0.0  ;;  %v684_v39 = vmul.f32 %v1220_v62, %v608_v29  ;;  %vm656_vm7 = vcmp.ge.f32.partialorder %v624_v32, 0.0  ;;  %v441_v40 = vpop.f32.mrf.mxu0  ;;  %v481_v41 = vpop.f32.mrf.mxu1 }
 0x11f   :  { %845 = vst [vmem:[%s1338_s4 + $0x60] sm:$0xff] %v929_v36  ;;  %v715_v42 = vsel %vm639_vm4, %v607_v27, %v683_v37  ;;  %v700_v43 = vmul.f32 %v1220_v62, %v624_v32  ;;  %vm641_vm8 = vcmp.ge.f32.partialorder %v609_v33, 0.0  ;;  %v685_v45 = vmul.f32 %v1214_v55, %v609_v33 }
 0x120   :  { %v716_v44 = vsel %vm640_vm6, %v608_v29, %v684_v39  ;;  %v625_v46 = vadd.f32 %v1212_v54, %v477_v25  ;;  %v610_v47 = vadd.f32 %v1216_v58, %v439_v34  ;;  %v731_v48 = vsel %vm655_vm5, %v623_v28, %v699_v38  ;;  %v443_v52 = vpop.f32.mrf.mxu0  ;;  %v483_v53 = vpop.f32.mrf.mxu1 }
 0x121   :  { %v922_v49 = vpack.c.bf16 %v716_v44, %v715_v42  ;;  %v732_v50 = vsel %vm656_vm7, %v624_v32, %v700_v43  ;;  %v626_v51 = vadd.f32 %v1216_v58, %v479_v35  ;;  %v611_v61 = vadd.f32 %v1212_v54, %v441_v40 }
 0x122   :  { %v930_v56 = vpack.c.bf16 %v732_v50, %v731_v48  ;;  %vm657_vm9 = vcmp.ge.f32.partialorder %v625_v46, 0.0  ;;  %v701_v57 = vmul.f32 %v1214_v55, %v625_v46  ;;  %vm642_vm10 = vcmp.ge.f32.partialorder %v610_v47, 0.0 }
 0x123   :  { %838 = vst [vmem:[%s1338_s4 + $0x28] sm:$0xff] %v922_v49  ;;  %v686_v59 = vmul.f32 %v1220_v62, %v610_v47  ;;  %vm658_vm11 = vcmp.ge.f32.partialorder %v626_v51, 0.0  ;;  %v702_v60 = vmul.f32 %v1220_v62, %v626_v51  ;;  %v717_v63 = vsel %vm641_vm8, %v609_v33, %v685_v45 }
 0x124   :  { %846 = vst [vmem:[%s1338_s4 + $0x68] sm:$0xff] %v930_v56  ;;  %v627_v0 = vadd.f32 %v1212_v54, %v481_v41  ;;  %v612_v1 = vadd.f32 %v1216_v58, %v443_v52  ;;  %v628_v2 = vadd.f32 %v1216_v58, %v483_v53  ;;  %v733_v3 = vsel %vm657_vm9, %v625_v46, %v701_v57 }
 0x125   :  { %v718_v4 = vsel %vm642_vm10, %v610_v47, %v686_v59  ;;  %v734_v5 = vsel %vm658_vm11, %v626_v51, %v702_v60  ;;  %v687_v6 = vmul.f32 %v1214_v55, %v611_v61  ;;  %vm643_vm12 = vcmp.ge.f32.partialorder %v611_v61, 0.0 }
 0x126   :  { %v923_v7 = vpack.c.bf16 %v718_v4, %v717_v63  ;;  %v931_v8 = vpack.c.bf16 %v734_v5, %v733_v3  ;;  %v703_v9 = vmul.f32 %v1214_v55, %v627_v0  ;;  %vm659_vm13 = vcmp.ge.f32.partialorder %v627_v0, 0.0 }
 0x127   :  { %vm644_vm14 = vcmp.ge.f32.partialorder %v612_v1, 0.0  ;;  %v688_v10 = vmul.f32 %v1220_v62, %v612_v1  ;;  %vm660_vm15 = vcmp.ge.f32.partialorder %v628_v2, 0.0  ;;  %v704_v54 = vmul.f32 %v1220_v62, %v628_v2 }
 0x128   :  { %839 = vst [vmem:[%s1338_s4 + $0x30] sm:$0xff] %v923_v7  ;;  %847 = vst [vmem:[%s1338_s4 + $0x70] sm:$0xff] %v931_v8  ;;  %v719_v58 = vsel %vm643_vm12, %v611_v61, %v687_v6  ;;  %v735_v12 = vsel %vm659_vm13, %v627_v0, %v703_v9 }
 0x129   :  { %v720_v11 = vsel %vm644_vm14, %v612_v1, %v688_v10  ;;  %v736_v55 = vsel %vm660_vm15, %v628_v2, %v704_v54 }
 0x12a   :  { %v924_v13 = vpack.c.bf16 %v720_v11, %v719_v58  ;;  %v932_v14 = vpack.c.bf16 %v736_v55, %v735_v12 }
 0x12c   :  { %840 = vst [vmem:[%s1338_s4 + $0x38] sm:$0xff] %v924_v13  ;;  %848 = vst [vmem:[%s1338_s4 + $0x78] sm:$0xff] %v932_v14 }

// kernel: gen_forward.45
= control target key start
LH: loop header
LB: loop body
LE: loop exit
PB: predicated region body
PF: predicated region fallthrough
CT: control target
= control target key end

     0   :  { %s3223_s21 = smov 0   ;;  %s3923_s0 = inlined_call_operand.vmem [shape: bf16[512,576], index: 0, kind: input, shape index: {}]   ;;  %s3924_s1 = inlined_call_operand.vmem [shape: bf16[576,128], index: 1, kind: input, shape index: {}]   ;;  %s3925_s2 = inlined_call_operand.vmem [shape: bf16[512,40], index: 2, kind: input, shape index: {}]   ;;  %s3926_s3 = inlined_call_operand.vmem [shape: bf16[40,128], index: 3, kind: input, shape index: {}]   ;;  %s3927_s4 = inlined_call_operand.vmem [shape: f32[1,128], index: 4, kind: input, shape index: {}]   ;;  %s3928_s5 = inlined_call_operand.vmem [shape: f32[1,128], index: 5, kind: input, shape index: {}]   ;;  %s3929_s6 = inlined_call_operand.vmem [shape: bf16[512,128], index: 6, kind: output, shape index: {}]  }
   0x1 LB: > { %s2313_s22 = sadd.s32 4294967295, %s3186_s21   ;;  %p2317_p0 = scmp.ge.s32.totalorder %s3186_s21, 1  ;;  %s3186_s21 = sphi %s3223_s21, %s16_s21  }
   0x2   : > { %p225_p1 = scmp.lt.s32.totalorder %s3186_s21, 3 }
   0x4   : > { %p226_p2 = pnand %p2317_p0, %p225_p1 }
   0x6   : > { %229 = sbr.rel (%p226_p2) target bundleno = 430 (0x1ae), region = 44 }
   0xb   : > { %v3013_v0 = vld [vmem:[%s3926_s3 + $0x10] ss:$0 sps:$4 sm:$0xff]   ;;  %vm630_vm0 = vcmask 1043456   ;;  %v3014_v1 = vld [vmem:[%s3924_s1 + $0x78] sm:$0xff]   ;;  %v3016_v4 = vld [vmem:[%s3926_s3 + $0x8] sm:$0xff]   ;;  %s2318_s7 = sshll.u32 %s2313_s22, 5 }
   0xc   : > { %3003 = vmatprep.subr.msk.bf16.mxu0 %vm630_vm0, %v3013_v0  ;;  %2673 = vmatprep.subr.bf16.mxu1 %v3014_v1  ;;  %v632_v2 = vsel %vm630_vm0, %v3013_v0, 0  ;;  %v3015_v3 = vld [vmem:[%s3924_s1 + $0x38] sm:$0xff]   ;;  %v3017_v5 = vld [vmem:[%s3924_s1 + $0x70] sm:$0xff]   ;;  %p262_p3 = scmp.lt.s32.totalorder %s2318_s7, 63  ;;  %v3019_v7 = vld [vmem:[%s3926_s3] sm:$0xff]   ;;  %vm581_vm1 = vcmask 326656  }
   0xd   : > { %2918 = vmatpush3.bf16.msra.mxu0 %v632_v2  ;;  %2674 = vmatpush3.bf16.msra.mxu1 %v3015_v3  ;;  %v3018_v6 = vld [vmem:[%s3924_s1 + $0x30] sm:$0xff]   ;;  %v3020_v8 = vld [vmem:[%s3924_s1 + $0x68] sm:$0xff]   ;;  %v3024_v10 = vld [vmem:[%s3924_s1 + $0x60] sm:$0xff]   ;;  %vm1411_vm2 = vcmask 523264  }
   0xe   : > { %2919 = vmatprep.subr.bf16.mxu0 %v3016_v4  ;;  %2675 = vmatprep.subr.bf16.mxu1 %v3017_v5  ;;  %s3983_s7 = smov (!%p262_p3, %s2318_s7), 63  ;;  %v3021_v9 = vld [vmem:[%s3924_s1 + $0x28] sm:$0xff]   ;;  %v3025_v13 = vld [vmem:[%s3924_s1 + $0x20] sm:$0xff]   ;;  %v3026_v14 = vld [vmem:[%s3924_s1 + $0x58] sm:$0xff]  }
   0xf   : > { %s2321_s18 = sshll.u32 %s3983_s7, 2  ;;  %v3027_v15 = vld [vmem:[%s3924_s1 + $0xf8] sm:$0xff]   ;;  %v3032_v20 = vld [vmem:[%s3924_s1 + $0x50] sm:$0xff]   ;;  %v3034_v22 = vld [vmem:[%s3924_s1 + $0x48] sm:$0xff]   ;;  %s3004_s19 = smul.u32 20, %s3983_s7 }
  0x10   : > { %s3269_s24 = scalar_lea.vmem %s3925_s2, %s2321_s18  ;;  %v3028_v16 = vld [vmem:[%s3924_s1 + $0x18] sm:$0xff]   ;;  %v3033_v21 = vld [vmem:[%s3924_s1 + $0x10] sm:$0xff]   ;;  %v3036_v24 = vld [vmem:[%s3924_s1 + $0x8] sm:$0xff]   ;;  %s3755_s10 = scalar_lea.vmem %s3929_s6, %s2321_s18 }
  0x11   : > { %2920 = vmatpush3.bf16.msra.mxu0 %v3016_v4  ;;  %2676 = vmatpush3.bf16.msra.mxu1 %v3018_v6  ;;  %v3022_v11 = vld [vmem:[%s3269_s24] sm:$0xff]   ;;  %v3023_v12 = vld [vmem:[%s3269_s24 + $0x8] sm:$0xff]   ;;  %v3029_v17 = vld [vmem:[%s3924_s1 + $0xb8] sm:$0xff]   ;;  %s3317_s30 = scalar_lea.vmem %s3923_s0, %s3004_s19 }
  0x12   : > { %2921 = vmatprep.subr.bf16.mxu0 %v3019_v7  ;;  %2677 = vmatprep.subr.bf16.mxu1 %v3020_v8  ;;  %v3030_v18 = vld [vmem:[%s3269_s24 + $0x10] sm:$0xff]   ;;  %v3031_v19 = vld [vmem:[%s3269_s24 + $0x18] sm:$0xff]   ;;  %v3038_v26 = vld [vmem:[%s3269_s24 + $0x20] sm:$0xff]  }
  0x13   : > { %2923 = vmatprep.mubr.msk.bf16.mxu0 %vm581_vm1, %v3022_v11  ;;  %v3035_v23 = vld [vmem:[%s3924_s1 + $0xf0] sm:$0xff]   ;;  %v3039_v27 = vld [vmem:[%s3269_s24 + $0x28] sm:$0xff]   ;;  %v3040_v28 = vld [vmem:[%s3924_s1 + $0x40] sm:$0xff]  }
  0x14   : > { %v3037_v25 = vld [vmem:[%s3924_s1 + $0xb0] sm:$0xff]   ;;  %v3041_v29 = vld [vmem:[%s3924_s1] sm:$0xff]   ;;  %v3045_v32 = vld [vmem:[%s3924_s1 + $0xe8] sm:$0xff]  }
  0x15   : > { %2922 = vmatpush3.bf16.msra.mxu0 %v3019_v7  ;;  %2678 = vmatpush3.bf16.msra.mxu1 %v3021_v9  ;;  %v3042_v30 = vld [vmem:[%s3317_s30] ss:$20 sps:$4 sm:$0xff]   ;;  %v3044_v31 = vld [vmem:[%s3317_s30 + $0x4] ss:$20 sps:$4 sm:$0xff]   ;;  %v3047_v34 = vld [vmem:[%s3924_s1 + $0xa8] sm:$0xff]  }
  0x16   : > { %2679 = vmatprep.subr.bf16.mxu1 %v3024_v10  ;;  %2785 = vmatprep.subr.bf16.mxu0 %v3027_v15  ;;  %v3336_v33 = vld [vmem:[%s3924_s1 + $0x118] sm:$0xff]   ;;  %v3048_v35 = vld [vmem:[%s3269_s24 + $0x30] sm:$0xff]   ;;  %v3050_v37 = vld [vmem:[%s3317_s30 + $0x2c] ss:$20 sps:$4 sm:$0xff]  }
  0x17   : > { %1492 = vmatprep.mubr.bf16.mxu1 %v3044_v31  ;;  %v3049_v36 = vld [vmem:[%s3269_s24 + $0x38] sm:$0xff]   ;;  %v3053_v39 = vld [vmem:[%s3924_s1 + $0xe0] sm:$0xff]   ;;  %v3056_v42 = vld [vmem:[%s3269_s24 + $0x48] sm:$0xff]  }
  0x18   : > { %2924 = vmatmul.mubr.msk.bf16.vlgmr.msra.gmra.mxu0 %vm581_vm1, %v3023_v12  ;;  %v3052_v38 = vld [vmem:[%s3317_s30 + $0x28] ss:$20 sps:$4 sm:$0xff]   ;;  %v3054_v40 = vld [vmem:[%s3924_s1 + $0xa0] sm:$0xff]   ;;  %v3062_v46 = vld [vmem:[%s3269_s24 + $0x50] sm:$0xff]  }
  0x19   : > { %2680 = vmatpush3.bf16.msra.mxu1 %v3025_v13  ;;  %2786 = vmatpush3.bf16.msra.mxu0 %v3029_v17  ;;  %v3055_v41 = vld [vmem:[%s3269_s24 + $0x40] sm:$0xff]   ;;  %v3057_v43 = vld [vmem:[%s3317_s30 + $0x54] ss:$20 sps:$4 sm:$0xff]   ;;  %v3060_v44 = vld [vmem:[%s3924_s1 + $0xd8] sm:$0xff]  }
  0x1a   : > { %2681 = vmatprep.subr.bf16.mxu1 %v3026_v14  ;;  %2927 = vmatprep.mubr.msk.bf16.mxu0 %vm581_vm1, %v3030_v18  ;;  %v3061_v45 = vld [vmem:[%s3924_s1 + $0x98] sm:$0xff]   ;;  %v3059_v47 = vld [vmem:[%s3317_s30 + $0x50] ss:$20 sps:$4 sm:$0xff]   ;;  %v3074_v54 = vld [vmem:[%s3924_s1 + $0xc8] sm:$0xff]  }
  0x1b   : > { %2787 = vmatprep.subr.bf16.mxu0 %v3035_v23  ;;  %v3064_v48 = vld [vmem:[%s3317_s30 + $0x7c] ss:$20 sps:$4 sm:$0xff]   ;;  %v3069_v52 = vld [vmem:[%s3269_s24 + $0x60] sm:$0xff]   ;;  %v3066_v53 = vld [vmem:[%s3317_s30 + $0x78] ss:$20 sps:$4 sm:$0xff]  }
  0x1c   : > { %v3067_v49 = vld [vmem:[%s3924_s1 + $0xd0] sm:$0xff]   ;;  %v3063_v51 = vld [vmem:[%s3269_s24 + $0x58] sm:$0xff]   ;;  %v3076_v56 = vld [vmem:[%s3924_s1 + $0x88] sm:$0xff]  }
  0x1d   : > { %2682 = vmatpush3.bf16.msra.mxu1 %v3028_v16  ;;  %2788 = vmatpush3.bf16.msra.mxu0 %v3037_v25  ;;  %v3068_v50 = vld [vmem:[%s3924_s1 + $0x90] sm:$0xff]   ;;  %v3071_v57 = vld [vmem:[%s3317_s30 + $0xa4] ss:$20 sps:$4 sm:$0xff]   ;;  %v3070_v58 = vld [vmem:[%s3269_s24 + $0x68] sm:$0xff]  }
  0x1e   : > { %2683 = vmatprep.subr.bf16.mxu1 %v3032_v20  ;;  %2789 = vmatprep.subr.bf16.mxu0 %v3045_v32  ;;  %v3075_v55 = vld [vmem:[%s3924_s1 + $0x110] sm:$0xff]   ;;  %v3082_v60 = vld [vmem:[%s3924_s1 + $0xc0] sm:$0xff]   ;;  %v3078_v0 = vld [vmem:[%s3269_s24 + $0x78] sm:$0xff]  }
  0x1f   : > { %v3077_v59 = vld [vmem:[%s3269_s24 + $0x70] sm:$0xff]   ;;  %v3083_v61 = vld [vmem:[%s3924_s1 + $0x80] sm:$0xff]   ;;  %v3102_v2 = vld [vmem:[%s3924_s1 + $0x108] sm:$0xff]  }
  0x20   : > { %2928 = vmatmul.mubr.msk.bf16.gmra.mxu0 %vm581_vm1, %v3031_v19  ;;  %v3073_v62 = vld [vmem:[%s3317_s30 + $0xa0] ss:$20 sps:$4 sm:$0xff]   ;;  %v3081_v3 = vld [vmem:[%s3317_s30 + $0xc8] ss:$20 sps:$4 sm:$0xff]   ;;  %v3089_v7 = vld [vmem:[%s3317_s30 + $0xf0] ss:$20 sps:$4 sm:$0xff]  }
  0x21   : > { %2684 = vmatpush3.bf16.msra.mxu1 %v3033_v21  ;;  %2931 = vmatprep.mubr.msk.bf16.mxu0 %vm581_vm1, %v3038_v26  ;;  %v3079_v63 = vld [vmem:[%s3317_s30 + $0xcc] ss:$20 sps:$4 sm:$0xff]   ;;  %v3087_v4 = vld [vmem:[%s3317_s30 + $0xf4] ss:$20 sps:$4 sm:$0xff]   ;;  %v3093_v8 = vld [vmem:[%s3317_s30 + $0x11c] ss:$20 sps:$4 sm:$0xff]  }
  0x22   : > { %2685 = vmatprep.subr.bf16.mxu1 %v3034_v22  ;;  %2790 = vmatpush3.bf16.msra.mxu0 %v3047_v34  ;;  %v3086_v1 = vld [vmem:[%s3317_s30 + $0xc] ss:$20 sps:$4 sm:$0xff]   ;;  %v3084_v5 = vld [vmem:[%s3317_s30 + $0x8] ss:$20 sps:$4 sm:$0xff]   ;;  %v3092_v10 = vld [vmem:[%s3317_s30 + $0x30] ss:$20 sps:$4 sm:$0xff]  }
  0x23   : > { %2791 = vmatprep.subr.bf16.mxu0 %v3053_v39  ;;  %v3090_v6 = vld [vmem:[%s3317_s30 + $0x34] ss:$20 sps:$4 sm:$0xff]   ;;  %v3127_v9 = vld [vmem:[%s3924_s1 + $0x100] sm:$0xff]   ;;  %v3096_v11 = vld [vmem:[%s3317_s30 + $0x5c] ss:$20 sps:$4 sm:$0xff]  }
  0x24   : > { %v3095_v12 = vld [vmem:[%s3317_s30 + $0x118] ss:$20 sps:$4 sm:$0xff]   ;;  %v3101_v16 = vld [vmem:[%s3317_s30 + $0x140] ss:$20 sps:$4 sm:$0xff]   ;;  %v3108_v20 = vld [vmem:[%s3317_s30 + $0x168] ss:$20 sps:$4 sm:$0xff]  }
  0x25   : > { %2686 = vmatpush3.bf16.msra.mxu1 %v3036_v24  ;;  %v3099_v13 = vld [vmem:[%s3317_s30 + $0x144] ss:$20 sps:$4 sm:$0xff]   ;;  %v3106_v17 = vld [vmem:[%s3317_s30 + $0x16c] ss:$20 sps:$4 sm:$0xff]   ;;  %v3112_v21 = vld [vmem:[%s3317_s30 + $0x194] ss:$20 sps:$4 sm:$0xff]  }
  0x26   : > { %2687 = vmatprep.subr.bf16.mxu1 %v3040_v28  ;;  %2792 = vmatpush3.bf16.msra.mxu0 %v3054_v40  ;;  %v3098_v14 = vld [vmem:[%s3317_s30 + $0x58] ss:$20 sps:$4 sm:$0xff]   ;;  %v3105_v18 = vld [vmem:[%s3317_s30 + $0x80] ss:$20 sps:$4 sm:$0xff]   ;;  %v3111_v22 = vld [vmem:[%s3317_s30 + $0xa8] ss:$20 sps:$4 sm:$0xff]  }
  0x27   : > { %2793 = vmatprep.subr.bf16.mxu0 %v3060_v44  ;;  %v3103_v15 = vld [vmem:[%s3317_s30 + $0x84] ss:$20 sps:$4 sm:$0xff]   ;;  %v3109_v19 = vld [vmem:[%s3317_s30 + $0xac] ss:$20 sps:$4 sm:$0xff]   ;;  %v3115_v23 = vld [vmem:[%s3317_s30 + $0xd4] ss:$20 sps:$4 sm:$0xff]  }
  0x28   : > { %2932 = vmatmul.mubr.msk.bf16.gmra.mxu0 %vm581_vm1, %v3039_v27  ;;  %v3114_v24 = vld [vmem:[%s3317_s30 + $0x190] ss:$20 sps:$4 sm:$0xff]   ;;  %v3120_v28 = vld [vmem:[%s3317_s30 + $0x1b8] ss:$20 sps:$4 sm:$0xff]   ;;  %v3126_v32 = vld [vmem:[%s3317_s30 + $0x1e0] ss:$20 sps:$4 sm:$0xff]  }
  0x29   : > { %2688 = vmatpush3.bf16.msra.mxu1 %v3041_v29  ;;  %2935 = vmatprep.mubr.msk.bf16.mxu0 %vm581_vm1, %v3048_v35  ;;  %v3118_v25 = vld [vmem:[%s3317_s30 + $0x1bc] ss:$20 sps:$4 sm:$0xff]   ;;  %v3124_v29 = vld [vmem:[%s3317_s30 + $0x1e4] ss:$20 sps:$4 sm:$0xff]   ;;  %v3130_v34 = vld [vmem:[%s3317_s30 + $0x120] ss:$20 sps:$4 sm:$0xff]  }
  0x2a   : > { %2995 = vmatprep.subr.bf16.mxu1 %v3336_v33  ;;  %2794 = vmatpush3.bf16.msra.mxu0 %v3061_v45  ;;  %v3117_v26 = vld [vmem:[%s3317_s30 + $0xd0] ss:$20 sps:$4 sm:$0xff]   ;;  %v3134_v35 = vld [vmem:[%s3317_s30 + $0x14c] ss:$20 sps:$4 sm:$0xff]   ;;  %v3140_v39 = vld [vmem:[%s3317_s30 + $0x174] ss:$20 sps:$4 sm:$0xff]  }
  0x2b   : > { %2795 = vmatprep.subr.bf16.mxu0 %v3067_v49  ;;  %v3121_v27 = vld [vmem:[%s3317_s30 + $0xfc] ss:$20 sps:$4 sm:$0xff]   ;;  %v3128_v31 = vld [vmem:[%s3317_s30 + $0x124] ss:$20 sps:$4 sm:$0xff]   ;;  %v3149_v45 = vld [vmem:[%s3317_s30 + $0x60] ss:$20 sps:$4 sm:$0xff]  }
  0x2c   : > { %1493 = vmatmul.mubr.bf16.vlgmr.msra.gmra.mxu1 %v3042_v30  ;;  %v3123_v30 = vld [vmem:[%s3317_s30 + $0xf8] ss:$20 sps:$4 sm:$0xff]   ;;  %v3139_v40 = vld [vmem:[%s3317_s30 + $0x230] ss:$20 sps:$4 sm:$0xff]  }
  0x2d   : > { %2999 = vmatpush3.bf16.msra.mxu1 %v3336_v33  ;;  %1500 = vmatprep.mubr.bf16.mxu1 %v3050_v37  ;;  %v3137_v37 = vld [vmem:[%s3317_s30 + $0x234] ss:$20 sps:$4 sm:$0xff]   ;;  %v3145_v44 = vld [vmem:[%s3317_s30 + $0x258] ss:$20 sps:$4 sm:$0xff]   ;;  %v3154_v49 = vld [vmem:[%s3317_s30 + $0xb0] ss:$20 sps:$4 sm:$0xff]  }
  0x2e   : > { %2796 = vmatpush3.bf16.msra.mxu0 %v3068_v50  ;;  %2996 = vmatprep.subr.bf16.mxu1 %v3075_v55  ;;  %v3153_v50 = vld [vmem:[%s3317_s30 + $0x1c0] ss:$20 sps:$4 sm:$0xff]  }
  0x2f   : > { %2797 = vmatprep.subr.bf16.mxu0 %v3074_v54  ;;  %v3158_v54 = vld [vmem:[%s3317_s30 + $0x1e8] ss:$20 sps:$4 sm:$0xff]  }
  0x30   : > { %2936 = vmatmul.mubr.msk.bf16.gmra.mxu0 %vm581_vm1, %v3049_v36  ;;  %v3133_v36 = vld [vmem:[%s3317_s30 + $0x208] ss:$20 sps:$4 sm:$0xff]  }
  0x31   : > { %2939 = vmatprep.mubr.msk.bf16.mxu0 %vm581_vm1, %v3055_v41  ;;  %3000 = vmatpush3.bf16.msra.mxu1 %v3075_v55  ;;  %v3143_v41 = vld [vmem:[%s3317_s30 + $0x25c] ss:$20 sps:$4 sm:$0xff]  }
  0x32   : > { %2798 = vmatpush3.bf16.msra.mxu0 %v3076_v56  ;;  %2997 = vmatprep.subr.bf16.mxu1 %v3102_v2  ;;  %v3160_v56 = vld [vmem:[%s3317_s30 + $0x128] ss:$20 sps:$4 sm:$0xff]  }
  0x33   : > { %2799 = vmatprep.subr.bf16.mxu0 %v3082_v60  ;;  %v3165_v60 = vld [vmem:[%s3317_s30 + $0x178] ss:$20 sps:$4 sm:$0xff]  }
  0x34   : > { %1501 = vmatmul.mubr.bf16.gmra.mxu1 %v3052_v38  ;;  %v3136_v38 = vld [vmem:[%s3317_s30 + $0x148] ss:$20 sps:$4 sm:$0xff]  }
  0x35   : > { %1508 = vmatprep.mubr.bf16.mxu1 %v3057_v43  ;;  %3001 = vmatpush3.bf16.msra.mxu1 %v3102_v2  ;;  %v3146_v43 = vld [vmem:[%s3317_s30 + $0x19c] ss:$20 sps:$4 sm:$0xff]  }
  0x36   : > { %2800 = vmatpush3.bf16.msra.mxu0 %v3083_v61  ;;  %2998 = vmatprep.subr.bf16.mxu1 %v3127_v9  ;;  %v3169_v61 = vld [vmem:[%s3317_s30 + $0x1a0] ss:$20 sps:$4 sm:$0xff]  }
  0x37   : > { %2955 = vmatprep.subr.bf16.mxu0 %v3336_v33 }
  0x38   : > { %2940 = vmatmul.mubr.msk.bf16.gmra.mxu0 %vm581_vm1, %v3056_v42  ;;  %v3142_v42 = vld [vmem:[%s3317_s30 + $0x170] ss:$20 sps:$4 sm:$0xff]  }
  0x39   : > { %2943 = vmatprep.mubr.msk.bf16.mxu0 %vm581_vm1, %v3062_v46  ;;  %3002 = vmatpush3.bf16.msra.mxu1 %v3127_v9  ;;  %v3148_v46 = vld [vmem:[%s3317_s30 + $0x198] ss:$20 sps:$4 sm:$0xff]  }
  0x3c   : > { %1509 = vmatmul.mubr.bf16.gmra.mxu1 %v3059_v47  ;;  %v3151_v47 = vld [vmem:[%s3317_s30 + $0x1c4] ss:$20 sps:$4 sm:$0xff]  }
  0x3d   : > { %1516 = vmatprep.mubr.bf16.mxu1 %v3064_v48  ;;  %v3150_v48 = vld [vmem:[%s3317_s30 + $0x88] ss:$20 sps:$4 sm:$0xff]  }
  0x40   : > { %2944 = vmatmul.mubr.msk.bf16.gmra.mxu0 %vm581_vm1, %v3063_v51  ;;  %v3156_v51 = vld [vmem:[%s3317_s30 + $0x1ec] ss:$20 sps:$4 sm:$0xff]  }
  0x41   : > { %2947 = vmatprep.mubr.msk.bf16.mxu0 %vm581_vm1, %v3069_v52  ;;  %v3155_v52 = vld [vmem:[%s3317_s30 + $0xd8] ss:$20 sps:$4 sm:$0xff]  }
  0x44   : > { %1517 = vmatmul.mubr.bf16.gmra.mxu1 %v3066_v53  ;;  %v3159_v53 = vld [vmem:[%s3317_s30 + $0x100] ss:$20 sps:$4 sm:$0xff]  }
  0x45   : > { %1524 = vmatprep.mubr.bf16.mxu1 %v3071_v57  ;;  %v3164_v57 = vld [vmem:[%s3317_s30 + $0x150] ss:$20 sps:$4 sm:$0xff]  }
  0x48   : > { %2948 = vmatmul.mubr.msk.bf16.gmra.mxu0 %vm581_vm1, %v3070_v58  ;;  %v3163_v58 = vld [vmem:[%s3317_s30 + $0x210] ss:$20 sps:$4 sm:$0xff]  }
  0x49   : > { %2951 = vmatprep.mubr.msk.bf16.mxu0 %vm581_vm1, %v3077_v59  ;;  %v3166_v59 = vld [vmem:[%s3317_s30 + $0x23c] ss:$20 sps:$4 sm:$0xff]  }
  0x4c   : > { %1525 = vmatmul.mubr.bf16.gmra.mxu1 %v3073_v62  ;;  %v3168_v62 = vld [vmem:[%s3317_s30 + $0x238] ss:$20 sps:$4 sm:$0xff]  }
  0x4d   : > { %1532 = vmatprep.mubr.bf16.mxu1 %v3079_v63  ;;  %v3171_v63 = vld [vmem:[%s3317_s30 + $0x264] ss:$20 sps:$4 sm:$0xff]  }
  0x50   : > { %2952 = vmatmul.mubr.msk.bf16.gmra.mxu0 %vm581_vm1, %v3078_v0  ;;  %v3170_v0 = vld [vmem:[%s3317_s30 + $0x1c8] ss:$20 sps:$4 sm:$0xff]  }
  0x51   : > { %1653 = vmatprep.mubr.bf16.mxu0 %v3086_v1  ;;  %v3174_v1 = vld [vmem:[%s3317_s30 + $0x1f0] ss:$20 sps:$4 sm:$0xff]  }
  0x54   : > { %1533 = vmatmul.mubr.bf16.gmra.mxu1 %v3081_v3  ;;  %v3176_v3 = vld [vmem:[%s3317_s30 + $0x10] ss:$20 sps:$4 sm:$0xff]  }
  0x55   : > { %1540 = vmatprep.mubr.bf16.mxu1 %v3087_v4  ;;  %v3175_v4 = vld [vmem:[%s3317_s30 + $0x218] ss:$20 sps:$4 sm:$0xff]  }
  0x58   : > { %1654 = vmatmul.mubr.bf16.vlgmr.msra.gmra.mxu0 %v3084_v5  ;;  %v3178_v5 = vld [vmem:[%s3317_s30 + $0x240] ss:$20 sps:$4 sm:$0xff]  }
  0x59   : > { %2956 = vmatpush3.bf16.msra.mxu0 %v3336_v33  ;;  %1661 = vmatprep.mubr.bf16.mxu0 %v3090_v6  ;;  %v3131_v33 = vld [vmem:[%s3317_s30 + $0x20c] ss:$20 sps:$4 sm:$0xff]  }
  0x5a   : > { %2957 = vmatprep.subr.bf16.mxu0 %v3075_v55  ;;  %v3177_v6 = vld [vmem:[%s3317_s30 + $0x38] ss:$20 sps:$4 sm:$0xff]  }
  0x5c   : > { %1541 = vmatmul.mubr.bf16.gmra.mxu1 %v3089_v7 }
  0x5d   : > { %2958 = vmatpush3.bf16.msra.mxu0 %v3075_v55  ;;  %1548 = vmatprep.mubr.bf16.mxu1 %v3093_v8  ;;  %v3161_v55 = vld [vmem:[%s3317_s30 + $0x214] ss:$20 sps:$4 sm:$0xff]  }
  0x5e   : > { %2959 = vmatprep.subr.bf16.mxu0 %v3102_v2  ;;  %v3179_v8 = vld [vmem:[%s3317_s30 + $0x268] ss:$20 sps:$4 sm:$0xff]  }
  0x60   : > { %1662 = vmatmul.mubr.bf16.gmra.mxu0 %v3092_v10 }
  0x61   : > { %1669 = vmatprep.mubr.bf16.mxu0 %v3096_v11  ;;  %2960 = vmatpush3.bf16.msra.mxu0 %v3102_v2  ;;  %v3173_v2 = vld [vmem:[%s3317_s30 + $0x260] ss:$20 sps:$4 sm:$0xff]  }
  0x62   : > { %2961 = vmatprep.subr.bf16.mxu0 %v3127_v9 }
  0x64   : > { %1549 = vmatmul.mubr.bf16.gmra.mxu1 %v3095_v12 }
  0x65   : > { %2962 = vmatpush3.bf16.msra.mxu0 %v3127_v9  ;;  %1556 = vmatprep.mubr.bf16.mxu1 %v3099_v13 }
  0x68   : > { %1670 = vmatmul.mubr.bf16.gmra.mxu0 %v3098_v14 }
  0x69   : > { %1677 = vmatprep.mubr.bf16.mxu0 %v3103_v15 }
  0x6c   : > { %1557 = vmatmul.mubr.bf16.gmra.mxu1 %v3101_v16 }
  0x6d   : > { %1564 = vmatprep.mubr.bf16.mxu1 %v3106_v17 }
  0x70   : > { %1678 = vmatmul.mubr.bf16.gmra.mxu0 %v3105_v18 }
  0x71   : > { %1685 = vmatprep.mubr.bf16.mxu0 %v3109_v19 }
  0x74   : > { %1565 = vmatmul.mubr.bf16.gmra.mxu1 %v3108_v20 }
  0x75   : > { %1572 = vmatprep.mubr.bf16.mxu1 %v3112_v21 }
  0x78   : > { %1686 = vmatmul.mubr.bf16.gmra.mxu0 %v3111_v22 }
  0x79   : > { %1693 = vmatprep.mubr.bf16.mxu0 %v3115_v23 }
  0x7c   : > { %1573 = vmatmul.mubr.bf16.gmra.mxu1 %v3114_v24 }
  0x7d   : > { %1580 = vmatprep.mubr.bf16.mxu1 %v3118_v25 }
  0x80   : > { %1694 = vmatmul.mubr.bf16.gmra.mxu0 %v3117_v26 }
  0x81   : > { %1701 = vmatprep.mubr.bf16.mxu0 %v3121_v27 }
  0x84   : > { %1581 = vmatmul.mubr.bf16.gmra.mxu1 %v3120_v28 }
  0x85   : > { %1588 = vmatprep.mubr.bf16.mxu1 %v3124_v29 }
  0x88   : > { %1702 = vmatmul.mubr.bf16.gmra.mxu0 %v3123_v30 }
  0x89   : > { %1709 = vmatprep.mubr.bf16.mxu0 %v3128_v31 }
  0x8c   : > { %1589 = vmatmul.mubr.bf16.gmra.mxu1 %v3126_v32 }
  0x8d   : > { %1596 = vmatprep.mubr.bf16.mxu1 %v3131_v33 }
  0x90   : > { %1710 = vmatmul.mubr.bf16.gmra.mxu0 %v3130_v34 }
  0x91   : > { %1717 = vmatprep.mubr.bf16.mxu0 %v3134_v35 }
  0x94   : > { %1597 = vmatmul.mubr.bf16.gmra.mxu1 %v3133_v36 }
  0x95   : > { %1604 = vmatprep.mubr.bf16.mxu1 %v3137_v37 }
  0x98   : > { %1718 = vmatmul.mubr.bf16.gmra.mxu0 %v3136_v38 }
  0x99   : > { %1725 = vmatprep.mubr.bf16.mxu0 %v3140_v39 }
  0x9c   : > { %1605 = vmatmul.mubr.bf16.gmra.mxu1 %v3139_v40 }
  0x9d   : > { %1612 = vmatprep.mubr.bf16.mxu1 %v3143_v41 }
  0xa0   : > { %1726 = vmatmul.mubr.bf16.gmra.mxu0 %v3142_v42 }
  0xa1   : > { %1733 = vmatprep.mubr.bf16.mxu0 %v3146_v43 }
  0xa4   : > { %1613 = vmatmul.mubr.bf16.gmra.mxu1 %v3145_v44 }
  0xa5   : > { %2967 = vmatprep.mubr.msk.bf16.mxu1 %vm1411_vm2, %v3149_v45 }
  0xa8   : > { %1734 = vmatmul.mubr.bf16.gmra.mxu0 %v3148_v46 }
  0xa9   : > { %1741 = vmatprep.mubr.bf16.mxu0 %v3151_v47 }
  0xac   : > { %2968 = vmatmul.mubr.msk.bf16.vlgmr.msra.gmra.mxu1 %vm1411_vm2, %v3150_v48 }
  0xad   : > { %2971 = vmatprep.mubr.msk.bf16.mxu1 %vm1411_vm2, %v3154_v49 }
  0xb0   : > { %1742 = vmatmul.mubr.bf16.gmra.mxu0 %v3153_v50 }
  0xb1   : > { %1749 = vmatprep.mubr.bf16.mxu0 %v3156_v51 }
  0xb4   : > { %2972 = vmatmul.mubr.msk.bf16.gmra.mxu1 %vm1411_vm2, %v3155_v52 }
  0xb5   : > { %2975 = vmatprep.mubr.msk.bf16.mxu1 %vm1411_vm2, %v3159_v53 }
  0xb8   : > { %1750 = vmatmul.mubr.bf16.gmra.mxu0 %v3158_v54 }
  0xb9   : > { %1757 = vmatprep.mubr.bf16.mxu0 %v3161_v55 }
  0xbc   : > { %2976 = vmatmul.mubr.msk.bf16.gmra.mxu1 %vm1411_vm2, %v3160_v56 }
  0xbd   : > { %2979 = vmatprep.mubr.msk.bf16.mxu1 %vm1411_vm2, %v3164_v57 }
  0xc0   : > { %1758 = vmatmul.mubr.bf16.gmra.mxu0 %v3163_v58 }
  0xc1   : > { %1765 = vmatprep.mubr.bf16.mxu0 %v3166_v59 }
  0xc4   : > { %2980 = vmatmul.mubr.msk.bf16.gmra.mxu1 %vm1411_vm2, %v3165_v60 }
  0xc5   : > { %2983 = vmatprep.mubr.msk.bf16.mxu1 %vm1411_vm2, %v3169_v61 }
  0xc8   : > { %1766 = vmatmul.mubr.bf16.gmra.mxu0 %v3168_v62 }
  0xc9   : > { %1773 = vmatprep.mubr.bf16.mxu0 %v3171_v63 }
  0xcc   : > { %2984 = vmatmul.mubr.msk.bf16.gmra.mxu1 %vm1411_vm2, %v3170_v0 }
  0xcd   : > { %2987 = vmatprep.mubr.msk.bf16.mxu1 %vm1411_vm2, %v3174_v1 }
  0xd0   : > { %1774 = vmatmul.mubr.bf16.gmra.mxu0 %v3173_v2 }
  0xd1   : > { %2963 = vmatprep.mubr.msk.bf16.mxu0 %vm1411_vm2, %v3176_v3 }
  0xd4   : > { %2988 = vmatmul.mubr.msk.bf16.gmra.mxu1 %vm1411_vm2, %v3175_v4 }
  0xd5   : > { %2991 = vmatprep.mubr.msk.bf16.mxu1 %vm1411_vm2, %v3178_v5 }
  0xd8   : > { %v2925_v7 = vpop.f32.mrf.mxu0  ;;  %2964 = vmatmul.mubr.msk.bf16.vlgmr.msra.gmra.mxu0 %vm1411_vm2, %v3177_v6 }
  0xda   : > { %v668_v9 = vpop.f32.mrf.mxu0 }
  0xdc   : > { %v2926_v10 = vpop.f32.mrf.mxu0  ;;  %2992 = vmatmul.mubr.msk.bf16.gmra.mxu1 %vm1411_vm2, %v3179_v8 }
  0xde   : > { %v671_v11 = vpop.f32.mrf.mxu0 }
  0xe0   : > { %v2929_v12 = vpop.f32.mrf.mxu0 }
  0xe2   : > { %v684_v13 = vpop.f32.mrf.mxu0 }
  0xe4   : > { %v2930_v14 = vpop.f32.mrf.mxu0 }
  0xe6   : > { %v687_v15 = vpop.f32.mrf.mxu0 }
  0xe8   : > { %v3498_v16 = vpop.f32.mrf.mxu0 }
  0xea   : > { %v700_v17 = vpop.f32.mrf.mxu0 }
  0xec   : > { %v3500_v18 = vpop.f32.mrf.mxu0  ;;  %v2689_v19 = vpop.f32.mrf.mxu1 }
  0xee   : > { %v703_v20 = vpop.f32.mrf.mxu0  ;;  %v2690_v21 = vpop.f32.mrf.mxu1 }
  0xef   : > { %v2691_v22 = vadd.f32 %v2690_v21, %v2689_v19 }
  0xf0   : > { %v3502_v23 = vpop.f32.mrf.mxu0  ;;  %v2692_v24 = vpop.f32.mrf.mxu1 }
  0xf1   : > { %v3504_v25 = vadd.f32 %v2691_v22, %v668_v9 }
  0xf2   : > { %v3506_v26 = vpop.f32.mrf.mxu0  ;;  %v2693_v27 = vpop.f32.mrf.mxu1 }
  0xf3   : > { %v2694_v28 = vadd.f32 %v2693_v27, %v2692_v24 }
  0xf4   : > { %v3508_v29 = vpop.f32.mrf.mxu0  ;;  %v2695_v30 = vpop.f32.mrf.mxu1 }
  0xf5   : > { %v3510_v31 = vadd.f32 %v2694_v28, %v671_v11 }
  0xf6   : > { %v3512_v32 = vpop.f32.mrf.mxu0  ;;  %v2696_v33 = vpop.f32.mrf.mxu1 }
  0xf7   : > { %v2697_v34 = vadd.f32 %v2696_v33, %v2695_v30 }
  0xf8   : > { %v3514_v35 = vpop.f32.mrf.mxu0  ;;  %v2698_v36 = vpop.f32.mrf.mxu1 }
  0xf9   : > { %v3516_v37 = vadd.f32 %v2925_v7, %v2697_v34 }
  0xfa   : > { %v3518_v38 = vpop.f32.mrf.mxu0  ;;  %v2699_v39 = vpop.f32.mrf.mxu1 }
  0xfb   : > { %v2700_v40 = vadd.f32 %v2699_v39, %v2698_v36 }
  0xfc   : > { %v3520_v41 = vpop.f32.mrf.mxu0  ;;  %v2701_v42 = vpop.f32.mrf.mxu1 }
  0xfd   : > { %v3522_v43 = vadd.f32 %v2926_v10, %v2700_v40 }
  0xfe   : > { %v3524_v44 = vpop.f32.mrf.mxu0  ;;  %v2702_v45 = vpop.f32.mrf.mxu1 }
  0xff   : > { %v2703_v46 = vadd.f32 %v2702_v45, %v2701_v42 }
 0x100   : > { %v3526_v47 = vpop.f32.mrf.mxu0  ;;  %v2704_v48 = vpop.f32.mrf.mxu1 }
 0x101   : > { %v3528_v49 = vadd.f32 %v2703_v46, %v684_v13 }
 0x102   : > { %v3530_v50 = vpop.f32.mrf.mxu0  ;;  %v2705_v51 = vpop.f32.mrf.mxu1 }
 0x103   : > { %v2706_v52 = vadd.f32 %v2705_v51, %v2704_v48 }
 0x104   : > { %v3532_v53 = vpop.f32.mrf.mxu0  ;;  %v2707_v54 = vpop.f32.mrf.mxu1 }
 0x105   : > { %v3534_v55 = vadd.f32 %v2706_v52, %v687_v15 }
 0x106   : > { %v3536_v56 = vpop.f32.mrf.mxu0  ;;  %v2708_v57 = vpop.f32.mrf.mxu1 }
 0x107   : > { %v2709_v58 = vadd.f32 %v2708_v57, %v2707_v54 }
 0x108   : > { %v3538_v59 = vpop.f32.mrf.mxu0  ;;  %v2710_v60 = vpop.f32.mrf.mxu1 }
 0x109   : > { %v3540_v61 = vadd.f32 %v2929_v12, %v2709_v58 }
 0x10a   : > { %v3542_v62 = vpop.f32.mrf.mxu0  ;;  %v2711_v63 = vpop.f32.mrf.mxu1 }
 0x10b   : > { %v2712_v0 = vadd.f32 %v2711_v63, %v2710_v60 }
 0x10c   : > { %v3544_v1 = vpop.f32.mrf.mxu0  ;;  %v2713_v2 = vpop.f32.mrf.mxu1 }
 0x10d   : > { %v3546_v3 = vadd.f32 %v2930_v14, %v2712_v0 }
 0x10e   : > { %v3548_v4 = vpop.f32.mrf.mxu0  ;;  %v2714_v5 = vpop.f32.mrf.mxu1 }
 0x10f   : > { %v2715_v6 = vadd.f32 %v2714_v5, %v2713_v2 }
 0x110   : > { %v3550_v7 = vpop.f32.mrf.mxu0  ;;  %v2716_v8 = vpop.f32.mrf.mxu1 }
 0x111   : > { %3930 = vst [vmem:[#allocation2_spill] sm:$0xff] %v3550_v7  ;;  %v3552_v9 = vadd.f32 %v2715_v6, %v700_v17 }
 0x112   : > { %v3554_v10 = vpop.f32.mrf.mxu0  ;;  %v2717_v11 = vpop.f32.mrf.mxu1 }
 0x113   : > { %3931 = vst [vmem:[#allocation3_spill] sm:$0xff] %v3554_v10  ;;  %v2718_v12 = vadd.f32 %v2717_v11, %v2716_v8 }
 0x114   : > { %v3556_v13 = vpop.f32.mrf.mxu0  ;;  %v2719_v15 = vpop.f32.mrf.mxu1 }
 0x115   : > { %3932 = vst [vmem:[#allocation4_spill] sm:$0xff] %v3556_v13  ;;  %v3558_v19 = vadd.f32 %v2718_v12, %v703_v20 }
 0x116   : > { %v3560_v14 = vpop.f32.mrf.mxu0  ;;  %v2720_v21 = vpop.f32.mrf.mxu1 }
 0x117   : > { %3933 = vst [vmem:[#allocation5_spill] sm:$0xff] %v3560_v14  ;;  %v2721_v22 = vadd.f32 %v2720_v21, %v2719_v15 }
 0x118   : > { %v2801_v24 = vpop.f32.mrf.mxu0  ;;  %v2722_v27 = vpop.f32.mrf.mxu1 }
 0x119   : > { %v3563_v28 = vadd.f32 %v3498_v16, %v2721_v22 }
 0x11a   : > { %v2802_v17 = vpop.f32.mrf.mxu0  ;;  %v2723_v30 = vpop.f32.mrf.mxu1 }
 0x11b   : > { %v2803_v33 = vadd.f32 %v2802_v17, %v2801_v24  ;;  %v2724_v34 = vadd.f32 %v2723_v30, %v2722_v27 }
 0x11c   : > { %v2804_v36 = vpop.f32.mrf.mxu0  ;;  %v2725_v39 = vpop.f32.mrf.mxu1 }
 0x11d   : > { %v3566_v40 = vadd.f32 %v2803_v33, %v3504_v25  ;;  %v3569_v20 = vadd.f32 %v3500_v18, %v2724_v34 }
 0x11e   : > { %v2805_v42 = vpop.f32.mrf.mxu0  ;;  %v2726_v45 = vpop.f32.mrf.mxu1 }
 0x11f   : > { %3934 = vst [vmem:[#allocation6_spill] sm:$0xff] %v3566_v40  ;;  %v2806_v46 = vadd.f32 %v2805_v42, %v2804_v36  ;;  %v2727_v48 = vadd.f32 %v2726_v45, %v2725_v39 }
 0x120   : > { %v2807_v51 = vpop.f32.mrf.mxu0  ;;  %v2728_v52 = vpop.f32.mrf.mxu1 }
 0x121   : > { %v3572_v16 = vadd.f32 %v2806_v46, %v3510_v31  ;;  %v3575_v54 = vadd.f32 %v2727_v48, %v3506_v26 }
 0x122   : > { %v2808_v57 = vpop.f32.mrf.mxu0  ;;  %v2729_v58 = vpop.f32.mrf.mxu1 }
 0x123   : > { %3935 = vst [vmem:[#allocation7_spill] sm:$0xff] %v3572_v16  ;;  %v2809_v60 = vadd.f32 %v2808_v57, %v2807_v51  ;;  %v2730_v25 = vadd.f32 %v2729_v58, %v2728_v52 }
 0x124   : > { %v2810_v63 = vpop.f32.mrf.mxu0  ;;  %v2731_v0 = vpop.f32.mrf.mxu1 }
 0x125   : > { %v3578_v18 = vadd.f32 %v2809_v60, %v3516_v37  ;;  %v3581_v2 = vadd.f32 %v2730_v25, %v3512_v32 }
 0x126   : > { %v2811_v5 = vpop.f32.mrf.mxu0  ;;  %v2732_v6 = vpop.f32.mrf.mxu1 }
 0x127   : > { %3936 = vst [vmem:[#allocation8_spill] sm:$0xff] %v3578_v18  ;;  %v2812_v8 = vadd.f32 %v2811_v5, %v2810_v63  ;;  %v2733_v31 = vadd.f32 %v2732_v6, %v2731_v0 }
 0x128   : > { %v2813_v11 = vpop.f32.mrf.mxu0  ;;  %v2734_v12 = vpop.f32.mrf.mxu1 }
 0x129   : > { %v3584_v26 = vadd.f32 %v2812_v8, %v3522_v43  ;;  %v3587_v15 = vadd.f32 %v3502_v23, %v2733_v31 }
 0x12a   : > { %v2814_v21 = vpop.f32.mrf.mxu0  ;;  %v2735_v22 = vpop.f32.mrf.mxu1 }
 0x12b   : > { %3937 = vst [vmem:[#allocation9_spill] sm:$0xff] %v3584_v26  ;;  %v2815_v24 = vadd.f32 %v2814_v21, %v2813_v11  ;;  %v2736_v37 = vadd.f32 %v2735_v22, %v2734_v12 }
 0x12c   : > { %v2816_v27 = vpop.f32.mrf.mxu0  ;;  %v2737_v17 = vpop.f32.mrf.mxu1 }
 0x12d   : > { %v3590_v32 = vadd.f32 %v2815_v24, %v3528_v49  ;;  %v3593_v30 = vadd.f32 %v3508_v29, %v2736_v37 }
 0x12e   : > { %v2817_v33 = vpop.f32.mrf.mxu0  ;;  %v2738_v34 = vpop.f32.mrf.mxu1 }
 0x12f   : > { %v2818_v36 = vadd.f32 %v2817_v33, %v2816_v27  ;;  %v2739_v43 = vadd.f32 %v2738_v34, %v2737_v17 }
 0x130   : > { %v3595_v39 = vpop.f32.mrf.mxu0  ;;  %v2740_v23 = vpop.f32.mrf.mxu1 }
 0x131   : > { %v3598_v42 = vadd.f32 %v2818_v36, %v3534_v55  ;;  %v3601_v45 = vadd.f32 %v2739_v43, %v3518_v38 }
 0x132   : > { %v3603_v46 = vpop.f32.mrf.mxu0  ;;  %v2741_v49 = vpop.f32.mrf.mxu1 }
 0x133   : > { %v2742_v48 = vadd.f32 %v2741_v49, %v2740_v23 }
 0x134   : > { %v3605_v51 = vpop.f32.mrf.mxu0  ;;  %v2743_v29 = vpop.f32.mrf.mxu1 }
 0x135   : > { %v3608_v52 = vadd.f32 %v2742_v48, %v3524_v44 }
 0x136   : > { %v3610_v57 = vpop.f32.mrf.mxu0  ;;  %v2744_v58 = vpop.f32.mrf.mxu1 }
 0x137   : > { %3938 = vst [vmem:[#allocation10_spill] sm:$0xff] %v3608_v52  ;;  %v2745_v60 = vadd.f32 %v2744_v58, %v2743_v29 }
 0x138   : > { %v3612_v25 = vpop.f32.mrf.mxu0  ;;  %v2746_v55 = vpop.f32.mrf.mxu1 }
 0x139   : > { %v3615_v38 = vadd.f32 %v3514_v35, %v2745_v60 }
 0x13a   : > { %v3617_v63 = vpop.f32.mrf.mxu0  ;;  %v2747_v0 = vpop.f32.mrf.mxu1 }
 0x13b   : > { %3939 = vst [vmem:[#allocation11_spill] sm:$0xff] %v3615_v38  ;;  %v2748_v5 = vadd.f32 %v2747_v0, %v2746_v55 }
 0x13c   : > { %v3619_v6 = vpop.f32.mrf.mxu0  ;;  %v2749_v8 = vpop.f32.mrf.mxu1 }
 0x13d   : > { %v3622_v44 = vadd.f32 %v3520_v41, %v2748_v5 }
 0x13e   : > { %v2829_v31 = vpop.f32.mrf.mxu0  ;;  %v2750_v11 = vpop.f32.mrf.mxu1 }
 0x13f   : > { %3940 = vst [vmem:[#allocation12_spill] sm:$0xff] %v3622_v44  ;;  %v2751_v12 = vadd.f32 %v2750_v11, %v2749_v8 }
 0x140   : > { %v2831_v21 = vpop.f32.mrf.mxu0  ;;  %v2752_v22 = vpop.f32.mrf.mxu1 }
 0x141   : > { %v3625_v24 = vadd.f32 %v2751_v12, %v3530_v50 }
 0x142   : > { %v2832_v35 = vpop.f32.mrf.mxu0  ;;  %v2753_v37 = vpop.f32.mrf.mxu1 }
 0x143   : > { %3941 = vst [vmem:[#allocation13_spill] sm:$0xff] %v3625_v24  ;;  %v2754_v27 = vadd.f32 %v2753_v37, %v2752_v22 }
 0x144   : > { %v2834_v17 = vpop.f32.mrf.mxu0  ;;  %v2755_v33 = vpop.f32.mrf.mxu1 }
 0x145   : > { %v3628_v34 = vadd.f32 %v2754_v27, %v3536_v56 }
 0x146   : > { %v2835_v36 = vpop.f32.mrf.mxu0  ;;  %v2756_v43 = vpop.f32.mrf.mxu1 }
 0x147   : > { %3942 = vst [vmem:[#allocation14_spill] sm:$0xff] %v3628_v34  ;;  %v3630_v41 = vadd.f32 %v2756_v43, %v2755_v33 }
 0x148   : > { %v2837_v23 = vpop.f32.mrf.mxu0  ;;  %v2758_v49 = vpop.f32.mrf.mxu1 }
 0x14a   : > { %v2838_v48 = vpop.f32.mrf.mxu0  ;;  %v2759_v29 = vpop.f32.mrf.mxu1 }
 0x14b   : > { %v3632_v58 = vadd.f32 %v2759_v29, %v2758_v49 }
 0x14c   : > { %v2840_v50 = vpop.f32.mrf.mxu0  ;;  %v2761_v60 = vpop.f32.mrf.mxu1 }
 0x14e   : > { %v2841_v55 = vpop.f32.mrf.mxu0  ;;  %v2762_v0 = vpop.f32.mrf.mxu1 }
 0x14f   : > { %v3634_v5 = vadd.f32 %v2762_v0, %v2761_v60 }
 0x150   : > { %v3636_v8 = vpop.f32.mrf.mxu0  ;;  %v2764_v56 = vpop.f32.mrf.mxu1 }
 0x152   : > { %v3638_v11 = vpop.f32.mrf.mxu0  ;;  %v2765_v12 = vpop.f32.mrf.mxu1 }
 0x153   : > { %v3640_v22 = vadd.f32 %v2765_v12, %v2764_v56 }
 0x154   : > { %v2846_v37 = vpop.f32.mrf.mxu0  ;;  %v3642_v27 = vpop.f32.mrf.mxu1 }
 0x156   : > { %v2847_v33 = vpop.f32.mrf.mxu0  ;;  %v3644_v43 = vpop.f32.mrf.mxu1 }
 0x158   : > { %v3646_v49 = vpop.f32.mrf.mxu0  ;;  %v3648_v29 = vpop.f32.mrf.mxu1 }
 0x15a   : > { %v3650_v60 = vpop.f32.mrf.mxu0  ;;  %v3652_v0 = vpop.f32.mrf.mxu1 }
 0x15c   : > { %v3654_v16 = vpop.f32.mrf.mxu0  ;;  %v2773_v26 = vpop.f32.mrf.mxu1 }
 0x15e   : > { %v3656_v40 = vpop.f32.mrf.mxu0  ;;  %v2774_v56 = vpop.f32.mrf.mxu1 }
 0x15f   : > { %v3658_v12 = vadd.f32 %v2774_v56, %v2773_v26  ;;  %v2821_v26 = vadd.f32 %v3603_v46, %v3595_v39  ;;  %v3694_v39 = vld [vmem:[%s3927_s4] ss:$0 sm:$0xff]  ;;  %v2827_v46 = vadd.f32 %v3617_v63, %v3612_v25 }
 0x160   : > { %v3660_v18 = vpop.f32.mrf.mxu0  ;;  %v3662_v34 = vpop.f32.mrf.mxu1  ;;  %v3709_v25 = vld [vmem:[%s3928_s5] ss:$0 sm:$0xff] }
 0x161   : > { %3943 = vst [vmem:[#allocation15_spill] sm:$0xff] %v3658_v12  ;;  %3944 = vst [vmem:[#allocation16_spill] sm:$0xff] %v3660_v18 }
 0x162   : > { %v3664_v24 = vpop.f32.mrf.mxu0  ;;  %v3666_v13 = vpop.f32.mrf.mxu1 }
 0x163   : > { %3945 = vst [vmem:[#allocation17_spill] sm:$0xff] %v3664_v24  ;;  %3946 = vst [vmem:[#allocation18_spill] sm:$0xff] %v3666_v13 }
 0x164   : > { %v3668_v7 = vpop.f32.mrf.mxu0  ;;  %v3670_v44 = vpop.f32.mrf.mxu1 }
 0x165   : > { %3947 = vst [vmem:[#allocation19_spill] sm:$0xff] %v3668_v7  ;;  %3948 = vst [vmem:[#allocation20_spill] sm:$0xff] %v3670_v44  ;;  %v2824_v7 = vadd.f32 %v3610_v57, %v3605_v51  ;;  %v1680_v44 = vadd.f32 %v2821_v26, %v3540_v61  ;;  %v2836_v51 = vadd.f32 %v2835_v36, %v2834_v17 }
 0x166   : > { %v3672_v14 = vpop.f32.mrf.mxu0  ;;  %v3674_v52 = vpop.f32.mrf.mxu1  ;;  %v2839_v57 = vadd.f32 %v2838_v48, %v2837_v23 }
 0x167   : > { %3949 = vst [vmem:[#allocation21_spill] sm:$0xff] %v3672_v14  ;;  %3950 = vst [vmem:[#allocation22_spill] sm:$0xff] %v3674_v52  ;;  %v2842_v52 = vadd.f32 %v2841_v55, %v2840_v50  ;;  %v1683_v13 = vadd.f32 %v2824_v7, %v3546_v3 }
 0x168   : > { %v3678_v56 = vpop.f32.mrf.mxu0  ;;  %v3680_v38 = vpop.f32.mrf.mxu1 }
 0x169   : > { %3951 = vst [vmem:[#allocation23_spill] sm:$0xff] %v3678_v56  ;;  %3952 = vst [vmem:[#allocation24_spill] sm:$0xff] %v3680_v38  ;;  %v2833_v56 = vadd.f32 %v2832_v35, %v2831_v21  ;;  %v1699_v21 = vadd.f32 %v2836_v51, %v3569_v20  ;;  %v2845_v35 = vadd.f32 %v3638_v11, %v3636_v8 }
 0x16a   : > { %v3682_v12 = vpop.f32.mrf.mxu0  ;;  %v3684_v10 = vpop.f32.mrf.mxu1  ;;  %v2848_v20 = vadd.f32 %v2847_v33, %v2846_v37 }
 0x16b   : > { %3953 = vst [vmem:[#allocation25_spill] sm:$0xff] %v3682_v12  ;;  %3954 = vst [vmem:[#allocation26_spill] sm:$0xff] %v3684_v10  ;;  %v2830_v12 = vadd.f32 %v2829_v31, %v3619_v6  ;;  %v1688_v31 = vadd.f32 %v2827_v46, %v3552_v9 }
 0x16c   : > { %v3688_v24 = vpop.f32.mrf.mxu0  ;;  %v2969_v14 = vpop.f32.mrf.mxu1 }
 0x16d   : > { %3955 = vst [vmem:[#allocation27_spill] sm:$0xff] %v3688_v24  ;;  %v1841_v10 = vadd.f32 %v2969_v14, %v1680_v44  ;;  %v1696_v44 = vadd.f32 %v2833_v56, %v3563_v28 }
 0x16e   : > { %v3699_v38 = vpop.f32.mrf.mxu0  ;;  %v1832_v24 = vpop.f32.mrf.mxu1 }
 0x16f   : > { %v1956_v61 = vadd.f32 %v3694_v39, %v1841_v10  ;;  %v1833_v26 = vadd.f32 %v1832_v24, %v3590_v32  ;;  %v1691_v10 = vadd.f32 %v2830_v12, %v3558_v19  ;;  %v3718_v32 = vadd.f32 %v3526_v47, %v3630_v41 }
 0x170   : > { %v3703_v18 = vpop.f32.mrf.mxu0  ;;  %v2970_v14 = vpop.f32.mrf.mxu1  ;;  %v3723_v24 = vadd.f32 %v2839_v57, %v3575_v54  ;;  %v3734_v47 = vadd.f32 %v2842_v52, %v3581_v2  ;;  %v2772_v2 = vadd.f32 %v3652_v0, %v3648_v29  ;;  %v2851_v52 = vadd.f32 %v3650_v60, %v3646_v49 }
 0x171   : > { %v1844_v63 = vadd.f32 %v2970_v14, %v1683_v13  ;;  %v1954_v3 = vadd.f32 %v3694_v39, %v1833_v26  ;;  %v3727_v13 = vadd.f32 %v3532_v53, %v3632_v58  ;;  %v2027_v9 = vmul.f32 %v3709_v25, %v1956_v61 }
 0x172   : > { %v3711_v6 = vpop.f32.mrf.mxu0  ;;  %v1835_v7 = vpop.f32.mrf.mxu1  ;;  %vm1988_vm3 = vcmp.ge.f32.partialorder %v1956_v61, 0.0  ;;  %v2769_v53 = vadd.f32 %v3644_v43, %v3642_v27  ;;  %v3763_v49 = vadd.f32 %v3634_v5, %v3542_v62  ;;  %v3767_v29 = vadd.f32 %v3640_v22, %v3548_v4 }
 0x173   : > { %v1957_v19 = vadd.f32 %v3694_v39, %v1844_v63  ;;  %v1836_v54 = vadd.f32 %v1835_v7, %v3598_v42  ;;  %v2025_v48 = vmul.f32 %v3709_v25, %v1954_v3  ;;  %v2059_v50 = vsel %vm1988_vm3, %v1956_v61, %v2027_v9 }
 0x174   : > { %v3731_v28 = vpop.f32.mrf.mxu0  ;;  %v2973_v17 = vpop.f32.mrf.mxu1  ;;  %vm1986_vm5 = vcmp.ge.f32.partialorder %v1954_v3, 0.0  ;;  %v1712_v12 = vadd.f32 %v2845_v35, %v3587_v15  ;;  %v1715_v61 = vadd.f32 %v2848_v20, %v3593_v30  ;;  %v3776_v62 = vadd.f32 %v3538_v59, %v2769_v53  ;;  %v3956_v59 = vld [vmem:[#allocation18_spill] sm:$0xff]  ;;  %v3960_v35 = vld [vmem:[#allocation21_spill] sm:$0xff] }
 0x175   : > { %vm1989_vm4 = vcmp.ge.f32.partialorder %v1957_v19, 0.0  ;;  %v2028_v36 = vmul.f32 %v3709_v25, %v1957_v19  ;;  %v1857_v41 = vadd.f32 %v2973_v17, %v1696_v44  ;;  %v1955_v42 = vadd.f32 %v3694_v39, %v1836_v54 }
 0x176   : > { %v3742_v23 = vpop.f32.mrf.mxu0  ;;  %v1848_v58 = vpop.f32.mrf.mxu1  ;;  %v2057_v56 = vsel %vm1986_vm5, %v1954_v3, %v2025_v48  ;;  %v3779_v4 = vadd.f32 %v3544_v1, %v2772_v2  ;;  %v1720_v15 = vadd.f32 %v2851_v52, %v3601_v45  ;;  %v2854_v26 = vadd.f32 %v3656_v40, %v3654_v16  ;;  %v3957_v3 = vld [vmem:[#allocation16_spill] sm:$0xff]  ;;  %v3958_v1 = vld [vmem:[#allocation17_spill] sm:$0xff]  ;;  %v3961_v52 = vld [vmem:[#allocation3_spill] sm:$0xff] }
 0x177   : > { %v2060_v55 = vsel %vm1989_vm4, %v1957_v19, %v2028_v36  ;;  %v1849_v8 = vadd.f32 %v1848_v58, %v1688_v31  ;;  %vm1987_vm6 = vcmp.ge.f32.partialorder %v1955_v42, 0.0  ;;  %v2026_v27 = vmul.f32 %v3709_v25, %v1955_v42  ;;  %v3959_v19 = vld [vmem:[#allocation19_spill] sm:$0xff] }
 0x178   : > { %v3757_v11 = vpop.f32.mrf.mxu0  ;;  %v2577_v37 = vpack.c.bf16 %v2060_v55, %v2059_v50  ;;  %v1960_v33 = vadd.f32 %v3694_v39, %v1857_v41  ;;  %v2974_v43 = vpop.f32.mrf.mxu1  ;;  %v2778_v31 = vadd.f32 %v3956_v59, %v3662_v34  ;;  %v2857_v7 = vadd.f32 %v3958_v1, %v3957_v3  ;;  %v3962_v48 = vld [vmem:[#allocation15_spill] sm:$0xff]  ;;  %v3969_v1 = vld [vmem:[#allocation24_spill] sm:$0xff] }
 0x179   : > { %v1860_v60 = vadd.f32 %v2974_v43, %v1699_v21  ;;  %v2058_v46 = vsel %vm1987_vm6, %v1955_v42, %v2026_v27  ;;  %v1958_v51 = vadd.f32 %v3694_v39, %v1849_v8  ;;  %v2860_v20 = vadd.f32 %v3960_v35, %v3959_v19  ;;  %v3963_v55 = vld [vmem:[#allocation11_spill] sm:$0xff] }
 0x17a   : > { %v3769_v0 = vpop.f32.mrf.mxu0  ;;  %2641 = vst [vmem:[%s3755_s10 + $0x18] sm:$0xff] %v2577_v37   ;;  %v1851_v57 = vpop.f32.mrf.mxu1  ;;  %v2572_v5 = vpack.c.bf16 %v2058_v46, %v2057_v56  ;;  %v2031_v14 = vmul.f32 %v3709_v25, %v1960_v33  ;;  %vm1992_vm7 = vcmp.ge.f32.partialorder %v1960_v33, 0.0  ;;  %v3807_v42 = vadd.f32 %v3962_v48, %v3961_v52  ;;  %v3964_v37 = vld [vmem:[#allocation10_spill] sm:$0xff]  ;;  %v3965_v56 = vld [vmem:[#allocation5_spill] sm:$0xff] }
 0x17b   : > { %v1961_v63 = vadd.f32 %v3694_v39, %v1860_v60  ;;  %v1852_v44 = vadd.f32 %v1851_v57, %v1691_v10  ;;  %v2029_v45 = vmul.f32 %v3709_v25, %v1958_v51  ;;  %vm1990_vm9 = vcmp.ge.f32.partialorder %v1958_v51, 0.0  ;;  %v3966_v57 = vld [vmem:[#allocation20_spill] sm:$0xff] }
 0x17c   : > { %v3781_v22 = vpop.f32.mrf.mxu0  ;;  %v2977_v30 = vpop.f32.mrf.mxu1  ;;  %2640 = vst [vmem:[%s3755_s10 + $0x10] sm:$0xff] %v2572_v5   ;;  %v2063_v53 = vsel %vm1992_vm7, %v1960_v33, %v2031_v14  ;;  %v1728_v8 = vadd.f32 %v2857_v7, %v3963_v55  ;;  %v1723_v27 = vadd.f32 %v2854_v26, %v3964_v37  ;;  %v3813_v46 = vadd.f32 %v2778_v31, %v3965_v56  ;;  %v3967_v5 = vld [vmem:[#allocation22_spill] sm:$0xff] }
 0x17d   : > { %v1873_v21 = vadd.f32 %v2977_v30, %v1712_v12  ;;  %vm1993_vm8 = vcmp.ge.f32.partialorder %v1961_v63, 0.0  ;;  %v2032_v40 = vmul.f32 %v3709_v25, %v1961_v63  ;;  %v1959_v16 = vadd.f32 %v3694_v39, %v1852_v44  ;;  %v3970_v7 = vld [vmem:[#allocation26_spill] sm:$0xff] }
 0x17e   : > { %v3793_v9 = vpop.f32.mrf.mxu0  ;;  %v1864_v10 = vpop.f32.mrf.mxu1  ;;  %v2781_v14 = vadd.f32 %v3967_v5, %v3966_v57  ;;  %v2784_v31 = vadd.f32 %v3970_v7, %v3969_v1  ;;  %v3976_v57 = vld [vmem:[#allocation27_spill] sm:$0xff] }
 0x17f   : > { %v1964_v34 = vadd.f32 %v3694_v39, %v1873_v21  ;;  %v1865_v54 = vadd.f32 %v1864_v10, %v3723_v24  ;;  %v2064_v36 = vsel %vm1993_vm8, %v1961_v63, %v2032_v40  ;;  %vm1991_vm10 = vcmp.ge.f32.partialorder %v1959_v16, 0.0  ;;  %v3971_v21 = vld [vmem:[#allocation23_spill] sm:$0xff] }
 0x180   : > { %v3802_v17 = vpop.f32.mrf.mxu0  ;;  %v2030_v41 = vmul.f32 %v3709_v25, %v1959_v16  ;;  %v2978_v2 = vpop.f32.mrf.mxu1  ;;  %v2587_v58 = vpack.c.bf16 %v2064_v36, %v2063_v53  ;;  %v2061_v24 = vsel %vm1990_vm9, %v1958_v51, %v2029_v45  ;;  %v3972_v45 = vld [vmem:[#allocation25_spill] sm:$0xff]  ;;  %v2872_v53 = vadd.f32 %v3742_v23, %v3731_v28 }
 0x181   : > { %v1962_v33 = vadd.f32 %v3694_v39, %v1865_v54  ;;  %v1876_v60 = vadd.f32 %v2978_v2, %v1715_v61  ;;  %v2035_v44 = vmul.f32 %v3709_v25, %v1964_v34  ;;  %vm1996_vm11 = vcmp.ge.f32.partialorder %v1964_v34, 0.0  ;;  %v3968_v61 = vld [vmem:[#allocation12_spill] sm:$0xff] }
 0x182   : > { %v2880_v50 = vpop.f32.mrf.mxu0  ;;  %v2062_v43 = vsel %vm1991_vm10, %v1959_v16, %v2030_v41  ;;  %v1867_v12 = vpop.f32.mrf.mxu1  ;;  %2643 = vst [vmem:[%s3755_s10 + $0x28] sm:$0xff] %v2587_v58   ;;  %v1731_v3 = vadd.f32 %v2860_v20, %v3968_v61  ;;  %v2863_v40 = vadd.f32 %v3972_v45, %v3971_v21  ;;  %v2869_v16 = vadd.f32 %v3711_v6, %v3703_v18  ;;  %v3973_v58 = vld [vmem:[#allocation2_spill] sm:$0xff] }
 0x183   : > { %v2582_v63 = vpack.c.bf16 %v2062_v43, %v2061_v24  ;;  %v1965_v51 = vadd.f32 %v3694_v39, %v1876_v60  ;;  %v1868_v26 = vadd.f32 %v1867_v12, %v3734_v47  ;;  %v2033_v35 = vmul.f32 %v3709_v25, %v1962_v33 }
 0x184   : > { %v2882_v30 = vpop.f32.mrf.mxu0  ;;  %v2981_v59 = vpop.f32.mrf.mxu1  ;;  %v2067_v36 = vsel %vm1996_vm11, %v1964_v34, %v2035_v44  ;;  %vm1994_vm13 = vcmp.ge.f32.partialorder %v1962_v33, 0.0  ;;  %v3838_v55 = vadd.f32 %v3973_v58, %v2781_v14  ;;  %v3975_v34 = vld [vmem:[#allocation13_spill] sm:$0xff]  ;;  %v2866_v5 = vadd.f32 %v3699_v38, %v3976_v57 }
 0x185   : > { %2642 = vst [vmem:[%s3755_s10 + $0x20] sm:$0xff] %v2582_v63   ;;  %v1889_v10 = vadd.f32 %v2981_v59, %v1728_v8  ;;  %vm1997_vm12 = vcmp.ge.f32.partialorder %v1965_v51, 0.0  ;;  %v2036_v47 = vmul.f32 %v3709_v25, %v1965_v51  ;;  %v1963_v54 = vadd.f32 %v3694_v39, %v1868_v26  ;;  %v3974_v8 = vld [vmem:[#allocation4_spill] sm:$0xff] }
 0x186   : > { %v2883_v19 = vpop.f32.mrf.mxu0  ;;  %v1880_v20 = vpop.f32.mrf.mxu1  ;;  %v3841_v37 = vadd.f32 %v3974_v8, %v2784_v31  ;;  %v1736_v24 = vadd.f32 %v2863_v40, %v3975_v34  ;;  %v1744_v44 = vadd.f32 %v2869_v16, %v3718_v32  ;;  %v2875_v26 = vadd.f32 %v3769_v0, %v3757_v11 }
 0x187   : > { %v1881_v41 = vadd.f32 %v1880_v20, %v1720_v15  ;;  %v2068_v18 = vsel %vm1997_vm12, %v1965_v51, %v2036_v47  ;;  %vm1995_vm14 = vcmp.ge.f32.partialorder %v1963_v54, 0.0  ;;  %v2034_v6 = vmul.f32 %v3709_v25, %v1963_v54 }
 0x188   : > { %v2885_v2 = vpop.f32.mrf.mxu0  ;;  %v1968_v52 = vadd.f32 %v3694_v39, %v1889_v10  ;;  %v2982_v48 = vpop.f32.mrf.mxu1  ;;  %v2597_v28 = vpack.c.bf16 %v2068_v18, %v2067_v36  ;;  %v2065_v15 = vsel %vm1994_vm13, %v1962_v33, %v2033_v35  ;;  %v1747_v51 = vadd.f32 %v2872_v53, %v3727_v13 }
 0x189   : > { %v2066_v43 = vsel %vm1995_vm14, %v1963_v54, %v2034_v6  ;;  %v1966_v60 = vadd.f32 %v3694_v39, %v1881_v41  ;;  %v1892_v12 = vadd.f32 %v2982_v48, %v1731_v3  ;;  %v2878_v1 = vadd.f32 %v3793_v9, %v3781_v22  ;;  %v3977_v54 = vld [vmem:[#allocation14_spill] sm:$0xff] }
 0x18a   : > { %v2886_v23 = vpop.f32.mrf.mxu0  ;;  %v1883_v56 = vpop.f32.mrf.mxu1  ;;  %2645 = vst [vmem:[%s3755_s10 + $0x38] sm:$0xff] %v2597_v28   ;;  %v2592_v14 = vpack.c.bf16 %v2066_v43, %v2065_v15  ;;  %v2039_v33 = vmul.f32 %v3709_v25, %v1968_v52  ;;  %v2881_v38 = vadd.f32 %v2880_v50, %v3802_v17  ;;  %vm2000_vm15 = vcmp.ge.f32.partialorder %v1968_v52, 0.0 }
 0x18b   : > { %v1969_v59 = vadd.f32 %v3694_v39, %v1892_v12  ;;  %v1884_v61 = vadd.f32 %v1883_v56, %v1723_v27  ;;  %v2037_v13 = vmul.f32 %v3709_v25, %v1966_v60  ;;  %v2884_v21 = vadd.f32 %v2883_v19, %v2882_v30 }
 0x18c   : > { %v2888_v63 = vpop.f32.mrf.mxu0  ;;  %v2985_v3 = vpop.f32.mrf.mxu1  ;;  %2644 = vst [vmem:[%s3755_s10 + $0x30] sm:$0xff] %v2592_v14   ;;  %vm1998_vm1 = vcmp.ge.f32.partialorder %v1966_v60, 0.0  ;;  %v2071_v9 = vsel %vm2000_vm15, %v1968_v52, %v2039_v33  ;;  %v2887_v10 = vadd.f32 %v2886_v23, %v2885_v2  ;;  %v1739_v20 = vadd.f32 %v2866_v5, %v3977_v54 }
 0x18d   : > { %v1905_v7 = vadd.f32 %v2985_v3, %v1744_v44  ;;  %vm2001_vm0 = vcmp.ge.f32.partialorder %v1969_v59, 0.0  ;;  %v2040_v11 = vmul.f32 %v3709_v25, %v1969_v59  ;;  %v1967_v0 = vadd.f32 %v3694_v39, %v1884_v61 }
 0x18e   : > { %v2889_v32 = vpop.f32.mrf.mxu0  ;;  %v1896_v31 = vpop.f32.mrf.mxu1  ;;  %v2069_v30 = vsel %vm1998_vm1, %v1966_v60, %v2037_v13  ;;  %v1752_v41 = vadd.f32 %v2875_v26, %v3763_v49  ;;  %v1760_v48 = vadd.f32 %v2881_v38, %v3776_v62  ;;  %v1755_v2 = vadd.f32 %v2878_v1, %v3767_v29 }
 0x18f   : > { %v1972_v27 = vadd.f32 %v3694_v39, %v1905_v7  ;;  %v1897_v45 = vadd.f32 %v1896_v31, %v1736_v24  ;;  %v2072_v17 = vsel %vm2001_vm0, %v1969_v59, %v2040_v11  ;;  %vm1999_vm2 = vcmp.ge.f32.partialorder %v1967_v0, 0.0 }
 0x190   : > { %v2891_v22 = vpop.f32.mrf.mxu0  ;;  %v2038_v50 = vmul.f32 %v3709_v25, %v1967_v0  ;;  %v2986_v40 = vpop.f32.mrf.mxu1  ;;  %v2607_v16 = vpack.c.bf16 %v2072_v17, %v2071_v9  ;;  %v1763_v23 = vadd.f32 %v2884_v21, %v3779_v4  ;;  %v2890_v34 = vadd.f32 %v2889_v32, %v2888_v63  ;;  %v3979_v32 = vld [vmem:[#allocation6_spill] sm:$0xff] }
 0x191   : > { %v1970_v35 = vadd.f32 %v3694_v39, %v1897_v45  ;;  %v1908_v53 = vadd.f32 %v2986_v40, %v1747_v51  ;;  %v2043_v6 = vmul.f32 %v3709_v25, %v1972_v27  ;;  %vm2004_vm3 = vcmp.ge.f32.partialorder %v1972_v27, 0.0  ;;  %v3980_v40 = vld [vmem:[#allocation9_spill] sm:$0xff] }
 0x192   : > { %v2892_v47 = vpop.f32.mrf.mxu0  ;;  %v2070_v19 = vsel %vm1999_vm2, %v1967_v0, %v2038_v50  ;;  %v1899_v36 = vpop.f32.mrf.mxu1  ;;  %2647 = vst [vmem:[%s3755_s10 + $0x48] sm:$0xff] %v2607_v16   ;;  %v1768_v43 = vadd.f32 %v2887_v10, %v3807_v42  ;;  %v3978_v42 = vld [vmem:[#allocation8_spill] sm:$0xff]  ;;  %v1771_v3 = vadd.f32 %v2890_v34, %v3813_v46 }
 0x193   : > { %v2602_v18 = vpack.c.bf16 %v2070_v19, %v2069_v30  ;;  %v1973_v58 = vadd.f32 %v3694_v39, %v1908_v53  ;;  %v1900_v8 = vadd.f32 %v1899_v36, %v1739_v20  ;;  %v2041_v49 = vmul.f32 %v3709_v25, %v1970_v35 }
 0x194   : > { %v2894_v52 = vpop.f32.mrf.mxu0  ;;  %v2989_v28 = vpop.f32.mrf.mxu1  ;;  %vm2002_vm4 = vcmp.ge.f32.partialorder %v1970_v35, 0.0  ;;  %v2075_v12 = vsel %vm2004_vm3, %v1972_v27, %v2043_v6  ;;  %v2893_v56 = vadd.f32 %v2892_v47, %v2891_v22 }
 0x195   : > { %2646 = vst [vmem:[%s3755_s10 + $0x40] sm:$0xff] %v2602_v18   ;;  %v1921_v24 = vadd.f32 %v2989_v28, %v1760_v48  ;;  %vm2005_vm5 = vcmp.ge.f32.partialorder %v1973_v58, 0.0  ;;  %v2044_v62 = vmul.f32 %v3709_v25, %v1973_v58  ;;  %v1971_v29 = vadd.f32 %v3694_v39, %v1900_v8  ;;  %v3981_v18 = vld [vmem:[#allocation7_spill] sm:$0xff] }
 0x196   : > { %v2895_v15 = vpop.f32.mrf.mxu0  ;;  %v1912_v60 = vpop.f32.mrf.mxu1  ;;  %v2073_v26 = vsel %vm2002_vm4, %v1970_v35, %v2041_v49  ;;  %v1776_v45 = vadd.f32 %v2893_v56, %v3838_v55 }
 0x197   : > { %v1976_v4 = vadd.f32 %v3694_v39, %v1921_v24  ;;  %v1913_v57 = vadd.f32 %v1912_v60, %v1752_v41  ;;  %v2076_v14 = vsel %vm2005_vm5, %v1973_v58, %v2044_v62  ;;  %vm2003_vm6 = vcmp.ge.f32.partialorder %v1971_v29, 0.0 }
 0x198   : > { %v2965_v5 = vpop.f32.mrf.mxu0  ;;  %v2042_v63 = vmul.f32 %v3709_v25, %v1971_v29  ;;  %v2990_v51 = vpop.f32.mrf.mxu1  ;;  %v2617_v33 = vpack.c.bf16 %v2076_v14, %v2075_v12  ;;  %v2896_v17 = vadd.f32 %v2895_v15, %v2894_v52 }
 0x199   : > { %v1825_v44 = vadd.f32 %v2965_v5, %v3978_v42  ;;  %v1974_v59 = vadd.f32 %v3694_v39, %v1913_v57  ;;  %v1924_v7 = vadd.f32 %v2990_v51, %v1763_v23  ;;  %v2047_v31 = vmul.f32 %v3709_v25, %v1976_v4 }
 0x19a   : > { %v1816_v61 = vpop.f32.mrf.mxu0  ;;  %v2074_v1 = vsel %vm2003_vm6, %v1971_v29, %v2042_v63  ;;  %v1915_v11 = vpop.f32.mrf.mxu1  ;;  %2649 = vst [vmem:[%s3755_s10 + $0x58] sm:$0xff] %v2617_v33   ;;  %vm2008_vm7 = vcmp.ge.f32.partialorder %v1976_v4, 0.0  ;;  %v1779_v8 = vadd.f32 %v2896_v17, %v3841_v37 }
 0x19b   : > { %v1952_v38 = vadd.f32 %v3694_v39, %v1825_v44  ;;  %v1817_v13 = vadd.f32 %v1816_v61, %v3979_v32  ;;  %v2612_v0 = vpack.c.bf16 %v2074_v1, %v2073_v26  ;;  %v2045_v21 = vmul.f32 %v3709_v25, %v1974_v59 }
 0x19c   : > { %v2966_v27 = vpop.f32.mrf.mxu0  ;;  %vm2006_vm8 = vcmp.ge.f32.partialorder %v1974_v59, 0.0  ;;  %v1977_v22 = vadd.f32 %v3694_v39, %v1924_v7  ;;  %v2993_v9 = vpop.f32.mrf.mxu1  ;;  %v1916_v50 = vadd.f32 %v1915_v11, %v1755_v2  ;;  %v2079_v20 = vsel %vm2008_vm7, %v1976_v4, %v2047_v31 }
 0x19d   : > { %v2023_v46 = vmul.f32 %v3709_v25, %v1952_v38  ;;  %2648 = vst [vmem:[%s3755_s10 + $0x50] sm:$0xff] %v2612_v0   ;;  %vm1984_vm9 = vcmp.ge.f32.partialorder %v1952_v38, 0.0  ;;  %v1828_v16 = vadd.f32 %v2966_v27, %v3980_v40  ;;  %v1950_v47 = vadd.f32 %v3694_v39, %v1817_v13 }
 0x19e   : > { %v1819_v10 = vpop.f32.mrf.mxu0  ;;  %vm2009_vm10 = vcmp.ge.f32.partialorder %v1977_v22, 0.0  ;;  %v2048_v35 = vmul.f32 %v3709_v25, %v1977_v22  ;;  %v1937_v55 = vadd.f32 %v2993_v9, %v1776_v45  ;;  %v1928_v54 = vpop.f32.mrf.mxu1  ;;  %v2077_v30 = vsel %vm2006_vm8, %v1974_v59, %v2045_v21 }
 0x19f   : > { %v1975_v19 = vadd.f32 %v3694_v39, %v1916_v50  ;;  %v1953_v53 = vadd.f32 %v3694_v39, %v1828_v16  ;;  %v2055_v36 = vsel %vm1984_vm9, %v1952_v38, %v2023_v46  ;;  %v1820_v6 = vadd.f32 %v1819_v10, %v3981_v18 }
 0x1a0   : > { %v2080_v41 = vsel %vm2009_vm10, %v1977_v22, %v2048_v35  ;;  %v1929_v52 = vadd.f32 %v1928_v54, %v1768_v43  ;;  %v2994_v48 = vpop.f32.mrf.mxu1  ;;  %v2021_v28 = vmul.f32 %v3709_v25, %v1950_v47  ;;  %v1980_v34 = vadd.f32 %v3694_v39, %v1937_v55 }
 0x1a1   : > { %v2627_v2 = vpack.c.bf16 %v2080_v41, %v2079_v20  ;;  %vm2007_vm11 = vcmp.ge.f32.partialorder %v1975_v19, 0.0  ;;  %v2046_v58 = vmul.f32 %v3709_v25, %v1975_v19  ;;  %vm1985_vm12 = vcmp.ge.f32.partialorder %v1953_v53, 0.0 }
 0x1a2   : > { %v2024_v23 = vmul.f32 %v3709_v25, %v1953_v53  ;;  %v1931_v49 = vpop.f32.mrf.mxu1  ;;  %v1951_v15 = vadd.f32 %v3694_v39, %v1820_v6  ;;  %v1978_v43 = vadd.f32 %v3694_v39, %v1929_v52  ;;  %v1940_v62 = vadd.f32 %v2994_v48, %v1779_v8 }
 0x1a3   : > { %2651 = vst [vmem:[%s3755_s10 + $0x68] sm:$0xff] %v2627_v2   ;;  %v2078_v24 = vsel %vm2007_vm11, %v1975_v19, %v2046_v58  ;;  %vm1982_vm13 = vcmp.ge.f32.partialorder %v1950_v47, 0.0  ;;  %v1932_v60 = vadd.f32 %v1931_v49, %v1771_v3  ;;  %v2051_v4 = vmul.f32 %v3709_v25, %v1980_v34 }
 0x1a4   : > { %v2622_v29 = vpack.c.bf16 %v2078_v24, %v2077_v30  ;;  %v2056_v37 = vsel %vm1985_vm12, %v1953_v53, %v2024_v23  ;;  %vm1983_vm14 = vcmp.ge.f32.partialorder %v1951_v15, 0.0  ;;  %v2022_v56 = vmul.f32 %v3709_v25, %v1951_v15 }
 0x1a5   : > { %v2567_v12 = vpack.c.bf16 %v2056_v37, %v2055_v36  ;;  %v1981_v57 = vadd.f32 %v3694_v39, %v1940_v62  ;;  %v1979_v5 = vadd.f32 %v3694_v39, %v1932_v60  ;;  %v2053_v14 = vsel %vm1982_vm13, %v1950_v47, %v2021_v28 }
 0x1a6   : > { %2650 = vst [vmem:[%s3755_s10 + $0x60] sm:$0xff] %v2622_v29   ;;  %vm2012_vm15 = vcmp.ge.f32.partialorder %v1980_v34, 0.0  ;;  %v2054_v63 = vsel %vm1983_vm14, %v1951_v15, %v2022_v56  ;;  %v2049_v42 = vmul.f32 %v3709_v25, %v1978_v43  ;;  %vm2010_vm0 = vcmp.ge.f32.partialorder %v1978_v43, 0.0 }
 0x1a7   : > { %2639 = vst [vmem:[%s3755_s10 + $0x8] sm:$0xff] %v2567_v12   ;;  %v2562_v44 = vpack.c.bf16 %v2054_v63, %v2053_v14  ;;  %vm2013_vm1 = vcmp.ge.f32.partialorder %v1981_v57, 0.0  ;;  %v2052_v51 = vmul.f32 %v3709_v25, %v1981_v57  ;;  %vm2011_vm2 = vcmp.ge.f32.partialorder %v1979_v5, 0.0 }
 0x1a8   : > { %v2050_v26 = vmul.f32 %v3709_v25, %v1979_v5  ;;  %v2083_v33 = vsel %vm2012_vm15, %v1980_v34, %v2051_v4  ;;  %v2081_v39 = vsel %vm2010_vm0, %v1978_v43, %v2049_v42 }
 0x1a9   : > { %2563 = vst [vmem:[%s3755_s10] sm:$0xff] %v2562_v44   ;;  %v2084_v59 = vsel %vm2013_vm1, %v1981_v57, %v2052_v51 }
 0x1aa   : > { %v2637_v61 = vpack.c.bf16 %v2084_v59, %v2083_v33  ;;  %v2082_v3 = vsel %vm2011_vm2, %v1979_v5, %v2050_v26 }
 0x1ab   : > { %v2632_v1 = vpack.c.bf16 %v2082_v3, %v2081_v39 }
 0x1ac   : > { %2653 = vst [vmem:[%s3755_s10 + $0x78] sm:$0xff] %v2637_v61  }
 0x1ad   : > { %2652 = vst [vmem:[%s3755_s10 + $0x70] sm:$0xff] %v2632_v1  }
 0x1ae PF: > { %s16_s21 = sadd.s32 1, %s3186_s21  }
 0x1af   : > { %p13_p4 = scmp.ge.s32.totalorder %s16_s21, 4  }
 0x1b1   :  { %15 = sbr.rel (!%p13_p4) target bundleno = 1 (0x1), region = 77 }

// kernel: gen_forward.46
= control target key start
LH: loop header
LB: loop body
LE: loop exit
PB: predicated region body
PF: predicated region fallthrough
CT: control target
= control target key end

     0   :  { %s2953_s15 = smov 0   ;;  %s2955_s16 = smov 0   ;;  %s3519_s0 = inlined_call_operand.vmem [shape: bf16[512,576], index: 0, kind: input, shape index: {}]   ;;  %s3520_s1 = inlined_call_operand.vmem [shape: bf16[576,128], index: 1, kind: input, shape index: {}]   ;;  %s3521_s2 = inlined_call_operand.vmem [shape: f32[1,128], index: 2, kind: input, shape index: {}]   ;;  %s3522_s3 = inlined_call_operand.vmem [shape: f32[1,128], index: 3, kind: input, shape index: {}]   ;;  %s3523_s4 = inlined_call_operand.vmem [shape: bf16[512,128], index: 4, kind: output, shape index: {}]  }
   0x1   :  { %s2957_s17 = smov 0  }
   0x2 LB: > { %s26_s18 = sadd.s32 1, %s2922_s16  ;;  %p2131_p0 = scmp.ge.s32.totalorder %s2926_s17, 1  ;;  %s2926_s17 = sphi %s2957_s17, %s14_s17   ;;  %s2922_s16 = sphi %s2955_s16, %s3561_s16   ;;  %s2918_s15 = sphi %s2953_s15, %s3560_s15  }
   0x3   : > { %p28_p1 = scmp.ge.s32.totalorder %s26_s18, 2  ;;  %p194_p2 = scmp.lt.s32.totalorder %s2926_s17, 3 }
   0x5   : > { %s3563_s18 = smov (%p28_p1, %s26_s18), 0  ;;  %p195_p3 = pnand %p2131_p0, %p194_p2 }
   0x7   : > { %198 = sbr.rel (%p195_p3) target bundleno = 410 (0x19a), region = 36 }
   0xc   : > { %v2756_v0 = vld [vmem:[%s3520_s1 + $0x78] sm:$0xff]   ;;  %s2132_s21 = sshll.u32 %s2918_s15, 5  ;;  %v2758_v2 = vld [vmem:[%s3520_s1 + $0x70] sm:$0xff]   ;;  %v2760_v4 = vld [vmem:[%s3520_s1 + $0x68] sm:$0xff]   ;;  %vm1107_vm0 = vcmask 523264  }
   0xd   : > { %v2757_v1 = vld [vmem:[%s3520_s1 + $0x38] sm:$0xff]   ;;  %2431 = vmatprep.subr.bf16.mxu0 %v2756_v0  ;;  %2715 = vmatprep.subr.bf16.mxu1 %v2756_v0  ;;  %p232_p4 = scmp.lt.s32.totalorder %s2132_s21, 63  ;;  %v2759_v3 = vld [vmem:[%s3520_s1 + $0x30] sm:$0xff]   ;;  %v2761_v5 = vld [vmem:[%s3520_s1 + $0x28] sm:$0xff]  }
   0xe   : > { %2432 = vmatpush3.bf16.msra.mxu0 %v2757_v1  ;;  %2723 = vmatpush3.bf16.msra.mxu1 %v2757_v1  ;;  %v2762_v6 = vld [vmem:[%s3520_s1 + $0x60] sm:$0xff]   ;;  %v2764_v8 = vld [vmem:[%s3520_s1 + $0x58] sm:$0xff]   ;;  %v2766_v10 = vld [vmem:[%s3520_s1 + $0x50] sm:$0xff]  }
   0xf   : > { %2433 = vmatprep.subr.bf16.mxu0 %v2758_v2  ;;  %2716 = vmatprep.subr.bf16.mxu1 %v2758_v2  ;;  %s3565_s21 = smov (!%p232_p4, %s2132_s21), 63  ;;  %v2763_v7 = vld [vmem:[%s3520_s1 + $0x20] sm:$0xff]   ;;  %v2765_v9 = vld [vmem:[%s3520_s1 + $0x18] sm:$0xff]   ;;  %v2767_v13 = vld [vmem:[%s3520_s1 + $0x10] sm:$0xff]  }
  0x10   : > { %s2731_s8 = smul.u32 20, %s3565_s21  ;;  %v2768_v14 = vld [vmem:[%s3520_s1 + $0x48] sm:$0xff]   ;;  %v2770_v16 = vld [vmem:[%s3520_s1 + $0x40] sm:$0xff]   ;;  %v2778_v18 = vld [vmem:[%s3520_s1 + $0xf8] sm:$0xff]   ;;  %s2135_s9 = sshll.u32 %s3565_s21, 2 }
  0x11   : > { %v2769_v15 = vld [vmem:[%s3520_s1 + $0x8] sm:$0xff]   ;;  %v2771_v17 = vld [vmem:[%s3520_s1] sm:$0xff]   ;;  %v2781_v19 = vld [vmem:[%s3520_s1 + $0x118] sm:$0xff]   ;;  %s3351_s11 = scalar_lea.vmem %s3523_s4, %s2135_s9 }
  0x12   : > { %2434 = vmatpush3.bf16.msra.mxu0 %v2759_v3  ;;  %2724 = vmatpush3.bf16.msra.mxu1 %v2759_v3  ;;  %s3004_s15 = scalar_lea.vmem %s3519_s0, %s2731_s8  ;;  %v2779_v22 = vld [vmem:[%s3520_s1 + $0xb8] sm:$0xff]   ;;  %v2780_v23 = vld [vmem:[%s3520_s1 + $0xf0] sm:$0xff]   ;;  %v2789_v28 = vld [vmem:[%s3520_s1 + $0xe8] sm:$0xff]  }
  0x13   : > { %2435 = vmatprep.subr.bf16.mxu0 %v2760_v4  ;;  %2717 = vmatprep.subr.bf16.mxu1 %v2760_v4  ;;  %v2774_v11 = vld [vmem:[%s3004_s15 + $0x4] ss:$20 sps:$4 sm:$0xff]   ;;  %v2772_v20 = vld [vmem:[%s3004_s15] ss:$20 sps:$4 sm:$0xff]   ;;  %v2787_v27 = vld [vmem:[%s3004_s15 + $0x28] ss:$20 sps:$4 sm:$0xff]  }
  0x14   : > { %v2777_v12 = vld [vmem:[%s3004_s15 + $0x1e4] ss:$20 sps:$4 sm:$0xff]   ;;  %1188 = vmatprep.mubr.bf16.mxu0 %v2774_v11  ;;  %v2775_v21 = vld [vmem:[%s3004_s15 + $0x1e0] ss:$20 sps:$4 sm:$0xff]   ;;  %v2788_v29 = vld [vmem:[%s3004_s15 + $0x208] ss:$20 sps:$4 sm:$0xff]  }
  0x15   : > { %1284 = vmatprep.mubr.bf16.mxu1 %v2777_v12  ;;  %v2783_v24 = vld [vmem:[%s3004_s15 + $0x2c] ss:$20 sps:$4 sm:$0xff]   ;;  %v2782_v26 = vld [vmem:[%s3520_s1 + $0xb0] sm:$0xff]   ;;  %v2799_v37 = vld [vmem:[%s3520_s1 + $0xd8] sm:$0xff]  }
  0x16   : > { %2436 = vmatpush3.bf16.msra.mxu0 %v2761_v5  ;;  %2725 = vmatpush3.bf16.msra.mxu1 %v2761_v5  ;;  %v2785_v25 = vld [vmem:[%s3004_s15 + $0x20c] ss:$20 sps:$4 sm:$0xff]   ;;  %v2793_v32 = vld [vmem:[%s3004_s15 + $0x54] ss:$20 sps:$4 sm:$0xff]   ;;  %v2797_v36 = vld [vmem:[%s3004_s15 + $0x50] ss:$20 sps:$4 sm:$0xff]  }
  0x17   : > { %2437 = vmatprep.subr.bf16.mxu0 %v2762_v6  ;;  %2718 = vmatprep.subr.bf16.mxu1 %v2762_v6  ;;  %v2790_v30 = vld [vmem:[%s3520_s1 + $0xa8] sm:$0xff]   ;;  %v2791_v31 = vld [vmem:[%s3520_s1 + $0xe0] sm:$0xff]   ;;  %v2812_v35 = vld [vmem:[%s3520_s1 + $0x110] sm:$0xff]  }
  0x18   : > { %v2795_v33 = vld [vmem:[%s3004_s15 + $0x234] ss:$20 sps:$4 sm:$0xff]   ;;  %v2792_v34 = vld [vmem:[%s3520_s1 + $0xa0] sm:$0xff]   ;;  %v2800_v39 = vld [vmem:[%s3520_s1 + $0x98] sm:$0xff]  }
  0x19   : > { %v2798_v38 = vld [vmem:[%s3004_s15 + $0x230] ss:$20 sps:$4 sm:$0xff]   ;;  %v2807_v44 = vld [vmem:[%s3004_s15 + $0x78] ss:$20 sps:$4 sm:$0xff]   ;;  %v2816_v53 = vld [vmem:[%s3004_s15 + $0x8] ss:$20 sps:$4 sm:$0xff]  }
  0x1a   : > { %2438 = vmatpush3.bf16.msra.mxu0 %v2763_v7  ;;  %2726 = vmatpush3.bf16.msra.mxu1 %v2763_v7  ;;  %v2801_v40 = vld [vmem:[%s3520_s1 + $0xd0] sm:$0xff]   ;;  %v2808_v45 = vld [vmem:[%s3004_s15 + $0x258] ss:$20 sps:$4 sm:$0xff]   ;;  %v2811_v49 = vld [vmem:[%s3520_s1 + $0xc0] sm:$0xff]  }
  0x1b   : > { %2439 = vmatprep.subr.bf16.mxu0 %v2764_v8  ;;  %2719 = vmatprep.subr.bf16.mxu1 %v2764_v8  ;;  %v2803_v41 = vld [vmem:[%s3004_s15 + $0x7c] ss:$20 sps:$4 sm:$0xff]   ;;  %v2809_v46 = vld [vmem:[%s3520_s1 + $0xc8] sm:$0xff]   ;;  %v2814_v50 = vld [vmem:[%s3004_s15 + $0xa4] ss:$20 sps:$4 sm:$0xff]  }
  0x1c   : > { %v2805_v42 = vld [vmem:[%s3004_s15 + $0x25c] ss:$20 sps:$4 sm:$0xff]   ;;  %v2832_v47 = vld [vmem:[%s3520_s1 + $0x108] sm:$0xff]   ;;  %v2813_v52 = vld [vmem:[%s3520_s1 + $0x80] sm:$0xff]  }
  0x1d   : > { %v2802_v43 = vld [vmem:[%s3520_s1 + $0x90] sm:$0xff]   ;;  %v2810_v48 = vld [vmem:[%s3520_s1 + $0x88] sm:$0xff]   ;;  %v2851_v56 = vld [vmem:[%s3520_s1 + $0x100] sm:$0xff]  }
  0x1e   : > { %2440 = vmatpush3.bf16.msra.mxu0 %v2765_v9  ;;  %2727 = vmatpush3.bf16.msra.mxu1 %v2765_v9  ;;  %v2818_v51 = vld [vmem:[%s3004_s15 + $0xc] ss:$20 sps:$4 sm:$0xff]   ;;  %v2822_v57 = vld [vmem:[%s3004_s15 + $0x34] ss:$20 sps:$4 sm:$0xff]   ;;  %v2825_v59 = vld [vmem:[%s3004_s15 + $0x30] ss:$20 sps:$4 sm:$0xff]  }
  0x1f   : > { %2441 = vmatprep.subr.bf16.mxu0 %v2766_v10  ;;  %2720 = vmatprep.subr.bf16.mxu1 %v2766_v10  ;;  %v2819_v54 = vld [vmem:[%s3004_s15 + $0xa0] ss:$20 sps:$4 sm:$0xff]   ;;  %v2824_v58 = vld [vmem:[%s3004_s15 + $0xc8] ss:$20 sps:$4 sm:$0xff]   ;;  %v2830_v62 = vld [vmem:[%s3004_s15 + $0xf0] ss:$20 sps:$4 sm:$0xff]  }
  0x20   : > { %v2820_v55 = vld [vmem:[%s3004_s15 + $0xcc] ss:$20 sps:$4 sm:$0xff]   ;;  %v2826_v60 = vld [vmem:[%s3004_s15 + $0xf4] ss:$20 sps:$4 sm:$0xff]   ;;  %v2828_v61 = vld [vmem:[%s3004_s15 + $0x5c] ss:$20 sps:$4 sm:$0xff]  }
  0x21   : > { %v2831_v63 = vld [vmem:[%s3004_s15 + $0x58] ss:$20 sps:$4 sm:$0xff]   ;;  %v2833_v0 = vld [vmem:[%s3004_s15 + $0x11c] ss:$20 sps:$4 sm:$0xff]   ;;  %v2838_v3 = vld [vmem:[%s3004_s15 + $0x80] ss:$20 sps:$4 sm:$0xff]  }
  0x22   : > { %2442 = vmatpush3.bf16.msra.mxu0 %v2767_v13  ;;  %2728 = vmatpush3.bf16.msra.mxu1 %v2767_v13  ;;  %v2835_v1 = vld [vmem:[%s3004_s15 + $0x84] ss:$20 sps:$4 sm:$0xff]   ;;  %v2841_v5 = vld [vmem:[%s3004_s15 + $0xac] ss:$20 sps:$4 sm:$0xff]   ;;  %v2844_v7 = vld [vmem:[%s3004_s15 + $0xa8] ss:$20 sps:$4 sm:$0xff]  }
  0x23   : > { %2443 = vmatprep.subr.bf16.mxu0 %v2768_v14  ;;  %2721 = vmatprep.subr.bf16.mxu1 %v2768_v14  ;;  %v2837_v2 = vld [vmem:[%s3004_s15 + $0x118] ss:$20 sps:$4 sm:$0xff]   ;;  %v2843_v6 = vld [vmem:[%s3004_s15 + $0x140] ss:$20 sps:$4 sm:$0xff]   ;;  %v2849_v10 = vld [vmem:[%s3004_s15 + $0x168] ss:$20 sps:$4 sm:$0xff]  }
  0x24   : > { %v2839_v4 = vld [vmem:[%s3004_s15 + $0x144] ss:$20 sps:$4 sm:$0xff]   ;;  %v2845_v8 = vld [vmem:[%s3004_s15 + $0x16c] ss:$20 sps:$4 sm:$0xff]   ;;  %v2847_v9 = vld [vmem:[%s3004_s15 + $0xd4] ss:$20 sps:$4 sm:$0xff]  }
  0x25   : > { %v2850_v11 = vld [vmem:[%s3004_s15 + $0xd0] ss:$20 sps:$4 sm:$0xff]   ;;  %v2852_v12 = vld [vmem:[%s3004_s15 + $0x194] ss:$20 sps:$4 sm:$0xff]  }
  0x26   : > { %2444 = vmatpush3.bf16.msra.mxu0 %v2769_v15  ;;  %2729 = vmatpush3.bf16.msra.mxu1 %v2769_v15  ;;  %v2854_v13 = vld [vmem:[%s3004_s15 + $0xfc] ss:$20 sps:$4 sm:$0xff]   ;;  %v2857_v15 = vld [vmem:[%s3004_s15 + $0xf8] ss:$20 sps:$4 sm:$0xff]  }
  0x27   : > { %2445 = vmatprep.subr.bf16.mxu0 %v2770_v16  ;;  %2722 = vmatprep.subr.bf16.mxu1 %v2770_v16  ;;  %v2856_v14 = vld [vmem:[%s3004_s15 + $0x190] ss:$20 sps:$4 sm:$0xff]  }
  0x28   : > { %v2858_v16 = vld [vmem:[%s3004_s15 + $0x1bc] ss:$20 sps:$4 sm:$0xff]  }
  0x2a   : > { %2446 = vmatpush3.bf16.msra.mxu0 %v2771_v17  ;;  %2730 = vmatpush3.bf16.msra.mxu1 %v2771_v17  ;;  %v2860_v17 = vld [vmem:[%s3004_s15 + $0x124] ss:$20 sps:$4 sm:$0xff]  }
  0x2b   : > { %2543 = vmatprep.subr.bf16.mxu1 %v2778_v18  ;;  %2675 = vmatprep.subr.bf16.mxu0 %v2781_v19  ;;  %v2862_v18 = vld [vmem:[%s3004_s15 + $0x1b8] ss:$20 sps:$4 sm:$0xff]  }
  0x2d   : > { %1189 = vmatmul.mubr.bf16.vlgmr.msra.gmra.mxu0 %v2772_v20  ;;  %1285 = vmatmul.mubr.bf16.vlgmr.msra.gmra.mxu1 %v2775_v21  ;;  %v2864_v20 = vld [vmem:[%s3004_s15 + $0x14c] ss:$20 sps:$4 sm:$0xff]   ;;  %v2866_v21 = vld [vmem:[%s3004_s15 + $0x10] ss:$20 sps:$4 sm:$0xff]  }
  0x2e   : > { %2544 = vmatpush3.bf16.msra.mxu1 %v2779_v22  ;;  %2676 = vmatpush3.bf16.msra.mxu0 %v2781_v19  ;;  %v2863_v19 = vld [vmem:[%s3004_s15 + $0x120] ss:$20 sps:$4 sm:$0xff]   ;;  %v2867_v22 = vld [vmem:[%s3004_s15 + $0x148] ss:$20 sps:$4 sm:$0xff]  }
  0x2f   : > { %2545 = vmatprep.subr.bf16.mxu1 %v2780_v23  ;;  %1196 = vmatprep.mubr.bf16.mxu0 %v2783_v24  ;;  %v2868_v23 = vld [vmem:[%s3004_s15 + $0x38] ss:$20 sps:$4 sm:$0xff]   ;;  %v2869_v24 = vld [vmem:[%s3004_s15 + $0x174] ss:$20 sps:$4 sm:$0xff]  }
  0x30   : > { %1292 = vmatprep.mubr.bf16.mxu1 %v2785_v25  ;;  %2677 = vmatprep.subr.bf16.mxu0 %v2812_v35  ;;  %v2871_v25 = vld [vmem:[%s3004_s15 + $0x60] ss:$20 sps:$4 sm:$0xff]  }
  0x32   : > { %2546 = vmatpush3.bf16.msra.mxu1 %v2782_v26  ;;  %2678 = vmatpush3.bf16.msra.mxu0 %v2812_v35  ;;  %v2872_v26 = vld [vmem:[%s3004_s15 + $0x170] ss:$20 sps:$4 sm:$0xff]   ;;  %v2883_v35 = vld [vmem:[%s3004_s15 + $0x128] ss:$20 sps:$4 sm:$0xff]  }
  0x33   : > { %2547 = vmatprep.subr.bf16.mxu1 %v2789_v28  ;;  %2679 = vmatprep.subr.bf16.mxu0 %v2832_v47  ;;  %v2874_v28 = vld [vmem:[%s3004_s15 + $0x19c] ss:$20 sps:$4 sm:$0xff]  }
  0x35   : > { %1197 = vmatmul.mubr.bf16.gmra.mxu0 %v2787_v27  ;;  %1293 = vmatmul.mubr.bf16.gmra.mxu1 %v2788_v29  ;;  %v2873_v27 = vld [vmem:[%s3004_s15 + $0x88] ss:$20 sps:$4 sm:$0xff]   ;;  %v2876_v29 = vld [vmem:[%s3004_s15 + $0xb0] ss:$20 sps:$4 sm:$0xff]  }
  0x36   : > { %2548 = vmatpush3.bf16.msra.mxu1 %v2790_v30  ;;  %1204 = vmatprep.mubr.bf16.mxu0 %v2793_v32  ;;  %v2877_v30 = vld [vmem:[%s3004_s15 + $0x198] ss:$20 sps:$4 sm:$0xff]  }
  0x37   : > { %2549 = vmatprep.subr.bf16.mxu1 %v2791_v31  ;;  %1300 = vmatprep.mubr.bf16.mxu1 %v2795_v33  ;;  %v2878_v31 = vld [vmem:[%s3004_s15 + $0xd8] ss:$20 sps:$4 sm:$0xff]   ;;  %v2881_v33 = vld [vmem:[%s3004_s15 + $0x100] ss:$20 sps:$4 sm:$0xff]  }
  0x38   : > { %2680 = vmatpush3.bf16.msra.mxu0 %v2832_v47  ;;  %v2879_v32 = vld [vmem:[%s3004_s15 + $0x1c4] ss:$20 sps:$4 sm:$0xff]  }
  0x39   : > { %2681 = vmatprep.subr.bf16.mxu0 %v2851_v56  ;;  %v2898_v47 = vld [vmem:[%s3004_s15 + $0x218] ss:$20 sps:$4 sm:$0xff]  }
  0x3a   : > { %2550 = vmatpush3.bf16.msra.mxu1 %v2792_v34  ;;  %v2882_v34 = vld [vmem:[%s3004_s15 + $0x1c0] ss:$20 sps:$4 sm:$0xff]  }
  0x3b   : > { %2551 = vmatprep.subr.bf16.mxu1 %v2799_v37  ;;  %v2886_v37 = vld [vmem:[%s3004_s15 + $0x150] ss:$20 sps:$4 sm:$0xff]  }
  0x3c   : > { %2682 = vmatpush3.bf16.msra.mxu0 %v2851_v56 }
  0x3d   : > { %1205 = vmatmul.mubr.bf16.gmra.mxu0 %v2797_v36  ;;  %1301 = vmatmul.mubr.bf16.gmra.mxu1 %v2798_v38  ;;  %v2884_v36 = vld [vmem:[%s3004_s15 + $0x1ec] ss:$20 sps:$4 sm:$0xff]   ;;  %v2887_v38 = vld [vmem:[%s3004_s15 + $0x1e8] ss:$20 sps:$4 sm:$0xff]  }
  0x3e   : > { %2552 = vmatpush3.bf16.msra.mxu1 %v2800_v39  ;;  %1212 = vmatprep.mubr.bf16.mxu0 %v2803_v41  ;;  %v2888_v39 = vld [vmem:[%s3004_s15 + $0x178] ss:$20 sps:$4 sm:$0xff]   ;;  %v2891_v41 = vld [vmem:[%s3004_s15 + $0x1a0] ss:$20 sps:$4 sm:$0xff]  }
  0x3f   : > { %2553 = vmatprep.subr.bf16.mxu1 %v2801_v40  ;;  %1308 = vmatprep.mubr.bf16.mxu1 %v2805_v42  ;;  %v2889_v40 = vld [vmem:[%s3004_s15 + $0x214] ss:$20 sps:$4 sm:$0xff]   ;;  %v2892_v42 = vld [vmem:[%s3004_s15 + $0x210] ss:$20 sps:$4 sm:$0xff]  }
  0x42   : > { %2554 = vmatpush3.bf16.msra.mxu1 %v2802_v43  ;;  %v2893_v43 = vld [vmem:[%s3004_s15 + $0x1c8] ss:$20 sps:$4 sm:$0xff]  }
  0x43   : > { %2555 = vmatprep.subr.bf16.mxu1 %v2809_v46  ;;  %v2897_v46 = vld [vmem:[%s3004_s15 + $0x238] ss:$20 sps:$4 sm:$0xff]  }
  0x45   : > { %1213 = vmatmul.mubr.bf16.gmra.mxu0 %v2807_v44  ;;  %1309 = vmatmul.mubr.bf16.gmra.mxu1 %v2808_v45  ;;  %v2894_v44 = vld [vmem:[%s3004_s15 + $0x23c] ss:$20 sps:$4 sm:$0xff]  }
  0x46   : > { %2556 = vmatpush3.bf16.msra.mxu1 %v2810_v48  ;;  %1220 = vmatprep.mubr.bf16.mxu0 %v2814_v50  ;;  %v2896_v45 = vld [vmem:[%s3004_s15 + $0x1f0] ss:$20 sps:$4 sm:$0xff]   ;;  %v2902_v50 = vld [vmem:[%s3004_s15 + $0x260] ss:$20 sps:$4 sm:$0xff]  }
  0x47   : > { %2557 = vmatprep.subr.bf16.mxu1 %v2811_v49  ;;  %1349 = vmatprep.mubr.bf16.mxu1 %v2818_v51  ;;  %v2899_v48 = vld [vmem:[%s3004_s15 + $0x264] ss:$20 sps:$4 sm:$0xff]   ;;  %v2901_v49 = vld [vmem:[%s3004_s15 + $0x240] ss:$20 sps:$4 sm:$0xff]   ;;  %v2903_v51 = vld [vmem:[%s3004_s15 + $0x268] ss:$20 sps:$4 sm:$0xff]  }
  0x4a   : > { %2558 = vmatpush3.bf16.msra.mxu1 %v2813_v52 }
  0x4d   : > { %1221 = vmatmul.mubr.bf16.gmra.mxu0 %v2819_v54  ;;  %1350 = vmatmul.mubr.bf16.vlgmr.msra.gmra.mxu1 %v2816_v53 }
  0x4e   : > { %1228 = vmatprep.mubr.bf16.mxu0 %v2820_v55  ;;  %1357 = vmatprep.mubr.bf16.mxu1 %v2822_v57 }
  0x55   : > { %1229 = vmatmul.mubr.bf16.gmra.mxu0 %v2824_v58  ;;  %1358 = vmatmul.mubr.bf16.gmra.mxu1 %v2825_v59 }
  0x56   : > { %1236 = vmatprep.mubr.bf16.mxu0 %v2826_v60  ;;  %1365 = vmatprep.mubr.bf16.mxu1 %v2828_v61 }
  0x5d   : > { %1237 = vmatmul.mubr.bf16.gmra.mxu0 %v2830_v62  ;;  %1366 = vmatmul.mubr.bf16.gmra.mxu1 %v2831_v63 }
  0x5e   : > { %1244 = vmatprep.mubr.bf16.mxu0 %v2833_v0  ;;  %1373 = vmatprep.mubr.bf16.mxu1 %v2835_v1 }
  0x65   : > { %1245 = vmatmul.mubr.bf16.gmra.mxu0 %v2837_v2  ;;  %1374 = vmatmul.mubr.bf16.gmra.mxu1 %v2838_v3 }
  0x66   : > { %1252 = vmatprep.mubr.bf16.mxu0 %v2839_v4  ;;  %1381 = vmatprep.mubr.bf16.mxu1 %v2841_v5 }
  0x6d   : > { %1253 = vmatmul.mubr.bf16.gmra.mxu0 %v2843_v6  ;;  %1382 = vmatmul.mubr.bf16.gmra.mxu1 %v2844_v7 }
  0x6e   : > { %1260 = vmatprep.mubr.bf16.mxu0 %v2845_v8  ;;  %1389 = vmatprep.mubr.bf16.mxu1 %v2847_v9 }
  0x75   : > { %1261 = vmatmul.mubr.bf16.gmra.mxu0 %v2849_v10  ;;  %1390 = vmatmul.mubr.bf16.gmra.mxu1 %v2850_v11 }
  0x76   : > { %1268 = vmatprep.mubr.bf16.mxu0 %v2852_v12  ;;  %1397 = vmatprep.mubr.bf16.mxu1 %v2854_v13 }
  0x7d   : > { %1269 = vmatmul.mubr.bf16.gmra.mxu0 %v2856_v14  ;;  %1398 = vmatmul.mubr.bf16.gmra.mxu1 %v2857_v15 }
  0x7e   : > { %1276 = vmatprep.mubr.bf16.mxu0 %v2858_v16  ;;  %1405 = vmatprep.mubr.bf16.mxu1 %v2860_v17 }
  0x85   : > { %1277 = vmatmul.mubr.bf16.gmra.mxu0 %v2862_v18  ;;  %1406 = vmatmul.mubr.bf16.gmra.mxu1 %v2863_v19 }
  0x86   : > { %1413 = vmatprep.mubr.bf16.mxu1 %v2864_v20  ;;  %2683 = vmatprep.mubr.msk.bf16.mxu0 %vm1107_vm0, %v2866_v21 }
  0x8d   : > { %1414 = vmatmul.mubr.bf16.gmra.mxu1 %v2867_v22  ;;  %2684 = vmatmul.mubr.msk.bf16.vlgmr.msra.gmra.mxu0 %vm1107_vm0, %v2868_v23 }
  0x8e   : > { %1421 = vmatprep.mubr.bf16.mxu1 %v2869_v24  ;;  %2687 = vmatprep.mubr.msk.bf16.mxu0 %vm1107_vm0, %v2871_v25 }
  0x95   : > { %1422 = vmatmul.mubr.bf16.gmra.mxu1 %v2872_v26  ;;  %2688 = vmatmul.mubr.msk.bf16.gmra.mxu0 %vm1107_vm0, %v2873_v27 }
  0x96   : > { %1429 = vmatprep.mubr.bf16.mxu1 %v2874_v28  ;;  %2691 = vmatprep.mubr.msk.bf16.mxu0 %vm1107_vm0, %v2876_v29 }
  0x9d   : > { %1430 = vmatmul.mubr.bf16.gmra.mxu1 %v2877_v30  ;;  %2692 = vmatmul.mubr.msk.bf16.gmra.mxu0 %vm1107_vm0, %v2878_v31 }
  0x9e   : > { %1437 = vmatprep.mubr.bf16.mxu1 %v2879_v32  ;;  %2695 = vmatprep.mubr.msk.bf16.mxu0 %vm1107_vm0, %v2881_v33 }
  0xa5   : > { %1438 = vmatmul.mubr.bf16.gmra.mxu1 %v2882_v34  ;;  %2696 = vmatmul.mubr.msk.bf16.gmra.mxu0 %vm1107_vm0, %v2883_v35 }
  0xa6   : > { %1445 = vmatprep.mubr.bf16.mxu1 %v2884_v36  ;;  %2699 = vmatprep.mubr.msk.bf16.mxu0 %vm1107_vm0, %v2886_v37 }
  0xad   : > { %1446 = vmatmul.mubr.bf16.gmra.mxu1 %v2887_v38  ;;  %2700 = vmatmul.mubr.msk.bf16.gmra.mxu0 %vm1107_vm0, %v2888_v39 }
  0xae   : > { %1453 = vmatprep.mubr.bf16.mxu1 %v2889_v40  ;;  %2703 = vmatprep.mubr.msk.bf16.mxu0 %vm1107_vm0, %v2891_v41 }
  0xb5   : > { %1454 = vmatmul.mubr.bf16.gmra.mxu1 %v2892_v42  ;;  %2704 = vmatmul.mubr.msk.bf16.gmra.mxu0 %vm1107_vm0, %v2893_v43 }
  0xb6   : > { %1461 = vmatprep.mubr.bf16.mxu1 %v2894_v44  ;;  %2707 = vmatprep.mubr.msk.bf16.mxu0 %vm1107_vm0, %v2896_v45 }
  0xbd   : > { %1462 = vmatmul.mubr.bf16.gmra.mxu1 %v2897_v46  ;;  %2708 = vmatmul.mubr.msk.bf16.gmra.mxu0 %vm1107_vm0, %v2898_v47 }
  0xbe   : > { %1469 = vmatprep.mubr.bf16.mxu1 %v2899_v48  ;;  %2711 = vmatprep.mubr.msk.bf16.mxu0 %vm1107_vm0, %v2901_v49 }
  0xc5   : > { %1470 = vmatmul.mubr.bf16.gmra.mxu1 %v2902_v50  ;;  %2712 = vmatmul.mubr.msk.bf16.gmra.mxu0 %vm1107_vm0, %v2903_v51 }
  0xed   : > { %v2447_v52 = vpop.f32.mrf.mxu0  ;;  %v2519_v53 = vpop.f32.mrf.mxu1 }
  0xef   : > { %v2448_v54 = vpop.f32.mrf.mxu0  ;;  %v2520_v55 = vpop.f32.mrf.mxu1 }
  0xf0   : > { %v2449_v56 = vadd.f32 %v2448_v54, %v2447_v52  ;;  %v3183_v57 = vadd.f32 %v2520_v55, %v2519_v53 }
  0xf1   : > { %v2450_v58 = vpop.f32.mrf.mxu0  ;;  %v2522_v59 = vpop.f32.mrf.mxu1 }
  0xf2   : > { %3524 = vst [vmem:[#allocation3_spill] sm:$0xff] %v3183_v57 }
  0xf3   : > { %v2451_v60 = vpop.f32.mrf.mxu0  ;;  %v2523_v61 = vpop.f32.mrf.mxu1 }
  0xf4   : > { %v3185_v62 = vadd.f32 %v2451_v60, %v2450_v58  ;;  %v3187_v63 = vadd.f32 %v2523_v61, %v2522_v59 }
  0xf5   : > { %v2453_v0 = vpop.f32.mrf.mxu0  ;;  %v2525_v1 = vpop.f32.mrf.mxu1 }
  0xf6   : > { %3525 = vst [vmem:[#allocation4_spill] sm:$0xff] %v3187_v63 }
  0xf7   : > { %v2454_v2 = vpop.f32.mrf.mxu0  ;;  %v2526_v3 = vpop.f32.mrf.mxu1 }
  0xf8   : > { %v3189_v4 = vadd.f32 %v2454_v2, %v2453_v0  ;;  %v3191_v5 = vadd.f32 %v2526_v3, %v2525_v1 }
  0xf9   : > { %v2456_v6 = vpop.f32.mrf.mxu0  ;;  %v2528_v7 = vpop.f32.mrf.mxu1 }
  0xfa   : > { %3526 = vst [vmem:[#allocation5_spill] sm:$0xff] %v3191_v5 }
  0xfb   : > { %v2457_v8 = vpop.f32.mrf.mxu0  ;;  %v2529_v9 = vpop.f32.mrf.mxu1 }
  0xfc   : > { %v3193_v10 = vadd.f32 %v2457_v8, %v2456_v6  ;;  %v3195_v11 = vadd.f32 %v2529_v9, %v2528_v7 }
  0xfd   : > { %v2459_v12 = vpop.f32.mrf.mxu0  ;;  %v2531_v13 = vpop.f32.mrf.mxu1 }
  0xfe   : > { %3527 = vst [vmem:[#allocation6_spill] sm:$0xff] %v3195_v11 }
  0xff   : > { %v2460_v14 = vpop.f32.mrf.mxu0  ;;  %v2532_v15 = vpop.f32.mrf.mxu1 }
 0x100   : > { %v3197_v16 = vadd.f32 %v2460_v14, %v2459_v12  ;;  %v3199_v17 = vadd.f32 %v2532_v15, %v2531_v13 }
 0x101   : > { %v2462_v18 = vpop.f32.mrf.mxu0  ;;  %v2534_v19 = vpop.f32.mrf.mxu1 }
 0x102   : > { %3528 = vst [vmem:[#allocation7_spill] sm:$0xff] %v3199_v17 }
 0x103   : > { %v2463_v20 = vpop.f32.mrf.mxu0  ;;  %v2535_v21 = vpop.f32.mrf.mxu1 }
 0x104   : > { %v3201_v22 = vadd.f32 %v2463_v20, %v2462_v18  ;;  %v3203_v23 = vadd.f32 %v2535_v21, %v2534_v19 }
 0x105   : > { %v2465_v24 = vpop.f32.mrf.mxu0  ;;  %v2537_v25 = vpop.f32.mrf.mxu1 }
 0x106   : > { %3529 = vst [vmem:[#allocation8_spill] sm:$0xff] %v3203_v23 }
 0x107   : > { %v2466_v26 = vpop.f32.mrf.mxu0  ;;  %v2538_v27 = vpop.f32.mrf.mxu1 }
 0x108   : > { %v3205_v28 = vadd.f32 %v2466_v26, %v2465_v24  ;;  %v3207_v29 = vadd.f32 %v2538_v27, %v2537_v25 }
 0x109   : > { %v2468_v30 = vpop.f32.mrf.mxu0  ;;  %v2540_v31 = vpop.f32.mrf.mxu1 }
 0x10a   : > { %3530 = vst [vmem:[#allocation9_spill] sm:$0xff] %v3207_v29 }
 0x10b   : > { %v2469_v32 = vpop.f32.mrf.mxu0  ;;  %v2541_v33 = vpop.f32.mrf.mxu1 }
 0x10c   : > { %v3209_v34 = vadd.f32 %v2469_v32, %v2468_v30  ;;  %v3211_v35 = vadd.f32 %v2541_v33, %v2540_v31 }
 0x10d   : > { %v2471_v36 = vpop.f32.mrf.mxu0  ;;  %v2559_v37 = vpop.f32.mrf.mxu1 }
 0x10e   : > { %3531 = vst [vmem:[#allocation10_spill] sm:$0xff] %v3211_v35 }
 0x10f   : > { %v2472_v38 = vpop.f32.mrf.mxu0  ;;  %v2560_v39 = vpop.f32.mrf.mxu1 }
 0x110   : > { %v3213_v40 = vadd.f32 %v2472_v38, %v2471_v36  ;;  %v2561_v41 = vadd.f32 %v2560_v39, %v2559_v37 }
 0x111   : > { %v2474_v42 = vpop.f32.mrf.mxu0  ;;  %v3215_v43 = vpop.f32.mrf.mxu1 }
 0x112   : > { %v3217_v44 = vadd.f32 %v2561_v41, %v2449_v56 }
 0x113   : > { %v2475_v45 = vpop.f32.mrf.mxu0  ;;  %v3219_v46 = vpop.f32.mrf.mxu1 }
 0x114   : > { %v3221_v47 = vadd.f32 %v2475_v45, %v2474_v42 }
 0x115   : > { %v2477_v48 = vpop.f32.mrf.mxu0  ;;  %v2565_v49 = vpop.f32.mrf.mxu1 }
 0x117   : > { %v2478_v50 = vpop.f32.mrf.mxu0  ;;  %v2566_v51 = vpop.f32.mrf.mxu1 }
 0x118   : > { %v3223_v52 = vadd.f32 %v2478_v50, %v2477_v48  ;;  %v2567_v17 = vadd.f32 %v2566_v51, %v2565_v49  ;;  %v2564_v51 = vadd.f32 %v3219_v46, %v3215_v43 }
 0x119   : > { %v2480_v53 = vpop.f32.mrf.mxu0  ;;  %v2568_v54 = vpop.f32.mrf.mxu1 }
 0x11b   : > { %v2481_v55 = vpop.f32.mrf.mxu0  ;;  %v2569_v58 = vpop.f32.mrf.mxu1 }
 0x11c   : > { %v3225_v59 = vadd.f32 %v2481_v55, %v2480_v53 }
 0x11d   : > { %v2483_v60 = vpop.f32.mrf.mxu0  ;;  %v3227_v56 = vpop.f32.mrf.mxu1 }
 0x11f   : > { %v2484_v61 = vpop.f32.mrf.mxu0  ;;  %v3229_v0 = vpop.f32.mrf.mxu1 }
 0x120   : > { %v3231_v1 = vadd.f32 %v2484_v61, %v2483_v60 }
 0x121   : > { %v2486_v2 = vpop.f32.mrf.mxu0  ;;  %v3233_v3 = vpop.f32.mrf.mxu1 }
 0x123   : > { %v2487_v6 = vpop.f32.mrf.mxu0  ;;  %v3235_v7 = vpop.f32.mrf.mxu1 }
 0x124   : > { %v3237_v8 = vadd.f32 %v2487_v6, %v2486_v2 }
 0x125   : > { %v3239_v9 = vpop.f32.mrf.mxu0  ;;  %v2577_v12 = vpop.f32.mrf.mxu1 }
 0x126   : > { %3532 = vst [vmem:[#allocation11_spill] sm:$0xff] %v3237_v8  ;;  %v1355_v8 = vadd.f32 %v2564_v51, %v3185_v62 }
 0x127   : > { %v3241_v13 = vpop.f32.mrf.mxu0  ;;  %v2578_v14 = vpop.f32.mrf.mxu1 }
 0x129   : > { %v3243_v15 = vpop.f32.mrf.mxu0  ;;  %v2580_v18 = vpop.f32.mrf.mxu1 }
 0x12b   : > { %v3245_v19 = vpop.f32.mrf.mxu0  ;;  %v2581_v20 = vpop.f32.mrf.mxu1 }
 0x12d   : > { %v2495_v21 = vpop.f32.mrf.mxu0  ;;  %v3247_v24 = vpop.f32.mrf.mxu1 }
 0x12f   : > { %v2496_v25 = vpop.f32.mrf.mxu0  ;;  %v3249_v26 = vpop.f32.mrf.mxu1 }
 0x130   : > { %v3251_v27 = vadd.f32 %v2496_v25, %v2495_v21 }
 0x131   : > { %v3253_v30 = vpop.f32.mrf.mxu0  ;;  %v3255_v31 = vpop.f32.mrf.mxu1 }
 0x132   : > { %3533 = vst [vmem:[#allocation12_spill] sm:$0xff] %v3251_v27 }
 0x133   : > { %v3257_v32 = vpop.f32.mrf.mxu0  ;;  %v3259_v33 = vpop.f32.mrf.mxu1 }
 0x135   : > { %v3261_v36 = vpop.f32.mrf.mxu0  ;;  %v2589_v37 = vpop.f32.mrf.mxu1 }
 0x137   : > { %v3263_v38 = vpop.f32.mrf.mxu0  ;;  %v2590_v39 = vpop.f32.mrf.mxu1 }
 0x139   : > { %v3265_v41 = vpop.f32.mrf.mxu0  ;;  %v3267_v42 = vpop.f32.mrf.mxu1 }
 0x13b   : > { %v3269_v45 = vpop.f32.mrf.mxu0  ;;  %v3271_v48 = vpop.f32.mrf.mxu1 }
 0x13d   : > { %v3273_v50 = vpop.f32.mrf.mxu0  ;;  %v3275_v53 = vpop.f32.mrf.mxu1 }
 0x13e   : > { %3534 = vst [vmem:[#allocation13_spill] sm:$0xff] %v3273_v50 }
 0x13f   : > { %v3277_v55 = vpop.f32.mrf.mxu0  ;;  %v3279_v60 = vpop.f32.mrf.mxu1 }
 0x140   : > { %3535 = vst [vmem:[#allocation14_spill] sm:$0xff] %v3277_v55  ;;  %v2579_v55 = vadd.f32 %v2578_v14, %v2577_v12 }
 0x141   : > { %v3281_v61 = vpop.f32.mrf.mxu0  ;;  %v3283_v2 = vpop.f32.mrf.mxu1 }
 0x142   : > { %3536 = vst [vmem:[#allocation15_spill] sm:$0xff] %v3281_v61  ;;  %v1360_v61 = vadd.f32 %v2567_v17, %v3189_v4  ;;  %v3321_v4 = vld [vmem:[%s3522_s3] ss:$0 sm:$0xff] }
 0x143   : > { %v3285_v6 = vpop.f32.mrf.mxu0  ;;  %v3287_v21 = vpop.f32.mrf.mxu1 }
 0x144   : > { %3537 = vst [vmem:[#allocation16_spill] sm:$0xff] %v3285_v6  ;;  %v2570_v6 = vadd.f32 %v2569_v58, %v2568_v54 }
 0x145   : > { %v3289_v25 = vpop.f32.mrf.mxu0  ;;  %v3291_v35 = vpop.f32.mrf.mxu1 }
 0x146   : > { %3538 = vst [vmem:[#allocation17_spill] sm:$0xff] %v3289_v25  ;;  %v1363_v58 = vadd.f32 %v2570_v6, %v3193_v10 }
 0x147   : > { %v3293_v23 = vpop.f32.mrf.mxu0  ;;  %v3295_v29 = vpop.f32.mrf.mxu1 }
 0x148   : > { %3539 = vst [vmem:[#allocation18_spill] sm:$0xff] %v3293_v23  ;;  %v3311_v23 = vld [vmem:[%s3521_s2] ss:$0 sm:$0xff] }
 0x149   : > { %v3297_v63 = vpop.f32.mrf.mxu0  ;;  %v3299_v11 = vpop.f32.mrf.mxu1 }
 0x14a   : > { %3540 = vst [vmem:[#allocation19_spill] sm:$0xff] %v3297_v63 }
 0x14b   : > { %v3301_v57 = vpop.f32.mrf.mxu0  ;;  %v3303_v5 = vpop.f32.mrf.mxu1 }
 0x14c   : > { %3541 = vst [vmem:[#allocation20_spill] sm:$0xff] %v3301_v57 }
 0x14d   : > { %v3306_v27 = vpop.f32.mrf.mxu1  ;;  %v2685_v25 = vpop.f32.mrf.mxu0 }
 0x14e   : > { %v1521_v49 = vadd.f32 %v2685_v25, %v1360_v61  ;;  %v2573_v61 = vadd.f32 %v3229_v0, %v3227_v56  ;;  %v2582_v25 = vadd.f32 %v2581_v20, %v2580_v18  ;;  %v2576_v56 = vadd.f32 %v3235_v7, %v3233_v3 }
 0x14f   : > { %v3315_v63 = vpop.f32.mrf.mxu1  ;;  %v1512_v57 = vpop.f32.mrf.mxu0 }
 0x150   : > { %v1747_v54 = vadd.f32 %v3311_v23, %v1521_v49  ;;  %v1513_v17 = vadd.f32 %v1512_v57, %v3217_v44  ;;  %v1376_v44 = vadd.f32 %v2579_v55, %v3205_v28  ;;  %v1368_v6 = vadd.f32 %v2573_v61, %v3197_v16 }
 0x151   : > { %v3327_v43 = vpop.f32.mrf.mxu1  ;;  %v2686_v46 = vpop.f32.mrf.mxu0  ;;  %v1379_v51 = vadd.f32 %v2582_v25, %v3209_v34 }
 0x152   : > { %v1524_v12 = vadd.f32 %v2686_v46, %v1363_v58  ;;  %v1818_v14 = vmul.f32 %v3321_v4, %v1747_v54  ;;  %v1745_v49 = vadd.f32 %v3311_v23, %v1513_v17  ;;  %vm1779_vm1 = vcmp.ge.f32.partialorder %v1747_v54, 0.0 }
 0x153   : > { %v3331_v50 = vpop.f32.mrf.mxu1  ;;  %v1515_v57 = vpop.f32.mrf.mxu0  ;;  %v2591_v58 = vadd.f32 %v2590_v39, %v2589_v37  ;;  %v2585_v37 = vadd.f32 %v3249_v26, %v3247_v24 }
 0x154   : > { %v1748_v10 = vadd.f32 %v3311_v23, %v1524_v12  ;;  %v1516_v0 = vadd.f32 %v1515_v57, %v1355_v8  ;;  %v1850_v46 = vsel %vm1779_vm1, %v1747_v54, %v1818_v14  ;;  %v1816_v28 = vmul.f32 %v3321_v4, %v1745_v49 }
 0x155   : > { %v3339_v18 = vpop.f32.mrf.mxu1  ;;  %v2689_v20 = vpop.f32.mrf.mxu0  ;;  %vm1777_vm3 = vcmp.ge.f32.partialorder %v1745_v49, 0.0  ;;  %v2594_v12 = vadd.f32 %v3271_v48, %v3267_v42  ;;  %v1371_v57 = vadd.f32 %v2576_v56, %v3201_v22  ;;  %v1392_v22 = vadd.f32 %v2591_v58, %v3223_v52 }
 0x156   : > { %vm1780_vm2 = vcmp.ge.f32.partialorder %v1748_v10, 0.0  ;;  %v1819_v17 = vmul.f32 %v3321_v4, %v1748_v10  ;;  %v1537_v62 = vadd.f32 %v2689_v20, %v1376_v44  ;;  %v1746_v55 = vadd.f32 %v3311_v23, %v1516_v0 }
 0x157   : > { %v3346_v3 = vpop.f32.mrf.mxu1  ;;  %v1528_v7 = vpop.f32.mrf.mxu0  ;;  %v1848_v44 = vsel %vm1777_vm3, %v1745_v49, %v1816_v28  ;;  %v1384_v56 = vadd.f32 %v2585_v37, %v3213_v40 }
 0x158   : > { %v1851_v16 = vsel %vm1780_vm2, %v1748_v10, %v1819_v17  ;;  %v1751_v8 = vadd.f32 %v3311_v23, %v1537_v62  ;;  %v1529_v34 = vadd.f32 %v1528_v7, %v1368_v6  ;;  %vm1778_vm4 = vcmp.ge.f32.partialorder %v1746_v55, 0.0 }
 0x159   : > { %v2344_v39 = vpack.c.bf16 %v1851_v16, %v1850_v46  ;;  %v1817_v54 = vmul.f32 %v3321_v4, %v1746_v55  ;;  %v3357_v61 = vpop.f32.mrf.mxu1  ;;  %v2690_v25 = vpop.f32.mrf.mxu0  ;;  %v2491_v10 = vadd.f32 %v3241_v13, %v3239_v9  ;;  %v2494_v6 = vadd.f32 %v3245_v19, %v3243_v15 }
 0x15a   : > { %v1540_v14 = vadd.f32 %v2690_v25, %v1379_v51  ;;  %v1749_v24 = vadd.f32 %v3311_v23, %v1529_v34  ;;  %v1822_v42 = vmul.f32 %v3321_v4, %v1751_v8  ;;  %vm1783_vm5 = vcmp.ge.f32.partialorder %v1751_v8, 0.0 }
 0x15b   : > { %2416 = vst [vmem:[%s3351_s11 + $0x8] sm:$0xff] %v2344_v39   ;;  %v1849_v0 = vsel %vm1778_vm4, %v1746_v55, %v1817_v54  ;;  %v3366_v26 = vpop.f32.mrf.mxu1  ;;  %v1531_v20 = vpop.f32.mrf.mxu0  ;;  %v2588_v62 = vadd.f32 %v3259_v33, %v3255_v31  ;;  %v2597_v15 = vadd.f32 %v3279_v60, %v3275_v53  ;;  %v1395_v51 = vadd.f32 %v2594_v12, %v3225_v59 }
 0x15c   : > { %v2339_v17 = vpack.c.bf16 %v1849_v0, %v1848_v44  ;;  %v1752_v9 = vadd.f32 %v3311_v23, %v1540_v14  ;;  %v1532_v13 = vadd.f32 %v1531_v20, %v1371_v57  ;;  %v1820_v52 = vmul.f32 %v3321_v4, %v1749_v24 }
 0x15d   : > { %v3373_v48 = vpop.f32.mrf.mxu1  ;;  %v2693_v49 = vpop.f32.mrf.mxu0  ;;  %v2603_v31 = vadd.f32 %v3295_v29, %v3291_v35  ;;  %v1854_v33 = vsel %vm1783_vm5, %v1751_v8, %v1822_v42  ;;  %vm1781_vm7 = vcmp.ge.f32.partialorder %v1749_v24, 0.0  ;;  %v3396_v34 = vadd.f32 %v3257_v32, %v3253_v30 }
 0x15e   : > { %2340 = vst [vmem:[%s3351_s11] sm:$0xff] %v2339_v17   ;;  %v1553_v19 = vadd.f32 %v2693_v49, %v1392_v22  ;;  %vm1784_vm6 = vcmp.ge.f32.partialorder %v1752_v9, 0.0  ;;  %v1823_v58 = vmul.f32 %v3321_v4, %v1752_v9  ;;  %v1750_v46 = vadd.f32 %v3311_v23, %v1532_v13 }
 0x15f   : > { %v3385_v28 = vpop.f32.mrf.mxu1  ;;  %v1544_v40 = vpop.f32.mrf.mxu0  ;;  %v2606_v29 = vadd.f32 %v3303_v5, %v3299_v11  ;;  %v1387_v8 = vadd.f32 %v2588_v62, %v3221_v47  ;;  %v1852_v37 = vsel %vm1781_vm7, %v1749_v24, %v1820_v52  ;;  %v2503_v57 = vadd.f32 %v3263_v38, %v3261_v36 }
 0x160   : > { %v1545_v53 = vadd.f32 %v1544_v40, %v1384_v56  ;;  %v1855_v60 = vsel %vm1784_vm6, %v1752_v9, %v1823_v58  ;;  %vm1782_vm8 = vcmp.ge.f32.partialorder %v1750_v46, 0.0  ;;  %v1821_v59 = vmul.f32 %v3321_v4, %v1750_v46 }
 0x161   : > { %v1755_v55 = vadd.f32 %v3311_v23, %v1553_v19  ;;  %v3392_v7 = vpop.f32.mrf.mxu1  ;;  %v2694_v16 = vpop.f32.mrf.mxu0  ;;  %v2354_v35 = vpack.c.bf16 %v1855_v60, %v1854_v33  ;;  %v1408_v32 = vadd.f32 %v2603_v31, %v2491_v10  ;;  %v1400_v5 = vadd.f32 %v2597_v15, %v3231_v1  ;;  %v3543_v33 = vld [vmem:[#allocation13_spill] sm:$0xff] }
 0x162   : > { %v1853_v39 = vsel %vm1782_vm8, %v1750_v46, %v1821_v59  ;;  %v1753_v54 = vadd.f32 %v3311_v23, %v1545_v53  ;;  %v1556_v25 = vadd.f32 %v2694_v16, %v1395_v51  ;;  %v2600_v11 = vadd.f32 %v3287_v21, %v3283_v2  ;;  %v3544_v53 = vld [vmem:[#allocation14_spill] sm:$0xff] }
 0x163   : > { %v3402_v12 = vpop.f32.mrf.mxu1  ;;  %v1547_v14 = vpop.f32.mrf.mxu0  ;;  %2418 = vst [vmem:[%s3351_s11 + $0x18] sm:$0xff] %v2354_v35   ;;  %v2349_v30 = vpack.c.bf16 %v1853_v39, %v1852_v37  ;;  %v1826_v47 = vmul.f32 %v3321_v4, %v1755_v55  ;;  %v2609_v17 = vadd.f32 %v3315_v63, %v3306_v27  ;;  %vm1787_vm9 = vcmp.ge.f32.partialorder %v1755_v55, 0.0 }
 0x164   : > { %v1756_v44 = vadd.f32 %v3311_v23, %v1556_v25  ;;  %v1548_v0 = vadd.f32 %v1547_v14, %v1387_v8  ;;  %v1411_v38 = vadd.f32 %v2606_v29, %v2494_v6  ;;  %v1824_v10 = vmul.f32 %v3321_v4, %v1753_v54  ;;  %v3545_v29 = vld [vmem:[#allocation12_spill] sm:$0xff] }
 0x165   : > { %v2625_v24 = vpop.f32.mrf.mxu1  ;;  %v2697_v20 = vpop.f32.mrf.mxu0  ;;  %2417 = vst [vmem:[%s3351_s11 + $0x10] sm:$0xff] %v2349_v30   ;;  %v2615_v22 = vadd.f32 %v3346_v3, %v3339_v18  ;;  %vm1785_vm11 = vcmp.ge.f32.partialorder %v1753_v54, 0.0  ;;  %v1858_v27 = vsel %vm1787_vm9, %v1755_v55, %v1826_v47  ;;  %v2506_v62 = vadd.f32 %v3269_v45, %v3265_v41  ;;  %v3542_v18 = vld [vmem:[#allocation11_spill] sm:$0xff] }
 0x166   : > { %v1569_v36 = vadd.f32 %v2697_v20, %v1408_v32  ;;  %vm1788_vm10 = vcmp.ge.f32.partialorder %v1756_v44, 0.0  ;;  %v1827_v1 = vmul.f32 %v3321_v4, %v1756_v44  ;;  %v1754_v2 = vadd.f32 %v3311_v23, %v1548_v0  ;;  %v3546_v0 = vld [vmem:[#allocation17_spill] sm:$0xff]  ;;  %v3547_v20 = vld [vmem:[#allocation18_spill] sm:$0xff] }
 0x167   : > { %v2626_v21 = vpop.f32.mrf.mxu1  ;;  %v1560_v42 = vpop.f32.mrf.mxu0  ;;  %v2618_v15 = vadd.f32 %v3366_v26, %v3357_v61  ;;  %v1403_v3 = vadd.f32 %v2600_v11, %v3542_v18  ;;  %v1856_v51 = vsel %vm1785_vm11, %v1753_v54, %v1824_v10  ;;  %v2509_v60 = vadd.f32 %v3544_v53, %v3543_v33 }
 0x168   : > { %v1759_v9 = vadd.f32 %v3311_v23, %v1569_v36  ;;  %v1561_v63 = vadd.f32 %v1560_v42, %v1400_v5  ;;  %v1859_v13 = vsel %vm1788_vm10, %v1756_v44, %v1827_v1  ;;  %vm1786_vm12 = vcmp.ge.f32.partialorder %v1754_v2, 0.0 }
 0x169   : > { %v1825_v6 = vmul.f32 %v3321_v4, %v1754_v2  ;;  %v2628_v49 = vpop.f32.mrf.mxu1  ;;  %v2698_v56 = vpop.f32.mrf.mxu0  ;;  %v2364_v19 = vpack.c.bf16 %v1859_v13, %v1858_v27  ;;  %v1424_v45 = vadd.f32 %v2615_v22, %v2503_v57  ;;  %v1416_v35 = vadd.f32 %v2609_v17, %v3545_v29  ;;  %v3550_v13 = vld [vmem:[#allocation19_spill] sm:$0xff] }
 0x16a   : > { %v1757_v58 = vadd.f32 %v3311_v23, %v1561_v63  ;;  %v1572_v46 = vadd.f32 %v2698_v56, %v1411_v38  ;;  %v1830_v41 = vmul.f32 %v3321_v4, %v1759_v9  ;;  %vm1791_vm13 = vcmp.ge.f32.partialorder %v1759_v9, 0.0  ;;  %v3549_v63 = vld [vmem:[#allocation16_spill] sm:$0xff] }
 0x16b   : > { %v1857_v52 = vsel %vm1786_vm12, %v1754_v2, %v1825_v6  ;;  %v2629_v40 = vpop.f32.mrf.mxu1  ;;  %v1563_v31 = vpop.f32.mrf.mxu0  ;;  %2420 = vst [vmem:[%s3351_s11 + $0x28] sm:$0xff] %v2364_v19   ;;  %v2612_v8 = vadd.f32 %v3331_v50, %v3327_v43  ;;  %v2621_v37 = vadd.f32 %v3385_v28, %v3373_v48  ;;  %v1427_v54 = vadd.f32 %v2618_v15, %v2506_v62  ;;  %v3551_v6 = vld [vmem:[#allocation20_spill] sm:$0xff] }
 0x16c   : > { %v2359_v59 = vpack.c.bf16 %v1857_v52, %v1856_v51  ;;  %v1760_v61 = vadd.f32 %v3311_v23, %v1572_v46  ;;  %v1564_v26 = vadd.f32 %v1563_v31, %v1403_v3  ;;  %v1828_v25 = vmul.f32 %v3321_v4, %v1757_v58 }
 0x16d   : > { %v3433_v55 = vpop.f32.mrf.mxu1  ;;  %v2701_v16 = vpop.f32.mrf.mxu0  ;;  %v1862_v5 = vsel %vm1791_vm13, %v1759_v9, %v1830_v41  ;;  %v2627_v11 = vadd.f32 %v2626_v21, %v2625_v24  ;;  %vm1789_vm15 = vcmp.ge.f32.partialorder %v1757_v58, 0.0  ;;  %v2515_v17 = vadd.f32 %v3547_v20, %v3546_v0  ;;  %v3548_v9 = vld [vmem:[#allocation15_spill] sm:$0xff] }
 0x16e   : > { %2419 = vst [vmem:[%s3351_s11 + $0x20] sm:$0xff] %v2359_v59   ;;  %v1585_v39 = vadd.f32 %v2701_v16, %v1424_v45  ;;  %vm1792_vm14 = vcmp.ge.f32.partialorder %v1760_v61, 0.0  ;;  %v1831_v14 = vmul.f32 %v3321_v4, %v1760_v61  ;;  %v1758_v57 = vadd.f32 %v3311_v23, %v1564_v26  ;;  %v3553_v20 = vld [vmem:[#allocation3_spill] sm:$0xff] }
 0x16f   : > { %v2632_v30 = vpop.f32.mrf.mxu1  ;;  %v1576_v32 = vpop.f32.mrf.mxu0  ;;  %v2630_v38 = vadd.f32 %v2629_v40, %v2628_v49  ;;  %v1419_v10 = vadd.f32 %v2612_v8, %v3396_v34  ;;  %v1860_v24 = vsel %vm1789_vm15, %v1757_v58, %v1828_v25  ;;  %v2512_v27 = vadd.f32 %v3549_v63, %v3548_v9 }
 0x170   : > { %v1577_v50 = vadd.f32 %v1576_v32, %v1416_v35  ;;  %v1863_v43 = vsel %vm1792_vm14, %v1760_v61, %v1831_v14  ;;  %vm1790_vm0 = vcmp.ge.f32.partialorder %v1758_v57, 0.0  ;;  %v1829_v48 = vmul.f32 %v3321_v4, %v1758_v57 }
 0x171   : > { %v1763_v28 = vadd.f32 %v3311_v23, %v1585_v39  ;;  %v3447_v47 = vpop.f32.mrf.mxu1  ;;  %v2702_v44 = vpop.f32.mrf.mxu0  ;;  %v2374_v36 = vpack.c.bf16 %v1863_v43, %v1862_v5  ;;  %v2518_v56 = vadd.f32 %v3551_v6, %v3550_v13  ;;  %v1440_v15 = vadd.f32 %v2627_v11, %v2515_v17  ;;  %v3552_v11 = vld [vmem:[#allocation5_spill] sm:$0xff] }
 0x172   : > { %v1861_v1 = vsel %vm1790_vm0, %v1758_v57, %v1829_v48  ;;  %v1761_v2 = vadd.f32 %v3311_v23, %v1577_v50  ;;  %v1588_v21 = vadd.f32 %v2702_v44, %v1427_v54  ;;  %v1432_v51 = vadd.f32 %v2621_v37, %v2509_v60 }
 0x173   : > { %v2635_v42 = vpop.f32.mrf.mxu1  ;;  %v1579_v22 = vpop.f32.mrf.mxu0  ;;  %2422 = vst [vmem:[%s3351_s11 + $0x38] sm:$0xff] %v2374_v36   ;;  %v2369_v62 = vpack.c.bf16 %v1861_v1, %v1860_v24  ;;  %v1834_v49 = vmul.f32 %v3321_v4, %v1763_v28  ;;  %v2624_v52 = vadd.f32 %v3402_v12, %v3392_v7  ;;  %vm1795_vm1 = vcmp.ge.f32.partialorder %v1763_v28, 0.0 }
 0x174   : > { %v1764_v34 = vadd.f32 %v3311_v23, %v1588_v21  ;;  %v1580_v19 = vadd.f32 %v1579_v22, %v1419_v10  ;;  %v1443_v46 = vadd.f32 %v2630_v38, %v2518_v56  ;;  %v1832_v40 = vmul.f32 %v3321_v4, %v1761_v2  ;;  %v3554_v22 = vld [vmem:[#allocation6_spill] sm:$0xff] }
 0x175   : > { %v2637_v18 = vpop.f32.mrf.mxu1  ;;  %v2705_v3 = vpop.f32.mrf.mxu0  ;;  %2421 = vst [vmem:[%s3351_s11 + $0x30] sm:$0xff] %v2369_v62   ;;  %vm1793_vm3 = vcmp.ge.f32.partialorder %v1761_v2, 0.0  ;;  %v1866_v7 = vsel %vm1795_vm1, %v1763_v28, %v1834_v49  ;;  %v2633_v29 = vadd.f32 %v2632_v30, %v3433_v55  ;;  %v1435_v8 = vadd.f32 %v2624_v52, %v2512_v27 }
 0x176   : > { %v1601_v58 = vadd.f32 %v2705_v3, %v1440_v15  ;;  %vm1796_vm2 = vcmp.ge.f32.partialorder %v1764_v34, 0.0  ;;  %v1835_v31 = vmul.f32 %v3321_v4, %v1764_v34  ;;  %v1762_v33 = vadd.f32 %v3311_v23, %v1580_v19 }
 0x177   : > { %v2638_v53 = vpop.f32.mrf.mxu1  ;;  %v1592_v59 = vpop.f32.mrf.mxu0  ;;  %v1864_v37 = vsel %vm1793_vm3, %v1761_v2, %v1832_v40  ;;  %v2636_v44 = vadd.f32 %v2635_v42, %v3447_v47  ;;  %v1448_v17 = vadd.f32 %v2633_v29, %v3553_v20 }
 0x178   : > { %v1767_v41 = vadd.f32 %v3311_v23, %v1601_v58  ;;  %v2639_v60 = vadd.f32 %v2638_v53, %v2637_v18  ;;  %v1593_v45 = vadd.f32 %v1592_v59, %v1432_v51  ;;  %v1867_v12 = vsel %vm1796_vm2, %v1764_v34, %v1835_v31  ;;  %v3555_v18 = vld [vmem:[#allocation4_spill] sm:$0xff]  ;;  %v3556_v59 = vld [vmem:[#allocation7_spill] sm:$0xff] }
 0x179   : > { %vm1794_vm4 = vcmp.ge.f32.partialorder %v1762_v33, 0.0  ;;  %v1833_v61 = vmul.f32 %v3321_v4, %v1762_v33  ;;  %v2640_v26 = vpop.f32.mrf.mxu1  ;;  %v2706_v16 = vpop.f32.mrf.mxu0  ;;  %v2384_v35 = vpack.c.bf16 %v1867_v12, %v1866_v7  ;;  %v1451_v3 = vadd.f32 %v2636_v44, %v3555_v18 }
 0x17a   : > { %v1765_v54 = vadd.f32 %v3311_v23, %v1593_v45  ;;  %v1604_v25 = vadd.f32 %v2706_v16, %v1443_v46  ;;  %v1838_v5 = vmul.f32 %v3321_v4, %v1767_v41  ;;  %v1456_v50 = vadd.f32 %v2639_v60, %v3552_v11 }
 0x17b   : > { %v1865_v39 = vsel %vm1794_vm4, %v1762_v33, %v1833_v61  ;;  %v2641_v14 = vpop.f32.mrf.mxu1  ;;  %v1595_v57 = vpop.f32.mrf.mxu0  ;;  %2424 = vst [vmem:[%s3351_s11 + $0x48] sm:$0xff] %v2384_v35   ;;  %vm1799_vm5 = vcmp.ge.f32.partialorder %v1767_v41, 0.0 }
 0x17c   : > { %v2379_v32 = vpack.c.bf16 %v1865_v39, %v1864_v37  ;;  %v1768_v43 = vadd.f32 %v3311_v23, %v1604_v25  ;;  %v2642_v55 = vadd.f32 %v2641_v14, %v2640_v26  ;;  %v1596_v30 = vadd.f32 %v1595_v57, %v1435_v8  ;;  %v3557_v25 = vld [vmem:[#allocation9_spill] sm:$0xff] }
 0x17d   : > { %v2643_v48 = vpop.f32.mrf.mxu1  ;;  %v2709_v28 = vpop.f32.mrf.mxu0  ;;  %v1836_v36 = vmul.f32 %v3321_v4, %v1765_v54  ;;  %v1870_v2 = vsel %vm1799_vm5, %v1767_v41, %v1838_v5  ;;  %vm1797_vm7 = vcmp.ge.f32.partialorder %v1765_v54, 0.0 }
 0x17e   : > { %2423 = vst [vmem:[%s3351_s11 + $0x40] sm:$0xff] %v2379_v32   ;;  %v1617_v0 = vadd.f32 %v2709_v28, %v1456_v50  ;;  %vm1800_vm6 = vcmp.ge.f32.partialorder %v1768_v43, 0.0  ;;  %v1839_v38 = vmul.f32 %v3321_v4, %v1768_v43  ;;  %v1766_v10 = vadd.f32 %v3311_v23, %v1596_v30  ;;  %v3558_v50 = vld [vmem:[#allocation8_spill] sm:$0xff] }
 0x17f   : > { %v2644_v24 = vpop.f32.mrf.mxu1  ;;  %v1608_v1 = vpop.f32.mrf.mxu0  ;;  %v1459_v9 = vadd.f32 %v2642_v55, %v3554_v22  ;;  %v1868_v15 = vsel %vm1797_vm7, %v1765_v54, %v1836_v36 }
 0x180   : > { %v1609_v21 = vadd.f32 %v1608_v1, %v1448_v17  ;;  %v1871_v47 = vsel %vm1800_vm6, %v1768_v43, %v1839_v38  ;;  %vm1798_vm8 = vcmp.ge.f32.partialorder %v1766_v10, 0.0  ;;  %v1837_v42 = vmul.f32 %v3321_v4, %v1766_v10  ;;  %v3559_v17 = vld [vmem:[#allocation10_spill] sm:$0xff] }
 0x181   : > { %v1771_v63 = vadd.f32 %v3311_v23, %v1617_v0  ;;  %v2646_v27 = vpop.f32.mrf.mxu1  ;;  %v2710_v13 = vpop.f32.mrf.mxu0  ;;  %v2394_v6 = vpack.c.bf16 %v1871_v47, %v1870_v2  ;;  %v2645_v56 = vadd.f32 %v2644_v24, %v2643_v48 }
 0x182   : > { %v1769_v62 = vadd.f32 %v3311_v23, %v1609_v21  ;;  %v1869_v49 = vsel %vm1798_vm8, %v1766_v10, %v1837_v42  ;;  %v1620_v34 = vadd.f32 %v2710_v13, %v1459_v9 }
 0x183   : > { %v2647_v19 = vpop.f32.mrf.mxu1  ;;  %v1611_v51 = vpop.f32.mrf.mxu0  ;;  %2426 = vst [vmem:[%s3351_s11 + $0x58] sm:$0xff] %v2394_v6   ;;  %v2389_v52 = vpack.c.bf16 %v1869_v49, %v1868_v15  ;;  %v1842_v58 = vmul.f32 %v3321_v4, %v1771_v63  ;;  %vm1803_vm9 = vcmp.ge.f32.partialorder %v1771_v63, 0.0  ;;  %v1464_v41 = vadd.f32 %v2645_v56, %v3556_v59 }
 0x184   : > { %v1772_v46 = vadd.f32 %v3311_v23, %v1620_v34  ;;  %v1612_v40 = vadd.f32 %v1611_v51, %v1451_v3  ;;  %v1840_v53 = vmul.f32 %v3321_v4, %v1769_v62  ;;  %v2648_v45 = vadd.f32 %v2647_v19, %v2646_v27 }
 0x185   : > { %v2649_v31 = vpop.f32.mrf.mxu1  ;;  %v2713_v33 = vpop.f32.mrf.mxu0  ;;  %2425 = vst [vmem:[%s3351_s11 + $0x50] sm:$0xff] %v2389_v52   ;;  %vm1801_vm11 = vcmp.ge.f32.partialorder %v1769_v62, 0.0  ;;  %v1874_v29 = vsel %vm1803_vm9, %v1771_v63, %v1842_v58 }
 0x186   : > { %vm1804_vm10 = vcmp.ge.f32.partialorder %v1772_v46, 0.0  ;;  %v1843_v60 = vmul.f32 %v3321_v4, %v1772_v46  ;;  %v1770_v7 = vadd.f32 %v3311_v23, %v1612_v40  ;;  %v1872_v57 = vsel %vm1801_vm11, %v1769_v62, %v1840_v53 }
 0x187   : > { %v2650_v12 = vpop.f32.mrf.mxu1  ;;  %v1624_v61 = vpop.f32.mrf.mxu0  ;;  %v1467_v43 = vadd.f32 %v2648_v45, %v3558_v50 }
 0x188   : > { %v2651_v26 = vadd.f32 %v2650_v12, %v2649_v31  ;;  %v1625_v16 = vadd.f32 %v1624_v61, %v1464_v41  ;;  %v1875_v35 = vsel %vm1804_vm10, %v1772_v46, %v1843_v60  ;;  %vm1802_vm12 = vcmp.ge.f32.partialorder %v1770_v7, 0.0 }
 0x189   : > { %v1841_v8 = vmul.f32 %v3321_v4, %v1770_v7  ;;  %v2652_v37 = vpop.f32.mrf.mxu1  ;;  %v2714_v39 = vpop.f32.mrf.mxu0  ;;  %v2404_v54 = vpack.c.bf16 %v1875_v35, %v1874_v29 }
 0x18a   : > { %v1472_v14 = vadd.f32 %v2651_v26, %v3557_v25  ;;  %v1773_v5 = vadd.f32 %v3311_v23, %v1625_v16 }
 0x18b   : > { %v1873_v32 = vsel %vm1802_vm12, %v1770_v7, %v1841_v8  ;;  %v2653_v11 = vpop.f32.mrf.mxu1  ;;  %v1627_v55 = vpop.f32.mrf.mxu0  ;;  %2428 = vst [vmem:[%s3351_s11 + $0x68] sm:$0xff] %v2404_v54  }
 0x18c   : > { %v2399_v30 = vpack.c.bf16 %v1873_v32, %v1872_v57  ;;  %v1633_v48 = vadd.f32 %v2713_v33, %v1472_v14  ;;  %v2654_v28 = vadd.f32 %v2653_v11, %v2652_v37  ;;  %v1628_v44 = vadd.f32 %v1627_v55, %v1467_v43 }
 0x18d   : > { %v1844_v20 = vmul.f32 %v3321_v4, %v1773_v5  ;;  %vm1805_vm13 = vcmp.ge.f32.partialorder %v1773_v5, 0.0 }
 0x18e   : > { %2427 = vst [vmem:[%s3351_s11 + $0x60] sm:$0xff] %v2399_v30   ;;  %v1775_v0 = vadd.f32 %v3311_v23, %v1633_v48  ;;  %v1475_v36 = vadd.f32 %v2654_v28, %v3559_v17  ;;  %v1774_v38 = vadd.f32 %v3311_v23, %v1628_v44 }
 0x18f   : > { %v1876_v2 = vsel %vm1805_vm13, %v1773_v5, %v1844_v20 }
 0x190   : > { %v1636_v10 = vadd.f32 %v2714_v39, %v1475_v36  ;;  %vm1806_vm14 = vcmp.ge.f32.partialorder %v1774_v38, 0.0  ;;  %v1845_v24 = vmul.f32 %v3321_v4, %v1774_v38  ;;  %v1846_v1 = vmul.f32 %v3321_v4, %v1775_v0 }
 0x191   : > { %vm1807_vm15 = vcmp.ge.f32.partialorder %v1775_v0, 0.0 }
 0x192   : > { %v1776_v21 = vadd.f32 %v3311_v23, %v1636_v10  ;;  %v1877_v22 = vsel %vm1806_vm14, %v1774_v38, %v1845_v24  ;;  %v1878_v42 = vsel %vm1807_vm15, %v1775_v0, %v1846_v1 }
 0x193   : > { %v2409_v9 = vpack.c.bf16 %v1877_v22, %v1876_v2 }
 0x194   : > { %vm1808_vm0 = vcmp.ge.f32.partialorder %v1776_v21, 0.0  ;;  %v1847_v47 = vmul.f32 %v3321_v4, %v1776_v21 }
 0x195   : > { %2429 = vst [vmem:[%s3351_s11 + $0x70] sm:$0xff] %v2409_v9  }
 0x196   : > { %v1879_v63 = vsel %vm1808_vm0, %v1776_v21, %v1847_v47 }
 0x197   : > { %v2414_v27 = vpack.c.bf16 %v1879_v63, %v1878_v42 }
 0x199   : > { %2430 = vst [vmem:[%s3351_s11 + $0x78] sm:$0xff] %v2414_v27  }
 0x19a PF: > { %s14_s17 = sadd.s32 1, %s2926_s17   ;;  %s3560_s15 = smov %s2922_s16 }
 0x19b   : > { %p11_p5 = scmp.ge.s32.totalorder %s14_s17, 4   ;;  %s3561_s16 = smov %s3563_s18 }
 0x19d   :  { %13 = sbr.rel (!%p11_p5) target bundleno = 2 (0x2), region = 77 }

</bundles_post_ra>
